<compile_context>
chip_gen: v7x
topology: tpu7x:2x2x1
jax: 0.10.0
libtpu: 0.0.40
codegen_flags: <defaults>
</compile_context>

<pallas_src>
import math
import functools

import jax
import jax.numpy as jnp
from jax.experimental import pallas as pl
from jax.experimental.pallas import tpu as pltpu


DTYPE = jnp.bfloat16       # storage / MXU-operand dtype (accumulation is always f32)
LN_EPS = 1e-5


# ----------------------------- tiling helpers --------------------------------

def _round_up(x, m):
    return (x + m - 1) // m * m


def _tile_targets():
    # MXU-natural N tile: 128 on v5e (4x128x128 MXU), 256 on v6e/v7x (2x256x256).
    try:
        kind = jax.devices()[0].device_kind.lower()
    except Exception:
        kind = ""
    tn = 128 if "v5" in kind else 256
    return 512, tn, 1024          # (tm, tn, tk)


_TM, _TN, _TK = _tile_targets()


def _pick_tile(dim, target, granule):
    """Largest tile <= target that divides dim (multiple of granule), else full dim."""
    if dim <= target:
        return dim
    t = (target // granule) * granule
    while t > granule:
        if dim % t == 0:
            return t
        t -= granule
    return granule if dim % granule == 0 else dim


def _gelu_exact(y):
    # PyTorch nn.GELU default (erf); erf lowers to the EUP slot on TPU.
    return 0.5 * y * (1.0 + jax.lax.erf(y * 0.7071067811865476))


# ----------------------------- grouped fused matmul ---------------------------

def _mm_kernel(*refs, act, has_ln, has_bias, has_res, has_pos, has_ln_out, single_k):
    """out[g] = epilogue(LN?(x) @ w[g]); epilogue: +bias, act, +residual, LN_out, +pos."""
    idx = 0
    x_ref = refs[idx]; idx += 1
    if has_ln:
        lg_ref, lb_ref = refs[idx], refs[idx + 1]; idx += 2
    w_ref = refs[idx]; idx += 1
    if has_bias:
        b_ref = refs[idx]; idx += 1
    if has_res:
        r_ref = refs[idx]; idx += 1
    if has_pos:
        p_ref = refs[idx]; idx += 1
    if has_ln_out:
        og_ref, ob_ref = refs[idx], refs[idx + 1]; idx += 2
    o_ref = refs[idx]; idx += 1
    if not single_k:
        acc_ref = refs[idx]; idx += 1
    if has_ln:
        xln_ref = refs[idx]; idx += 1

    g = pl.program_id(1)
    j = pl.program_id(2)
    k = pl.program_id(3)

    if has_ln:
        # LN prologue computed once per row-block and cached in VMEM, so it is not
        # redone for every (group, column) tile.  (ln forces tk == K -> single_k.)
        @pl.when((g == 0) & (j == 0) & (k == 0))
        def _():
            xf = x_ref[...].astype(jnp.float32)
            mu = jnp.mean(xf, axis=-1, keepdims=True)
            xc = xf - mu
            var = jnp.mean(xc * xc, axis=-1, keepdims=True)
            xn = xc * jax.lax.rsqrt(var + LN_EPS)
            xln_ref[...] = (xn * lg_ref[...].astype(jnp.float32)
                            + lb_ref[...].astype(jnp.float32)).astype(xln_ref.dtype)
        x = xln_ref[...]
    else:
        x = x_ref[...]

    part = jnp.dot(x, w_ref[0], preferred_element_type=jnp.float32)

    def epilogue(y):
        if has_bias:
            y = y + b_ref[0].astype(jnp.float32)
        if act == "gelu":
            y = _gelu_exact(y)
        if has_res:
            y = y + r_ref[...].astype(jnp.float32)
        if has_ln_out:
            mu = jnp.mean(y, axis=-1, keepdims=True)
            yc = y - mu
            var = jnp.mean(yc * yc, axis=-1, keepdims=True)
            y = (yc * jax.lax.rsqrt(var + LN_EPS) * og_ref[...].astype(jnp.float32)
                 + ob_ref[...].astype(jnp.float32))
        if has_pos:
            y = y + p_ref[...].astype(jnp.float32)
        o_ref[0] = y.astype(o_ref.dtype)

    if single_k:
        epilogue(part)
    else:
        @pl.when(k == 0)
        def _():
            acc_ref[...] = jnp.zeros_like(acc_ref)
        acc_ref[...] += part

        @pl.when(k == pl.num_programs(3) - 1)
        def _():
            epilogue(acc_ref[...])


def matmul(x, w, b=None, *, act=None, residual=None, pos=None, ln=None, ln_out=None):
    """x:[M,K], w:[G,K,N], b:[G,1,N], residual:[M,N], pos:[T,N] (T | M) -> [G,M,N]."""
    M, K = x.shape
    G, Kw, N = w.shape
    assert Kw == K

    if pos is not None:
        T = pos.shape[0]
        assert M % T == 0 and G == 1
        tm = T
    else:
        tm = _pick_tile(M, _TM, 8)
    tk = K if ln is not None else _pick_tile(K, _TK, 128)
    tn = N if ln_out is not None else _pick_tile(N, _TN, 128)
    num_k = K // tk
    single_k = num_k == 1

    inputs = [x]
    in_specs = [pl.BlockSpec((tm, tk), lambda i, g, j, k: (i, k))]
    if ln is not None:
        inputs += [ln["g"], ln["b"]]
        in_specs += [pl.BlockSpec((1, K), lambda i, g, j, k: (0, 0)),
                     pl.BlockSpec((1, K), lambda i, g, j, k: (0, 0))]
    inputs.append(w)
    in_specs.append(pl.BlockSpec((1, tk, tn), lambda i, g, j, k: (g, k, j)))
    if b is not None:
        inputs.append(b)
        in_specs.append(pl.BlockSpec((1, 1, tn), lambda i, g, j, k: (g, 0, j)))
    if residual is not None:
        assert G == 1
        inputs.append(residual)
        in_specs.append(pl.BlockSpec((tm, tn), lambda i, g, j, k: (i, j)))
    if pos is not None:
        inputs.append(pos)
        in_specs.append(pl.BlockSpec((tm, tn), lambda i, g, j, k: (0, j)))
    if ln_out is not None:
        assert G == 1
        inputs += [ln_out["g"], ln_out["b"]]
        in_specs += [pl.BlockSpec((1, N), lambda i, g, j, k: (0, 0)),
                     pl.BlockSpec((1, N), lambda i, g, j, k: (0, 0))]

    scratch = []
    if not single_k:
        scratch.append(pltpu.VMEM((tm, tn), jnp.float32))
    if ln is not None:
        scratch.append(pltpu.VMEM((tm, K), w.dtype))

    if ln is not None:
        sem = ("parallel", "arbitrary", "arbitrary", "arbitrary")
    else:
        sem = ("parallel", "parallel", "parallel", "arbitrary")

    return pl.pallas_call(
        functools.partial(_mm_kernel, act=act, has_ln=ln is not None,
                          has_bias=b is not None, has_res=residual is not None,
                          has_pos=pos is not None, has_ln_out=ln_out is not None,
                          single_k=single_k),
        out_shape=jax.ShapeDtypeStruct((G, M, N), x.dtype),
        grid=(M // tm, G, N // tn, num_k),
        in_specs=in_specs,
        out_specs=pl.BlockSpec((1, tm, tn), lambda i, g, j, k: (g, i, j)),
        scratch_shapes=scratch,
        compiler_params=pltpu.CompilerParams(dimension_semantics=sem),
    )(*inputs)


def matmul3(x, p, *, residual=None, pos=None, ln=None, ln_out=None, act=None):
    B, T, K = x.shape
    r = residual.reshape(B * T, -1) if residual is not None else None
    y = matmul(x.reshape(B * T, K), p["w"], p["b"], residual=r, pos=pos,
               ln=ln, ln_out=ln_out, act=act)
    G, _, N = y.shape
    return y.reshape(B, T, N) if G == 1 else y.reshape(G, B, T, N)


# ----------------------------- attention kernel -------------------------------

def _attn_kernel(*refs, num_heads, scale, band, window, has_kp):
    if has_kp:
        q_ref, k_ref, v_ref, kp_ref, o_ref = refs
    else:
        q_ref, k_ref, v_ref, o_ref = refs
    q = q_ref[0, 0]                               # [tq, D]   (bf16)
    k = k_ref[0, 0]                               # [Tk, D]
    v = v_ref[0, 0]
    tq, D = q.shape
    Tk = k.shape[0]
    Dh = D // num_heads

    keep = None
    if band:
        row0 = pl.program_id(1) * tq
        ri = row0 + jax.lax.broadcasted_iota(jnp.int32, (tq, Tk), 0)
        ci = jax.lax.broadcasted_iota(jnp.int32, (tq, Tk), 1)
        keep = (ci >= ri) & (ci <= ri + window)
    if has_kp:
        kpb = kp_ref[0] > 0.5                     # [1, Tk] bool, broadcast over rows
        keep = kpb if keep is None else (keep & kpb)

    for h in range(num_heads):                    # static unroll over heads
        qh = q[:, h * Dh:(h + 1) * Dh]
        kh = k[:, h * Dh:(h + 1) * Dh]
        vh = v[:, h * Dh:(h + 1) * Dh]
        # TODO(synk): contracting kh's lane dim costs an XLU transpose; a pre-transposed
        # K layout from the projection would remove it.
        s = jax.lax.dot_general(qh, kh, (((1,), (1,)), ((), ())),
                                preferred_element_type=jnp.float32) * scale
        if keep is not None:
            s = jnp.where(keep, s, -1e30)
        m = jnp.max(s, axis=-1, keepdims=True)
        p = jnp.exp(s - m)
        p = p / jnp.sum(p, axis=-1, keepdims=True)
        oh = jnp.dot(p.astype(vh.dtype), vh, preferred_element_type=jnp.float32)
        o_ref[0, :, h * Dh:(h + 1) * Dh] = oh.astype(o_ref.dtype)   # direct slice store


def attention(q_src, kv_src, *, q_idx, k_idx, v_idx, num_heads,
              kp_mask=None, band=False, window=0):
    """q_src:[Gq,B,Tq,D], kv_src:[Gk,B,Tk,D]; group indices select q/k/v in-kernel."""
    _, B, Tq, D = q_src.shape
    Tk = kv_src.shape[2]
    scale = 1.0 / math.sqrt(D // num_heads)
    tq = _pick_tile(Tq, 256, 8)

    inputs = [q_src, kv_src, kv_src]
    in_specs = [
        pl.BlockSpec((1, 1, tq, D), lambda b, i, qi=q_idx: (qi, b, i, 0)),
        pl.BlockSpec((1, 1, Tk, D), lambda b, i, ki=k_idx: (ki, b, 0, 0)),
        pl.BlockSpec((1, 1, Tk, D), lambda b, i, vi=v_idx: (vi, b, 0, 0)),
    ]
    if kp_mask is not None:
        inputs.append(kp_mask.reshape(B, 1, Tk).astype(jnp.float32))
        in_specs.append(pl.BlockSpec((1, 1, Tk), lambda b, i: (b, 0, 0)))

    return pl.pallas_call(
        functools.partial(_attn_kernel, num_heads=num_heads, scale=scale,
                          band=band, window=window, has_kp=kp_mask is not None),
        out_shape=jax.ShapeDtypeStruct((B, Tq, D), q_src.dtype),
        grid=(B, Tq // tq),
        in_specs=in_specs,
        out_specs=pl.BlockSpec((1, tq, D), lambda b, i: (b, i, 0)),
        compiler_params=pltpu.CompilerParams(
            dimension_semantics=("parallel", "parallel")),
    )(*inputs)


# ----------------------------- fused FFN kernel --------------------------------

def _ffn_kernel(*refs, has_ln, has_ln_out):
    idx = 0
    x_ref = refs[idx]; idx += 1
    if has_ln:
        lg_ref, lb_ref = refs[idx], refs[idx + 1]; idx += 2
    w1_ref, b1_ref, w2_ref, b2_ref, r_ref = refs[idx:idx + 5]; idx += 5
    if has_ln_out:
        og_ref, ob_ref = refs[idx], refs[idx + 1]; idx += 2
    o_ref = refs[idx]

    x = x_ref[...].astype(jnp.float32)
    if has_ln:
        mu = jnp.mean(x, axis=-1, keepdims=True)
        xc = x - mu
        var = jnp.mean(xc * xc, axis=-1, keepdims=True)
        x = (xc * jax.lax.rsqrt(var + LN_EPS) * lg_ref[...].astype(jnp.float32)
             + lb_ref[...].astype(jnp.float32))
    h = jnp.dot(x.astype(w1_ref.dtype), w1_ref[...],
                preferred_element_type=jnp.float32) + b1_ref[...].astype(jnp.float32)
    h = _gelu_exact(h)
    y = jnp.dot(h.astype(w2_ref.dtype), w2_ref[...],
                preferred_element_type=jnp.float32) + b2_ref[...].astype(jnp.float32)
    y = y + r_ref[...].astype(jnp.float32)
    if has_ln_out:
        mu = jnp.mean(y, axis=-1, keepdims=True)
        yc = y - mu
        var = jnp.mean(yc * yc, axis=-1, keepdims=True)
        y = (yc * jax.lax.rsqrt(var + LN_EPS) * og_ref[...].astype(jnp.float32)
             + ob_ref[...].astype(jnp.float32))
    o_ref[...] = y.astype(o_ref.dtype)


def ffn(x, p, residual, *, ln=None, ln_out=None):
    """y = LN_out?(residual + GELU(LN?(x) @ w1 + b1) @ w2 + b2)."""
    M, D = x.shape
    F = p["w1"].shape[1]
    tm = _pick_tile(M, 256, 8)

    # VMEM residency estimate (double-buffered weights + f32 intermediate); fall back
    # to the tiled matmul path if it would not comfortably fit (v7x: 64 MiB physical).
    est = 4 * (D * F + F * D) * p["w1"].dtype.itemsize + 4 * tm * max(F, D) * 4
    if est > 24 * 1024 * 1024:
        # TODO(synk): could also keep the fused path with pl.Buffered(1) weight specs.
        h = matmul(x, p["w1"][None], p["b1"][None], act="gelu", ln=ln).reshape(M, F)
        return matmul(h, p["w2"][None], p["b2"][None], residual=residual,
                      ln_out=ln_out).reshape(M, D)

    inputs = [x]
    in_specs = [pl.BlockSpec((tm, D), lambda i: (i, 0))]
    if ln is not None:
        inputs += [ln["g"], ln["b"]]
        in_specs += [pl.BlockSpec((1, D), lambda i: (0, 0))] * 2
    inputs += [p["w1"], p["b1"], p["w2"], p["b2"], residual]
    in_specs += [pl.BlockSpec((D, F), lambda i: (0, 0)),
                 pl.BlockSpec((1, F), lambda i: (0, 0)),
                 pl.BlockSpec((F, D), lambda i: (0, 0)),
                 pl.BlockSpec((1, D), lambda i: (0, 0)),
                 pl.BlockSpec((tm, D), lambda i: (i, 0))]
    if ln_out is not None:
        inputs += [ln_out["g"], ln_out["b"]]
        in_specs += [pl.BlockSpec((1, D), lambda i: (0, 0))] * 2

    return pl.pallas_call(
        functools.partial(_ffn_kernel, has_ln=ln is not None, has_ln_out=ln_out is not None),
        out_shape=jax.ShapeDtypeStruct((M, D), x.dtype),
        grid=(M // tm,),
        in_specs=in_specs,
        out_specs=pl.BlockSpec((tm, D), lambda i: (i, 0)),
        compiler_params=pltpu.CompilerParams(
            dimension_semantics=("parallel",),
            vmem_limit_bytes=48 * 1024 * 1024),
    )(*inputs)


def ffn3(x, p, residual, *, ln=None, ln_out=None):
    B, T, D = x.shape
    return ffn(x.reshape(B * T, D), p, residual.reshape(B * T, D),
               ln=ln, ln_out=ln_out).reshape(B, T, D)


# ----------------------------- attention blocks --------------------------------

def self_attn_block(x_in, residual, p, num_heads, *, ln=None, kp_mask=None,
                    band=False, window=0, ln_out=None, pos=None):
    """LN_out?(residual + Wo(MHA(fused-QKV(LN?(x_in))))) [+ pos]."""
    B, T, D = x_in.shape
    qkv = matmul(x_in.reshape(B * T, D), p["qkv"]["w"], p["qkv"]["b"],
                 ln=ln).reshape(3, B, T, D)
    o = attention(qkv, qkv, q_idx=0, k_idx=1, v_idx=2, num_heads=num_heads,
                  kp_mask=kp_mask, band=band, window=window)
    return matmul3(o, p["wo"], residual=residual, ln_out=ln_out, pos=pos)


def cross_attn_block(x_q, x_kv, residual, p, num_heads, *, ln=None, kp_mask=None,
                     ln_out=None):
    B, Tq, D = x_q.shape
    Tk = x_kv.shape[1]
    q = matmul(x_q.reshape(B * Tq, D), p["q"]["w"], p["q"]["b"],
               ln=ln).reshape(1, B, Tq, D)
    kv = matmul(x_kv.reshape(B * Tk, D), p["kv"]["w"],
                p["kv"]["b"]).reshape(2, B, Tk, D)
    o = attention(q, kv, q_idx=0, k_idx=0, v_idx=1, num_heads=num_heads, kp_mask=kp_mask)
    return matmul3(o, p["wo"], residual=residual, ln_out=ln_out)


def sinusoidal_pe(max_len, d):
    pos = jnp.arange(max_len, dtype=jnp.float32)[:, None]
    div = jnp.exp(jnp.arange(0, d, 2, dtype=jnp.float32) * (-math.log(10000.0) / d))
    pe = jnp.zeros((max_len, d), jnp.float32)
    pe = pe.at[:, 0::2].set(jnp.sin(pos * div))
    pe = pe.at[:, 1::2].set(jnp.cos(pos * div))
    return pe


# ----------------------------- parameter init ---------------------------------

def _lin_p(key, din, dout, g=1, scale=0.02):
    w = jax.random.normal(key, (g, din, dout), jnp.float32) * scale
    return {"w": w.astype(DTYPE), "b": jnp.zeros((g, 1, dout), DTYPE)}


def _lin2_p(key, din, dout, scale=0.02):
    w = jax.random.normal(key, (din, dout), jnp.float32) * scale
    return {"w": w, "b": jnp.zeros((1, dout), jnp.float32)}


def _ln_p(d):
    return {"g": jnp.ones((1, d), DTYPE), "b": jnp.zeros((1, d), DTYPE)}


def _sa_p(key, d):
    k1, k2 = jax.random.split(key)
    return {"qkv": _lin_p(k1, d, d, g=3), "wo": _lin_p(k2, d, d)}


def _ca_p(key, d):
    k1, k2, k3 = jax.random.split(key, 3)
    return {"q": _lin_p(k1, d, d), "kv": _lin_p(k2, d, d, g=2), "wo": _lin_p(k3, d, d)}


def _ffn_p(key, d, ff):
    k1, k2 = jax.random.split(key)
    return {"w1": (jax.random.normal(k1, (d, ff), jnp.float32) * 0.02).astype(DTYPE),
            "b1": jnp.zeros((1, ff), DTYPE),
            "w2": (jax.random.normal(k2, (ff, d), jnp.float32) * 0.02).astype(DTYPE),
            "b2": jnp.zeros((1, d), DTYPE)}


def _enc_layer_p(key, d, ff):
    k1, k2 = jax.random.split(key)
    return {"attn": _sa_p(k1, d), "ff": _ffn_p(k2, d, ff), "ln1": _ln_p(d), "ln2": _ln_p(d)}


def _react_block_p(key, d, ff):
    ks = jax.random.split(key, 7)
    return {
        "a_sa": _sa_p(ks[0], d), "a_ca_m": _ca_p(ks[1], d), "a_ff": _ffn_p(ks[2], d, ff),
        "ln_a1": _ln_p(d), "ln_a2": _ln_p(d), "ln_a3": _ln_p(d),
        "b_sa": _sa_p(ks[3], d), "b_ca_a": _ca_p(ks[4], d), "b_ca_m": _ca_p(ks[5], d),
        "b_ff": _ffn_p(ks[6], d, ff),
        "ln_b1": _ln_p(d), "ln_b2": _ln_p(d), "ln_b3": _ln_p(d), "ln_b4": _ln_p(d),
    }


def init_params(key, cfg):
    ks = iter(jax.random.split(key, 64))
    d = cfg["latent"]
    Fd = cfg["input_feats"]
    p = {}
    p["pe"] = sinusoidal_pe(5000, d)
    p["time_mlp1"] = _lin2_p(next(ks), d, d)
    p["time_mlp2"] = _lin2_p(next(ks), d, d)
    p["text_embed"] = _lin2_p(next(ks), cfg["text_dim"], d)
    p["motion_embed"] = _lin_p(next(ks), Fd, d)
    p["music_embed"] = _lin_p(next(ks), cfg["music_dim"], d)
    p["look_ahead"] = {"attn": _sa_p(next(ks), d), "ln": _ln_p(d)}
    p["music_encoder"] = [_enc_layer_p(next(ks), d, cfg["ff"]) for _ in range(4)]
    p["blocks"] = [_react_block_p(next(ks), d, cfg["ff"]) for _ in range(cfg["num_layers"])]
    # FinalLayer: LN + Linear.  NOTE: zero_module() zeroes these weights in PyTorch;
    # nonzero init is used so the kernel compute is exercised.  The output columns are
    # padded to 128 lanes (lane-dense stores); sliced back once at the end of forward.
    p["out_ln"] = _ln_p(d)
    npad = _round_up(Fd, 128)
    w = jax.random.normal(next(ks), (1, d, Fd), jnp.float32) * 0.02
    w = jnp.pad(w, ((0, 0), (0, 0), (0, npad - Fd)))
    p["out_lin"] = {"w": w.astype(DTYPE), "b": jnp.zeros((1, 1, npad), DTYPE)}
    return p


# ----------------------------- model forward ----------------------------------

def react_block(h_a, h_b, music, emb, p, num_heads, kp_mask):
    # TODO(synk): exact FlashReactBlock internals are not in the provided source;
    # implemented as a pre-norm reactive block (leader: self-attn + music cross-attn
    # + FFN; follower: self-attn + leader cross-attn + music cross-attn + FFN),
    # conditioned by adding `emb` before the first norm.  Retrieval (re_dict) path omitted.
    e = emb[:, None, :]
    h_a = self_attn_block(h_a + e, h_a, p["a_sa"], num_heads, ln=p["ln_a1"], kp_mask=kp_mask)
    h_a = cross_attn_block(h_a, music, h_a, p["a_ca_m"], num_heads, ln=p["ln_a2"],
                           kp_mask=kp_mask)
    h_a = ffn3(h_a, p["a_ff"], h_a, ln=p["ln_a3"])

    h_b = self_attn_block(h_b + e, h_b, p["b_sa"], num_heads, ln=p["ln_b1"], kp_mask=kp_mask)
    h_b = cross_attn_block(h_b, h_a, h_b, p["b_ca_a"], num_heads, ln=p["ln_b2"],
                           kp_mask=kp_mask)
    h_b = cross_attn_block(h_b, music, h_b, p["b_ca_m"], num_heads, ln=p["ln_b3"],
                           kp_mask=kp_mask)
    h_b = ffn3(h_b, p["b_ff"], h_b, ln=p["ln_b4"])
    return h_a, h_b, music


def flownet_react_forward(params, cfg, x, timesteps, mask=None, cond=None, music=None,
                          re_dict=None, cond_type=None):
    B, T, _ = x.shape
    Fd = cfg["input_feats"]

    x_a = x[..., :Fd].astype(DTYPE)
    x_b = x[..., Fd:].astype(DTYPE)

    if mask is not None:
        mask = mask[..., 0]
    if cond_type is not None:
        text_active = (cond_type % 10 > 0).astype(jnp.float32)
        if cond is not None:
            cond = cond * text_active.reshape(B, 1)
        # TODO(synk): re_dict retrieval gating not implemented (block retrieval path unknown).
    if (not cfg["use_text"]) or (cond is None):
        cond = jnp.zeros((B, cfg["text_dim"]), jnp.float32)
    if (not cfg["use_music"]) or (music is None):
        music = jnp.zeros((B, T, cfg["music_dim"]), jnp.float32)

    # Pad T once (multiple of 8) so no per-kernel pad/slice is ever needed; padded
    # frames are masked out of every attention and the output is sliced once at the end.
    Tp = _round_up(T, 8)
    if Tp != T:
        padT = Tp - T
        x_a = jnp.pad(x_a, ((0, 0), (0, padT), (0, 0)))
        x_b = jnp.pad(x_b, ((0, 0), (0, padT), (0, 0)))
        music = jnp.pad(music, ((0, 0), (0, padT), (0, 0)))
        valid = jnp.broadcast_to((jnp.arange(Tp) < T).astype(jnp.float32)[None], (B, Tp))
        mask = valid if mask is None else jnp.pad(mask, ((0, 0), (0, padT))) * valid
    kp_mask = mask.astype(jnp.float32) if mask is not None else None     # >0.5 == keep
    enc_mask = kp_mask if Tp != T else None      # look-ahead / music encoder need it only if padded

    pe = params["pe"]
    pos = pe[:Tp].astype(DTYPE)                  # [Tp, D] -- fused as a row residual

    # Timestep embedder (MDM-style MLP over the sinusoidal row) + text embed: tiny
    # [B, latent] matmuls -- plain XLA, a Pallas dispatch would cost more than the math.
    def _dense(z, p):
        return z @ p["w"] + p["b"]
    t_emb = _dense(pe[timesteps], params["time_mlp1"])
    t_emb = t_emb * jax.nn.sigmoid(t_emb)                      # SiLU
    t_emb = _dense(t_emb, params["time_mlp2"])
    emb = (t_emb + _dense(cond.astype(jnp.float32), params["text_embed"])).astype(DTYPE)

    nh = cfg["num_heads"]

    # Leader: motion embed -> look-ahead self-attention (band mask built in-kernel),
    # its residual + LayerNorm + positional encoding fused into the out-projection.
    # TODO(synk): LookAheadTransformer source not provided; self-attention restricted to
    # [t, t + look_ahead_window] + residual + LayerNorm.
    a_emb = matmul3(x_a, params["motion_embed"])
    h_a = self_attn_block(a_emb, a_emb, params["look_ahead"]["attn"], nh,
                          band=True, window=cfg["look_ahead_window"], kp_mask=enc_mask,
                          ln_out=params["look_ahead"]["ln"], pos=pos)
    # Follower: motion embed with the positional encoding fused in the epilogue.
    h_b = matmul3(x_b, params["motion_embed"], pos=pos)

    # Music: embed (+pos fused) -> 4-layer post-norm encoder (nhead=8, GELU); the
    # post-attention / post-FFN LayerNorms are fused as kernel epilogues.
    music_emb = matmul3(music.astype(DTYPE), params["music_embed"], pos=pos)
    for lp in params["music_encoder"]:
        music_emb = self_attn_block(music_emb, music_emb, lp["attn"], cfg["music_heads"],
                                    kp_mask=enc_mask, ln_out=lp["ln1"])
        music_emb = ffn3(music_emb, lp["ff"], music_emb, ln_out=lp["ln2"])

    for bp in params["blocks"]:
        h_a, h_b, music_emb = react_block(h_a, h_b, music_emb, emb, bp, nh, kp_mask)

    # FinalLayer: fused LN + Linear; h_a / h_b stacked along rows so the (lane-dense,
    # 128-padded) weight panel is streamed once.
    h = jnp.concatenate([h_a, h_b], axis=0)                    # [2B, Tp, D]
    out = matmul3(h, params["out_lin"], ln=params["out_ln"])   # [2B, Tp, 128-pad]
    out = out[..., :Fd]
    out = jnp.concatenate([out[:B], out[B:]], axis=-1)         # [B, Tp, 2F]
    if Tp != T:
        out = out[:, :T]
    return out.astype(jnp.float32)


# --------------------------------- main ----------------------------------------

if __name__ == "__main__":
    cfg = dict(
        input_feats=12,
        latent=32,
        ff=64,
        music_dim=64,        # module default 4800; small for the synthetic test
        text_dim=768,
        num_layers=2,        # module default 8; small for the synthetic test
        num_heads=4,
        music_heads=8,       # hardcoded nhead=8 in musicTransEncoder
        look_ahead_window=50,
        use_text=True,
        use_music=True,
    )

    key = jax.random.PRNGKey(0)
    k_p, k_x, k_c, k_m = jax.random.split(key, 4)

    B, T = 2, 8
    params = init_params(k_p, cfg)
    x = jax.random.normal(k_x, (B, T, 2 * cfg["input_feats"]), jnp.float32)
    timesteps = jnp.array([3, 17], dtype=jnp.int32)
    cond = jax.random.normal(k_c, (B, cfg["text_dim"]), jnp.float32)
    music = jax.random.normal(k_m, (B, T, cfg["music_dim"]), jnp.float32)
    mask = jnp.ones((B, T, 1), jnp.float32)   # module defaults to an all-ones mask

    fwd = jax.jit(lambda p, xx, ts, m, c, mu:
                  flownet_react_forward(p, cfg, xx, ts, mask=m, cond=c, music=mu))
    out = jax.block_until_ready(fwd(params, x, timesteps, mask, cond, music))

    assert out.shape == (B, T, 2 * cfg["input_feats"]), out.shape
    assert bool(jnp.all(jnp.isfinite(out)))
    print("KERNEL_OK")
</pallas_src>

<mosaic_0001>
module attributes {stable_mosaic.version = 11 : i64} {
  func.func @_mm_kernel(%arg0: i32, %arg1: i32, %arg2: i32, %arg3: i32, %arg4: memref<16x32xbf16, #tpu.memory_space<vmem>>, %arg5: memref<1x32x32xbf16, #tpu.memory_space<vmem>>, %arg6: memref<1x1x32xbf16, #tpu.memory_space<vmem>>, %arg7: memref<1x16x32xbf16, #tpu.memory_space<vmem>>) attributes {dimension_semantics = [#tpu.dimension_semantics<parallel>, #tpu.dimension_semantics<parallel>, #tpu.dimension_semantics<parallel>, #tpu.dimension_semantics<arbitrary>], iteration_bounds = array<i64: 1, 3, 1, 1>, scalar_prefetch = 0 : i64, scratch_operands = 0 : i64, tpu.core_type = #tpu.core_type<tc>, window_params = [{transform_indices = @transform_0, window_bounds = array<i64: 16, 32>}, {transform_indices = @transform_1, window_bounds = array<i64: 1, 32, 32>}, {transform_indices = @transform_2, window_bounds = array<i64: 1, 1, 32>}, {transform_indices = @transform_3, window_bounds = array<i64: 1, 16, 32>}]} {
    %c0 = arith.constant 0 : index
    %c0_0 = arith.constant 0 : index
    %0 = vector.load %arg4[%c0, %c0_0] : memref<16x32xbf16, #tpu.memory_space<vmem>>, vector<16x32xbf16>
    %c0_1 = arith.constant 0 : index
    %c0_2 = arith.constant 0 : index
    %c0_3 = arith.constant 0 : index
    %1 = vector.load %arg5[%c0_1, %c0_2, %c0_3] : memref<1x32x32xbf16, #tpu.memory_space<vmem>>, vector<1x32x32xbf16>
    %2 = vector.shape_cast %1 : vector<1x32x32xbf16> to vector<32x32xbf16>
    %cst = arith.constant dense<0.000000e+00> : vector<16x32xf32>
    %3 = tpu.matmul %0, %2, %cst {dimension_numbers = #tpu.dot_dimension_numbers<[1], [0], [0], [1], [0, 0, 1, 1], [], []>} : vector<16x32xbf16>, vector<32x32xbf16>, vector<16x32xf32> -> vector<16x32xf32>
    %c0_4 = arith.constant 0 : index
    %c0_5 = arith.constant 0 : index
    %c0_6 = arith.constant 0 : index
    %4 = vector.load %arg6[%c0_4, %c0_5, %c0_6] : memref<1x1x32xbf16, #tpu.memory_space<vmem>>, vector<1x1x32xbf16>
    %5 = vector.shape_cast %4 : vector<1x1x32xbf16> to vector<1x32xbf16>
    %6 = arith.extf %5 : vector<1x32xbf16> to vector<1x32xf32>
    %7 = vector.broadcast %6 : vector<1x32xf32> to vector<16x32xf32>
    %8 = arith.addf %3, %7 : vector<16x32xf32>
    %9 = arith.truncf %8 : vector<16x32xf32> to vector<16x32xbf16>
    %c0_7 = arith.constant 0 : index
    %c0_8 = arith.constant 0 : index
    %c0_9 = arith.constant 0 : index
    %10 = vector.load %arg7[%c0_7, %c0_8, %c0_9] : memref<1x16x32xbf16, #tpu.memory_space<vmem>>, vector<1x16x32xbf16>
    %11 = vector.shape_cast %10 : vector<1x16x32xbf16> to vector<16x32xbf16>
    %12 = vector.shape_cast %9 : vector<16x32xbf16> to vector<1x16x32xbf16>
    tpu.vector_store %arg7[%c0_7, %c0_8, %c0_9], %12 {strides = array<i32>} : memref<1x16x32xbf16, #tpu.memory_space<vmem>>, vector<1x16x32xbf16>,
    return
  }
  func.func @transform_0(%arg0: i32, %arg1: i32, %arg2: i32, %arg3: i32) -> (i32, i32) {
    %c0_i32 = arith.constant 0 : i32
    return %arg0, %arg3 : i32, i32
  }
  func.func @transform_1(%arg0: i32, %arg1: i32, %arg2: i32, %arg3: i32) -> (i32, i32, i32) {
    %c0_i32 = arith.constant 0 : i32
    return %arg1, %arg3, %arg2 : i32, i32, i32
  }
  func.func @transform_2(%arg0: i32, %arg1: i32, %arg2: i32, %arg3: i32) -> (i32, i32, i32) {
    %c0_i32 = arith.constant 0 : i32
    %c0_i32_0 = arith.constant 0 : i32
    return %arg1, %c0_i32, %arg2 : i32, i32, i32
  }
  func.func @transform_3(%arg0: i32, %arg1: i32, %arg2: i32, %arg3: i32) -> (i32, i32, i32) {
    %c0_i32 = arith.constant 0 : i32
    return %arg1, %arg0, %arg2 : i32, i32, i32
  }
}

module attributes {stable_mosaic.version = 11 : i64} {
  func.func @_mm_kernel(%arg0: i32, %arg1: i32, %arg2: i32, %arg3: i32, %arg4: memref<16x12xbf16, #tpu.memory_space<vmem>>, %arg5: memref<1x12x32xbf16, #tpu.memory_space<vmem>>, %arg6: memref<1x1x32xbf16, #tpu.memory_space<vmem>>, %arg7: memref<1x16x32xbf16, #tpu.memory_space<vmem>>) attributes {dimension_semantics = [#tpu.dimension_semantics<parallel>, #tpu.dimension_semantics<parallel>, #tpu.dimension_semantics<parallel>, #tpu.dimension_semantics<arbitrary>], iteration_bounds = array<i64: 1, 1, 1, 1>, scalar_prefetch = 0 : i64, scratch_operands = 0 : i64, tpu.core_type = #tpu.core_type<tc>, window_params = [{transform_indices = @transform_0, window_bounds = array<i64: 16, 12>}, {transform_indices = @transform_1, window_bounds = array<i64: 1, 12, 32>}, {transform_indices = @transform_2, window_bounds = array<i64: 1, 1, 32>}, {transform_indices = @transform_3, window_bounds = array<i64: 1, 16, 32>}]} {
    %c0 = arith.constant 0 : index
    %c0_0 = arith.constant 0 : index
    %0 = vector.load %arg4[%c0, %c0_0] : memref<16x12xbf16, #tpu.memory_space<vmem>>, vector<16x12xbf16>
    %c0_1 = arith.constant 0 : index
    %c0_2 = arith.constant 0 : index
    %c0_3 = arith.constant 0 : index
    %1 = vector.load %arg5[%c0_1, %c0_2, %c0_3] : memref<1x12x32xbf16, #tpu.memory_space<vmem>>, vector<1x12x32xbf16>
    %2 = vector.shape_cast %1 : vector<1x12x32xbf16> to vector<12x32xbf16>
    %cst = arith.constant dense<0.000000e+00> : vector<16x32xf32>
    %3 = tpu.matmul %0, %2, %cst {dimension_numbers = #tpu.dot_dimension_numbers<[1], [0], [0], [1], [0, 0, 1, 1], [], []>} : vector<16x12xbf16>, vector<12x32xbf16>, vector<16x32xf32> -> vector<16x32xf32>
    %c0_4 = arith.constant 0 : index
    %c0_5 = arith.constant 0 : index
    %c0_6 = arith.constant 0 : index
    %4 = vector.load %arg6[%c0_4, %c0_5, %c0_6] : memref<1x1x32xbf16, #tpu.memory_space<vmem>>, vector<1x1x32xbf16>
    %5 = vector.shape_cast %4 : vector<1x1x32xbf16> to vector<1x32xbf16>
    %6 = arith.extf %5 : vector<1x32xbf16> to vector<1x32xf32>
    %7 = vector.broadcast %6 : vector<1x32xf32> to vector<16x32xf32>
    %8 = arith.addf %3, %7 : vector<16x32xf32>
    %9 = arith.truncf %8 : vector<16x32xf32> to vector<16x32xbf16>
    %c0_7 = arith.constant 0 : index
    %c0_8 = arith.constant 0 : index
    %c0_9 = arith.constant 0 : index
    %10 = vector.load %arg7[%c0_7, %c0_8, %c0_9] : memref<1x16x32xbf16, #tpu.memory_space<vmem>>, vector<1x16x32xbf16>
    %11 = vector.shape_cast %10 : vector<1x16x32xbf16> to vector<16x32xbf16>
    %12 = vector.shape_cast %9 : vector<16x32xbf16> to vector<1x16x32xbf16>
    tpu.vector_store %arg7[%c0_7, %c0_8, %c0_9], %12 {strides = array<i32>} : memref<1x16x32xbf16, #tpu.memory_space<vmem>>, vector<1x16x32xbf16>,
    return
  }
  func.func @transform_0(%arg0: i32, %arg1: i32, %arg2: i32, %arg3: i32) -> (i32, i32) {
    %c0_i32 = arith.constant 0 : i32
    return %arg0, %arg3 : i32, i32
  }
  func.func @transform_1(%arg0: i32, %arg1: i32, %arg2: i32, %arg3: i32) -> (i32, i32, i32) {
    %c0_i32 = arith.constant 0 : i32
    return %arg1, %arg3, %arg2 : i32, i32, i32
  }
  func.func @transform_2(%arg0: i32, %arg1: i32, %arg2: i32, %arg3: i32) -> (i32, i32, i32) {
    %c0_i32 = arith.constant 0 : i32
    %c0_i32_0 = arith.constant 0 : i32
    return %arg1, %c0_i32, %arg2 : i32, i32, i32
  }
  func.func @transform_3(%arg0: i32, %arg1: i32, %arg2: i32, %arg3: i32) -> (i32, i32, i32) {
    %c0_i32 = arith.constant 0 : i32
    return %arg1, %arg0, %arg2 : i32, i32, i32
  }
}

module attributes {stable_mosaic.version = 11 : i64} {
  func.func @_attn_kernel(%arg0: i32, %arg1: i32, %arg2: memref<1x1x8x32xbf16, #tpu.memory_space<vmem>>, %arg3: memref<1x1x8x32xbf16, #tpu.memory_space<vmem>>, %arg4: memref<1x1x8x32xbf16, #tpu.memory_space<vmem>>, %arg5: memref<1x8x32xbf16, #tpu.memory_space<vmem>>) attributes {dimension_semantics = [#tpu.dimension_semantics<parallel>, #tpu.dimension_semantics<parallel>], iteration_bounds = array<i64: 2, 1>, scalar_prefetch = 0 : i64, scratch_operands = 0 : i64, tpu.core_type = #tpu.core_type<tc>, window_params = [{transform_indices = @transform_0, window_bounds = array<i64: 1, 1, 8, 32>}, {transform_indices = @transform_1, window_bounds = array<i64: 1, 1, 8, 32>}, {transform_indices = @transform_2, window_bounds = array<i64: 1, 1, 8, 32>}, {transform_indices = @transform_3, window_bounds = array<i64: 1, 8, 32>}]} {
    %c0 = arith.constant 0 : index
    %c0_0 = arith.constant 0 : index
    %c0_1 = arith.constant 0 : index
    %c0_2 = arith.constant 0 : index
    %0 = vector.load %arg2[%c0, %c0_0, %c0_1, %c0_2] : memref<1x1x8x32xbf16, #tpu.memory_space<vmem>>, vector<1x1x8x32xbf16>
    %1 = vector.shape_cast %0 : vector<1x1x8x32xbf16> to vector<8x32xbf16>
    %c0_3 = arith.constant 0 : index
    %c0_4 = arith.constant 0 : index
    %c0_5 = arith.constant 0 : index
    %c0_6 = arith.constant 0 : index
    %2 = vector.load %arg3[%c0_3, %c0_4, %c0_5, %c0_6] : memref<1x1x8x32xbf16, #tpu.memory_space<vmem>>, vector<1x1x8x32xbf16>
    %3 = vector.shape_cast %2 : vector<1x1x8x32xbf16> to vector<8x32xbf16>
    %c0_7 = arith.constant 0 : index
    %c0_8 = arith.constant 0 : index
    %c0_9 = arith.constant 0 : index
    %c0_10 = arith.constant 0 : index
    %4 = vector.load %arg4[%c0_7, %c0_8, %c0_9, %c0_10] : memref<1x1x8x32xbf16, #tpu.memory_space<vmem>>, vector<1x1x8x32xbf16>
    %5 = vector.shape_cast %4 : vector<1x1x8x32xbf16> to vector<8x32xbf16>
    %c8_i32 = arith.constant 8 : i32
    %6 = arith.muli %arg1, %c8_i32 : i32
    %7 = tpu.iota {dimensions = array<i32: 0>} : vector<8x8xi32>
    %8 = vector.broadcast %6 : i32 to vector<8x8xi32>
    %9 = arith.addi %8, %7 : vector<8x8xi32>
    %10 = tpu.iota {dimensions = array<i32: 1>} : vector<8x8xi32>
    %11 = arith.cmpi sge, %10, %9 : vector<8x8xi32>
    %c50_i32 = arith.constant 50 : i32
    %12 = vector.broadcast %c50_i32 : i32 to vector<8x8xi32>
    %13 = arith.addi %9, %12 : vector<8x8xi32>
    %14 = arith.cmpi sle, %10, %13 : vector<8x8xi32>
    %15 = arith.andi %11, %14 : vector<8x8xi1>
    %16 = vector.extract_strided_slice %1 {offsets = [0, 0], sizes = [8, 8], strides = [1, 1]} : vector<8x32xbf16> to vector<8x8xbf16>
    %17 = vector.extract_strided_slice %3 {offsets = [0, 0], sizes = [8, 8], strides = [1, 1]} : vector<8x32xbf16> to vector<8x8xbf16>
    %18 = vector.extract_strided_slice %5 {offsets = [0, 0], sizes = [8, 8], strides = [1, 1]} : vector<8x32xbf16> to vector<8x8xbf16>
    %cst = arith.constant dense<0.000000e+00> : vector<8x8xf32>
    %19 = tpu.matmul %16, %17, %cst {dimension_numbers = #tpu.dot_dimension_numbers<[1], [1], [0], [0], [0, 0, 1, 0], [], []>} : vector<8x8xbf16>, vector<8x8xbf16>, vector<8x8xf32> -> vector<8x8xf32>
    %cst_11 = arith.constant 0.353553385 : f32
    %20 = vector.broadcast %cst_11 : f32 to vector<8x8xf32>
    %21 = arith.mulf %19, %20 : vector<8x8xf32>
    %cst_12 = arith.constant -1.000000e+30 : f32
    %22 = vector.broadcast %cst_12 : f32 to vector<8x8xf32>
    %23 = arith.select %15, %21, %22 : vector<8x8xi1>, vector<8x8xf32>
    %cst_13 = arith.constant dense<0xFF800000> : vector<8xf32>
    %24 = vector.multi_reduction <maximumf>, %23, %cst_13 [1] : vector<8x8xf32> to vector<8xf32>
    %25 = vector.shape_cast %24 : vector<8xf32> to vector<8x1xf32>
    %26 = vector.broadcast %25 : vector<8x1xf32> to vector<8x8xf32>
    %27 = arith.subf %23, %26 : vector<8x8xf32>
    %28 = math.exp %27 : vector<8x8xf32>
    %cst_14 = arith.constant dense<0.000000e+00> : vector<8xf32>
    %29 = vector.multi_reduction <add>, %28, %cst_14 [1] : vector<8x8xf32> to vector<8xf32>
    %30 = vector.shape_cast %29 : vector<8xf32> to vector<8x1xf32>
    %31 = vector.broadcast %30 : vector<8x1xf32> to vector<8x8xf32>
    %32 = arith.divf %28, %31 : vector<8x8xf32>
    %33 = arith.truncf %32 : vector<8x8xf32> to vector<8x8xbf16>
    %cst_15 = arith.constant dense<0.000000e+00> : vector<8x8xf32>
    %34 = tpu.matmul %33, %18, %cst_15 {dimension_numbers = #tpu.dot_dimension_numbers<[1], [0], [0], [1], [0, 0, 1, 1], [], []>} : vector<8x8xbf16>, vector<8x8xbf16>, vector<8x8xf32> -> vector<8x8xf32>
    %35 = arith.truncf %34 : vector<8x8xf32> to vector<8x8xbf16>
    %c0_16 = arith.constant 0 : index
    %c0_17 = arith.constant 0 : index
    %c0_18 = arith.constant 0 : index
    %36 = vector.load %arg5[%c0_16, %c0_17, %c0_18] : memref<1x8x32xbf16, #tpu.memory_space<vmem>>, vector<1x8x8xbf16>
    %37 = vector.shape_cast %36 : vector<1x8x8xbf16> to vector<8x8xbf16>
    %38 = vector.shape_cast %35 : vector<8x8xbf16> to vector<1x8x8xbf16>
    tpu.vector_store %arg5[%c0_16, %c0_17, %c0_18], %38 {strides = array<i32>} : memref<1x8x32xbf16, #tpu.memory_space<vmem>>, vector<1x8x8xbf16>,
    %39 = vector.extract_strided_slice %1 {offsets = [0, 8], sizes = [8, 8], strides = [1, 1]} : vector<8x32xbf16> to vector<8x8xbf16>
    %40 = vector.extract_strided_slice %3 {offsets = [0, 8], sizes = [8, 8], strides = [1, 1]} : vector<8x32xbf16> to vector<8x8xbf16>
    %41 = vector.extract_strided_slice %5 {offsets = [0, 8], sizes = [8, 8], strides = [1, 1]} : vector<8x32xbf16> to vector<8x8xbf16>
    %cst_19 = arith.constant dense<0.000000e+00> : vector<8x8xf32>
    %42 = tpu.matmul %39, %40, %cst_19 {dimension_numbers = #tpu.dot_dimension_numbers<[1], [1], [0], [0], [0, 0, 1, 0], [], []>} : vector<8x8xbf16>, vector<8x8xbf16>, vector<8x8xf32> -> vector<8x8xf32>
    %cst_20 = arith.constant 0.353553385 : f32
    %43 = vector.broadcast %cst_20 : f32 to vector<8x8xf32>
    %44 = arith.mulf %42, %43 : vector<8x8xf32>
    %cst_21 = arith.constant -1.000000e+30 : f32
    %45 = vector.broadcast %cst_21 : f32 to vector<8x8xf32>
    %46 = arith.select %15, %44, %45 : vector<8x8xi1>, vector<8x8xf32>
    %cst_22 = arith.constant dense<0xFF800000> : vector<8xf32>
    %47 = vector.multi_reduction <maximumf>, %46, %cst_22 [1] : vector<8x8xf32> to vector<8xf32>
    %48 = vector.shape_cast %47 : vector<8xf32> to vector<8x1xf32>
    %49 = vector.broadcast %48 : vector<8x1xf32> to vector<8x8xf32>
    %50 = arith.subf %46, %49 : vector<8x8xf32>
    %51 = math.exp %50 : vector<8x8xf32>
    %cst_23 = arith.constant dense<0.000000e+00> : vector<8xf32>
    %52 = vector.multi_reduction <add>, %51, %cst_23 [1] : vector<8x8xf32> to vector<8xf32>
    %53 = vector.shape_cast %52 : vector<8xf32> to vector<8x1xf32>
    %54 = vector.broadcast %53 : vector<8x1xf32> to vector<8x8xf32>
    %55 = arith.divf %51, %54 : vector<8x8xf32>
    %56 = arith.truncf %55 : vector<8x8xf32> to vector<8x8xbf16>
    %cst_24 = arith.constant dense<0.000000e+00> : vector<8x8xf32>
    %57 = tpu.matmul %56, %41, %cst_24 {dimension_numbers = #tpu.dot_dimension_numbers<[1], [0], [0], [1], [0, 0, 1, 1], [], []>} : vector<8x8xbf16>, vector<8x8xbf16>, vector<8x8xf32> -> vector<8x8xf32>
    %58 = arith.truncf %57 : vector<8x8xf32> to vector<8x8xbf16>
    %c0_25 = arith.constant 0 : index
    %c0_26 = arith.constant 0 : index
    %c8 = arith.constant 8 : index
    %59 = vector.load %arg5[%c0_25, %c0_26, %c8] : memref<1x8x32xbf16, #tpu.memory_space<vmem>>, vector<1x8x8xbf16>
    %60 = vector.shape_cast %59 : vector<1x8x8xbf16> to vector<8x8xbf16>
    %61 = vector.shape_cast %58 : vector<8x8xbf16> to vector<1x8x8xbf16>
    tpu.vector_store %arg5[%c0_25, %c0_26, %c8], %61 {strides = array<i32>} : memref<1x8x32xbf16, #tpu.memory_space<vmem>>, vector<1x8x8xbf16>,
    %62 = vector.extract_strided_slice %1 {offsets = [0, 16], sizes = [8, 8], strides = [1, 1]} : vector<8x32xbf16> to vector<8x8xbf16>
    %63 = vector.extract_strided_slice %3 {offsets = [0, 16], sizes = [8, 8], strides = [1, 1]} : vector<8x32xbf16> to vector<8x8xbf16>
    %64 = vector.extract_strided_slice %5 {offsets = [0, 16], sizes = [8, 8], strides = [1, 1]} : vector<8x32xbf16> to vector<8x8xbf16>
    %cst_27 = arith.constant dense<0.000000e+00> : vector<8x8xf32>
    %65 = tpu.matmul %62, %63, %cst_27 {dimension_numbers = #tpu.dot_dimension_numbers<[1], [1], [0], [0], [0, 0, 1, 0], [], []>} : vector<8x8xbf16>, vector<8x8xbf16>, vector<8x8xf32> -> vector<8x8xf32>
    %cst_28 = arith.constant 0.353553385 : f32
    %66 = vector.broadcast %cst_28 : f32 to vector<8x8xf32>
    %67 = arith.mulf %65, %66 : vector<8x8xf32>
    %cst_29 = arith.constant -1.000000e+30 : f32
    %68 = vector.broadcast %cst_29 : f32 to vector<8x8xf32>
    %69 = arith.select %15, %67, %68 : vector<8x8xi1>, vector<8x8xf32>
    %cst_30 = arith.constant dense<0xFF800000> : vector<8xf32>
    %70 = vector.multi_reduction <maximumf>, %69, %cst_30 [1] : vector<8x8xf32> to vector<8xf32>
    %71 = vector.shape_cast %70 : vector<8xf32> to vector<8x1xf32>
    %72 = vector.broadcast %71 : vector<8x1xf32> to vector<8x8xf32>
    %73 = arith.subf %69, %72 : vector<8x8xf32>
    %74 = math.exp %73 : vector<8x8xf32>
    %cst_31 = arith.constant dense<0.000000e+00> : vector<8xf32>
    %75 = vector.multi_reduction <add>, %74, %cst_31 [1] : vector<8x8xf32> to vector<8xf32>
    %76 = vector.shape_cast %75 : vector<8xf32> to vector<8x1xf32>
    %77 = vector.broadcast %76 : vector<8x1xf32> to vector<8x8xf32>
    %78 = arith.divf %74, %77 : vector<8x8xf32>
    %79 = arith.truncf %78 : vector<8x8xf32> to vector<8x8xbf16>
    %cst_32 = arith.constant dense<0.000000e+00> : vector<8x8xf32>
    %80 = tpu.matmul %79, %64, %cst_32 {dimension_numbers = #tpu.dot_dimension_numbers<[1], [0], [0], [1], [0, 0, 1, 1], [], []>} : vector<8x8xbf16>, vector<8x8xbf16>, vector<8x8xf32> -> vector<8x8xf32>
    %81 = arith.truncf %80 : vector<8x8xf32> to vector<8x8xbf16>
    %c0_33 = arith.constant 0 : index
    %c0_34 = arith.constant 0 : index
    %c16 = arith.constant 16 : index
    %82 = vector.load %arg5[%c0_33, %c0_34, %c16] : memref<1x8x32xbf16, #tpu.memory_space<vmem>>, vector<1x8x8xbf16>
    %83 = vector.shape_cast %82 : vector<1x8x8xbf16> to vector<8x8xbf16>
    %84 = vector.shape_cast %81 : vector<8x8xbf16> to vector<1x8x8xbf16>
    tpu.vector_store %arg5[%c0_33, %c0_34, %c16], %84 {strides = array<i32>} : memref<1x8x32xbf16, #tpu.memory_space<vmem>>, vector<1x8x8xbf16>,
    %85 = vector.extract_strided_slice %1 {offsets = [0, 24], sizes = [8, 8], strides = [1, 1]} : vector<8x32xbf16> to vector<8x8xbf16>
    %86 = vector.extract_strided_slice %3 {offsets = [0, 24], sizes = [8, 8], strides = [1, 1]} : vector<8x32xbf16> to vector<8x8xbf16>
    %87 = vector.extract_strided_slice %5 {offsets = [0, 24], sizes = [8, 8], strides = [1, 1]} : vector<8x32xbf16> to vector<8x8xbf16>
    %cst_35 = arith.constant dense<0.000000e+00> : vector<8x8xf32>
    %88 = tpu.matmul %85, %86, %cst_35 {dimension_numbers = #tpu.dot_dimension_numbers<[1], [1], [0], [0], [0, 0, 1, 0], [], []>} : vector<8x8xbf16>, vector<8x8xbf16>, vector<8x8xf32> -> vector<8x8xf32>
    %cst_36 = arith.constant 0.353553385 : f32
    %89 = vector.broadcast %cst_36 : f32 to vector<8x8xf32>
    %90 = arith.mulf %88, %89 : vector<8x8xf32>
    %cst_37 = arith.constant -1.000000e+30 : f32
    %91 = vector.broadcast %cst_37 : f32 to vector<8x8xf32>
    %92 = arith.select %15, %90, %91 : vector<8x8xi1>, vector<8x8xf32>
    %cst_38 = arith.constant dense<0xFF800000> : vector<8xf32>
    %93 = vector.multi_reduction <maximumf>, %92, %cst_38 [1] : vector<8x8xf32> to vector<8xf32>
    %94 = vector.shape_cast %93 : vector<8xf32> to vector<8x1xf32>
    %95 = vector.broadcast %94 : vector<8x1xf32> to vector<8x8xf32>
    %96 = arith.subf %92, %95 : vector<8x8xf32>
    %97 = math.exp %96 : vector<8x8xf32>
    %cst_39 = arith.constant dense<0.000000e+00> : vector<8xf32>
    %98 = vector.multi_reduction <add>, %97, %cst_39 [1] : vector<8x8xf32> to vector<8xf32>
    %99 = vector.shape_cast %98 : vector<8xf32> to vector<8x1xf32>
    %100 = vector.broadcast %99 : vector<8x1xf32> to vector<8x8xf32>
    %101 = arith.divf %97, %100 : vector<8x8xf32>
    %102 = arith.truncf %101 : vector<8x8xf32> to vector<8x8xbf16>
    %cst_40 = arith.constant dense<0.000000e+00> : vector<8x8xf32>
    %103 = tpu.matmul %102, %87, %cst_40 {dimension_numbers = #tpu.dot_dimension_numbers<[1], [0], [0], [1], [0, 0, 1, 1], [], []>} : vector<8x8xbf16>, vector<8x8xbf16>, vector<8x8xf32> -> vector<8x8xf32>
    %104 = arith.truncf %103 : vector<8x8xf32> to vector<8x8xbf16>
    %c0_41 = arith.constant 0 : index
    %c0_42 = arith.constant 0 : index
    %c24 = arith.constant 24 : index
    %105 = vector.load %arg5[%c0_41, %c0_42, %c24] : memref<1x8x32xbf16, #tpu.memory_space<vmem>>, vector<1x8x8xbf16>
    %106 = vector.shape_cast %105 : vector<1x8x8xbf16> to vector<8x8xbf16>
    %107 = vector.shape_cast %104 : vector<8x8xbf16> to vector<1x8x8xbf16>
    tpu.vector_store %arg5[%c0_41, %c0_42, %c24], %107 {strides = array<i32>} : memref<1x8x32xbf16, #tpu.memory_space<vmem>>, vector<1x8x8xbf16>,
    return
  }
  func.func @transform_0(%arg0: i32, %arg1: i32) -> (i32, i32, i32, i32) {
    %c0_i32 = arith.constant 0 : i32
    %c0_i32_0 = arith.constant 0 : i32
    %c0_i32_1 = arith.constant 0 : i32
    return %c0_i32, %arg0, %arg1, %c0_i32_0 : i32, i32, i32, i32
  }
  func.func @transform_1(%arg0: i32, %arg1: i32) -> (i32, i32, i32, i32) {
    %c1_i32 = arith.constant 1 : i32
    %c0_i32 = arith.constant 0 : i32
    %c0_i32_0 = arith.constant 0 : i32
    %c0_i32_1 = arith.constant 0 : i32
    return %c1_i32, %arg0, %c0_i32, %c0_i32_0 : i32, i32, i32, i32
  }
  func.func @transform_2(%arg0: i32, %arg1: i32) -> (i32, i32, i32, i32) {
    %c2_i32 = arith.constant 2 : i32
    %c0_i32 = arith.constant 0 : i32
    %c0_i32_0 = arith.constant 0 : i32
    %c0_i32_1 = arith.constant 0 : i32
    return %c2_i32, %arg0, %c0_i32, %c0_i32_0 : i32, i32, i32, i32
  }
  func.func @transform_3(%arg0: i32, %arg1: i32) -> (i32, i32, i32) {
    %c0_i32 = arith.constant 0 : i32
    %c0_i32_0 = arith.constant 0 : i32
    return %arg0, %arg1, %c0_i32 : i32, i32, i32
  }
}

module attributes {stable_mosaic.version = 11 : i64} {
  func.func @_mm_kernel(%arg0: i32, %arg1: i32, %arg2: i32, %arg3: i32, %arg4: memref<8x12xbf16, #tpu.memory_space<vmem>>, %arg5: memref<1x12x32xbf16, #tpu.memory_space<vmem>>, %arg6: memref<1x1x32xbf16, #tpu.memory_space<vmem>>, %arg7: memref<8x32xbf16, #tpu.memory_space<vmem>>, %arg8: memref<1x8x32xbf16, #tpu.memory_space<vmem>>) attributes {dimension_semantics = [#tpu.dimension_semantics<parallel>, #tpu.dimension_semantics<parallel>, #tpu.dimension_semantics<parallel>, #tpu.dimension_semantics<arbitrary>], iteration_bounds = array<i64: 2, 1, 1, 1>, scalar_prefetch = 0 : i64, scratch_operands = 0 : i64, tpu.core_type = #tpu.core_type<tc>, window_params = [{transform_indices = @transform_0, window_bounds = array<i64: 8, 12>}, {transform_indices = @transform_1, window_bounds = array<i64: 1, 12, 32>}, {transform_indices = @transform_2, window_bounds = array<i64: 1, 1, 32>}, {transform_indices = @transform_3, window_bounds = array<i64: 8, 32>}, {transform_indices = @transform_4, window_bounds = array<i64: 1, 8, 32>}]} {
    %c0 = arith.constant 0 : index
    %c0_0 = arith.constant 0 : index
    %0 = vector.load %arg4[%c0, %c0_0] : memref<8x12xbf16, #tpu.memory_space<vmem>>, vector<8x12xbf16>
    %c0_1 = arith.constant 0 : index
    %c0_2 = arith.constant 0 : index
    %c0_3 = arith.constant 0 : index
    %1 = vector.load %arg5[%c0_1, %c0_2, %c0_3] : memref<1x12x32xbf16, #tpu.memory_space<vmem>>, vector<1x12x32xbf16>
    %2 = vector.shape_cast %1 : vector<1x12x32xbf16> to vector<12x32xbf16>
    %cst = arith.constant dense<0.000000e+00> : vector<8x32xf32>
    %3 = tpu.matmul %0, %2, %cst {dimension_numbers = #tpu.dot_dimension_numbers<[1], [0], [0], [1], [0, 0, 1, 1], [], []>} : vector<8x12xbf16>, vector<12x32xbf16>, vector<8x32xf32> -> vector<8x32xf32>
    %c0_4 = arith.constant 0 : index
    %c0_5 = arith.constant 0 : index
    %c0_6 = arith.constant 0 : index
    %4 = vector.load %arg6[%c0_4, %c0_5, %c0_6] : memref<1x1x32xbf16, #tpu.memory_space<vmem>>, vector<1x1x32xbf16>
    %5 = vector.shape_cast %4 : vector<1x1x32xbf16> to vector<1x32xbf16>
    %6 = arith.extf %5 : vector<1x32xbf16> to vector<1x32xf32>
    %7 = vector.broadcast %6 : vector<1x32xf32> to vector<8x32xf32>
    %8 = arith.addf %3, %7 : vector<8x32xf32>
    %c0_7 = arith.constant 0 : index
    %c0_8 = arith.constant 0 : index
    %9 = vector.load %arg7[%c0_7, %c0_8] : memref<8x32xbf16, #tpu.memory_space<vmem>>, vector<8x32xbf16>
    %10 = arith.extf %9 : vector<8x32xbf16> to vector<8x32xf32>
    %11 = arith.addf %8, %10 : vector<8x32xf32>
    %12 = arith.truncf %11 : vector<8x32xf32> to vector<8x32xbf16>
    %c0_9 = arith.constant 0 : index
    %c0_10 = arith.constant 0 : index
    %c0_11 = arith.constant 0 : index
    %13 = vector.load %arg8[%c0_9, %c0_10, %c0_11] : memref<1x8x32xbf16, #tpu.memory_space<vmem>>, vector<1x8x32xbf16>
    %14 = vector.shape_cast %13 : vector<1x8x32xbf16> to vector<8x32xbf16>
    %15 = vector.shape_cast %12 : vector<8x32xbf16> to vector<1x8x32xbf16>
    tpu.vector_store %arg8[%c0_9, %c0_10, %c0_11], %15 {strides = array<i32>} : memref<1x8x32xbf16, #tpu.memory_space<vmem>>, vector<1x8x32xbf16>,
    return
  }
  func.func @transform_0(%arg0: i32, %arg1: i32, %arg2: i32, %arg3: i32) -> (i32, i32) {
    %c0_i32 = arith.constant 0 : i32
    return %arg0, %arg3 : i32, i32
  }
  func.func @transform_1(%arg0: i32, %arg1: i32, %arg2: i32, %arg3: i32) -> (i32, i32, i32) {
    %c0_i32 = arith.constant 0 : i32
    return %arg1, %arg3, %arg2 : i32, i32, i32
  }
  func.func @transform_2(%arg0: i32, %arg1: i32, %arg2: i32, %arg3: i32) -> (i32, i32, i32) {
    %c0_i32 = arith.constant 0 : i32
    %c0_i32_0 = arith.constant 0 : i32
    return %arg1, %c0_i32, %arg2 : i32, i32, i32
  }
  func.func @transform_3(%arg0: i32, %arg1: i32, %arg2: i32, %arg3: i32) -> (i32, i32) {
    %c0_i32 = arith.constant 0 : i32
    %c0_i32_0 = arith.constant 0 : i32
    return %c0_i32, %arg2 : i32, i32
  }
  func.func @transform_4(%arg0: i32, %arg1: i32, %arg2: i32, %arg3: i32) -> (i32, i32, i32) {
    %c0_i32 = arith.constant 0 : i32
    return %arg1, %arg0, %arg2 : i32, i32, i32
  }
}

module attributes {stable_mosaic.version = 11 : i64} {
  func.func @_mm_kernel(%arg0: i32, %arg1: i32, %arg2: i32, %arg3: i32, %arg4: memref<8x32xbf16, #tpu.memory_space<vmem>>, %arg5: memref<1x32x32xbf16, #tpu.memory_space<vmem>>, %arg6: memref<1x1x32xbf16, #tpu.memory_space<vmem>>, %arg7: memref<8x32xbf16, #tpu.memory_space<vmem>>, %arg8: memref<8x32xbf16, #tpu.memory_space<vmem>>, %arg9: memref<1x32xbf16, #tpu.memory_space<vmem>>, %arg10: memref<1x32xbf16, #tpu.memory_space<vmem>>, %arg11: memref<1x8x32xbf16, #tpu.memory_space<vmem>>) attributes {dimension_semantics = [#tpu.dimension_semantics<parallel>, #tpu.dimension_semantics<parallel>, #tpu.dimension_semantics<parallel>, #tpu.dimension_semantics<arbitrary>], iteration_bounds = array<i64: 2, 1, 1, 1>, scalar_prefetch = 0 : i64, scratch_operands = 0 : i64, tpu.core_type = #tpu.core_type<tc>, window_params = [{transform_indices = @transform_0, window_bounds = array<i64: 8, 32>}, {transform_indices = @transform_1, window_bounds = array<i64: 1, 32, 32>}, {transform_indices = @transform_2, window_bounds = array<i64: 1, 1, 32>}, {transform_indices = @transform_3, window_bounds = array<i64: 8, 32>}, {transform_indices = @transform_4, window_bounds = array<i64: 8, 32>}, {pipeline_mode = #tpu.pipeline_mode<synchronous>, transform_indices = @transform_5, window_bounds = array<i64: 1, 32>}, {pipeline_mode = #tpu.pipeline_mode<synchronous>, transform_indices = @transform_6, window_bounds = array<i64: 1, 32>}, {transform_indices = @transform_7, window_bounds = array<i64: 1, 8, 32>}]} {
    %c0 = arith.constant 0 : index
    %c0_0 = arith.constant 0 : index
    %0 = vector.load %arg4[%c0, %c0_0] : memref<8x32xbf16, #tpu.memory_space<vmem>>, vector<8x32xbf16>
    %c0_1 = arith.constant 0 : index
    %c0_2 = arith.constant 0 : index
    %c0_3 = arith.constant 0 : index
    %1 = vector.load %arg5[%c0_1, %c0_2, %c0_3] : memref<1x32x32xbf16, #tpu.memory_space<vmem>>, vector<1x32x32xbf16>
    %2 = vector.shape_cast %1 : vector<1x32x32xbf16> to vector<32x32xbf16>
    %cst = arith.constant dense<0.000000e+00> : vector<8x32xf32>
    %3 = tpu.matmul %0, %2, %cst {dimension_numbers = #tpu.dot_dimension_numbers<[1], [0], [0], [1], [0, 0, 1, 1], [], []>} : vector<8x32xbf16>, vector<32x32xbf16>, vector<8x32xf32> -> vector<8x32xf32>
    %c0_4 = arith.constant 0 : index
    %c0_5 = arith.constant 0 : index
    %c0_6 = arith.constant 0 : index
    %4 = vector.load %arg6[%c0_4, %c0_5, %c0_6] : memref<1x1x32xbf16, #tpu.memory_space<vmem>>, vector<1x1x32xbf16>
    %5 = vector.shape_cast %4 : vector<1x1x32xbf16> to vector<1x32xbf16>
    %6 = arith.extf %5 : vector<1x32xbf16> to vector<1x32xf32>
    %7 = vector.broadcast %6 : vector<1x32xf32> to vector<8x32xf32>
    %8 = arith.addf %3, %7 : vector<8x32xf32>
    %c0_7 = arith.constant 0 : index
    %c0_8 = arith.constant 0 : index
    %9 = vector.load %arg7[%c0_7, %c0_8] : memref<8x32xbf16, #tpu.memory_space<vmem>>, vector<8x32xbf16>
    %10 = arith.extf %9 : vector<8x32xbf16> to vector<8x32xf32>
    %11 = arith.addf %8, %10 : vector<8x32xf32>
    %cst_9 = arith.constant dense<0.000000e+00> : vector<8xf32>
    %12 = vector.multi_reduction <add>, %11, %cst_9 [1] : vector<8x32xf32> to vector<8xf32>
    %13 = vector.shape_cast %12 : vector<8xf32> to vector<8x1xf32>
    %cst_10 = arith.constant 3.200000e+01 : f32
    %14 = vector.broadcast %cst_10 : f32 to vector<8x1xf32>
    %15 = arith.divf %13, %14 : vector<8x1xf32>
    %16 = vector.broadcast %15 : vector<8x1xf32> to vector<8x32xf32>
    %17 = arith.subf %11, %16 : vector<8x32xf32>
    %18 = arith.mulf %17, %17 : vector<8x32xf32>
    %cst_11 = arith.constant dense<0.000000e+00> : vector<8xf32>
    %19 = vector.multi_reduction <add>, %18, %cst_11 [1] : vector<8x32xf32> to vector<8xf32>
    %20 = vector.shape_cast %19 : vector<8xf32> to vector<8x1xf32>
    %cst_12 = arith.constant 3.200000e+01 : f32
    %21 = vector.broadcast %cst_12 : f32 to vector<8x1xf32>
    %22 = arith.divf %20, %21 : vector<8x1xf32>
    %cst_13 = arith.constant 9.99999974E-6 : f32
    %23 = vector.broadcast %cst_13 : f32 to vector<8x1xf32>
    %24 = arith.addf %22, %23 : vector<8x1xf32>
    %25 = math.rsqrt %24 : vector<8x1xf32>
    %26 = vector.broadcast %25 : vector<8x1xf32> to vector<8x32xf32>
    %27 = arith.mulf %17, %26 : vector<8x32xf32>
    %c0_14 = arith.constant 0 : index
    %c0_15 = arith.constant 0 : index
    %28 = vector.load %arg9[%c0_14, %c0_15] : memref<1x32xbf16, #tpu.memory_space<vmem>>, vector<1x32xbf16>
    %29 = arith.extf %28 : vector<1x32xbf16> to vector<1x32xf32>
    %30 = vector.broadcast %29 : vector<1x32xf32> to vector<8x32xf32>
    %31 = arith.mulf %27, %30 : vector<8x32xf32>
    %c0_16 = arith.constant 0 : index
    %c0_17 = arith.constant 0 : index
    %32 = vector.load %arg10[%c0_16, %c0_17] : memref<1x32xbf16, #tpu.memory_space<vmem>>, vector<1x32xbf16>
    %33 = arith.extf %32 : vector<1x32xbf16> to vector<1x32xf32>
    %34 = vector.broadcast %33 : vector<1x32xf32> to vector<8x32xf32>
    %35 = arith.addf %31, %34 : vector<8x32xf32>
    %c0_18 = arith.constant 0 : index
    %c0_19 = arith.constant 0 : index
    %36 = vector.load %arg8[%c0_18, %c0_19] : memref<8x32xbf16, #tpu.memory_space<vmem>>, vector<8x32xbf16>
    %37 = arith.extf %36 : vector<8x32xbf16> to vector<8x32xf32>
    %38 = arith.addf %35, %37 : vector<8x32xf32>
    %39 = arith.truncf %38 : vector<8x32xf32> to vector<8x32xbf16>
    %c0_20 = arith.constant 0 : index
    %c0_21 = arith.constant 0 : index
    %c0_22 = arith.constant 0 : index
    %40 = vector.load %arg11[%c0_20, %c0_21, %c0_22] : memref<1x8x32xbf16, #tpu.memory_space<vmem>>, vector<1x8x32xbf16>
    %41 = vector.shape_cast %40 : vector<1x8x32xbf16> to vector<8x32xbf16>
    %42 = vector.shape_cast %39 : vector<8x32xbf16> to vector<1x8x32xbf16>
    tpu.vector_store %arg11[%c0_20, %c0_21, %c0_22], %42 {strides = array<i32>} : memref<1x8x32xbf16, #tpu.memory_space<vmem>>, vector<1x8x32xbf16>,
    return
  }
  func.func @transform_0(%arg0: i32, %arg1: i32, %arg2: i32, %arg3: i32) -> (i32, i32) {
    %c0_i32 = arith.constant 0 : i32
    return %arg0, %arg3 : i32, i32
  }
  func.func @transform_1(%arg0: i32, %arg1: i32, %arg2: i32, %arg3: i32) -> (i32, i32, i32) {
    %c0_i32 = arith.constant 0 : i32
    return %arg1, %arg3, %arg2 : i32, i32, i32
  }
  func.func @transform_2(%arg0: i32, %arg1: i32, %arg2: i32, %arg3: i32) -> (i32, i32, i32) {
    %c0_i32 = arith.constant 0 : i32
    %c0_i32_0 = arith.constant 0 : i32
    return %arg1, %c0_i32, %arg2 : i32, i32, i32
  }
  func.func @transform_3(%arg0: i32, %arg1: i32, %arg2: i32, %arg3: i32) -> (i32, i32) {
    %c0_i32 = arith.constant 0 : i32
    return %arg0, %arg2 : i32, i32
  }
  func.func @transform_4(%arg0: i32, %arg1: i32, %arg2: i32, %arg3: i32) -> (i32, i32) {
    %c0_i32 = arith.constant 0 : i32
    %c0_i32_0 = arith.constant 0 : i32
    return %c0_i32, %arg2 : i32, i32
  }
  func.func @transform_5(%arg0: i32, %arg1: i32, %arg2: i32, %arg3: i32) -> (i32, i32) {
    %c0_i32 = arith.constant 0 : i32
    %c0_i32_0 = arith.constant 0 : i32
    %c0_i32_1 = arith.constant 0 : i32
    return %c0_i32, %c0_i32_0 : i32, i32
  }
  func.func @transform_6(%arg0: i32, %arg1: i32, %arg2: i32, %arg3: i32) -> (i32, i32) {
    %c0_i32 = arith.constant 0 : i32
    %c0_i32_0 = arith.constant 0 : i32
    %c0_i32_1 = arith.constant 0 : i32
    return %c0_i32, %c0_i32_0 : i32, i32
  }
  func.func @transform_7(%arg0: i32, %arg1: i32, %arg2: i32, %arg3: i32) -> (i32, i32, i32) {
    %c0_i32 = arith.constant 0 : i32
    return %arg1, %arg0, %arg2 : i32, i32, i32
  }
}

module attributes {stable_mosaic.version = 11 : i64} {
  func.func @_mm_kernel(%arg0: i32, %arg1: i32, %arg2: i32, %arg3: i32, %arg4: memref<16x32xbf16, #tpu.memory_space<vmem>>, %arg5: memref<1x32xbf16, #tpu.memory_space<vmem>>, %arg6: memref<1x32xbf16, #tpu.memory_space<vmem>>, %arg7: memref<1x32x32xbf16, #tpu.memory_space<vmem>>, %arg8: memref<1x1x32xbf16, #tpu.memory_space<vmem>>, %arg9: memref<1x16x32xbf16, #tpu.memory_space<vmem>>, %arg10: memref<16x32xbf16, #tpu.memory_space<vmem>>) attributes {dimension_semantics = [#tpu.dimension_semantics<parallel>, #tpu.dimension_semantics<arbitrary>, #tpu.dimension_semantics<arbitrary>, #tpu.dimension_semantics<arbitrary>], iteration_bounds = array<i64: 1, 3, 1, 1>, scalar_prefetch = 0 : i64, scratch_operands = 1 : i64, tpu.core_type = #tpu.core_type<tc>, window_params = [{transform_indices = @transform_0, window_bounds = array<i64: 16, 32>}, {pipeline_mode = #tpu.pipeline_mode<synchronous>, transform_indices = @transform_1, window_bounds = array<i64: 1, 32>}, {pipeline_mode = #tpu.pipeline_mode<synchronous>, transform_indices = @transform_2, window_bounds = array<i64: 1, 32>}, {transform_indices = @transform_3, window_bounds = array<i64: 1, 32, 32>}, {transform_indices = @transform_4, window_bounds = array<i64: 1, 1, 32>}, {transform_indices = @transform_5, window_bounds = array<i64: 1, 16, 32>}]} {
    %c0_i32 = arith.constant 0 : i32
    %0 = arith.cmpi eq, %arg1, %c0_i32 : i32
    %c0_i32_0 = arith.constant 0 : i32
    %1 = arith.cmpi eq, %arg2, %c0_i32_0 : i32
    %2 = arith.andi %0, %1 : i1
    %c0_i32_1 = arith.constant 0 : i32
    %3 = arith.cmpi eq, %arg3, %c0_i32_1 : i32
    %4 = arith.andi %2, %3 : i1
    %5 = arith.extui %4 : i1 to i32
    %c0_i32_2 = arith.constant 0 : i32
    %6 = arith.cmpi ne, %5, %c0_i32_2 : i32
    scf.if %6 {
      %c0_13 = arith.constant 0 : index
      %c0_14 = arith.constant 0 : index
      %20 = vector.load %arg4[%c0_13, %c0_14] : memref<16x32xbf16, #tpu.memory_space<vmem>>, vector<16x32xbf16>
      %21 = arith.extf %20 : vector<16x32xbf16> to vector<16x32xf32>
      %cst_15 = arith.constant dense<0.000000e+00> : vector<16xf32>
      %22 = vector.multi_reduction <add>, %21, %cst_15 [1] : vector<16x32xf32> to vector<16xf32>
      %23 = vector.shape_cast %22 : vector<16xf32> to vector<16x1xf32>
      %cst_16 = arith.constant 3.200000e+01 : f32
      %24 = vector.broadcast %cst_16 : f32 to vector<16x1xf32>
      %25 = arith.divf %23, %24 : vector<16x1xf32>
      %26 = vector.broadcast %25 : vector<16x1xf32> to vector<16x32xf32>
      %27 = arith.subf %21, %26 : vector<16x32xf32>
      %28 = arith.mulf %27, %27 : vector<16x32xf32>
      %cst_17 = arith.constant dense<0.000000e+00> : vector<16xf32>
      %29 = vector.multi_reduction <add>, %28, %cst_17 [1] : vector<16x32xf32> to vector<16xf32>
      %30 = vector.shape_cast %29 : vector<16xf32> to vector<16x1xf32>
      %cst_18 = arith.constant 3.200000e+01 : f32
      %31 = vector.broadcast %cst_18 : f32 to vector<16x1xf32>
      %32 = arith.divf %30, %31 : vector<16x1xf32>
      %cst_19 = arith.constant 9.99999974E-6 : f32
      %33 = vector.broadcast %cst_19 : f32 to vector<16x1xf32>
      %34 = arith.addf %32, %33 : vector<16x1xf32>
      %35 = math.rsqrt %34 : vector<16x1xf32>
      %36 = vector.broadcast %35 : vector<16x1xf32> to vector<16x32xf32>
      %37 = arith.mulf %27, %36 : vector<16x32xf32>
      %c0_20 = arith.constant 0 : index
      %c0_21 = arith.constant 0 : index
      %38 = vector.load %arg5[%c0_20, %c0_21] : memref<1x32xbf16, #tpu.memory_space<vmem>>, vector<1x32xbf16>
      %39 = arith.extf %38 : vector<1x32xbf16> to vector<1x32xf32>
      %40 = vector.broadcast %39 : vector<1x32xf32> to vector<16x32xf32>
      %41 = arith.mulf %37, %40 : vector<16x32xf32>
      %c0_22 = arith.constant 0 : index
      %c0_23 = arith.constant 0 : index
      %42 = vector.load %arg6[%c0_22, %c0_23] : memref<1x32xbf16, #tpu.memory_space<vmem>>, vector<1x32xbf16>
      %43 = arith.extf %42 : vector<1x32xbf16> to vector<1x32xf32>
      %44 = vector.broadcast %43 : vector<1x32xf32> to vector<16x32xf32>
      %45 = arith.addf %41, %44 : vector<16x32xf32>
      %46 = arith.truncf %45 : vector<16x32xf32> to vector<16x32xbf16>
      %c0_24 = arith.constant 0 : index
      %c0_25 = arith.constant 0 : index
      %47 = vector.load %arg10[%c0_24, %c0_25] : memref<16x32xbf16, #tpu.memory_space<vmem>>, vector<16x32xbf16>
      tpu.vector_store %arg10[%c0_24, %c0_25], %46 {strides = array<i32>} : memref<16x32xbf16, #tpu.memory_space<vmem>>, vector<16x32xbf16>,
    } else {
    }
    %c0 = arith.constant 0 : index
    %c0_3 = arith.constant 0 : index
    %7 = vector.load %arg10[%c0, %c0_3] : memref<16x32xbf16, #tpu.memory_space<vmem>>, vector<16x32xbf16>
    %c0_4 = arith.constant 0 : index
    %c0_5 = arith.constant 0 : index
    %c0_6 = arith.constant 0 : index
    %8 = vector.load %arg7[%c0_4, %c0_5, %c0_6] : memref<1x32x32xbf16, #tpu.memory_space<vmem>>, vector<1x32x32xbf16>
    %9 = vector.shape_cast %8 : vector<1x32x32xbf16> to vector<32x32xbf16>
    %cst = arith.constant dense<0.000000e+00> : vector<16x32xf32>
    %10 = tpu.matmul %7, %9, %cst {dimension_numbers = #tpu.dot_dimension_numbers<[1], [0], [0], [1], [0, 0, 1, 1], [], []>} : vector<16x32xbf16>, vector<32x32xbf16>, vector<16x32xf32> -> vector<16x32xf32>
    %c0_7 = arith.constant 0 : index
    %c0_8 = arith.constant 0 : index
    %c0_9 = arith.constant 0 : index
    %11 = vector.load %arg8[%c0_7, %c0_8, %c0_9] : memref<1x1x32xbf16, #tpu.memory_space<vmem>>, vector<1x1x32xbf16>
    %12 = vector.shape_cast %11 : vector<1x1x32xbf16> to vector<1x32xbf16>
    %13 = arith.extf %12 : vector<1x32xbf16> to vector<1x32xf32>
    %14 = vector.broadcast %13 : vector<1x32xf32> to vector<16x32xf32>
    %15 = arith.addf %10, %14 : vector<16x32xf32>
    %16 = arith.truncf %15 : vector<16x32xf32> to vector<16x32xbf16>
    %c0_10 = arith.constant 0 : index
    %c0_11 = arith.constant 0 : index
    %c0_12 = arith.constant 0 : index
    %17 = vector.load %arg9[%c0_10, %c0_11, %c0_12] : memref<1x16x32xbf16, #tpu.memory_space<vmem>>, vector<1x16x32xbf16>
    %18 = vector.shape_cast %17 : vector<1x16x32xbf16> to vector<16x32xbf16>
    %19 = vector.shape_cast %16 : vector<16x32xbf16> to vector<1x16x32xbf16>
    tpu.vector_store %arg9[%c0_10, %c0_11, %c0_12], %19 {strides = array<i32>} : memref<1x16x32xbf16, #tpu.memory_space<vmem>>, vector<1x16x32xbf16>,
    return
  }
  func.func @transform_0(%arg0: i32, %arg1: i32, %arg2: i32, %arg3: i32) -> (i32, i32) {
    %c0_i32 = arith.constant 0 : i32
    return %arg0, %arg3 : i32, i32
  }
  func.func @transform_1(%arg0: i32, %arg1: i32, %arg2: i32, %arg3: i32) -> (i32, i32) {
    %c0_i32 = arith.constant 0 : i32
    %c0_i32_0 = arith.constant 0 : i32
    %c0_i32_1 = arith.constant 0 : i32
    return %c0_i32, %c0_i32_0 : i32, i32
  }
  func.func @transform_2(%arg0: i32, %arg1: i32, %arg2: i32, %arg3: i32) -> (i32, i32) {
    %c0_i32 = arith.constant 0 : i32
    %c0_i32_0 = arith.constant 0 : i32
    %c0_i32_1 = arith.constant 0 : i32
    return %c0_i32, %c0_i32_0 : i32, i32
  }
  func.func @transform_3(%arg0: i32, %arg1: i32, %arg2: i32, %arg3: i32) -> (i32, i32, i32) {
    %c0_i32 = arith.constant 0 : i32
    return %arg1, %arg3, %arg2 : i32, i32, i32
  }
  func.func @transform_4(%arg0: i32, %arg1: i32, %arg2: i32, %arg3: i32) -> (i32, i32, i32) {
    %c0_i32 = arith.constant 0 : i32
    %c0_i32_0 = arith.constant 0 : i32
    return %arg1, %c0_i32, %arg2 : i32, i32, i32
  }
  func.func @transform_5(%arg0: i32, %arg1: i32, %arg2: i32, %arg3: i32) -> (i32, i32, i32) {
    %c0_i32 = arith.constant 0 : i32
    return %arg1, %arg0, %arg2 : i32, i32, i32
  }
}

module attributes {stable_mosaic.version = 11 : i64} {
  func.func @_attn_kernel(%arg0: i32, %arg1: i32, %arg2: memref<1x1x8x32xbf16, #tpu.memory_space<vmem>>, %arg3: memref<1x1x8x32xbf16, #tpu.memory_space<vmem>>, %arg4: memref<1x1x8x32xbf16, #tpu.memory_space<vmem>>, %arg5: memref<1x1x8xf32, #tpu.memory_space<vmem>>, %arg6: memref<1x8x32xbf16, #tpu.memory_space<vmem>>) attributes {dimension_semantics = [#tpu.dimension_semantics<parallel>, #tpu.dimension_semantics<parallel>], iteration_bounds = array<i64: 2, 1>, scalar_prefetch = 0 : i64, scratch_operands = 0 : i64, tpu.core_type = #tpu.core_type<tc>, window_params = [{transform_indices = @transform_0, window_bounds = array<i64: 1, 1, 8, 32>}, {transform_indices = @transform_1, window_bounds = array<i64: 1, 1, 8, 32>}, {transform_indices = @transform_2, window_bounds = array<i64: 1, 1, 8, 32>}, {transform_indices = @transform_3, window_bounds = array<i64: 1, 1, 8>}, {transform_indices = @transform_4, window_bounds = array<i64: 1, 8, 32>}]} {
    %c0 = arith.constant 0 : index
    %c0_0 = arith.constant 0 : index
    %c0_1 = arith.constant 0 : index
    %c0_2 = arith.constant 0 : index
    %0 = vector.load %arg2[%c0, %c0_0, %c0_1, %c0_2] : memref<1x1x8x32xbf16, #tpu.memory_space<vmem>>, vector<1x1x8x32xbf16>
    %1 = vector.shape_cast %0 : vector<1x1x8x32xbf16> to vector<8x32xbf16>
    %c0_3 = arith.constant 0 : index
    %c0_4 = arith.constant 0 : index
    %c0_5 = arith.constant 0 : index
    %c0_6 = arith.constant 0 : index
    %2 = vector.load %arg3[%c0_3, %c0_4, %c0_5, %c0_6] : memref<1x1x8x32xbf16, #tpu.memory_space<vmem>>, vector<1x1x8x32xbf16>
    %3 = vector.shape_cast %2 : vector<1x1x8x32xbf16> to vector<8x32xbf16>
    %c0_7 = arith.constant 0 : index
    %c0_8 = arith.constant 0 : index
    %c0_9 = arith.constant 0 : index
    %c0_10 = arith.constant 0 : index
    %4 = vector.load %arg4[%c0_7, %c0_8, %c0_9, %c0_10] : memref<1x1x8x32xbf16, #tpu.memory_space<vmem>>, vector<1x1x8x32xbf16>
    %5 = vector.shape_cast %4 : vector<1x1x8x32xbf16> to vector<8x32xbf16>
    %c0_11 = arith.constant 0 : index
    %c0_12 = arith.constant 0 : index
    %c0_13 = arith.constant 0 : index
    %6 = vector.load %arg5[%c0_11, %c0_12, %c0_13] : memref<1x1x8xf32, #tpu.memory_space<vmem>>, vector<1x1x8xf32>
    %7 = vector.shape_cast %6 : vector<1x1x8xf32> to vector<1x8xf32>
    %cst = arith.constant 5.000000e-01 : f32
    %8 = vector.broadcast %cst : f32 to vector<1x8xf32>
    %9 = arith.cmpf ogt, %7, %8 : vector<1x8xf32>
    %10 = vector.extract_strided_slice %1 {offsets = [0, 0], sizes = [8, 8], strides = [1, 1]} : vector<8x32xbf16> to vector<8x8xbf16>
    %11 = vector.extract_strided_slice %3 {offsets = [0, 0], sizes = [8, 8], strides = [1, 1]} : vector<8x32xbf16> to vector<8x8xbf16>
    %12 = vector.extract_strided_slice %5 {offsets = [0, 0], sizes = [8, 8], strides = [1, 1]} : vector<8x32xbf16> to vector<8x8xbf16>
    %cst_14 = arith.constant dense<0.000000e+00> : vector<8x8xf32>
    %13 = tpu.matmul %10, %11, %cst_14 {dimension_numbers = #tpu.dot_dimension_numbers<[1], [1], [0], [0], [0, 0, 1, 0], [], []>} : vector<8x8xbf16>, vector<8x8xbf16>, vector<8x8xf32> -> vector<8x8xf32>
    %cst_15 = arith.constant 0.353553385 : f32
    %14 = vector.broadcast %cst_15 : f32 to vector<8x8xf32>
    %15 = arith.mulf %13, %14 : vector<8x8xf32>
    %cst_16 = arith.constant -1.000000e+30 : f32
    %16 = vector.shape_cast %9 : vector<1x8xi1> to vector<1x8xi1>
    %17 = vector.broadcast %16 : vector<1x8xi1> to vector<8x8xi1>
    %18 = vector.broadcast %cst_16 : f32 to vector<8x8xf32>
    %19 = arith.select %17, %15, %18 : vector<8x8xi1>, vector<8x8xf32>
    %cst_17 = arith.constant dense<0xFF800000> : vector<8xf32>
    %20 = vector.multi_reduction <maximumf>, %19, %cst_17 [1] : vector<8x8xf32> to vector<8xf32>
    %21 = vector.shape_cast %20 : vector<8xf32> to vector<8x1xf32>
    %22 = vector.broadcast %21 : vector<8x1xf32> to vector<8x8xf32>
    %23 = arith.subf %19, %22 : vector<8x8xf32>
    %24 = math.exp %23 : vector<8x8xf32>
    %cst_18 = arith.constant dense<0.000000e+00> : vector<8xf32>
    %25 = vector.multi_reduction <add>, %24, %cst_18 [1] : vector<8x8xf32> to vector<8xf32>
    %26 = vector.shape_cast %25 : vector<8xf32> to vector<8x1xf32>
    %27 = vector.broadcast %26 : vector<8x1xf32> to vector<8x8xf32>
    %28 = arith.divf %24, %27 : vector<8x8xf32>
    %29 = arith.truncf %28 : vector<8x8xf32> to vector<8x8xbf16>
    %cst_19 = arith.constant dense<0.000000e+00> : vector<8x8xf32>
    %30 = tpu.matmul %29, %12, %cst_19 {dimension_numbers = #tpu.dot_dimension_numbers<[1], [0], [0], [1], [0, 0, 1, 1], [], []>} : vector<8x8xbf16>, vector<8x8xbf16>, vector<8x8xf32> -> vector<8x8xf32>
    %31 = arith.truncf %30 : vector<8x8xf32> to vector<8x8xbf16>
    %c0_20 = arith.constant 0 : index
    %c0_21 = arith.constant 0 : index
    %c0_22 = arith.constant 0 : index
    %32 = vector.load %arg6[%c0_20, %c0_21, %c0_22] : memref<1x8x32xbf16, #tpu.memory_space<vmem>>, vector<1x8x8xbf16>
    %33 = vector.shape_cast %32 : vector<1x8x8xbf16> to vector<8x8xbf16>
    %34 = vector.shape_cast %31 : vector<8x8xbf16> to vector<1x8x8xbf16>
    tpu.vector_store %arg6[%c0_20, %c0_21, %c0_22], %34 {strides = array<i32>} : memref<1x8x32xbf16, #tpu.memory_space<vmem>>, vector<1x8x8xbf16>,
    %35 = vector.extract_strided_slice %1 {offsets = [0, 8], sizes = [8, 8], strides = [1, 1]} : vector<8x32xbf16> to vector<8x8xbf16>
    %36 = vector.extract_strided_slice %3 {offsets = [0, 8], sizes = [8, 8], strides = [1, 1]} : vector<8x32xbf16> to vector<8x8xbf16>
    %37 = vector.extract_strided_slice %5 {offsets = [0, 8], sizes = [8, 8], strides = [1, 1]} : vector<8x32xbf16> to vector<8x8xbf16>
    %cst_23 = arith.constant dense<0.000000e+00> : vector<8x8xf32>
    %38 = tpu.matmul %35, %36, %cst_23 {dimension_numbers = #tpu.dot_dimension_numbers<[1], [1], [0], [0], [0, 0, 1, 0], [], []>} : vector<8x8xbf16>, vector<8x8xbf16>, vector<8x8xf32> -> vector<8x8xf32>
    %cst_24 = arith.constant 0.353553385 : f32
    %39 = vector.broadcast %cst_24 : f32 to vector<8x8xf32>
    %40 = arith.mulf %38, %39 : vector<8x8xf32>
    %cst_25 = arith.constant -1.000000e+30 : f32
    %41 = vector.shape_cast %9 : vector<1x8xi1> to vector<1x8xi1>
    %42 = vector.broadcast %41 : vector<1x8xi1> to vector<8x8xi1>
    %43 = vector.broadcast %cst_25 : f32 to vector<8x8xf32>
    %44 = arith.select %42, %40, %43 : vector<8x8xi1>, vector<8x8xf32>
    %cst_26 = arith.constant dense<0xFF800000> : vector<8xf32>
    %45 = vector.multi_reduction <maximumf>, %44, %cst_26 [1] : vector<8x8xf32> to vector<8xf32>
    %46 = vector.shape_cast %45 : vector<8xf32> to vector<8x1xf32>
    %47 = vector.broadcast %46 : vector<8x1xf32> to vector<8x8xf32>
    %48 = arith.subf %44, %47 : vector<8x8xf32>
    %49 = math.exp %48 : vector<8x8xf32>
    %cst_27 = arith.constant dense<0.000000e+00> : vector<8xf32>
    %50 = vector.multi_reduction <add>, %49, %cst_27 [1] : vector<8x8xf32> to vector<8xf32>
    %51 = vector.shape_cast %50 : vector<8xf32> to vector<8x1xf32>
    %52 = vector.broadcast %51 : vector<8x1xf32> to vector<8x8xf32>
    %53 = arith.divf %49, %52 : vector<8x8xf32>
    %54 = arith.truncf %53 : vector<8x8xf32> to vector<8x8xbf16>
    %cst_28 = arith.constant dense<0.000000e+00> : vector<8x8xf32>
    %55 = tpu.matmul %54, %37, %cst_28 {dimension_numbers = #tpu.dot_dimension_numbers<[1], [0], [0], [1], [0, 0, 1, 1], [], []>} : vector<8x8xbf16>, vector<8x8xbf16>, vector<8x8xf32> -> vector<8x8xf32>
    %56 = arith.truncf %55 : vector<8x8xf32> to vector<8x8xbf16>
    %c0_29 = arith.constant 0 : index
    %c0_30 = arith.constant 0 : index
    %c8 = arith.constant 8 : index
    %57 = vector.load %arg6[%c0_29, %c0_30, %c8] : memref<1x8x32xbf16, #tpu.memory_space<vmem>>, vector<1x8x8xbf16>
    %58 = vector.shape_cast %57 : vector<1x8x8xbf16> to vector<8x8xbf16>
    %59 = vector.shape_cast %56 : vector<8x8xbf16> to vector<1x8x8xbf16>
    tpu.vector_store %arg6[%c0_29, %c0_30, %c8], %59 {strides = array<i32>} : memref<1x8x32xbf16, #tpu.memory_space<vmem>>, vector<1x8x8xbf16>,
    %60 = vector.extract_strided_slice %1 {offsets = [0, 16], sizes = [8, 8], strides = [1, 1]} : vector<8x32xbf16> to vector<8x8xbf16>
    %61 = vector.extract_strided_slice %3 {offsets = [0, 16], sizes = [8, 8], strides = [1, 1]} : vector<8x32xbf16> to vector<8x8xbf16>
    %62 = vector.extract_strided_slice %5 {offsets = [0, 16], sizes = [8, 8], strides = [1, 1]} : vector<8x32xbf16> to vector<8x8xbf16>
    %cst_31 = arith.constant dense<0.000000e+00> : vector<8x8xf32>
    %63 = tpu.matmul %60, %61, %cst_31 {dimension_numbers = #tpu.dot_dimension_numbers<[1], [1], [0], [0], [0, 0, 1, 0], [], []>} : vector<8x8xbf16>, vector<8x8xbf16>, vector<8x8xf32> -> vector<8x8xf32>
    %cst_32 = arith.constant 0.353553385 : f32
    %64 = vector.broadcast %cst_32 : f32 to vector<8x8xf32>
    %65 = arith.mulf %63, %64 : vector<8x8xf32>
    %cst_33 = arith.constant -1.000000e+30 : f32
    %66 = vector.shape_cast %9 : vector<1x8xi1> to vector<1x8xi1>
    %67 = vector.broadcast %66 : vector<1x8xi1> to vector<8x8xi1>
    %68 = vector.broadcast %cst_33 : f32 to vector<8x8xf32>
    %69 = arith.select %67, %65, %68 : vector<8x8xi1>, vector<8x8xf32>
    %cst_34 = arith.constant dense<0xFF800000> : vector<8xf32>
    %70 = vector.multi_reduction <maximumf>, %69, %cst_34 [1] : vector<8x8xf32> to vector<8xf32>
    %71 = vector.shape_cast %70 : vector<8xf32> to vector<8x1xf32>
    %72 = vector.broadcast %71 : vector<8x1xf32> to vector<8x8xf32>
    %73 = arith.subf %69, %72 : vector<8x8xf32>
    %74 = math.exp %73 : vector<8x8xf32>
    %cst_35 = arith.constant dense<0.000000e+00> : vector<8xf32>
    %75 = vector.multi_reduction <add>, %74, %cst_35 [1] : vector<8x8xf32> to vector<8xf32>
    %76 = vector.shape_cast %75 : vector<8xf32> to vector<8x1xf32>
    %77 = vector.broadcast %76 : vector<8x1xf32> to vector<8x8xf32>
    %78 = arith.divf %74, %77 : vector<8x8xf32>
    %79 = arith.truncf %78 : vector<8x8xf32> to vector<8x8xbf16>
    %cst_36 = arith.constant dense<0.000000e+00> : vector<8x8xf32>
    %80 = tpu.matmul %79, %62, %cst_36 {dimension_numbers = #tpu.dot_dimension_numbers<[1], [0], [0], [1], [0, 0, 1, 1], [], []>} : vector<8x8xbf16>, vector<8x8xbf16>, vector<8x8xf32> -> vector<8x8xf32>
    %81 = arith.truncf %80 : vector<8x8xf32> to vector<8x8xbf16>
    %c0_37 = arith.constant 0 : index
    %c0_38 = arith.constant 0 : index
    %c16 = arith.constant 16 : index
    %82 = vector.load %arg6[%c0_37, %c0_38, %c16] : memref<1x8x32xbf16, #tpu.memory_space<vmem>>, vector<1x8x8xbf16>
    %83 = vector.shape_cast %82 : vector<1x8x8xbf16> to vector<8x8xbf16>
    %84 = vector.shape_cast %81 : vector<8x8xbf16> to vector<1x8x8xbf16>
    tpu.vector_store %arg6[%c0_37, %c0_38, %c16], %84 {strides = array<i32>} : memref<1x8x32xbf16, #tpu.memory_space<vmem>>, vector<1x8x8xbf16>,
    %85 = vector.extract_strided_slice %1 {offsets = [0, 24], sizes = [8, 8], strides = [1, 1]} : vector<8x32xbf16> to vector<8x8xbf16>
    %86 = vector.extract_strided_slice %3 {offsets = [0, 24], sizes = [8, 8], strides = [1, 1]} : vector<8x32xbf16> to vector<8x8xbf16>
    %87 = vector.extract_strided_slice %5 {offsets = [0, 24], sizes = [8, 8], strides = [1, 1]} : vector<8x32xbf16> to vector<8x8xbf16>
    %cst_39 = arith.constant dense<0.000000e+00> : vector<8x8xf32>
    %88 = tpu.matmul %85, %86, %cst_39 {dimension_numbers = #tpu.dot_dimension_numbers<[1], [1], [0], [0], [0, 0, 1, 0], [], []>} : vector<8x8xbf16>, vector<8x8xbf16>, vector<8x8xf32> -> vector<8x8xf32>
    %cst_40 = arith.constant 0.353553385 : f32
    %89 = vector.broadcast %cst_40 : f32 to vector<8x8xf32>
    %90 = arith.mulf %88, %89 : vector<8x8xf32>
    %cst_41 = arith.constant -1.000000e+30 : f32
    %91 = vector.shape_cast %9 : vector<1x8xi1> to vector<1x8xi1>
    %92 = vector.broadcast %91 : vector<1x8xi1> to vector<8x8xi1>
    %93 = vector.broadcast %cst_41 : f32 to vector<8x8xf32>
    %94 = arith.select %92, %90, %93 : vector<8x8xi1>, vector<8x8xf32>
    %cst_42 = arith.constant dense<0xFF800000> : vector<8xf32>
    %95 = vector.multi_reduction <maximumf>, %94, %cst_42 [1] : vector<8x8xf32> to vector<8xf32>
    %96 = vector.shape_cast %95 : vector<8xf32> to vector<8x1xf32>
    %97 = vector.broadcast %96 : vector<8x1xf32> to vector<8x8xf32>
    %98 = arith.subf %94, %97 : vector<8x8xf32>
    %99 = math.exp %98 : vector<8x8xf32>
    %cst_43 = arith.constant dense<0.000000e+00> : vector<8xf32>
    %100 = vector.multi_reduction <add>, %99, %cst_43 [1] : vector<8x8xf32> to vector<8xf32>
    %101 = vector.shape_cast %100 : vector<8xf32> to vector<8x1xf32>
    %102 = vector.broadcast %101 : vector<8x1xf32> to vector<8x8xf32>
    %103 = arith.divf %99, %102 : vector<8x8xf32>
    %104 = arith.truncf %103 : vector<8x8xf32> to vector<8x8xbf16>
    %cst_44 = arith.constant dense<0.000000e+00> : vector<8x8xf32>
    %105 = tpu.matmul %104, %87, %cst_44 {dimension_numbers = #tpu.dot_dimension_numbers<[1], [0], [0], [1], [0, 0, 1, 1], [], []>} : vector<8x8xbf16>, vector<8x8xbf16>, vector<8x8xf32> -> vector<8x8xf32>
    %106 = arith.truncf %105 : vector<8x8xf32> to vector<8x8xbf16>
    %c0_45 = arith.constant 0 : index
    %c0_46 = arith.constant 0 : index
    %c24 = arith.constant 24 : index
    %107 = vector.load %arg6[%c0_45, %c0_46, %c24] : memref<1x8x32xbf16, #tpu.memory_space<vmem>>, vector<1x8x8xbf16>
    %108 = vector.shape_cast %107 : vector<1x8x8xbf16> to vector<8x8xbf16>
    %109 = vector.shape_cast %106 : vector<8x8xbf16> to vector<1x8x8xbf16>
    tpu.vector_store %arg6[%c0_45, %c0_46, %c24], %109 {strides = array<i32>} : memref<1x8x32xbf16, #tpu.memory_space<vmem>>, vector<1x8x8xbf16>,
    return
  }
  func.func @transform_0(%arg0: i32, %arg1: i32) -> (i32, i32, i32, i32) {
    %c0_i32 = arith.constant 0 : i32
    %c0_i32_0 = arith.constant 0 : i32
    %c0_i32_1 = arith.constant 0 : i32
    return %c0_i32, %arg0, %arg1, %c0_i32_0 : i32, i32, i32, i32
  }
  func.func @transform_1(%arg0: i32, %arg1: i32) -> (i32, i32, i32, i32) {
    %c1_i32 = arith.constant 1 : i32
    %c0_i32 = arith.constant 0 : i32
    %c0_i32_0 = arith.constant 0 : i32
    %c0_i32_1 = arith.constant 0 : i32
    return %c1_i32, %arg0, %c0_i32, %c0_i32_0 : i32, i32, i32, i32
  }
  func.func @transform_2(%arg0: i32, %arg1: i32) -> (i32, i32, i32, i32) {
    %c2_i32 = arith.constant 2 : i32
    %c0_i32 = arith.constant 0 : i32
    %c0_i32_0 = arith.constant 0 : i32
    %c0_i32_1 = arith.constant 0 : i32
    return %c2_i32, %arg0, %c0_i32, %c0_i32_0 : i32, i32, i32, i32
  }
  func.func @transform_3(%arg0: i32, %arg1: i32) -> (i32, i32, i32) {
    %c0_i32 = arith.constant 0 : i32
    %c0_i32_0 = arith.constant 0 : i32
    %c0_i32_1 = arith.constant 0 : i32
    return %arg0, %c0_i32, %c0_i32_0 : i32, i32, i32
  }
  func.func @transform_4(%arg0: i32, %arg1: i32) -> (i32, i32, i32) {
    %c0_i32 = arith.constant 0 : i32
    %c0_i32_0 = arith.constant 0 : i32
    return %arg0, %arg1, %c0_i32 : i32, i32, i32
  }
}

module attributes {stable_mosaic.version = 11 : i64} {
  func.func @_mm_kernel(%arg0: i32, %arg1: i32, %arg2: i32, %arg3: i32, %arg4: memref<16x32xbf16, #tpu.memory_space<vmem>>, %arg5: memref<1x32x32xbf16, #tpu.memory_space<vmem>>, %arg6: memref<1x1x32xbf16, #tpu.memory_space<vmem>>, %arg7: memref<16x32xbf16, #tpu.memory_space<vmem>>, %arg8: memref<1x16x32xbf16, #tpu.memory_space<vmem>>) attributes {dimension_semantics = [#tpu.dimension_semantics<parallel>, #tpu.dimension_semantics<parallel>, #tpu.dimension_semantics<parallel>, #tpu.dimension_semantics<arbitrary>], iteration_bounds = array<i64: 1, 1, 1, 1>, scalar_prefetch = 0 : i64, scratch_operands = 0 : i64, tpu.core_type = #tpu.core_type<tc>, window_params = [{transform_indices = @transform_0, window_bounds = array<i64: 16, 32>}, {transform_indices = @transform_1, window_bounds = array<i64: 1, 32, 32>}, {transform_indices = @transform_2, window_bounds = array<i64: 1, 1, 32>}, {transform_indices = @transform_3, window_bounds = array<i64: 16, 32>}, {transform_indices = @transform_4, window_bounds = array<i64: 1, 16, 32>}]} {
    %c0 = arith.constant 0 : index
    %c0_0 = arith.constant 0 : index
    %0 = vector.load %arg4[%c0, %c0_0] : memref<16x32xbf16, #tpu.memory_space<vmem>>, vector<16x32xbf16>
    %c0_1 = arith.constant 0 : index
    %c0_2 = arith.constant 0 : index
    %c0_3 = arith.constant 0 : index
    %1 = vector.load %arg5[%c0_1, %c0_2, %c0_3] : memref<1x32x32xbf16, #tpu.memory_space<vmem>>, vector<1x32x32xbf16>
    %2 = vector.shape_cast %1 : vector<1x32x32xbf16> to vector<32x32xbf16>
    %cst = arith.constant dense<0.000000e+00> : vector<16x32xf32>
    %3 = tpu.matmul %0, %2, %cst {dimension_numbers = #tpu.dot_dimension_numbers<[1], [0], [0], [1], [0, 0, 1, 1], [], []>} : vector<16x32xbf16>, vector<32x32xbf16>, vector<16x32xf32> -> vector<16x32xf32>
    %c0_4 = arith.constant 0 : index
    %c0_5 = arith.constant 0 : index
    %c0_6 = arith.constant 0 : index
    %4 = vector.load %arg6[%c0_4, %c0_5, %c0_6] : memref<1x1x32xbf16, #tpu.memory_space<vmem>>, vector<1x1x32xbf16>
    %5 = vector.shape_cast %4 : vector<1x1x32xbf16> to vector<1x32xbf16>
    %6 = arith.extf %5 : vector<1x32xbf16> to vector<1x32xf32>
    %7 = vector.broadcast %6 : vector<1x32xf32> to vector<16x32xf32>
    %8 = arith.addf %3, %7 : vector<16x32xf32>
    %c0_7 = arith.constant 0 : index
    %c0_8 = arith.constant 0 : index
    %9 = vector.load %arg7[%c0_7, %c0_8] : memref<16x32xbf16, #tpu.memory_space<vmem>>, vector<16x32xbf16>
    %10 = arith.extf %9 : vector<16x32xbf16> to vector<16x32xf32>
    %11 = arith.addf %8, %10 : vector<16x32xf32>
    %12 = arith.truncf %11 : vector<16x32xf32> to vector<16x32xbf16>
    %c0_9 = arith.constant 0 : index
    %c0_10 = arith.constant 0 : index
    %c0_11 = arith.constant 0 : index
    %13 = vector.load %arg8[%c0_9, %c0_10, %c0_11] : memref<1x16x32xbf16, #tpu.memory_space<vmem>>, vector<1x16x32xbf16>
    %14 = vector.shape_cast %13 : vector<1x16x32xbf16> to vector<16x32xbf16>
    %15 = vector.shape_cast %12 : vector<16x32xbf16> to vector<1x16x32xbf16>
    tpu.vector_store %arg8[%c0_9, %c0_10, %c0_11], %15 {strides = array<i32>} : memref<1x16x32xbf16, #tpu.memory_space<vmem>>, vector<1x16x32xbf16>,
    return
  }
  func.func @transform_0(%arg0: i32, %arg1: i32, %arg2: i32, %arg3: i32) -> (i32, i32) {
    %c0_i32 = arith.constant 0 : i32
    return %arg0, %arg3 : i32, i32
  }
  func.func @transform_1(%arg0: i32, %arg1: i32, %arg2: i32, %arg3: i32) -> (i32, i32, i32) {
    %c0_i32 = arith.constant 0 : i32
    return %arg1, %arg3, %arg2 : i32, i32, i32
  }
  func.func @transform_2(%arg0: i32, %arg1: i32, %arg2: i32, %arg3: i32) -> (i32, i32, i32) {
    %c0_i32 = arith.constant 0 : i32
    %c0_i32_0 = arith.constant 0 : i32
    return %arg1, %c0_i32, %arg2 : i32, i32, i32
  }
  func.func @transform_3(%arg0: i32, %arg1: i32, %arg2: i32, %arg3: i32) -> (i32, i32) {
    %c0_i32 = arith.constant 0 : i32
    return %arg0, %arg2 : i32, i32
  }
  func.func @transform_4(%arg0: i32, %arg1: i32, %arg2: i32, %arg3: i32) -> (i32, i32, i32) {
    %c0_i32 = arith.constant 0 : i32
    return %arg1, %arg0, %arg2 : i32, i32, i32
  }
}

module attributes {stable_mosaic.version = 11 : i64} {
  func.func @_mm_kernel(%arg0: i32, %arg1: i32, %arg2: i32, %arg3: i32, %arg4: memref<8x64xbf16, #tpu.memory_space<vmem>>, %arg5: memref<1x64x32xbf16, #tpu.memory_space<vmem>>, %arg6: memref<1x1x32xbf16, #tpu.memory_space<vmem>>, %arg7: memref<8x32xbf16, #tpu.memory_space<vmem>>, %arg8: memref<1x8x32xbf16, #tpu.memory_space<vmem>>) attributes {dimension_semantics = [#tpu.dimension_semantics<parallel>, #tpu.dimension_semantics<parallel>, #tpu.dimension_semantics<parallel>, #tpu.dimension_semantics<arbitrary>], iteration_bounds = array<i64: 2, 1, 1, 1>, scalar_prefetch = 0 : i64, scratch_operands = 0 : i64, tpu.core_type = #tpu.core_type<tc>, window_params = [{transform_indices = @transform_0, window_bounds = array<i64: 8, 64>}, {transform_indices = @transform_1, window_bounds = array<i64: 1, 64, 32>}, {transform_indices = @transform_2, window_bounds = array<i64: 1, 1, 32>}, {transform_indices = @transform_3, window_bounds = array<i64: 8, 32>}, {transform_indices = @transform_4, window_bounds = array<i64: 1, 8, 32>}]} {
    %c0 = arith.constant 0 : index
    %c0_0 = arith.constant 0 : index
    %0 = vector.load %arg4[%c0, %c0_0] : memref<8x64xbf16, #tpu.memory_space<vmem>>, vector<8x64xbf16>
    %c0_1 = arith.constant 0 : index
    %c0_2 = arith.constant 0 : index
    %c0_3 = arith.constant 0 : index
    %1 = vector.load %arg5[%c0_1, %c0_2, %c0_3] : memref<1x64x32xbf16, #tpu.memory_space<vmem>>, vector<1x64x32xbf16>
    %2 = vector.shape_cast %1 : vector<1x64x32xbf16> to vector<64x32xbf16>
    %cst = arith.constant dense<0.000000e+00> : vector<8x32xf32>
    %3 = tpu.matmul %0, %2, %cst {dimension_numbers = #tpu.dot_dimension_numbers<[1], [0], [0], [1], [0, 0, 1, 1], [], []>} : vector<8x64xbf16>, vector<64x32xbf16>, vector<8x32xf32> -> vector<8x32xf32>
    %c0_4 = arith.constant 0 : index
    %c0_5 = arith.constant 0 : index
    %c0_6 = arith.constant 0 : index
    %4 = vector.load %arg6[%c0_4, %c0_5, %c0_6] : memref<1x1x32xbf16, #tpu.memory_space<vmem>>, vector<1x1x32xbf16>
    %5 = vector.shape_cast %4 : vector<1x1x32xbf16> to vector<1x32xbf16>
    %6 = arith.extf %5 : vector<1x32xbf16> to vector<1x32xf32>
    %7 = vector.broadcast %6 : vector<1x32xf32> to vector<8x32xf32>
    %8 = arith.addf %3, %7 : vector<8x32xf32>
    %c0_7 = arith.constant 0 : index
    %c0_8 = arith.constant 0 : index
    %9 = vector.load %arg7[%c0_7, %c0_8] : memref<8x32xbf16, #tpu.memory_space<vmem>>, vector<8x32xbf16>
    %10 = arith.extf %9 : vector<8x32xbf16> to vector<8x32xf32>
    %11 = arith.addf %8, %10 : vector<8x32xf32>
    %12 = arith.truncf %11 : vector<8x32xf32> to vector<8x32xbf16>
    %c0_9 = arith.constant 0 : index
    %c0_10 = arith.constant 0 : index
    %c0_11 = arith.constant 0 : index
    %13 = vector.load %arg8[%c0_9, %c0_10, %c0_11] : memref<1x8x32xbf16, #tpu.memory_space<vmem>>, vector<1x8x32xbf16>
    %14 = vector.shape_cast %13 : vector<1x8x32xbf16> to vector<8x32xbf16>
    %15 = vector.shape_cast %12 : vector<8x32xbf16> to vector<1x8x32xbf16>
    tpu.vector_store %arg8[%c0_9, %c0_10, %c0_11], %15 {strides = array<i32>} : memref<1x8x32xbf16, #tpu.memory_space<vmem>>, vector<1x8x32xbf16>,
    return
  }
  func.func @transform_0(%arg0: i32, %arg1: i32, %arg2: i32, %arg3: i32) -> (i32, i32) {
    %c0_i32 = arith.constant 0 : i32
    return %arg0, %arg3 : i32, i32
  }
  func.func @transform_1(%arg0: i32, %arg1: i32, %arg2: i32, %arg3: i32) -> (i32, i32, i32) {
    %c0_i32 = arith.constant 0 : i32
    return %arg1, %arg3, %arg2 : i32, i32, i32
  }
  func.func @transform_2(%arg0: i32, %arg1: i32, %arg2: i32, %arg3: i32) -> (i32, i32, i32) {
    %c0_i32 = arith.constant 0 : i32
    %c0_i32_0 = arith.constant 0 : i32
    return %arg1, %c0_i32, %arg2 : i32, i32, i32
  }
  func.func @transform_3(%arg0: i32, %arg1: i32, %arg2: i32, %arg3: i32) -> (i32, i32) {
    %c0_i32 = arith.constant 0 : i32
    %c0_i32_0 = arith.constant 0 : i32
    return %c0_i32, %arg2 : i32, i32
  }
  func.func @transform_4(%arg0: i32, %arg1: i32, %arg2: i32, %arg3: i32) -> (i32, i32, i32) {
    %c0_i32 = arith.constant 0 : i32
    return %arg1, %arg0, %arg2 : i32, i32, i32
  }
}

module attributes {stable_mosaic.version = 11 : i64} {
  func.func @_mm_kernel(%arg0: i32, %arg1: i32, %arg2: i32, %arg3: i32, %arg4: memref<16x32xbf16, #tpu.memory_space<vmem>>, %arg5: memref<1x32xbf16, #tpu.memory_space<vmem>>, %arg6: memref<1x32xbf16, #tpu.memory_space<vmem>>, %arg7: memref<1x32x32xbf16, #tpu.memory_space<vmem>>, %arg8: memref<1x1x32xbf16, #tpu.memory_space<vmem>>, %arg9: memref<1x16x32xbf16, #tpu.memory_space<vmem>>, %arg10: memref<16x32xbf16, #tpu.memory_space<vmem>>) attributes {dimension_semantics = [#tpu.dimension_semantics<parallel>, #tpu.dimension_semantics<arbitrary>, #tpu.dimension_semantics<arbitrary>, #tpu.dimension_semantics<arbitrary>], iteration_bounds = array<i64: 1, 1, 1, 1>, scalar_prefetch = 0 : i64, scratch_operands = 1 : i64, tpu.core_type = #tpu.core_type<tc>, window_params = [{transform_indices = @transform_0, window_bounds = array<i64: 16, 32>}, {pipeline_mode = #tpu.pipeline_mode<synchronous>, transform_indices = @transform_1, window_bounds = array<i64: 1, 32>}, {pipeline_mode = #tpu.pipeline_mode<synchronous>, transform_indices = @transform_2, window_bounds = array<i64: 1, 32>}, {transform_indices = @transform_3, window_bounds = array<i64: 1, 32, 32>}, {transform_indices = @transform_4, window_bounds = array<i64: 1, 1, 32>}, {transform_indices = @transform_5, window_bounds = array<i64: 1, 16, 32>}]} {
    %c0_i32 = arith.constant 0 : i32
    %0 = arith.cmpi eq, %arg1, %c0_i32 : i32
    %c0_i32_0 = arith.constant 0 : i32
    %1 = arith.cmpi eq, %arg2, %c0_i32_0 : i32
    %2 = arith.andi %0, %1 : i1
    %c0_i32_1 = arith.constant 0 : i32
    %3 = arith.cmpi eq, %arg3, %c0_i32_1 : i32
    %4 = arith.andi %2, %3 : i1
    %5 = arith.extui %4 : i1 to i32
    %c0_i32_2 = arith.constant 0 : i32
    %6 = arith.cmpi ne, %5, %c0_i32_2 : i32
    scf.if %6 {
      %c0_13 = arith.constant 0 : index
      %c0_14 = arith.constant 0 : index
      %20 = vector.load %arg4[%c0_13, %c0_14] : memref<16x32xbf16, #tpu.memory_space<vmem>>, vector<16x32xbf16>
      %21 = arith.extf %20 : vector<16x32xbf16> to vector<16x32xf32>
      %cst_15 = arith.constant dense<0.000000e+00> : vector<16xf32>
      %22 = vector.multi_reduction <add>, %21, %cst_15 [1] : vector<16x32xf32> to vector<16xf32>
      %23 = vector.shape_cast %22 : vector<16xf32> to vector<16x1xf32>
      %cst_16 = arith.constant 3.200000e+01 : f32
      %24 = vector.broadcast %cst_16 : f32 to vector<16x1xf32>
      %25 = arith.divf %23, %24 : vector<16x1xf32>
      %26 = vector.broadcast %25 : vector<16x1xf32> to vector<16x32xf32>
      %27 = arith.subf %21, %26 : vector<16x32xf32>
      %28 = arith.mulf %27, %27 : vector<16x32xf32>
      %cst_17 = arith.constant dense<0.000000e+00> : vector<16xf32>
      %29 = vector.multi_reduction <add>, %28, %cst_17 [1] : vector<16x32xf32> to vector<16xf32>
      %30 = vector.shape_cast %29 : vector<16xf32> to vector<16x1xf32>
      %cst_18 = arith.constant 3.200000e+01 : f32
      %31 = vector.broadcast %cst_18 : f32 to vector<16x1xf32>
      %32 = arith.divf %30, %31 : vector<16x1xf32>
      %cst_19 = arith.constant 9.99999974E-6 : f32
      %33 = vector.broadcast %cst_19 : f32 to vector<16x1xf32>
      %34 = arith.addf %32, %33 : vector<16x1xf32>
      %35 = math.rsqrt %34 : vector<16x1xf32>
      %36 = vector.broadcast %35 : vector<16x1xf32> to vector<16x32xf32>
      %37 = arith.mulf %27, %36 : vector<16x32xf32>
      %c0_20 = arith.constant 0 : index
      %c0_21 = arith.constant 0 : index
      %38 = vector.load %arg5[%c0_20, %c0_21] : memref<1x32xbf16, #tpu.memory_space<vmem>>, vector<1x32xbf16>
      %39 = arith.extf %38 : vector<1x32xbf16> to vector<1x32xf32>
      %40 = vector.broadcast %39 : vector<1x32xf32> to vector<16x32xf32>
      %41 = arith.mulf %37, %40 : vector<16x32xf32>
      %c0_22 = arith.constant 0 : index
      %c0_23 = arith.constant 0 : index
      %42 = vector.load %arg6[%c0_22, %c0_23] : memref<1x32xbf16, #tpu.memory_space<vmem>>, vector<1x32xbf16>
      %43 = arith.extf %42 : vector<1x32xbf16> to vector<1x32xf32>
      %44 = vector.broadcast %43 : vector<1x32xf32> to vector<16x32xf32>
      %45 = arith.addf %41, %44 : vector<16x32xf32>
      %46 = arith.truncf %45 : vector<16x32xf32> to vector<16x32xbf16>
      %c0_24 = arith.constant 0 : index
      %c0_25 = arith.constant 0 : index
      %47 = vector.load %arg10[%c0_24, %c0_25] : memref<16x32xbf16, #tpu.memory_space<vmem>>, vector<16x32xbf16>
      tpu.vector_store %arg10[%c0_24, %c0_25], %46 {strides = array<i32>} : memref<16x32xbf16, #tpu.memory_space<vmem>>, vector<16x32xbf16>,
    } else {
    }
    %c0 = arith.constant 0 : index
    %c0_3 = arith.constant 0 : index
    %7 = vector.load %arg10[%c0, %c0_3] : memref<16x32xbf16, #tpu.memory_space<vmem>>, vector<16x32xbf16>
    %c0_4 = arith.constant 0 : index
    %c0_5 = arith.constant 0 : index
    %c0_6 = arith.constant 0 : index
    %8 = vector.load %arg7[%c0_4, %c0_5, %c0_6] : memref<1x32x32xbf16, #tpu.memory_space<vmem>>, vector<1x32x32xbf16>
    %9 = vector.shape_cast %8 : vector<1x32x32xbf16> to vector<32x32xbf16>
    %cst = arith.constant dense<0.000000e+00> : vector<16x32xf32>
    %10 = tpu.matmul %7, %9, %cst {dimension_numbers = #tpu.dot_dimension_numbers<[1], [0], [0], [1], [0, 0, 1, 1], [], []>} : vector<16x32xbf16>, vector<32x32xbf16>, vector<16x32xf32> -> vector<16x32xf32>
    %c0_7 = arith.constant 0 : index
    %c0_8 = arith.constant 0 : index
    %c0_9 = arith.constant 0 : index
    %11 = vector.load %arg8[%c0_7, %c0_8, %c0_9] : memref<1x1x32xbf16, #tpu.memory_space<vmem>>, vector<1x1x32xbf16>
    %12 = vector.shape_cast %11 : vector<1x1x32xbf16> to vector<1x32xbf16>
    %13 = arith.extf %12 : vector<1x32xbf16> to vector<1x32xf32>
    %14 = vector.broadcast %13 : vector<1x32xf32> to vector<16x32xf32>
    %15 = arith.addf %10, %14 : vector<16x32xf32>
    %16 = arith.truncf %15 : vector<16x32xf32> to vector<16x32xbf16>
    %c0_10 = arith.constant 0 : index
    %c0_11 = arith.constant 0 : index
    %c0_12 = arith.constant 0 : index
    %17 = vector.load %arg9[%c0_10, %c0_11, %c0_12] : memref<1x16x32xbf16, #tpu.memory_space<vmem>>, vector<1x16x32xbf16>
    %18 = vector.shape_cast %17 : vector<1x16x32xbf16> to vector<16x32xbf16>
    %19 = vector.shape_cast %16 : vector<16x32xbf16> to vector<1x16x32xbf16>
    tpu.vector_store %arg9[%c0_10, %c0_11, %c0_12], %19 {strides = array<i32>} : memref<1x16x32xbf16, #tpu.memory_space<vmem>>, vector<1x16x32xbf16>,
    return
  }
  func.func @transform_0(%arg0: i32, %arg1: i32, %arg2: i32, %arg3: i32) -> (i32, i32) {
    %c0_i32 = arith.constant 0 : i32
    return %arg0, %arg3 : i32, i32
  }
  func.func @transform_1(%arg0: i32, %arg1: i32, %arg2: i32, %arg3: i32) -> (i32, i32) {
    %c0_i32 = arith.constant 0 : i32
    %c0_i32_0 = arith.constant 0 : i32
    %c0_i32_1 = arith.constant 0 : i32
    return %c0_i32, %c0_i32_0 : i32, i32
  }
  func.func @transform_2(%arg0: i32, %arg1: i32, %arg2: i32, %arg3: i32) -> (i32, i32) {
    %c0_i32 = arith.constant 0 : i32
    %c0_i32_0 = arith.constant 0 : i32
    %c0_i32_1 = arith.constant 0 : i32
    return %c0_i32, %c0_i32_0 : i32, i32
  }
  func.func @transform_3(%arg0: i32, %arg1: i32, %arg2: i32, %arg3: i32) -> (i32, i32, i32) {
    %c0_i32 = arith.constant 0 : i32
    return %arg1, %arg3, %arg2 : i32, i32, i32
  }
  func.func @transform_4(%arg0: i32, %arg1: i32, %arg2: i32, %arg3: i32) -> (i32, i32, i32) {
    %c0_i32 = arith.constant 0 : i32
    %c0_i32_0 = arith.constant 0 : i32
    return %arg1, %c0_i32, %arg2 : i32, i32, i32
  }
  func.func @transform_5(%arg0: i32, %arg1: i32, %arg2: i32, %arg3: i32) -> (i32, i32, i32) {
    %c0_i32 = arith.constant 0 : i32
    return %arg1, %arg0, %arg2 : i32, i32, i32
  }
}

module attributes {stable_mosaic.version = 11 : i64} {
  func.func @_mm_kernel(%arg0: i32, %arg1: i32, %arg2: i32, %arg3: i32, %arg4: memref<16x32xbf16, #tpu.memory_space<vmem>>, %arg5: memref<1x32x32xbf16, #tpu.memory_space<vmem>>, %arg6: memref<1x1x32xbf16, #tpu.memory_space<vmem>>, %arg7: memref<16x32xbf16, #tpu.memory_space<vmem>>, %arg8: memref<1x32xbf16, #tpu.memory_space<vmem>>, %arg9: memref<1x32xbf16, #tpu.memory_space<vmem>>, %arg10: memref<1x16x32xbf16, #tpu.memory_space<vmem>>) attributes {dimension_semantics = [#tpu.dimension_semantics<parallel>, #tpu.dimension_semantics<parallel>, #tpu.dimension_semantics<parallel>, #tpu.dimension_semantics<arbitrary>], iteration_bounds = array<i64: 1, 1, 1, 1>, scalar_prefetch = 0 : i64, scratch_operands = 0 : i64, tpu.core_type = #tpu.core_type<tc>, window_params = [{transform_indices = @transform_0, window_bounds = array<i64: 16, 32>}, {transform_indices = @transform_1, window_bounds = array<i64: 1, 32, 32>}, {transform_indices = @transform_2, window_bounds = array<i64: 1, 1, 32>}, {transform_indices = @transform_3, window_bounds = array<i64: 16, 32>}, {pipeline_mode = #tpu.pipeline_mode<synchronous>, transform_indices = @transform_4, window_bounds = array<i64: 1, 32>}, {pipeline_mode = #tpu.pipeline_mode<synchronous>, transform_indices = @transform_5, window_bounds = array<i64: 1, 32>}, {transform_indices = @transform_6, window_bounds = array<i64: 1, 16, 32>}]} {
    %c0 = arith.constant 0 : index
    %c0_0 = arith.constant 0 : index
    %0 = vector.load %arg4[%c0, %c0_0] : memref<16x32xbf16, #tpu.memory_space<vmem>>, vector<16x32xbf16>
    %c0_1 = arith.constant 0 : index
    %c0_2 = arith.constant 0 : index
    %c0_3 = arith.constant 0 : index
    %1 = vector.load %arg5[%c0_1, %c0_2, %c0_3] : memref<1x32x32xbf16, #tpu.memory_space<vmem>>, vector<1x32x32xbf16>
    %2 = vector.shape_cast %1 : vector<1x32x32xbf16> to vector<32x32xbf16>
    %cst = arith.constant dense<0.000000e+00> : vector<16x32xf32>
    %3 = tpu.matmul %0, %2, %cst {dimension_numbers = #tpu.dot_dimension_numbers<[1], [0], [0], [1], [0, 0, 1, 1], [], []>} : vector<16x32xbf16>, vector<32x32xbf16>, vector<16x32xf32> -> vector<16x32xf32>
    %c0_4 = arith.constant 0 : index
    %c0_5 = arith.constant 0 : index
    %c0_6 = arith.constant 0 : index
    %4 = vector.load %arg6[%c0_4, %c0_5, %c0_6] : memref<1x1x32xbf16, #tpu.memory_space<vmem>>, vector<1x1x32xbf16>
    %5 = vector.shape_cast %4 : vector<1x1x32xbf16> to vector<1x32xbf16>
    %6 = arith.extf %5 : vector<1x32xbf16> to vector<1x32xf32>
    %7 = vector.broadcast %6 : vector<1x32xf32> to vector<16x32xf32>
    %8 = arith.addf %3, %7 : vector<16x32xf32>
    %c0_7 = arith.constant 0 : index
    %c0_8 = arith.constant 0 : index
    %9 = vector.load %arg7[%c0_7, %c0_8] : memref<16x32xbf16, #tpu.memory_space<vmem>>, vector<16x32xbf16>
    %10 = arith.extf %9 : vector<16x32xbf16> to vector<16x32xf32>
    %11 = arith.addf %8, %10 : vector<16x32xf32>
    %cst_9 = arith.constant dense<0.000000e+00> : vector<16xf32>
    %12 = vector.multi_reduction <add>, %11, %cst_9 [1] : vector<16x32xf32> to vector<16xf32>
    %13 = vector.shape_cast %12 : vector<16xf32> to vector<16x1xf32>
    %cst_10 = arith.constant 3.200000e+01 : f32
    %14 = vector.broadcast %cst_10 : f32 to vector<16x1xf32>
    %15 = arith.divf %13, %14 : vector<16x1xf32>
    %16 = vector.broadcast %15 : vector<16x1xf32> to vector<16x32xf32>
    %17 = arith.subf %11, %16 : vector<16x32xf32>
    %18 = arith.mulf %17, %17 : vector<16x32xf32>
    %cst_11 = arith.constant dense<0.000000e+00> : vector<16xf32>
    %19 = vector.multi_reduction <add>, %18, %cst_11 [1] : vector<16x32xf32> to vector<16xf32>
    %20 = vector.shape_cast %19 : vector<16xf32> to vector<16x1xf32>
    %cst_12 = arith.constant 3.200000e+01 : f32
    %21 = vector.broadcast %cst_12 : f32 to vector<16x1xf32>
    %22 = arith.divf %20, %21 : vector<16x1xf32>
    %cst_13 = arith.constant 9.99999974E-6 : f32
    %23 = vector.broadcast %cst_13 : f32 to vector<16x1xf32>
    %24 = arith.addf %22, %23 : vector<16x1xf32>
    %25 = math.rsqrt %24 : vector<16x1xf32>
    %26 = vector.broadcast %25 : vector<16x1xf32> to vector<16x32xf32>
    %27 = arith.mulf %17, %26 : vector<16x32xf32>
    %c0_14 = arith.constant 0 : index
    %c0_15 = arith.constant 0 : index
    %28 = vector.load %arg8[%c0_14, %c0_15] : memref<1x32xbf16, #tpu.memory_space<vmem>>, vector<1x32xbf16>
    %29 = arith.extf %28 : vector<1x32xbf16> to vector<1x32xf32>
    %30 = vector.broadcast %29 : vector<1x32xf32> to vector<16x32xf32>
    %31 = arith.mulf %27, %30 : vector<16x32xf32>
    %c0_16 = arith.constant 0 : index
    %c0_17 = arith.constant 0 : index
    %32 = vector.load %arg9[%c0_16, %c0_17] : memref<1x32xbf16, #tpu.memory_space<vmem>>, vector<1x32xbf16>
    %33 = arith.extf %32 : vector<1x32xbf16> to vector<1x32xf32>
    %34 = vector.broadcast %33 : vector<1x32xf32> to vector<16x32xf32>
    %35 = arith.addf %31, %34 : vector<16x32xf32>
    %36 = arith.truncf %35 : vector<16x32xf32> to vector<16x32xbf16>
    %c0_18 = arith.constant 0 : index
    %c0_19 = arith.constant 0 : index
    %c0_20 = arith.constant 0 : index
    %37 = vector.load %arg10[%c0_18, %c0_19, %c0_20] : memref<1x16x32xbf16, #tpu.memory_space<vmem>>, vector<1x16x32xbf16>
    %38 = vector.shape_cast %37 : vector<1x16x32xbf16> to vector<16x32xbf16>
    %39 = vector.shape_cast %36 : vector<16x32xbf16> to vector<1x16x32xbf16>
    tpu.vector_store %arg10[%c0_18, %c0_19, %c0_20], %39 {strides = array<i32>} : memref<1x16x32xbf16, #tpu.memory_space<vmem>>, vector<1x16x32xbf16>,
    return
  }
  func.func @transform_0(%arg0: i32, %arg1: i32, %arg2: i32, %arg3: i32) -> (i32, i32) {
    %c0_i32 = arith.constant 0 : i32
    return %arg0, %arg3 : i32, i32
  }
  func.func @transform_1(%arg0: i32, %arg1: i32, %arg2: i32, %arg3: i32) -> (i32, i32, i32) {
    %c0_i32 = arith.constant 0 : i32
    return %arg1, %arg3, %arg2 : i32, i32, i32
  }
  func.func @transform_2(%arg0: i32, %arg1: i32, %arg2: i32, %arg3: i32) -> (i32, i32, i32) {
    %c0_i32 = arith.constant 0 : i32
    %c0_i32_0 = arith.constant 0 : i32
    return %arg1, %c0_i32, %arg2 : i32, i32, i32
  }
  func.func @transform_3(%arg0: i32, %arg1: i32, %arg2: i32, %arg3: i32) -> (i32, i32) {
    %c0_i32 = arith.constant 0 : i32
    return %arg0, %arg2 : i32, i32
  }
  func.func @transform_4(%arg0: i32, %arg1: i32, %arg2: i32, %arg3: i32) -> (i32, i32) {
    %c0_i32 = arith.constant 0 : i32
    %c0_i32_0 = arith.constant 0 : i32
    %c0_i32_1 = arith.constant 0 : i32
    return %c0_i32, %c0_i32_0 : i32, i32
  }
  func.func @transform_5(%arg0: i32, %arg1: i32, %arg2: i32, %arg3: i32) -> (i32, i32) {
    %c0_i32 = arith.constant 0 : i32
    %c0_i32_0 = arith.constant 0 : i32
    %c0_i32_1 = arith.constant 0 : i32
    return %c0_i32, %c0_i32_0 : i32, i32
  }
  func.func @transform_6(%arg0: i32, %arg1: i32, %arg2: i32, %arg3: i32) -> (i32, i32, i32) {
    %c0_i32 = arith.constant 0 : i32
    return %arg1, %arg0, %arg2 : i32, i32, i32
  }
}

module attributes {stable_mosaic.version = 11 : i64} {
  func.func @_attn_kernel(%arg0: i32, %arg1: i32, %arg2: memref<1x1x8x32xbf16, #tpu.memory_space<vmem>>, %arg3: memref<1x1x8x32xbf16, #tpu.memory_space<vmem>>, %arg4: memref<1x1x8x32xbf16, #tpu.memory_space<vmem>>, %arg5: memref<1x8x32xbf16, #tpu.memory_space<vmem>>) attributes {dimension_semantics = [#tpu.dimension_semantics<parallel>, #tpu.dimension_semantics<parallel>], iteration_bounds = array<i64: 2, 1>, scalar_prefetch = 0 : i64, scratch_operands = 0 : i64, tpu.core_type = #tpu.core_type<tc>, window_params = [{transform_indices = @transform_0, window_bounds = array<i64: 1, 1, 8, 32>}, {transform_indices = @transform_1, window_bounds = array<i64: 1, 1, 8, 32>}, {transform_indices = @transform_2, window_bounds = array<i64: 1, 1, 8, 32>}, {transform_indices = @transform_3, window_bounds = array<i64: 1, 8, 32>}]} {
    %c0 = arith.constant 0 : index
    %c0_0 = arith.constant 0 : index
    %c0_1 = arith.constant 0 : index
    %c0_2 = arith.constant 0 : index
    %0 = vector.load %arg2[%c0, %c0_0, %c0_1, %c0_2] : memref<1x1x8x32xbf16, #tpu.memory_space<vmem>>, vector<1x1x8x32xbf16>
    %1 = vector.shape_cast %0 : vector<1x1x8x32xbf16> to vector<8x32xbf16>
    %c0_3 = arith.constant 0 : index
    %c0_4 = arith.constant 0 : index
    %c0_5 = arith.constant 0 : index
    %c0_6 = arith.constant 0 : index
    %2 = vector.load %arg3[%c0_3, %c0_4, %c0_5, %c0_6] : memref<1x1x8x32xbf16, #tpu.memory_space<vmem>>, vector<1x1x8x32xbf16>
    %3 = vector.shape_cast %2 : vector<1x1x8x32xbf16> to vector<8x32xbf16>
    %c0_7 = arith.constant 0 : index
    %c0_8 = arith.constant 0 : index
    %c0_9 = arith.constant 0 : index
    %c0_10 = arith.constant 0 : index
    %4 = vector.load %arg4[%c0_7, %c0_8, %c0_9, %c0_10] : memref<1x1x8x32xbf16, #tpu.memory_space<vmem>>, vector<1x1x8x32xbf16>
    %5 = vector.shape_cast %4 : vector<1x1x8x32xbf16> to vector<8x32xbf16>
    %6 = vector.extract_strided_slice %1 {offsets = [0, 0], sizes = [8, 4], strides = [1, 1]} : vector<8x32xbf16> to vector<8x4xbf16>
    %7 = vector.extract_strided_slice %3 {offsets = [0, 0], sizes = [8, 4], strides = [1, 1]} : vector<8x32xbf16> to vector<8x4xbf16>
    %8 = vector.extract_strided_slice %5 {offsets = [0, 0], sizes = [8, 4], strides = [1, 1]} : vector<8x32xbf16> to vector<8x4xbf16>
    %cst = arith.constant dense<0.000000e+00> : vector<8x8xf32>
    %9 = tpu.matmul %6, %7, %cst {dimension_numbers = #tpu.dot_dimension_numbers<[1], [1], [0], [0], [0, 0, 1, 0], [], []>} : vector<8x4xbf16>, vector<8x4xbf16>, vector<8x8xf32> -> vector<8x8xf32>
    %cst_11 = arith.constant 5.000000e-01 : f32
    %10 = vector.broadcast %cst_11 : f32 to vector<8x8xf32>
    %11 = arith.mulf %9, %10 : vector<8x8xf32>
    %cst_12 = arith.constant dense<0xFF800000> : vector<8xf32>
    %12 = vector.multi_reduction <maximumf>, %11, %cst_12 [1] : vector<8x8xf32> to vector<8xf32>
    %13 = vector.shape_cast %12 : vector<8xf32> to vector<8x1xf32>
    %14 = vector.broadcast %13 : vector<8x1xf32> to vector<8x8xf32>
    %15 = arith.subf %11, %14 : vector<8x8xf32>
    %16 = math.exp %15 : vector<8x8xf32>
    %cst_13 = arith.constant dense<0.000000e+00> : vector<8xf32>
    %17 = vector.multi_reduction <add>, %16, %cst_13 [1] : vector<8x8xf32> to vector<8xf32>
    %18 = vector.shape_cast %17 : vector<8xf32> to vector<8x1xf32>
    %19 = vector.broadcast %18 : vector<8x1xf32> to vector<8x8xf32>
    %20 = arith.divf %16, %19 : vector<8x8xf32>
    %21 = arith.truncf %20 : vector<8x8xf32> to vector<8x8xbf16>
    %cst_14 = arith.constant dense<0.000000e+00> : vector<8x4xf32>
    %22 = tpu.matmul %21, %8, %cst_14 {dimension_numbers = #tpu.dot_dimension_numbers<[1], [0], [0], [1], [0, 0, 1, 1], [], []>} : vector<8x8xbf16>, vector<8x4xbf16>, vector<8x4xf32> -> vector<8x4xf32>
    %23 = arith.truncf %22 : vector<8x4xf32> to vector<8x4xbf16>
    %c0_15 = arith.constant 0 : index
    %c0_16 = arith.constant 0 : index
    %c0_17 = arith.constant 0 : index
    %24 = vector.load %arg5[%c0_15, %c0_16, %c0_17] : memref<1x8x32xbf16, #tpu.memory_space<vmem>>, vector<1x8x4xbf16>
    %25 = vector.shape_cast %24 : vector<1x8x4xbf16> to vector<8x4xbf16>
    %26 = vector.shape_cast %23 : vector<8x4xbf16> to vector<1x8x4xbf16>
    tpu.vector_store %arg5[%c0_15, %c0_16, %c0_17], %26 {strides = array<i32>} : memref<1x8x32xbf16, #tpu.memory_space<vmem>>, vector<1x8x4xbf16>,
    %27 = vector.extract_strided_slice %1 {offsets = [0, 4], sizes = [8, 4], strides = [1, 1]} : vector<8x32xbf16> to vector<8x4xbf16>
    %28 = vector.extract_strided_slice %3 {offsets = [0, 4], sizes = [8, 4], strides = [1, 1]} : vector<8x32xbf16> to vector<8x4xbf16>
    %29 = vector.extract_strided_slice %5 {offsets = [0, 4], sizes = [8, 4], strides = [1, 1]} : vector<8x32xbf16> to vector<8x4xbf16>
    %cst_18 = arith.constant dense<0.000000e+00> : vector<8x8xf32>
    %30 = tpu.matmul %27, %28, %cst_18 {dimension_numbers = #tpu.dot_dimension_numbers<[1], [1], [0], [0], [0, 0, 1, 0], [], []>} : vector<8x4xbf16>, vector<8x4xbf16>, vector<8x8xf32> -> vector<8x8xf32>
    %cst_19 = arith.constant 5.000000e-01 : f32
    %31 = vector.broadcast %cst_19 : f32 to vector<8x8xf32>
    %32 = arith.mulf %30, %31 : vector<8x8xf32>
    %cst_20 = arith.constant dense<0xFF800000> : vector<8xf32>
    %33 = vector.multi_reduction <maximumf>, %32, %cst_20 [1] : vector<8x8xf32> to vector<8xf32>
    %34 = vector.shape_cast %33 : vector<8xf32> to vector<8x1xf32>
    %35 = vector.broadcast %34 : vector<8x1xf32> to vector<8x8xf32>
    %36 = arith.subf %32, %35 : vector<8x8xf32>
    %37 = math.exp %36 : vector<8x8xf32>
    %cst_21 = arith.constant dense<0.000000e+00> : vector<8xf32>
    %38 = vector.multi_reduction <add>, %37, %cst_21 [1] : vector<8x8xf32> to vector<8xf32>
    %39 = vector.shape_cast %38 : vector<8xf32> to vector<8x1xf32>
    %40 = vector.broadcast %39 : vector<8x1xf32> to vector<8x8xf32>
    %41 = arith.divf %37, %40 : vector<8x8xf32>
    %42 = arith.truncf %41 : vector<8x8xf32> to vector<8x8xbf16>
    %cst_22 = arith.constant dense<0.000000e+00> : vector<8x4xf32>
    %43 = tpu.matmul %42, %29, %cst_22 {dimension_numbers = #tpu.dot_dimension_numbers<[1], [0], [0], [1], [0, 0, 1, 1], [], []>} : vector<8x8xbf16>, vector<8x4xbf16>, vector<8x4xf32> -> vector<8x4xf32>
    %44 = arith.truncf %43 : vector<8x4xf32> to vector<8x4xbf16>
    %c0_23 = arith.constant 0 : index
    %c0_24 = arith.constant 0 : index
    %c4 = arith.constant 4 : index
    %45 = vector.load %arg5[%c0_23, %c0_24, %c4] : memref<1x8x32xbf16, #tpu.memory_space<vmem>>, vector<1x8x4xbf16>
    %46 = vector.shape_cast %45 : vector<1x8x4xbf16> to vector<8x4xbf16>
    %47 = vector.shape_cast %44 : vector<8x4xbf16> to vector<1x8x4xbf16>
    tpu.vector_store %arg5[%c0_23, %c0_24, %c4], %47 {strides = array<i32>} : memref<1x8x32xbf16, #tpu.memory_space<vmem>>, vector<1x8x4xbf16>,
    %48 = vector.extract_strided_slice %1 {offsets = [0, 8], sizes = [8, 4], strides = [1, 1]} : vector<8x32xbf16> to vector<8x4xbf16>
    %49 = vector.extract_strided_slice %3 {offsets = [0, 8], sizes = [8, 4], strides = [1, 1]} : vector<8x32xbf16> to vector<8x4xbf16>
    %50 = vector.extract_strided_slice %5 {offsets = [0, 8], sizes = [8, 4], strides = [1, 1]} : vector<8x32xbf16> to vector<8x4xbf16>
    %cst_25 = arith.constant dense<0.000000e+00> : vector<8x8xf32>
    %51 = tpu.matmul %48, %49, %cst_25 {dimension_numbers = #tpu.dot_dimension_numbers<[1], [1], [0], [0], [0, 0, 1, 0], [], []>} : vector<8x4xbf16>, vector<8x4xbf16>, vector<8x8xf32> -> vector<8x8xf32>
    %cst_26 = arith.constant 5.000000e-01 : f32
    %52 = vector.broadcast %cst_26 : f32 to vector<8x8xf32>
    %53 = arith.mulf %51, %52 : vector<8x8xf32>
    %cst_27 = arith.constant dense<0xFF800000> : vector<8xf32>
    %54 = vector.multi_reduction <maximumf>, %53, %cst_27 [1] : vector<8x8xf32> to vector<8xf32>
    %55 = vector.shape_cast %54 : vector<8xf32> to vector<8x1xf32>
    %56 = vector.broadcast %55 : vector<8x1xf32> to vector<8x8xf32>
    %57 = arith.subf %53, %56 : vector<8x8xf32>
    %58 = math.exp %57 : vector<8x8xf32>
    %cst_28 = arith.constant dense<0.000000e+00> : vector<8xf32>
    %59 = vector.multi_reduction <add>, %58, %cst_28 [1] : vector<8x8xf32> to vector<8xf32>
    %60 = vector.shape_cast %59 : vector<8xf32> to vector<8x1xf32>
    %61 = vector.broadcast %60 : vector<8x1xf32> to vector<8x8xf32>
    %62 = arith.divf %58, %61 : vector<8x8xf32>
    %63 = arith.truncf %62 : vector<8x8xf32> to vector<8x8xbf16>
    %cst_29 = arith.constant dense<0.000000e+00> : vector<8x4xf32>
    %64 = tpu.matmul %63, %50, %cst_29 {dimension_numbers = #tpu.dot_dimension_numbers<[1], [0], [0], [1], [0, 0, 1, 1], [], []>} : vector<8x8xbf16>, vector<8x4xbf16>, vector<8x4xf32> -> vector<8x4xf32>
    %65 = arith.truncf %64 : vector<8x4xf32> to vector<8x4xbf16>
    %c0_30 = arith.constant 0 : index
    %c0_31 = arith.constant 0 : index
    %c8 = arith.constant 8 : index
    %66 = vector.load %arg5[%c0_30, %c0_31, %c8] : memref<1x8x32xbf16, #tpu.memory_space<vmem>>, vector<1x8x4xbf16>
    %67 = vector.shape_cast %66 : vector<1x8x4xbf16> to vector<8x4xbf16>
    %68 = vector.shape_cast %65 : vector<8x4xbf16> to vector<1x8x4xbf16>
    tpu.vector_store %arg5[%c0_30, %c0_31, %c8], %68 {strides = array<i32>} : memref<1x8x32xbf16, #tpu.memory_space<vmem>>, vector<1x8x4xbf16>,
    %69 = vector.extract_strided_slice %1 {offsets = [0, 12], sizes = [8, 4], strides = [1, 1]} : vector<8x32xbf16> to vector<8x4xbf16>
    %70 = vector.extract_strided_slice %3 {offsets = [0, 12], sizes = [8, 4], strides = [1, 1]} : vector<8x32xbf16> to vector<8x4xbf16>
    %71 = vector.extract_strided_slice %5 {offsets = [0, 12], sizes = [8, 4], strides = [1, 1]} : vector<8x32xbf16> to vector<8x4xbf16>
    %cst_32 = arith.constant dense<0.000000e+00> : vector<8x8xf32>
    %72 = tpu.matmul %69, %70, %cst_32 {dimension_numbers = #tpu.dot_dimension_numbers<[1], [1], [0], [0], [0, 0, 1, 0], [], []>} : vector<8x4xbf16>, vector<8x4xbf16>, vector<8x8xf32> -> vector<8x8xf32>
    %cst_33 = arith.constant 5.000000e-01 : f32
    %73 = vector.broadcast %cst_33 : f32 to vector<8x8xf32>
    %74 = arith.mulf %72, %73 : vector<8x8xf32>
    %cst_34 = arith.constant dense<0xFF800000> : vector<8xf32>
    %75 = vector.multi_reduction <maximumf>, %74, %cst_34 [1] : vector<8x8xf32> to vector<8xf32>
    %76 = vector.shape_cast %75 : vector<8xf32> to vector<8x1xf32>
    %77 = vector.broadcast %76 : vector<8x1xf32> to vector<8x8xf32>
    %78 = arith.subf %74, %77 : vector<8x8xf32>
    %79 = math.exp %78 : vector<8x8xf32>
    %cst_35 = arith.constant dense<0.000000e+00> : vector<8xf32>
    %80 = vector.multi_reduction <add>, %79, %cst_35 [1] : vector<8x8xf32> to vector<8xf32>
    %81 = vector.shape_cast %80 : vector<8xf32> to vector<8x1xf32>
    %82 = vector.broadcast %81 : vector<8x1xf32> to vector<8x8xf32>
    %83 = arith.divf %79, %82 : vector<8x8xf32>
    %84 = arith.truncf %83 : vector<8x8xf32> to vector<8x8xbf16>
    %cst_36 = arith.constant dense<0.000000e+00> : vector<8x4xf32>
    %85 = tpu.matmul %84, %71, %cst_36 {dimension_numbers = #tpu.dot_dimension_numbers<[1], [0], [0], [1], [0, 0, 1, 1], [], []>} : vector<8x8xbf16>, vector<8x4xbf16>, vector<8x4xf32> -> vector<8x4xf32>
    %86 = arith.truncf %85 : vector<8x4xf32> to vector<8x4xbf16>
    %c0_37 = arith.constant 0 : index
    %c0_38 = arith.constant 0 : index
    %c12 = arith.constant 12 : index
    %87 = vector.load %arg5[%c0_37, %c0_38, %c12] : memref<1x8x32xbf16, #tpu.memory_space<vmem>>, vector<1x8x4xbf16>
    %88 = vector.shape_cast %87 : vector<1x8x4xbf16> to vector<8x4xbf16>
    %89 = vector.shape_cast %86 : vector<8x4xbf16> to vector<1x8x4xbf16>
    tpu.vector_store %arg5[%c0_37, %c0_38, %c12], %89 {strides = array<i32>} : memref<1x8x32xbf16, #tpu.memory_space<vmem>>, vector<1x8x4xbf16>,
    %90 = vector.extract_strided_slice %1 {offsets = [0, 16], sizes = [8, 4], strides = [1, 1]} : vector<8x32xbf16> to vector<8x4xbf16>
    %91 = vector.extract_strided_slice %3 {offsets = [0, 16], sizes = [8, 4], strides = [1, 1]} : vector<8x32xbf16> to vector<8x4xbf16>
    %92 = vector.extract_strided_slice %5 {offsets = [0, 16], sizes = [8, 4], strides = [1, 1]} : vector<8x32xbf16> to vector<8x4xbf16>
    %cst_39 = arith.constant dense<0.000000e+00> : vector<8x8xf32>
    %93 = tpu.matmul %90, %91, %cst_39 {dimension_numbers = #tpu.dot_dimension_numbers<[1], [1], [0], [0], [0, 0, 1, 0], [], []>} : vector<8x4xbf16>, vector<8x4xbf16>, vector<8x8xf32> -> vector<8x8xf32>
    %cst_40 = arith.constant 5.000000e-01 : f32
    %94 = vector.broadcast %cst_40 : f32 to vector<8x8xf32>
    %95 = arith.mulf %93, %94 : vector<8x8xf32>
    %cst_41 = arith.constant dense<0xFF800000> : vector<8xf32>
    %96 = vector.multi_reduction <maximumf>, %95, %cst_41 [1] : vector<8x8xf32> to vector<8xf32>
    %97 = vector.shape_cast %96 : vector<8xf32> to vector<8x1xf32>
    %98 = vector.broadcast %97 : vector<8x1xf32> to vector<8x8xf32>
    %99 = arith.subf %95, %98 : vector<8x8xf32>
    %100 = math.exp %99 : vector<8x8xf32>
    %cst_42 = arith.constant dense<0.000000e+00> : vector<8xf32>
    %101 = vector.multi_reduction <add>, %100, %cst_42 [1] : vector<8x8xf32> to vector<8xf32>
    %102 = vector.shape_cast %101 : vector<8xf32> to vector<8x1xf32>
    %103 = vector.broadcast %102 : vector<8x1xf32> to vector<8x8xf32>
    %104 = arith.divf %100, %103 : vector<8x8xf32>
    %105 = arith.truncf %104 : vector<8x8xf32> to vector<8x8xbf16>
    %cst_43 = arith.constant dense<0.000000e+00> : vector<8x4xf32>
    %106 = tpu.matmul %105, %92, %cst_43 {dimension_numbers = #tpu.dot_dimension_numbers<[1], [0], [0], [1], [0, 0, 1, 1], [], []>} : vector<8x8xbf16>, vector<8x4xbf16>, vector<8x4xf32> -> vector<8x4xf32>
    %107 = arith.truncf %106 : vector<8x4xf32> to vector<8x4xbf16>
    %c0_44 = arith.constant 0 : index
    %c0_45 = arith.constant 0 : index
    %c16 = arith.constant 16 : index
    %108 = vector.load %arg5[%c0_44, %c0_45, %c16] : memref<1x8x32xbf16, #tpu.memory_space<vmem>>, vector<1x8x4xbf16>
    %109 = vector.shape_cast %108 : vector<1x8x4xbf16> to vector<8x4xbf16>
    %110 = vector.shape_cast %107 : vector<8x4xbf16> to vector<1x8x4xbf16>
    tpu.vector_store %arg5[%c0_44, %c0_45, %c16], %110 {strides = array<i32>} : memref<1x8x32xbf16, #tpu.memory_space<vmem>>, vector<1x8x4xbf16>,
    %111 = vector.extract_strided_slice %1 {offsets = [0, 20], sizes = [8, 4], strides = [1, 1]} : vector<8x32xbf16> to vector<8x4xbf16>
    %112 = vector.extract_strided_slice %3 {offsets = [0, 20], sizes = [8, 4], strides = [1, 1]} : vector<8x32xbf16> to vector<8x4xbf16>
    %113 = vector.extract_strided_slice %5 {offsets = [0, 20], sizes = [8, 4], strides = [1, 1]} : vector<8x32xbf16> to vector<8x4xbf16>
    %cst_46 = arith.constant dense<0.000000e+00> : vector<8x8xf32>
    %114 = tpu.matmul %111, %112, %cst_46 {dimension_numbers = #tpu.dot_dimension_numbers<[1], [1], [0], [0], [0, 0, 1, 0], [], []>} : vector<8x4xbf16>, vector<8x4xbf16>, vector<8x8xf32> -> vector<8x8xf32>
    %cst_47 = arith.constant 5.000000e-01 : f32
    %115 = vector.broadcast %cst_47 : f32 to vector<8x8xf32>
    %116 = arith.mulf %114, %115 : vector<8x8xf32>
    %cst_48 = arith.constant dense<0xFF800000> : vector<8xf32>
    %117 = vector.multi_reduction <maximumf>, %116, %cst_48 [1] : vector<8x8xf32> to vector<8xf32>
    %118 = vector.shape_cast %117 : vector<8xf32> to vector<8x1xf32>
    %119 = vector.broadcast %118 : vector<8x1xf32> to vector<8x8xf32>
    %120 = arith.subf %116, %119 : vector<8x8xf32>
    %121 = math.exp %120 : vector<8x8xf32>
    %cst_49 = arith.constant dense<0.000000e+00> : vector<8xf32>
    %122 = vector.multi_reduction <add>, %121, %cst_49 [1] : vector<8x8xf32> to vector<8xf32>
    %123 = vector.shape_cast %122 : vector<8xf32> to vector<8x1xf32>
    %124 = vector.broadcast %123 : vector<8x1xf32> to vector<8x8xf32>
    %125 = arith.divf %121, %124 : vector<8x8xf32>
    %126 = arith.truncf %125 : vector<8x8xf32> to vector<8x8xbf16>
    %cst_50 = arith.constant dense<0.000000e+00> : vector<8x4xf32>
    %127 = tpu.matmul %126, %113, %cst_50 {dimension_numbers = #tpu.dot_dimension_numbers<[1], [0], [0], [1], [0, 0, 1, 1], [], []>} : vector<8x8xbf16>, vector<8x4xbf16>, vector<8x4xf32> -> vector<8x4xf32>
    %128 = arith.truncf %127 : vector<8x4xf32> to vector<8x4xbf16>
    %c0_51 = arith.constant 0 : index
    %c0_52 = arith.constant 0 : index
    %c20 = arith.constant 20 : index
    %129 = vector.load %arg5[%c0_51, %c0_52, %c20] : memref<1x8x32xbf16, #tpu.memory_space<vmem>>, vector<1x8x4xbf16>
    %130 = vector.shape_cast %129 : vector<1x8x4xbf16> to vector<8x4xbf16>
    %131 = vector.shape_cast %128 : vector<8x4xbf16> to vector<1x8x4xbf16>
    tpu.vector_store %arg5[%c0_51, %c0_52, %c20], %131 {strides = array<i32>} : memref<1x8x32xbf16, #tpu.memory_space<vmem>>, vector<1x8x4xbf16>,
    %132 = vector.extract_strided_slice %1 {offsets = [0, 24], sizes = [8, 4], strides = [1, 1]} : vector<8x32xbf16> to vector<8x4xbf16>
    %133 = vector.extract_strided_slice %3 {offsets = [0, 24], sizes = [8, 4], strides = [1, 1]} : vector<8x32xbf16> to vector<8x4xbf16>
    %134 = vector.extract_strided_slice %5 {offsets = [0, 24], sizes = [8, 4], strides = [1, 1]} : vector<8x32xbf16> to vector<8x4xbf16>
    %cst_53 = arith.constant dense<0.000000e+00> : vector<8x8xf32>
    %135 = tpu.matmul %132, %133, %cst_53 {dimension_numbers = #tpu.dot_dimension_numbers<[1], [1], [0], [0], [0, 0, 1, 0], [], []>} : vector<8x4xbf16>, vector<8x4xbf16>, vector<8x8xf32> -> vector<8x8xf32>
    %cst_54 = arith.constant 5.000000e-01 : f32
    %136 = vector.broadcast %cst_54 : f32 to vector<8x8xf32>
    %137 = arith.mulf %135, %136 : vector<8x8xf32>
    %cst_55 = arith.constant dense<0xFF800000> : vector<8xf32>
    %138 = vector.multi_reduction <maximumf>, %137, %cst_55 [1] : vector<8x8xf32> to vector<8xf32>
    %139 = vector.shape_cast %138 : vector<8xf32> to vector<8x1xf32>
    %140 = vector.broadcast %139 : vector<8x1xf32> to vector<8x8xf32>
    %141 = arith.subf %137, %140 : vector<8x8xf32>
    %142 = math.exp %141 : vector<8x8xf32>
    %cst_56 = arith.constant dense<0.000000e+00> : vector<8xf32>
    %143 = vector.multi_reduction <add>, %142, %cst_56 [1] : vector<8x8xf32> to vector<8xf32>
    %144 = vector.shape_cast %143 : vector<8xf32> to vector<8x1xf32>
    %145 = vector.broadcast %144 : vector<8x1xf32> to vector<8x8xf32>
    %146 = arith.divf %142, %145 : vector<8x8xf32>
    %147 = arith.truncf %146 : vector<8x8xf32> to vector<8x8xbf16>
    %cst_57 = arith.constant dense<0.000000e+00> : vector<8x4xf32>
    %148 = tpu.matmul %147, %134, %cst_57 {dimension_numbers = #tpu.dot_dimension_numbers<[1], [0], [0], [1], [0, 0, 1, 1], [], []>} : vector<8x8xbf16>, vector<8x4xbf16>, vector<8x4xf32> -> vector<8x4xf32>
    %149 = arith.truncf %148 : vector<8x4xf32> to vector<8x4xbf16>
    %c0_58 = arith.constant 0 : index
    %c0_59 = arith.constant 0 : index
    %c24 = arith.constant 24 : index
    %150 = vector.load %arg5[%c0_58, %c0_59, %c24] : memref<1x8x32xbf16, #tpu.memory_space<vmem>>, vector<1x8x4xbf16>
    %151 = vector.shape_cast %150 : vector<1x8x4xbf16> to vector<8x4xbf16>
    %152 = vector.shape_cast %149 : vector<8x4xbf16> to vector<1x8x4xbf16>
    tpu.vector_store %arg5[%c0_58, %c0_59, %c24], %152 {strides = array<i32>} : memref<1x8x32xbf16, #tpu.memory_space<vmem>>, vector<1x8x4xbf16>,
    %153 = vector.extract_strided_slice %1 {offsets = [0, 28], sizes = [8, 4], strides = [1, 1]} : vector<8x32xbf16> to vector<8x4xbf16>
    %154 = vector.extract_strided_slice %3 {offsets = [0, 28], sizes = [8, 4], strides = [1, 1]} : vector<8x32xbf16> to vector<8x4xbf16>
    %155 = vector.extract_strided_slice %5 {offsets = [0, 28], sizes = [8, 4], strides = [1, 1]} : vector<8x32xbf16> to vector<8x4xbf16>
    %cst_60 = arith.constant dense<0.000000e+00> : vector<8x8xf32>
    %156 = tpu.matmul %153, %154, %cst_60 {dimension_numbers = #tpu.dot_dimension_numbers<[1], [1], [0], [0], [0, 0, 1, 0], [], []>} : vector<8x4xbf16>, vector<8x4xbf16>, vector<8x8xf32> -> vector<8x8xf32>
    %cst_61 = arith.constant 5.000000e-01 : f32
    %157 = vector.broadcast %cst_61 : f32 to vector<8x8xf32>
    %158 = arith.mulf %156, %157 : vector<8x8xf32>
    %cst_62 = arith.constant dense<0xFF800000> : vector<8xf32>
    %159 = vector.multi_reduction <maximumf>, %158, %cst_62 [1] : vector<8x8xf32> to vector<8xf32>
    %160 = vector.shape_cast %159 : vector<8xf32> to vector<8x1xf32>
    %161 = vector.broadcast %160 : vector<8x1xf32> to vector<8x8xf32>
    %162 = arith.subf %158, %161 : vector<8x8xf32>
    %163 = math.exp %162 : vector<8x8xf32>
    %cst_63 = arith.constant dense<0.000000e+00> : vector<8xf32>
    %164 = vector.multi_reduction <add>, %163, %cst_63 [1] : vector<8x8xf32> to vector<8xf32>
    %165 = vector.shape_cast %164 : vector<8xf32> to vector<8x1xf32>
    %166 = vector.broadcast %165 : vector<8x1xf32> to vector<8x8xf32>
    %167 = arith.divf %163, %166 : vector<8x8xf32>
    %168 = arith.truncf %167 : vector<8x8xf32> to vector<8x8xbf16>
    %cst_64 = arith.constant dense<0.000000e+00> : vector<8x4xf32>
    %169 = tpu.matmul %168, %155, %cst_64 {dimension_numbers = #tpu.dot_dimension_numbers<[1], [0], [0], [1], [0, 0, 1, 1], [], []>} : vector<8x8xbf16>, vector<8x4xbf16>, vector<8x4xf32> -> vector<8x4xf32>
    %170 = arith.truncf %169 : vector<8x4xf32> to vector<8x4xbf16>
    %c0_65 = arith.constant 0 : index
    %c0_66 = arith.constant 0 : index
    %c28 = arith.constant 28 : index
    %171 = vector.load %arg5[%c0_65, %c0_66, %c28] : memref<1x8x32xbf16, #tpu.memory_space<vmem>>, vector<1x8x4xbf16>
    %172 = vector.shape_cast %171 : vector<1x8x4xbf16> to vector<8x4xbf16>
    %173 = vector.shape_cast %170 : vector<8x4xbf16> to vector<1x8x4xbf16>
    tpu.vector_store %arg5[%c0_65, %c0_66, %c28], %173 {strides = array<i32>} : memref<1x8x32xbf16, #tpu.memory_space<vmem>>, vector<1x8x4xbf16>,
    return
  }
  func.func @transform_0(%arg0: i32, %arg1: i32) -> (i32, i32, i32, i32) {
    %c0_i32 = arith.constant 0 : i32
    %c0_i32_0 = arith.constant 0 : i32
    %c0_i32_1 = arith.constant 0 : i32
    return %c0_i32, %arg0, %arg1, %c0_i32_0 : i32, i32, i32, i32
  }
  func.func @transform_1(%arg0: i32, %arg1: i32) -> (i32, i32, i32, i32) {
    %c1_i32 = arith.constant 1 : i32
    %c0_i32 = arith.constant 0 : i32
    %c0_i32_0 = arith.constant 0 : i32
    %c0_i32_1 = arith.constant 0 : i32
    return %c1_i32, %arg0, %c0_i32, %c0_i32_0 : i32, i32, i32, i32
  }
  func.func @transform_2(%arg0: i32, %arg1: i32) -> (i32, i32, i32, i32) {
    %c2_i32 = arith.constant 2 : i32
    %c0_i32 = arith.constant 0 : i32
    %c0_i32_0 = arith.constant 0 : i32
    %c0_i32_1 = arith.constant 0 : i32
    return %c2_i32, %arg0, %c0_i32, %c0_i32_0 : i32, i32, i32, i32
  }
  func.func @transform_3(%arg0: i32, %arg1: i32) -> (i32, i32, i32) {
    %c0_i32 = arith.constant 0 : i32
    %c0_i32_0 = arith.constant 0 : i32
    return %arg0, %arg1, %c0_i32 : i32, i32, i32
  }
}

module attributes {stable_mosaic.version = 11 : i64} {
  func.func @_mm_kernel(%arg0: i32, %arg1: i32, %arg2: i32, %arg3: i32, %arg4: memref<16x32xbf16, #tpu.memory_space<vmem>>, %arg5: memref<1x32x32xbf16, #tpu.memory_space<vmem>>, %arg6: memref<1x1x32xbf16, #tpu.memory_space<vmem>>, %arg7: memref<1x16x32xbf16, #tpu.memory_space<vmem>>) attributes {dimension_semantics = [#tpu.dimension_semantics<parallel>, #tpu.dimension_semantics<parallel>, #tpu.dimension_semantics<parallel>, #tpu.dimension_semantics<arbitrary>], iteration_bounds = array<i64: 1, 2, 1, 1>, scalar_prefetch = 0 : i64, scratch_operands = 0 : i64, tpu.core_type = #tpu.core_type<tc>, window_params = [{transform_indices = @transform_0, window_bounds = array<i64: 16, 32>}, {transform_indices = @transform_1, window_bounds = array<i64: 1, 32, 32>}, {transform_indices = @transform_2, window_bounds = array<i64: 1, 1, 32>}, {transform_indices = @transform_3, window_bounds = array<i64: 1, 16, 32>}]} {
    %c0 = arith.constant 0 : index
    %c0_0 = arith.constant 0 : index
    %0 = vector.load %arg4[%c0, %c0_0] : memref<16x32xbf16, #tpu.memory_space<vmem>>, vector<16x32xbf16>
    %c0_1 = arith.constant 0 : index
    %c0_2 = arith.constant 0 : index
    %c0_3 = arith.constant 0 : index
    %1 = vector.load %arg5[%c0_1, %c0_2, %c0_3] : memref<1x32x32xbf16, #tpu.memory_space<vmem>>, vector<1x32x32xbf16>
    %2 = vector.shape_cast %1 : vector<1x32x32xbf16> to vector<32x32xbf16>
    %cst = arith.constant dense<0.000000e+00> : vector<16x32xf32>
    %3 = tpu.matmul %0, %2, %cst {dimension_numbers = #tpu.dot_dimension_numbers<[1], [0], [0], [1], [0, 0, 1, 1], [], []>} : vector<16x32xbf16>, vector<32x32xbf16>, vector<16x32xf32> -> vector<16x32xf32>
    %c0_4 = arith.constant 0 : index
    %c0_5 = arith.constant 0 : index
    %c0_6 = arith.constant 0 : index
    %4 = vector.load %arg6[%c0_4, %c0_5, %c0_6] : memref<1x1x32xbf16, #tpu.memory_space<vmem>>, vector<1x1x32xbf16>
    %5 = vector.shape_cast %4 : vector<1x1x32xbf16> to vector<1x32xbf16>
    %6 = arith.extf %5 : vector<1x32xbf16> to vector<1x32xf32>
    %7 = vector.broadcast %6 : vector<1x32xf32> to vector<16x32xf32>
    %8 = arith.addf %3, %7 : vector<16x32xf32>
    %9 = arith.truncf %8 : vector<16x32xf32> to vector<16x32xbf16>
    %c0_7 = arith.constant 0 : index
    %c0_8 = arith.constant 0 : index
    %c0_9 = arith.constant 0 : index
    %10 = vector.load %arg7[%c0_7, %c0_8, %c0_9] : memref<1x16x32xbf16, #tpu.memory_space<vmem>>, vector<1x16x32xbf16>
    %11 = vector.shape_cast %10 : vector<1x16x32xbf16> to vector<16x32xbf16>
    %12 = vector.shape_cast %9 : vector<16x32xbf16> to vector<1x16x32xbf16>
    tpu.vector_store %arg7[%c0_7, %c0_8, %c0_9], %12 {strides = array<i32>} : memref<1x16x32xbf16, #tpu.memory_space<vmem>>, vector<1x16x32xbf16>,
    return
  }
  func.func @transform_0(%arg0: i32, %arg1: i32, %arg2: i32, %arg3: i32) -> (i32, i32) {
    %c0_i32 = arith.constant 0 : i32
    return %arg0, %arg3 : i32, i32
  }
  func.func @transform_1(%arg0: i32, %arg1: i32, %arg2: i32, %arg3: i32) -> (i32, i32, i32) {
    %c0_i32 = arith.constant 0 : i32
    return %arg1, %arg3, %arg2 : i32, i32, i32
  }
  func.func @transform_2(%arg0: i32, %arg1: i32, %arg2: i32, %arg3: i32) -> (i32, i32, i32) {
    %c0_i32 = arith.constant 0 : i32
    %c0_i32_0 = arith.constant 0 : i32
    return %arg1, %c0_i32, %arg2 : i32, i32, i32
  }
  func.func @transform_3(%arg0: i32, %arg1: i32, %arg2: i32, %arg3: i32) -> (i32, i32, i32) {
    %c0_i32 = arith.constant 0 : i32
    return %arg1, %arg0, %arg2 : i32, i32, i32
  }
}

module attributes {stable_mosaic.version = 11 : i64} {
  func.func @_ffn_kernel(%arg0: i32, %arg1: memref<16x32xbf16, #tpu.memory_space<vmem>>, %arg2: memref<32x64xbf16, #tpu.memory_space<vmem>>, %arg3: memref<1x64xbf16, #tpu.memory_space<vmem>>, %arg4: memref<64x32xbf16, #tpu.memory_space<vmem>>, %arg5: memref<1x32xbf16, #tpu.memory_space<vmem>>, %arg6: memref<16x32xbf16, #tpu.memory_space<vmem>>, %arg7: memref<1x32xbf16, #tpu.memory_space<vmem>>, %arg8: memref<1x32xbf16, #tpu.memory_space<vmem>>, %arg9: memref<16x32xbf16, #tpu.memory_space<vmem>>) attributes {dimension_semantics = [#tpu.dimension_semantics<parallel>], iteration_bounds = array<i64: 1>, scalar_prefetch = 0 : i64, scratch_operands = 0 : i64, tpu.core_type = #tpu.core_type<tc>, window_params = [{transform_indices = @transform_0, window_bounds = array<i64: 16, 32>}, {pipeline_mode = #tpu.pipeline_mode<synchronous>, transform_indices = @transform_1, window_bounds = array<i64: 32, 64>}, {pipeline_mode = #tpu.pipeline_mode<synchronous>, transform_indices = @transform_2, window_bounds = array<i64: 1, 64>}, {pipeline_mode = #tpu.pipeline_mode<synchronous>, transform_indices = @transform_3, window_bounds = array<i64: 64, 32>}, {pipeline_mode = #tpu.pipeline_mode<synchronous>, transform_indices = @transform_4, window_bounds = array<i64: 1, 32>}, {transform_indices = @transform_5, window_bounds = array<i64: 16, 32>}, {pipeline_mode = #tpu.pipeline_mode<synchronous>, transform_indices = @transform_6, window_bounds = array<i64: 1, 32>}, {pipeline_mode = #tpu.pipeline_mode<synchronous>, transform_indices = @transform_7, window_bounds = array<i64: 1, 32>}, {transform_indices = @transform_8, window_bounds = array<i64: 16, 32>}]} {
    %c0 = arith.constant 0 : index
    %c0_0 = arith.constant 0 : index
    %0 = vector.load %arg1[%c0, %c0_0] : memref<16x32xbf16, #tpu.memory_space<vmem>>, vector<16x32xbf16>
    %1 = arith.extf %0 : vector<16x32xbf16> to vector<16x32xf32>
    %2 = arith.truncf %1 : vector<16x32xf32> to vector<16x32xbf16>
    %c0_1 = arith.constant 0 : index
    %c0_2 = arith.constant 0 : index
    %3 = vector.load %arg2[%c0_1, %c0_2] : memref<32x64xbf16, #tpu.memory_space<vmem>>, vector<32x64xbf16>
    %cst = arith.constant dense<0.000000e+00> : vector<16x64xf32>
    %4 = tpu.matmul %2, %3, %cst {dimension_numbers = #tpu.dot_dimension_numbers<[1], [0], [0], [1], [0, 0, 1, 1], [], []>} : vector<16x32xbf16>, vector<32x64xbf16>, vector<16x64xf32> -> vector<16x64xf32>
    %c0_3 = arith.constant 0 : index
    %c0_4 = arith.constant 0 : index
    %5 = vector.load %arg3[%c0_3, %c0_4] : memref<1x64xbf16, #tpu.memory_space<vmem>>, vector<1x64xbf16>
    %6 = arith.extf %5 : vector<1x64xbf16> to vector<1x64xf32>
    %7 = vector.broadcast %6 : vector<1x64xf32> to vector<16x64xf32>
    %8 = arith.addf %4, %7 : vector<16x64xf32>
    %cst_5 = arith.constant 5.000000e-01 : f32
    %9 = vector.broadcast %cst_5 : f32 to vector<16x64xf32>
    %10 = arith.mulf %9, %8 : vector<16x64xf32>
    %cst_6 = arith.constant 0.707106769 : f32
    %11 = vector.broadcast %cst_6 : f32 to vector<16x64xf32>
    %12 = arith.mulf %8, %11 : vector<16x64xf32>
    %13 = math.erf %12 : vector<16x64xf32>
    %cst_7 = arith.constant 1.000000e+00 : f32
    %14 = vector.broadcast %cst_7 : f32 to vector<16x64xf32>
    %15 = arith.addf %14, %13 : vector<16x64xf32>
    %16 = arith.mulf %10, %15 : vector<16x64xf32>
    %17 = arith.truncf %16 : vector<16x64xf32> to vector<16x64xbf16>
    %c0_8 = arith.constant 0 : index
    %c0_9 = arith.constant 0 : index
    %18 = vector.load %arg4[%c0_8, %c0_9] : memref<64x32xbf16, #tpu.memory_space<vmem>>, vector<64x32xbf16>
    %cst_10 = arith.constant dense<0.000000e+00> : vector<16x32xf32>
    %19 = tpu.matmul %17, %18, %cst_10 {dimension_numbers = #tpu.dot_dimension_numbers<[1], [0], [0], [1], [0, 0, 1, 1], [], []>} : vector<16x64xbf16>, vector<64x32xbf16>, vector<16x32xf32> -> vector<16x32xf32>
    %c0_11 = arith.constant 0 : index
    %c0_12 = arith.constant 0 : index
    %20 = vector.load %arg5[%c0_11, %c0_12] : memref<1x32xbf16, #tpu.memory_space<vmem>>, vector<1x32xbf16>
    %21 = arith.extf %20 : vector<1x32xbf16> to vector<1x32xf32>
    %22 = vector.broadcast %21 : vector<1x32xf32> to vector<16x32xf32>
    %23 = arith.addf %19, %22 : vector<16x32xf32>
    %c0_13 = arith.constant 0 : index
    %c0_14 = arith.constant 0 : index
    %24 = vector.load %arg6[%c0_13, %c0_14] : memref<16x32xbf16, #tpu.memory_space<vmem>>, vector<16x32xbf16>
    %25 = arith.extf %24 : vector<16x32xbf16> to vector<16x32xf32>
    %26 = arith.addf %23, %25 : vector<16x32xf32>
    %cst_15 = arith.constant dense<0.000000e+00> : vector<16xf32>
    %27 = vector.multi_reduction <add>, %26, %cst_15 [1] : vector<16x32xf32> to vector<16xf32>
    %28 = vector.shape_cast %27 : vector<16xf32> to vector<16x1xf32>
    %cst_16 = arith.constant 3.200000e+01 : f32
    %29 = vector.broadcast %cst_16 : f32 to vector<16x1xf32>
    %30 = arith.divf %28, %29 : vector<16x1xf32>
    %31 = vector.broadcast %30 : vector<16x1xf32> to vector<16x32xf32>
    %32 = arith.subf %26, %31 : vector<16x32xf32>
    %33 = arith.mulf %32, %32 : vector<16x32xf32>
    %cst_17 = arith.constant dense<0.000000e+00> : vector<16xf32>
    %34 = vector.multi_reduction <add>, %33, %cst_17 [1] : vector<16x32xf32> to vector<16xf32>
    %35 = vector.shape_cast %34 : vector<16xf32> to vector<16x1xf32>
    %cst_18 = arith.constant 3.200000e+01 : f32
    %36 = vector.broadcast %cst_18 : f32 to vector<16x1xf32>
    %37 = arith.divf %35, %36 : vector<16x1xf32>
    %cst_19 = arith.constant 9.99999974E-6 : f32
    %38 = vector.broadcast %cst_19 : f32 to vector<16x1xf32>
    %39 = arith.addf %37, %38 : vector<16x1xf32>
    %40 = math.rsqrt %39 : vector<16x1xf32>
    %41 = vector.broadcast %40 : vector<16x1xf32> to vector<16x32xf32>
    %42 = arith.mulf %32, %41 : vector<16x32xf32>
    %c0_20 = arith.constant 0 : index
    %c0_21 = arith.constant 0 : index
    %43 = vector.load %arg7[%c0_20, %c0_21] : memref<1x32xbf16, #tpu.memory_space<vmem>>, vector<1x32xbf16>
    %44 = arith.extf %43 : vector<1x32xbf16> to vector<1x32xf32>
    %45 = vector.broadcast %44 : vector<1x32xf32> to vector<16x32xf32>
    %46 = arith.mulf %42, %45 : vector<16x32xf32>
    %c0_22 = arith.constant 0 : index
    %c0_23 = arith.constant 0 : index
    %47 = vector.load %arg8[%c0_22, %c0_23] : memref<1x32xbf16, #tpu.memory_space<vmem>>, vector<1x32xbf16>
    %48 = arith.extf %47 : vector<1x32xbf16> to vector<1x32xf32>
    %49 = vector.broadcast %48 : vector<1x32xf32> to vector<16x32xf32>
    %50 = arith.addf %46, %49 : vector<16x32xf32>
    %51 = arith.truncf %50 : vector<16x32xf32> to vector<16x32xbf16>
    %c0_24 = arith.constant 0 : index
    %c0_25 = arith.constant 0 : index
    %52 = vector.load %arg9[%c0_24, %c0_25] : memref<16x32xbf16, #tpu.memory_space<vmem>>, vector<16x32xbf16>
    tpu.vector_store %arg9[%c0_24, %c0_25], %51 {strides = array<i32>} : memref<16x32xbf16, #tpu.memory_space<vmem>>, vector<16x32xbf16>,
    return
  }
  func.func @transform_0(%arg0: i32) -> (i32, i32) {
    %c0_i32 = arith.constant 0 : i32
    %c0_i32_0 = arith.constant 0 : i32
    return %arg0, %c0_i32 : i32, i32
  }
  func.func @transform_1(%arg0: i32) -> (i32, i32) {
    %c0_i32 = arith.constant 0 : i32
    %c0_i32_0 = arith.constant 0 : i32
    %c0_i32_1 = arith.constant 0 : i32
    return %c0_i32, %c0_i32_0 : i32, i32
  }
  func.func @transform_2(%arg0: i32) -> (i32, i32) {
    %c0_i32 = arith.constant 0 : i32
    %c0_i32_0 = arith.constant 0 : i32
    %c0_i32_1 = arith.constant 0 : i32
    return %c0_i32, %c0_i32_0 : i32, i32
  }
  func.func @transform_3(%arg0: i32) -> (i32, i32) {
    %c0_i32 = arith.constant 0 : i32
    %c0_i32_0 = arith.constant 0 : i32
    %c0_i32_1 = arith.constant 0 : i32
    return %c0_i32, %c0_i32_0 : i32, i32
  }
  func.func @transform_4(%arg0: i32) -> (i32, i32) {
    %c0_i32 = arith.constant 0 : i32
    %c0_i32_0 = arith.constant 0 : i32
    %c0_i32_1 = arith.constant 0 : i32
    return %c0_i32, %c0_i32_0 : i32, i32
  }
  func.func @transform_5(%arg0: i32) -> (i32, i32) {
    %c0_i32 = arith.constant 0 : i32
    %c0_i32_0 = arith.constant 0 : i32
    return %arg0, %c0_i32 : i32, i32
  }
  func.func @transform_6(%arg0: i32) -> (i32, i32) {
    %c0_i32 = arith.constant 0 : i32
    %c0_i32_0 = arith.constant 0 : i32
    %c0_i32_1 = arith.constant 0 : i32
    return %c0_i32, %c0_i32_0 : i32, i32
  }
  func.func @transform_7(%arg0: i32) -> (i32, i32) {
    %c0_i32 = arith.constant 0 : i32
    %c0_i32_0 = arith.constant 0 : i32
    %c0_i32_1 = arith.constant 0 : i32
    return %c0_i32, %c0_i32_0 : i32, i32
  }
  func.func @transform_8(%arg0: i32) -> (i32, i32) {
    %c0_i32 = arith.constant 0 : i32
    %c0_i32_0 = arith.constant 0 : i32
    return %arg0, %c0_i32 : i32, i32
  }
}

module attributes {stable_mosaic.version = 11 : i64} {
  func.func @_attn_kernel(%arg0: i32, %arg1: i32, %arg2: memref<1x1x8x32xbf16, #tpu.memory_space<vmem>>, %arg3: memref<1x1x8x32xbf16, #tpu.memory_space<vmem>>, %arg4: memref<1x1x8x32xbf16, #tpu.memory_space<vmem>>, %arg5: memref<1x1x8xf32, #tpu.memory_space<vmem>>, %arg6: memref<1x8x32xbf16, #tpu.memory_space<vmem>>) attributes {dimension_semantics = [#tpu.dimension_semantics<parallel>, #tpu.dimension_semantics<parallel>], iteration_bounds = array<i64: 2, 1>, scalar_prefetch = 0 : i64, scratch_operands = 0 : i64, tpu.core_type = #tpu.core_type<tc>, window_params = [{transform_indices = @transform_0, window_bounds = array<i64: 1, 1, 8, 32>}, {transform_indices = @transform_1, window_bounds = array<i64: 1, 1, 8, 32>}, {transform_indices = @transform_2, window_bounds = array<i64: 1, 1, 8, 32>}, {transform_indices = @transform_3, window_bounds = array<i64: 1, 1, 8>}, {transform_indices = @transform_4, window_bounds = array<i64: 1, 8, 32>}]} {
    %c0 = arith.constant 0 : index
    %c0_0 = arith.constant 0 : index
    %c0_1 = arith.constant 0 : index
    %c0_2 = arith.constant 0 : index
    %0 = vector.load %arg2[%c0, %c0_0, %c0_1, %c0_2] : memref<1x1x8x32xbf16, #tpu.memory_space<vmem>>, vector<1x1x8x32xbf16>
    %1 = vector.shape_cast %0 : vector<1x1x8x32xbf16> to vector<8x32xbf16>
    %c0_3 = arith.constant 0 : index
    %c0_4 = arith.constant 0 : index
    %c0_5 = arith.constant 0 : index
    %c0_6 = arith.constant 0 : index
    %2 = vector.load %arg3[%c0_3, %c0_4, %c0_5, %c0_6] : memref<1x1x8x32xbf16, #tpu.memory_space<vmem>>, vector<1x1x8x32xbf16>
    %3 = vector.shape_cast %2 : vector<1x1x8x32xbf16> to vector<8x32xbf16>
    %c0_7 = arith.constant 0 : index
    %c0_8 = arith.constant 0 : index
    %c0_9 = arith.constant 0 : index
    %c0_10 = arith.constant 0 : index
    %4 = vector.load %arg4[%c0_7, %c0_8, %c0_9, %c0_10] : memref<1x1x8x32xbf16, #tpu.memory_space<vmem>>, vector<1x1x8x32xbf16>
    %5 = vector.shape_cast %4 : vector<1x1x8x32xbf16> to vector<8x32xbf16>
    %c0_11 = arith.constant 0 : index
    %c0_12 = arith.constant 0 : index
    %c0_13 = arith.constant 0 : index
    %6 = vector.load %arg5[%c0_11, %c0_12, %c0_13] : memref<1x1x8xf32, #tpu.memory_space<vmem>>, vector<1x1x8xf32>
    %7 = vector.shape_cast %6 : vector<1x1x8xf32> to vector<1x8xf32>
    %cst = arith.constant 5.000000e-01 : f32
    %8 = vector.broadcast %cst : f32 to vector<1x8xf32>
    %9 = arith.cmpf ogt, %7, %8 : vector<1x8xf32>
    %10 = vector.extract_strided_slice %1 {offsets = [0, 0], sizes = [8, 8], strides = [1, 1]} : vector<8x32xbf16> to vector<8x8xbf16>
    %11 = vector.extract_strided_slice %3 {offsets = [0, 0], sizes = [8, 8], strides = [1, 1]} : vector<8x32xbf16> to vector<8x8xbf16>
    %12 = vector.extract_strided_slice %5 {offsets = [0, 0], sizes = [8, 8], strides = [1, 1]} : vector<8x32xbf16> to vector<8x8xbf16>
    %cst_14 = arith.constant dense<0.000000e+00> : vector<8x8xf32>
    %13 = tpu.matmul %10, %11, %cst_14 {dimension_numbers = #tpu.dot_dimension_numbers<[1], [1], [0], [0], [0, 0, 1, 0], [], []>} : vector<8x8xbf16>, vector<8x8xbf16>, vector<8x8xf32> -> vector<8x8xf32>
    %cst_15 = arith.constant 0.353553385 : f32
    %14 = vector.broadcast %cst_15 : f32 to vector<8x8xf32>
    %15 = arith.mulf %13, %14 : vector<8x8xf32>
    %cst_16 = arith.constant -1.000000e+30 : f32
    %16 = vector.shape_cast %9 : vector<1x8xi1> to vector<1x8xi1>
    %17 = vector.broadcast %16 : vector<1x8xi1> to vector<8x8xi1>
    %18 = vector.broadcast %cst_16 : f32 to vector<8x8xf32>
    %19 = arith.select %17, %15, %18 : vector<8x8xi1>, vector<8x8xf32>
    %cst_17 = arith.constant dense<0xFF800000> : vector<8xf32>
    %20 = vector.multi_reduction <maximumf>, %19, %cst_17 [1] : vector<8x8xf32> to vector<8xf32>
    %21 = vector.shape_cast %20 : vector<8xf32> to vector<8x1xf32>
    %22 = vector.broadcast %21 : vector<8x1xf32> to vector<8x8xf32>
    %23 = arith.subf %19, %22 : vector<8x8xf32>
    %24 = math.exp %23 : vector<8x8xf32>
    %cst_18 = arith.constant dense<0.000000e+00> : vector<8xf32>
    %25 = vector.multi_reduction <add>, %24, %cst_18 [1] : vector<8x8xf32> to vector<8xf32>
    %26 = vector.shape_cast %25 : vector<8xf32> to vector<8x1xf32>
    %27 = vector.broadcast %26 : vector<8x1xf32> to vector<8x8xf32>
    %28 = arith.divf %24, %27 : vector<8x8xf32>
    %29 = arith.truncf %28 : vector<8x8xf32> to vector<8x8xbf16>
    %cst_19 = arith.constant dense<0.000000e+00> : vector<8x8xf32>
    %30 = tpu.matmul %29, %12, %cst_19 {dimension_numbers = #tpu.dot_dimension_numbers<[1], [0], [0], [1], [0, 0, 1, 1], [], []>} : vector<8x8xbf16>, vector<8x8xbf16>, vector<8x8xf32> -> vector<8x8xf32>
    %31 = arith.truncf %30 : vector<8x8xf32> to vector<8x8xbf16>
    %c0_20 = arith.constant 0 : index
    %c0_21 = arith.constant 0 : index
    %c0_22 = arith.constant 0 : index
    %32 = vector.load %arg6[%c0_20, %c0_21, %c0_22] : memref<1x8x32xbf16, #tpu.memory_space<vmem>>, vector<1x8x8xbf16>
    %33 = vector.shape_cast %32 : vector<1x8x8xbf16> to vector<8x8xbf16>
    %34 = vector.shape_cast %31 : vector<8x8xbf16> to vector<1x8x8xbf16>
    tpu.vector_store %arg6[%c0_20, %c0_21, %c0_22], %34 {strides = array<i32>} : memref<1x8x32xbf16, #tpu.memory_space<vmem>>, vector<1x8x8xbf16>,
    %35 = vector.extract_strided_slice %1 {offsets = [0, 8], sizes = [8, 8], strides = [1, 1]} : vector<8x32xbf16> to vector<8x8xbf16>
    %36 = vector.extract_strided_slice %3 {offsets = [0, 8], sizes = [8, 8], strides = [1, 1]} : vector<8x32xbf16> to vector<8x8xbf16>
    %37 = vector.extract_strided_slice %5 {offsets = [0, 8], sizes = [8, 8], strides = [1, 1]} : vector<8x32xbf16> to vector<8x8xbf16>
    %cst_23 = arith.constant dense<0.000000e+00> : vector<8x8xf32>
    %38 = tpu.matmul %35, %36, %cst_23 {dimension_numbers = #tpu.dot_dimension_numbers<[1], [1], [0], [0], [0, 0, 1, 0], [], []>} : vector<8x8xbf16>, vector<8x8xbf16>, vector<8x8xf32> -> vector<8x8xf32>
    %cst_24 = arith.constant 0.353553385 : f32
    %39 = vector.broadcast %cst_24 : f32 to vector<8x8xf32>
    %40 = arith.mulf %38, %39 : vector<8x8xf32>
    %cst_25 = arith.constant -1.000000e+30 : f32
    %41 = vector.shape_cast %9 : vector<1x8xi1> to vector<1x8xi1>
    %42 = vector.broadcast %41 : vector<1x8xi1> to vector<8x8xi1>
    %43 = vector.broadcast %cst_25 : f32 to vector<8x8xf32>
    %44 = arith.select %42, %40, %43 : vector<8x8xi1>, vector<8x8xf32>
    %cst_26 = arith.constant dense<0xFF800000> : vector<8xf32>
    %45 = vector.multi_reduction <maximumf>, %44, %cst_26 [1] : vector<8x8xf32> to vector<8xf32>
    %46 = vector.shape_cast %45 : vector<8xf32> to vector<8x1xf32>
    %47 = vector.broadcast %46 : vector<8x1xf32> to vector<8x8xf32>
    %48 = arith.subf %44, %47 : vector<8x8xf32>
    %49 = math.exp %48 : vector<8x8xf32>
    %cst_27 = arith.constant dense<0.000000e+00> : vector<8xf32>
    %50 = vector.multi_reduction <add>, %49, %cst_27 [1] : vector<8x8xf32> to vector<8xf32>
    %51 = vector.shape_cast %50 : vector<8xf32> to vector<8x1xf32>
    %52 = vector.broadcast %51 : vector<8x1xf32> to vector<8x8xf32>
    %53 = arith.divf %49, %52 : vector<8x8xf32>
    %54 = arith.truncf %53 : vector<8x8xf32> to vector<8x8xbf16>
    %cst_28 = arith.constant dense<0.000000e+00> : vector<8x8xf32>
    %55 = tpu.matmul %54, %37, %cst_28 {dimension_numbers = #tpu.dot_dimension_numbers<[1], [0], [0], [1], [0, 0, 1, 1], [], []>} : vector<8x8xbf16>, vector<8x8xbf16>, vector<8x8xf32> -> vector<8x8xf32>
    %56 = arith.truncf %55 : vector<8x8xf32> to vector<8x8xbf16>
    %c0_29 = arith.constant 0 : index
    %c0_30 = arith.constant 0 : index
    %c8 = arith.constant 8 : index
    %57 = vector.load %arg6[%c0_29, %c0_30, %c8] : memref<1x8x32xbf16, #tpu.memory_space<vmem>>, vector<1x8x8xbf16>
    %58 = vector.shape_cast %57 : vector<1x8x8xbf16> to vector<8x8xbf16>
    %59 = vector.shape_cast %56 : vector<8x8xbf16> to vector<1x8x8xbf16>
    tpu.vector_store %arg6[%c0_29, %c0_30, %c8], %59 {strides = array<i32>} : memref<1x8x32xbf16, #tpu.memory_space<vmem>>, vector<1x8x8xbf16>,
    %60 = vector.extract_strided_slice %1 {offsets = [0, 16], sizes = [8, 8], strides = [1, 1]} : vector<8x32xbf16> to vector<8x8xbf16>
    %61 = vector.extract_strided_slice %3 {offsets = [0, 16], sizes = [8, 8], strides = [1, 1]} : vector<8x32xbf16> to vector<8x8xbf16>
    %62 = vector.extract_strided_slice %5 {offsets = [0, 16], sizes = [8, 8], strides = [1, 1]} : vector<8x32xbf16> to vector<8x8xbf16>
    %cst_31 = arith.constant dense<0.000000e+00> : vector<8x8xf32>
    %63 = tpu.matmul %60, %61, %cst_31 {dimension_numbers = #tpu.dot_dimension_numbers<[1], [1], [0], [0], [0, 0, 1, 0], [], []>} : vector<8x8xbf16>, vector<8x8xbf16>, vector<8x8xf32> -> vector<8x8xf32>
    %cst_32 = arith.constant 0.353553385 : f32
    %64 = vector.broadcast %cst_32 : f32 to vector<8x8xf32>
    %65 = arith.mulf %63, %64 : vector<8x8xf32>
    %cst_33 = arith.constant -1.000000e+30 : f32
    %66 = vector.shape_cast %9 : vector<1x8xi1> to vector<1x8xi1>
    %67 = vector.broadcast %66 : vector<1x8xi1> to vector<8x8xi1>
    %68 = vector.broadcast %cst_33 : f32 to vector<8x8xf32>
    %69 = arith.select %67, %65, %68 : vector<8x8xi1>, vector<8x8xf32>
    %cst_34 = arith.constant dense<0xFF800000> : vector<8xf32>
    %70 = vector.multi_reduction <maximumf>, %69, %cst_34 [1] : vector<8x8xf32> to vector<8xf32>
    %71 = vector.shape_cast %70 : vector<8xf32> to vector<8x1xf32>
    %72 = vector.broadcast %71 : vector<8x1xf32> to vector<8x8xf32>
    %73 = arith.subf %69, %72 : vector<8x8xf32>
    %74 = math.exp %73 : vector<8x8xf32>
    %cst_35 = arith.constant dense<0.000000e+00> : vector<8xf32>
    %75 = vector.multi_reduction <add>, %74, %cst_35 [1] : vector<8x8xf32> to vector<8xf32>
    %76 = vector.shape_cast %75 : vector<8xf32> to vector<8x1xf32>
    %77 = vector.broadcast %76 : vector<8x1xf32> to vector<8x8xf32>
    %78 = arith.divf %74, %77 : vector<8x8xf32>
    %79 = arith.truncf %78 : vector<8x8xf32> to vector<8x8xbf16>
    %cst_36 = arith.constant dense<0.000000e+00> : vector<8x8xf32>
    %80 = tpu.matmul %79, %62, %cst_36 {dimension_numbers = #tpu.dot_dimension_numbers<[1], [0], [0], [1], [0, 0, 1, 1], [], []>} : vector<8x8xbf16>, vector<8x8xbf16>, vector<8x8xf32> -> vector<8x8xf32>
    %81 = arith.truncf %80 : vector<8x8xf32> to vector<8x8xbf16>
    %c0_37 = arith.constant 0 : index
    %c0_38 = arith.constant 0 : index
    %c16 = arith.constant 16 : index
    %82 = vector.load %arg6[%c0_37, %c0_38, %c16] : memref<1x8x32xbf16, #tpu.memory_space<vmem>>, vector<1x8x8xbf16>
    %83 = vector.shape_cast %82 : vector<1x8x8xbf16> to vector<8x8xbf16>
    %84 = vector.shape_cast %81 : vector<8x8xbf16> to vector<1x8x8xbf16>
    tpu.vector_store %arg6[%c0_37, %c0_38, %c16], %84 {strides = array<i32>} : memref<1x8x32xbf16, #tpu.memory_space<vmem>>, vector<1x8x8xbf16>,
    %85 = vector.extract_strided_slice %1 {offsets = [0, 24], sizes = [8, 8], strides = [1, 1]} : vector<8x32xbf16> to vector<8x8xbf16>
    %86 = vector.extract_strided_slice %3 {offsets = [0, 24], sizes = [8, 8], strides = [1, 1]} : vector<8x32xbf16> to vector<8x8xbf16>
    %87 = vector.extract_strided_slice %5 {offsets = [0, 24], sizes = [8, 8], strides = [1, 1]} : vector<8x32xbf16> to vector<8x8xbf16>
    %cst_39 = arith.constant dense<0.000000e+00> : vector<8x8xf32>
    %88 = tpu.matmul %85, %86, %cst_39 {dimension_numbers = #tpu.dot_dimension_numbers<[1], [1], [0], [0], [0, 0, 1, 0], [], []>} : vector<8x8xbf16>, vector<8x8xbf16>, vector<8x8xf32> -> vector<8x8xf32>
    %cst_40 = arith.constant 0.353553385 : f32
    %89 = vector.broadcast %cst_40 : f32 to vector<8x8xf32>
    %90 = arith.mulf %88, %89 : vector<8x8xf32>
    %cst_41 = arith.constant -1.000000e+30 : f32
    %91 = vector.shape_cast %9 : vector<1x8xi1> to vector<1x8xi1>
    %92 = vector.broadcast %91 : vector<1x8xi1> to vector<8x8xi1>
    %93 = vector.broadcast %cst_41 : f32 to vector<8x8xf32>
    %94 = arith.select %92, %90, %93 : vector<8x8xi1>, vector<8x8xf32>
    %cst_42 = arith.constant dense<0xFF800000> : vector<8xf32>
    %95 = vector.multi_reduction <maximumf>, %94, %cst_42 [1] : vector<8x8xf32> to vector<8xf32>
    %96 = vector.shape_cast %95 : vector<8xf32> to vector<8x1xf32>
    %97 = vector.broadcast %96 : vector<8x1xf32> to vector<8x8xf32>
    %98 = arith.subf %94, %97 : vector<8x8xf32>
    %99 = math.exp %98 : vector<8x8xf32>
    %cst_43 = arith.constant dense<0.000000e+00> : vector<8xf32>
    %100 = vector.multi_reduction <add>, %99, %cst_43 [1] : vector<8x8xf32> to vector<8xf32>
    %101 = vector.shape_cast %100 : vector<8xf32> to vector<8x1xf32>
    %102 = vector.broadcast %101 : vector<8x1xf32> to vector<8x8xf32>
    %103 = arith.divf %99, %102 : vector<8x8xf32>
    %104 = arith.truncf %103 : vector<8x8xf32> to vector<8x8xbf16>
    %cst_44 = arith.constant dense<0.000000e+00> : vector<8x8xf32>
    %105 = tpu.matmul %104, %87, %cst_44 {dimension_numbers = #tpu.dot_dimension_numbers<[1], [0], [0], [1], [0, 0, 1, 1], [], []>} : vector<8x8xbf16>, vector<8x8xbf16>, vector<8x8xf32> -> vector<8x8xf32>
    %106 = arith.truncf %105 : vector<8x8xf32> to vector<8x8xbf16>
    %c0_45 = arith.constant 0 : index
    %c0_46 = arith.constant 0 : index
    %c24 = arith.constant 24 : index
    %107 = vector.load %arg6[%c0_45, %c0_46, %c24] : memref<1x8x32xbf16, #tpu.memory_space<vmem>>, vector<1x8x8xbf16>
    %108 = vector.shape_cast %107 : vector<1x8x8xbf16> to vector<8x8xbf16>
    %109 = vector.shape_cast %106 : vector<8x8xbf16> to vector<1x8x8xbf16>
    tpu.vector_store %arg6[%c0_45, %c0_46, %c24], %109 {strides = array<i32>} : memref<1x8x32xbf16, #tpu.memory_space<vmem>>, vector<1x8x8xbf16>,
    return
  }
  func.func @transform_0(%arg0: i32, %arg1: i32) -> (i32, i32, i32, i32) {
    %c0_i32 = arith.constant 0 : i32
    %c0_i32_0 = arith.constant 0 : i32
    %c0_i32_1 = arith.constant 0 : i32
    return %c0_i32, %arg0, %arg1, %c0_i32_0 : i32, i32, i32, i32
  }
  func.func @transform_1(%arg0: i32, %arg1: i32) -> (i32, i32, i32, i32) {
    %c0_i32 = arith.constant 0 : i32
    %c0_i32_0 = arith.constant 0 : i32
    %c0_i32_1 = arith.constant 0 : i32
    %c0_i32_2 = arith.constant 0 : i32
    return %c0_i32, %arg0, %c0_i32_0, %c0_i32_1 : i32, i32, i32, i32
  }
  func.func @transform_2(%arg0: i32, %arg1: i32) -> (i32, i32, i32, i32) {
    %c1_i32 = arith.constant 1 : i32
    %c0_i32 = arith.constant 0 : i32
    %c0_i32_0 = arith.constant 0 : i32
    %c0_i32_1 = arith.constant 0 : i32
    return %c1_i32, %arg0, %c0_i32, %c0_i32_0 : i32, i32, i32, i32
  }
  func.func @transform_3(%arg0: i32, %arg1: i32) -> (i32, i32, i32) {
    %c0_i32 = arith.constant 0 : i32
    %c0_i32_0 = arith.constant 0 : i32
    %c0_i32_1 = arith.constant 0 : i32
    return %arg0, %c0_i32, %c0_i32_0 : i32, i32, i32
  }
  func.func @transform_4(%arg0: i32, %arg1: i32) -> (i32, i32, i32) {
    %c0_i32 = arith.constant 0 : i32
    %c0_i32_0 = arith.constant 0 : i32
    return %arg0, %arg1, %c0_i32 : i32, i32, i32
  }
}

module attributes {stable_mosaic.version = 11 : i64} {
  func.func @_ffn_kernel(%arg0: i32, %arg1: memref<16x32xbf16, #tpu.memory_space<vmem>>, %arg2: memref<1x32xbf16, #tpu.memory_space<vmem>>, %arg3: memref<1x32xbf16, #tpu.memory_space<vmem>>, %arg4: memref<32x64xbf16, #tpu.memory_space<vmem>>, %arg5: memref<1x64xbf16, #tpu.memory_space<vmem>>, %arg6: memref<64x32xbf16, #tpu.memory_space<vmem>>, %arg7: memref<1x32xbf16, #tpu.memory_space<vmem>>, %arg8: memref<16x32xbf16, #tpu.memory_space<vmem>>, %arg9: memref<16x32xbf16, #tpu.memory_space<vmem>>) attributes {dimension_semantics = [#tpu.dimension_semantics<parallel>], iteration_bounds = array<i64: 1>, scalar_prefetch = 0 : i64, scratch_operands = 0 : i64, tpu.core_type = #tpu.core_type<tc>, window_params = [{transform_indices = @transform_0, window_bounds = array<i64: 16, 32>}, {pipeline_mode = #tpu.pipeline_mode<synchronous>, transform_indices = @transform_1, window_bounds = array<i64: 1, 32>}, {pipeline_mode = #tpu.pipeline_mode<synchronous>, transform_indices = @transform_2, window_bounds = array<i64: 1, 32>}, {pipeline_mode = #tpu.pipeline_mode<synchronous>, transform_indices = @transform_3, window_bounds = array<i64: 32, 64>}, {pipeline_mode = #tpu.pipeline_mode<synchronous>, transform_indices = @transform_4, window_bounds = array<i64: 1, 64>}, {pipeline_mode = #tpu.pipeline_mode<synchronous>, transform_indices = @transform_5, window_bounds = array<i64: 64, 32>}, {pipeline_mode = #tpu.pipeline_mode<synchronous>, transform_indices = @transform_6, window_bounds = array<i64: 1, 32>}, {transform_indices = @transform_7, window_bounds = array<i64: 16, 32>}, {transform_indices = @transform_8, window_bounds = array<i64: 16, 32>}]} {
    %c0 = arith.constant 0 : index
    %c0_0 = arith.constant 0 : index
    %0 = vector.load %arg1[%c0, %c0_0] : memref<16x32xbf16, #tpu.memory_space<vmem>>, vector<16x32xbf16>
    %1 = arith.extf %0 : vector<16x32xbf16> to vector<16x32xf32>
    %cst = arith.constant dense<0.000000e+00> : vector<16xf32>
    %2 = vector.multi_reduction <add>, %1, %cst [1] : vector<16x32xf32> to vector<16xf32>
    %3 = vector.shape_cast %2 : vector<16xf32> to vector<16x1xf32>
    %cst_1 = arith.constant 3.200000e+01 : f32
    %4 = vector.broadcast %cst_1 : f32 to vector<16x1xf32>
    %5 = arith.divf %3, %4 : vector<16x1xf32>
    %6 = vector.broadcast %5 : vector<16x1xf32> to vector<16x32xf32>
    %7 = arith.subf %1, %6 : vector<16x32xf32>
    %8 = arith.mulf %7, %7 : vector<16x32xf32>
    %cst_2 = arith.constant dense<0.000000e+00> : vector<16xf32>
    %9 = vector.multi_reduction <add>, %8, %cst_2 [1] : vector<16x32xf32> to vector<16xf32>
    %10 = vector.shape_cast %9 : vector<16xf32> to vector<16x1xf32>
    %cst_3 = arith.constant 3.200000e+01 : f32
    %11 = vector.broadcast %cst_3 : f32 to vector<16x1xf32>
    %12 = arith.divf %10, %11 : vector<16x1xf32>
    %cst_4 = arith.constant 9.99999974E-6 : f32
    %13 = vector.broadcast %cst_4 : f32 to vector<16x1xf32>
    %14 = arith.addf %12, %13 : vector<16x1xf32>
    %15 = math.rsqrt %14 : vector<16x1xf32>
    %16 = vector.broadcast %15 : vector<16x1xf32> to vector<16x32xf32>
    %17 = arith.mulf %7, %16 : vector<16x32xf32>
    %c0_5 = arith.constant 0 : index
    %c0_6 = arith.constant 0 : index
    %18 = vector.load %arg2[%c0_5, %c0_6] : memref<1x32xbf16, #tpu.memory_space<vmem>>, vector<1x32xbf16>
    %19 = arith.extf %18 : vector<1x32xbf16> to vector<1x32xf32>
    %20 = vector.broadcast %19 : vector<1x32xf32> to vector<16x32xf32>
    %21 = arith.mulf %17, %20 : vector<16x32xf32>
    %c0_7 = arith.constant 0 : index
    %c0_8 = arith.constant 0 : index
    %22 = vector.load %arg3[%c0_7, %c0_8] : memref<1x32xbf16, #tpu.memory_space<vmem>>, vector<1x32xbf16>
    %23 = arith.extf %22 : vector<1x32xbf16> to vector<1x32xf32>
    %24 = vector.broadcast %23 : vector<1x32xf32> to vector<16x32xf32>
    %25 = arith.addf %21, %24 : vector<16x32xf32>
    %26 = arith.truncf %25 : vector<16x32xf32> to vector<16x32xbf16>
    %c0_9 = arith.constant 0 : index
    %c0_10 = arith.constant 0 : index
    %27 = vector.load %arg4[%c0_9, %c0_10] : memref<32x64xbf16, #tpu.memory_space<vmem>>, vector<32x64xbf16>
    %cst_11 = arith.constant dense<0.000000e+00> : vector<16x64xf32>
    %28 = tpu.matmul %26, %27, %cst_11 {dimension_numbers = #tpu.dot_dimension_numbers<[1], [0], [0], [1], [0, 0, 1, 1], [], []>} : vector<16x32xbf16>, vector<32x64xbf16>, vector<16x64xf32> -> vector<16x64xf32>
    %c0_12 = arith.constant 0 : index
    %c0_13 = arith.constant 0 : index
    %29 = vector.load %arg5[%c0_12, %c0_13] : memref<1x64xbf16, #tpu.memory_space<vmem>>, vector<1x64xbf16>
    %30 = arith.extf %29 : vector<1x64xbf16> to vector<1x64xf32>
    %31 = vector.broadcast %30 : vector<1x64xf32> to vector<16x64xf32>
    %32 = arith.addf %28, %31 : vector<16x64xf32>
    %cst_14 = arith.constant 5.000000e-01 : f32
    %33 = vector.broadcast %cst_14 : f32 to vector<16x64xf32>
    %34 = arith.mulf %33, %32 : vector<16x64xf32>
    %cst_15 = arith.constant 0.707106769 : f32
    %35 = vector.broadcast %cst_15 : f32 to vector<16x64xf32>
    %36 = arith.mulf %32, %35 : vector<16x64xf32>
    %37 = math.erf %36 : vector<16x64xf32>
    %cst_16 = arith.constant 1.000000e+00 : f32
    %38 = vector.broadcast %cst_16 : f32 to vector<16x64xf32>
    %39 = arith.addf %38, %37 : vector<16x64xf32>
    %40 = arith.mulf %34, %39 : vector<16x64xf32>
    %41 = arith.truncf %40 : vector<16x64xf32> to vector<16x64xbf16>
    %c0_17 = arith.constant 0 : index
    %c0_18 = arith.constant 0 : index
    %42 = vector.load %arg6[%c0_17, %c0_18] : memref<64x32xbf16, #tpu.memory_space<vmem>>, vector<64x32xbf16>
    %cst_19 = arith.constant dense<0.000000e+00> : vector<16x32xf32>
    %43 = tpu.matmul %41, %42, %cst_19 {dimension_numbers = #tpu.dot_dimension_numbers<[1], [0], [0], [1], [0, 0, 1, 1], [], []>} : vector<16x64xbf16>, vector<64x32xbf16>, vector<16x32xf32> -> vector<16x32xf32>
    %c0_20 = arith.constant 0 : index
    %c0_21 = arith.constant 0 : index
    %44 = vector.load %arg7[%c0_20, %c0_21] : memref<1x32xbf16, #tpu.memory_space<vmem>>, vector<1x32xbf16>
    %45 = arith.extf %44 : vector<1x32xbf16> to vector<1x32xf32>
    %46 = vector.broadcast %45 : vector<1x32xf32> to vector<16x32xf32>
    %47 = arith.addf %43, %46 : vector<16x32xf32>
    %c0_22 = arith.constant 0 : index
    %c0_23 = arith.constant 0 : index
    %48 = vector.load %arg8[%c0_22, %c0_23] : memref<16x32xbf16, #tpu.memory_space<vmem>>, vector<16x32xbf16>
    %49 = arith.extf %48 : vector<16x32xbf16> to vector<16x32xf32>
    %50 = arith.addf %47, %49 : vector<16x32xf32>
    %51 = arith.truncf %50 : vector<16x32xf32> to vector<16x32xbf16>
    %c0_24 = arith.constant 0 : index
    %c0_25 = arith.constant 0 : index
    %52 = vector.load %arg9[%c0_24, %c0_25] : memref<16x32xbf16, #tpu.memory_space<vmem>>, vector<16x32xbf16>
    tpu.vector_store %arg9[%c0_24, %c0_25], %51 {strides = array<i32>} : memref<16x32xbf16, #tpu.memory_space<vmem>>, vector<16x32xbf16>,
    return
  }
  func.func @transform_0(%arg0: i32) -> (i32, i32) {
    %c0_i32 = arith.constant 0 : i32
    %c0_i32_0 = arith.constant 0 : i32
    return %arg0, %c0_i32 : i32, i32
  }
  func.func @transform_1(%arg0: i32) -> (i32, i32) {
    %c0_i32 = arith.constant 0 : i32
    %c0_i32_0 = arith.constant 0 : i32
    %c0_i32_1 = arith.constant 0 : i32
    return %c0_i32, %c0_i32_0 : i32, i32
  }
  func.func @transform_2(%arg0: i32) -> (i32, i32) {
    %c0_i32 = arith.constant 0 : i32
    %c0_i32_0 = arith.constant 0 : i32
    %c0_i32_1 = arith.constant 0 : i32
    return %c0_i32, %c0_i32_0 : i32, i32
  }
  func.func @transform_3(%arg0: i32) -> (i32, i32) {
    %c0_i32 = arith.constant 0 : i32
    %c0_i32_0 = arith.constant 0 : i32
    %c0_i32_1 = arith.constant 0 : i32
    return %c0_i32, %c0_i32_0 : i32, i32
  }
  func.func @transform_4(%arg0: i32) -> (i32, i32) {
    %c0_i32 = arith.constant 0 : i32
    %c0_i32_0 = arith.constant 0 : i32
    %c0_i32_1 = arith.constant 0 : i32
    return %c0_i32, %c0_i32_0 : i32, i32
  }
  func.func @transform_5(%arg0: i32) -> (i32, i32) {
    %c0_i32 = arith.constant 0 : i32
    %c0_i32_0 = arith.constant 0 : i32
    %c0_i32_1 = arith.constant 0 : i32
    return %c0_i32, %c0_i32_0 : i32, i32
  }
  func.func @transform_6(%arg0: i32) -> (i32, i32) {
    %c0_i32 = arith.constant 0 : i32
    %c0_i32_0 = arith.constant 0 : i32
    %c0_i32_1 = arith.constant 0 : i32
    return %c0_i32, %c0_i32_0 : i32, i32
  }
  func.func @transform_7(%arg0: i32) -> (i32, i32) {
    %c0_i32 = arith.constant 0 : i32
    %c0_i32_0 = arith.constant 0 : i32
    return %arg0, %c0_i32 : i32, i32
  }
  func.func @transform_8(%arg0: i32) -> (i32, i32) {
    %c0_i32 = arith.constant 0 : i32
    %c0_i32_0 = arith.constant 0 : i32
    return %arg0, %c0_i32 : i32, i32
  }
}

module attributes {stable_mosaic.version = 11 : i64} {
  func.func @_mm_kernel(%arg0: i32, %arg1: i32, %arg2: i32, %arg3: i32, %arg4: memref<16x32xbf16, #tpu.memory_space<vmem>>, %arg5: memref<1x32xbf16, #tpu.memory_space<vmem>>, %arg6: memref<1x32xbf16, #tpu.memory_space<vmem>>, %arg7: memref<1x32x32xbf16, #tpu.memory_space<vmem>>, %arg8: memref<1x1x32xbf16, #tpu.memory_space<vmem>>, %arg9: memref<1x16x32xbf16, #tpu.memory_space<vmem>>, %arg10: memref<16x32xbf16, #tpu.memory_space<vmem>>) attributes {dimension_semantics = [#tpu.dimension_semantics<parallel>, #tpu.dimension_semantics<arbitrary>, #tpu.dimension_semantics<arbitrary>, #tpu.dimension_semantics<arbitrary>], iteration_bounds = array<i64: 1, 1, 1, 1>, scalar_prefetch = 0 : i64, scratch_operands = 1 : i64, tpu.core_type = #tpu.core_type<tc>, window_params = [{transform_indices = @transform_0, window_bounds = array<i64: 16, 32>}, {pipeline_mode = #tpu.pipeline_mode<synchronous>, transform_indices = @transform_1, window_bounds = array<i64: 1, 32>}, {pipeline_mode = #tpu.pipeline_mode<synchronous>, transform_indices = @transform_2, window_bounds = array<i64: 1, 32>}, {transform_indices = @transform_3, window_bounds = array<i64: 1, 32, 32>}, {transform_indices = @transform_4, window_bounds = array<i64: 1, 1, 32>}, {transform_indices = @transform_5, window_bounds = array<i64: 1, 16, 32>}]} {
    %c0_i32 = arith.constant 0 : i32
    %0 = arith.cmpi eq, %arg1, %c0_i32 : i32
    %c0_i32_0 = arith.constant 0 : i32
    %1 = arith.cmpi eq, %arg2, %c0_i32_0 : i32
    %2 = arith.andi %0, %1 : i1
    %c0_i32_1 = arith.constant 0 : i32
    %3 = arith.cmpi eq, %arg3, %c0_i32_1 : i32
    %4 = arith.andi %2, %3 : i1
    %5 = arith.extui %4 : i1 to i32
    %c0_i32_2 = arith.constant 0 : i32
    %6 = arith.cmpi ne, %5, %c0_i32_2 : i32
    scf.if %6 {
      %c0_13 = arith.constant 0 : index
      %c0_14 = arith.constant 0 : index
      %20 = vector.load %arg4[%c0_13, %c0_14] : memref<16x32xbf16, #tpu.memory_space<vmem>>, vector<16x32xbf16>
      %21 = arith.extf %20 : vector<16x32xbf16> to vector<16x32xf32>
      %cst_15 = arith.constant dense<0.000000e+00> : vector<16xf32>
      %22 = vector.multi_reduction <add>, %21, %cst_15 [1] : vector<16x32xf32> to vector<16xf32>
      %23 = vector.shape_cast %22 : vector<16xf32> to vector<16x1xf32>
      %cst_16 = arith.constant 3.200000e+01 : f32
      %24 = vector.broadcast %cst_16 : f32 to vector<16x1xf32>
      %25 = arith.divf %23, %24 : vector<16x1xf32>
      %26 = vector.broadcast %25 : vector<16x1xf32> to vector<16x32xf32>
      %27 = arith.subf %21, %26 : vector<16x32xf32>
      %28 = arith.mulf %27, %27 : vector<16x32xf32>
      %cst_17 = arith.constant dense<0.000000e+00> : vector<16xf32>
      %29 = vector.multi_reduction <add>, %28, %cst_17 [1] : vector<16x32xf32> to vector<16xf32>
      %30 = vector.shape_cast %29 : vector<16xf32> to vector<16x1xf32>
      %cst_18 = arith.constant 3.200000e+01 : f32
      %31 = vector.broadcast %cst_18 : f32 to vector<16x1xf32>
      %32 = arith.divf %30, %31 : vector<16x1xf32>
      %cst_19 = arith.constant 9.99999974E-6 : f32
      %33 = vector.broadcast %cst_19 : f32 to vector<16x1xf32>
      %34 = arith.addf %32, %33 : vector<16x1xf32>
      %35 = math.rsqrt %34 : vector<16x1xf32>
      %36 = vector.broadcast %35 : vector<16x1xf32> to vector<16x32xf32>
      %37 = arith.mulf %27, %36 : vector<16x32xf32>
      %c0_20 = arith.constant 0 : index
      %c0_21 = arith.constant 0 : index
      %38 = vector.load %arg5[%c0_20, %c0_21] : memref<1x32xbf16, #tpu.memory_space<vmem>>, vector<1x32xbf16>
      %39 = arith.extf %38 : vector<1x32xbf16> to vector<1x32xf32>
      %40 = vector.broadcast %39 : vector<1x32xf32> to vector<16x32xf32>
      %41 = arith.mulf %37, %40 : vector<16x32xf32>
      %c0_22 = arith.constant 0 : index
      %c0_23 = arith.constant 0 : index
      %42 = vector.load %arg6[%c0_22, %c0_23] : memref<1x32xbf16, #tpu.memory_space<vmem>>, vector<1x32xbf16>
      %43 = arith.extf %42 : vector<1x32xbf16> to vector<1x32xf32>
      %44 = vector.broadcast %43 : vector<1x32xf32> to vector<16x32xf32>
      %45 = arith.addf %41, %44 : vector<16x32xf32>
      %46 = arith.truncf %45 : vector<16x32xf32> to vector<16x32xbf16>
      %c0_24 = arith.constant 0 : index
      %c0_25 = arith.constant 0 : index
      %47 = vector.load %arg10[%c0_24, %c0_25] : memref<16x32xbf16, #tpu.memory_space<vmem>>, vector<16x32xbf16>
      tpu.vector_store %arg10[%c0_24, %c0_25], %46 {strides = array<i32>} : memref<16x32xbf16, #tpu.memory_space<vmem>>, vector<16x32xbf16>,
    } else {
    }
    %c0 = arith.constant 0 : index
    %c0_3 = arith.constant 0 : index
    %7 = vector.load %arg10[%c0, %c0_3] : memref<16x32xbf16, #tpu.memory_space<vmem>>, vector<16x32xbf16>
    %c0_4 = arith.constant 0 : index
    %c0_5 = arith.constant 0 : index
    %c0_6 = arith.constant 0 : index
    %8 = vector.load %arg7[%c0_4, %c0_5, %c0_6] : memref<1x32x32xbf16, #tpu.memory_space<vmem>>, vector<1x32x32xbf16>
    %9 = vector.shape_cast %8 : vector<1x32x32xbf16> to vector<32x32xbf16>
    %cst = arith.constant dense<0.000000e+00> : vector<16x32xf32>
    %10 = tpu.matmul %7, %9, %cst {dimension_numbers = #tpu.dot_dimension_numbers<[1], [0], [0], [1], [0, 0, 1, 1], [], []>} : vector<16x32xbf16>, vector<32x32xbf16>, vector<16x32xf32> -> vector<16x32xf32>
    %c0_7 = arith.constant 0 : index
    %c0_8 = arith.constant 0 : index
    %c0_9 = arith.constant 0 : index
    %11 = vector.load %arg8[%c0_7, %c0_8, %c0_9] : memref<1x1x32xbf16, #tpu.memory_space<vmem>>, vector<1x1x32xbf16>
    %12 = vector.shape_cast %11 : vector<1x1x32xbf16> to vector<1x32xbf16>
    %13 = arith.extf %12 : vector<1x32xbf16> to vector<1x32xf32>
    %14 = vector.broadcast %13 : vector<1x32xf32> to vector<16x32xf32>
    %15 = arith.addf %10, %14 : vector<16x32xf32>
    %16 = arith.truncf %15 : vector<16x32xf32> to vector<16x32xbf16>
    %c0_10 = arith.constant 0 : index
    %c0_11 = arith.constant 0 : index
    %c0_12 = arith.constant 0 : index
    %17 = vector.load %arg9[%c0_10, %c0_11, %c0_12] : memref<1x16x32xbf16, #tpu.memory_space<vmem>>, vector<1x16x32xbf16>
    %18 = vector.shape_cast %17 : vector<1x16x32xbf16> to vector<16x32xbf16>
    %19 = vector.shape_cast %16 : vector<16x32xbf16> to vector<1x16x32xbf16>
    tpu.vector_store %arg9[%c0_10, %c0_11, %c0_12], %19 {strides = array<i32>} : memref<1x16x32xbf16, #tpu.memory_space<vmem>>, vector<1x16x32xbf16>,
    return
  }
  func.func @transform_0(%arg0: i32, %arg1: i32, %arg2: i32, %arg3: i32) -> (i32, i32) {
    %c0_i32 = arith.constant 0 : i32
    return %arg0, %arg3 : i32, i32
  }
  func.func @transform_1(%arg0: i32, %arg1: i32, %arg2: i32, %arg3: i32) -> (i32, i32) {
    %c0_i32 = arith.constant 0 : i32
    %c0_i32_0 = arith.constant 0 : i32
    %c0_i32_1 = arith.constant 0 : i32
    return %c0_i32, %c0_i32_0 : i32, i32
  }
  func.func @transform_2(%arg0: i32, %arg1: i32, %arg2: i32, %arg3: i32) -> (i32, i32) {
    %c0_i32 = arith.constant 0 : i32
    %c0_i32_0 = arith.constant 0 : i32
    %c0_i32_1 = arith.constant 0 : i32
    return %c0_i32, %c0_i32_0 : i32, i32
  }
  func.func @transform_3(%arg0: i32, %arg1: i32, %arg2: i32, %arg3: i32) -> (i32, i32, i32) {
    %c0_i32 = arith.constant 0 : i32
    return %arg1, %arg3, %arg2 : i32, i32, i32
  }
  func.func @transform_4(%arg0: i32, %arg1: i32, %arg2: i32, %arg3: i32) -> (i32, i32, i32) {
    %c0_i32 = arith.constant 0 : i32
    %c0_i32_0 = arith.constant 0 : i32
    return %arg1, %c0_i32, %arg2 : i32, i32, i32
  }
  func.func @transform_5(%arg0: i32, %arg1: i32, %arg2: i32, %arg3: i32) -> (i32, i32, i32) {
    %c0_i32 = arith.constant 0 : i32
    return %arg1, %arg0, %arg2 : i32, i32, i32
  }
}

module attributes {stable_mosaic.version = 11 : i64} {
  func.func @_mm_kernel(%arg0: i32, %arg1: i32, %arg2: i32, %arg3: i32, %arg4: memref<16x32xbf16, #tpu.memory_space<vmem>>, %arg5: memref<1x32x32xbf16, #tpu.memory_space<vmem>>, %arg6: memref<1x1x32xbf16, #tpu.memory_space<vmem>>, %arg7: memref<16x32xbf16, #tpu.memory_space<vmem>>, %arg8: memref<1x16x32xbf16, #tpu.memory_space<vmem>>) attributes {dimension_semantics = [#tpu.dimension_semantics<parallel>, #tpu.dimension_semantics<parallel>, #tpu.dimension_semantics<parallel>, #tpu.dimension_semantics<arbitrary>], iteration_bounds = array<i64: 1, 1, 1, 1>, scalar_prefetch = 0 : i64, scratch_operands = 0 : i64, tpu.core_type = #tpu.core_type<tc>, window_params = [{transform_indices = @transform_0, window_bounds = array<i64: 16, 32>}, {transform_indices = @transform_1, window_bounds = array<i64: 1, 32, 32>}, {transform_indices = @transform_2, window_bounds = array<i64: 1, 1, 32>}, {transform_indices = @transform_3, window_bounds = array<i64: 16, 32>}, {transform_indices = @transform_4, window_bounds = array<i64: 1, 16, 32>}]} {
    %c0 = arith.constant 0 : index
    %c0_0 = arith.constant 0 : index
    %0 = vector.load %arg4[%c0, %c0_0] : memref<16x32xbf16, #tpu.memory_space<vmem>>, vector<16x32xbf16>
    %c0_1 = arith.constant 0 : index
    %c0_2 = arith.constant 0 : index
    %c0_3 = arith.constant 0 : index
    %1 = vector.load %arg5[%c0_1, %c0_2, %c0_3] : memref<1x32x32xbf16, #tpu.memory_space<vmem>>, vector<1x32x32xbf16>
    %2 = vector.shape_cast %1 : vector<1x32x32xbf16> to vector<32x32xbf16>
    %cst = arith.constant dense<0.000000e+00> : vector<16x32xf32>
    %3 = tpu.matmul %0, %2, %cst {dimension_numbers = #tpu.dot_dimension_numbers<[1], [0], [0], [1], [0, 0, 1, 1], [], []>} : vector<16x32xbf16>, vector<32x32xbf16>, vector<16x32xf32> -> vector<16x32xf32>
    %c0_4 = arith.constant 0 : index
    %c0_5 = arith.constant 0 : index
    %c0_6 = arith.constant 0 : index
    %4 = vector.load %arg6[%c0_4, %c0_5, %c0_6] : memref<1x1x32xbf16, #tpu.memory_space<vmem>>, vector<1x1x32xbf16>
    %5 = vector.shape_cast %4 : vector<1x1x32xbf16> to vector<1x32xbf16>
    %6 = arith.extf %5 : vector<1x32xbf16> to vector<1x32xf32>
    %7 = vector.broadcast %6 : vector<1x32xf32> to vector<16x32xf32>
    %8 = arith.addf %3, %7 : vector<16x32xf32>
    %c0_7 = arith.constant 0 : index
    %c0_8 = arith.constant 0 : index
    %9 = vector.load %arg7[%c0_7, %c0_8] : memref<16x32xbf16, #tpu.memory_space<vmem>>, vector<16x32xbf16>
    %10 = arith.extf %9 : vector<16x32xbf16> to vector<16x32xf32>
    %11 = arith.addf %8, %10 : vector<16x32xf32>
    %12 = arith.truncf %11 : vector<16x32xf32> to vector<16x32xbf16>
    %c0_9 = arith.constant 0 : index
    %c0_10 = arith.constant 0 : index
    %c0_11 = arith.constant 0 : index
    %13 = vector.load %arg8[%c0_9, %c0_10, %c0_11] : memref<1x16x32xbf16, #tpu.memory_space<vmem>>, vector<1x16x32xbf16>
    %14 = vector.shape_cast %13 : vector<1x16x32xbf16> to vector<16x32xbf16>
    %15 = vector.shape_cast %12 : vector<16x32xbf16> to vector<1x16x32xbf16>
    tpu.vector_store %arg8[%c0_9, %c0_10, %c0_11], %15 {strides = array<i32>} : memref<1x16x32xbf16, #tpu.memory_space<vmem>>, vector<1x16x32xbf16>,
    return
  }
  func.func @transform_0(%arg0: i32, %arg1: i32, %arg2: i32, %arg3: i32) -> (i32, i32) {
    %c0_i32 = arith.constant 0 : i32
    return %arg0, %arg3 : i32, i32
  }
  func.func @transform_1(%arg0: i32, %arg1: i32, %arg2: i32, %arg3: i32) -> (i32, i32, i32) {
    %c0_i32 = arith.constant 0 : i32
    return %arg1, %arg3, %arg2 : i32, i32, i32
  }
  func.func @transform_2(%arg0: i32, %arg1: i32, %arg2: i32, %arg3: i32) -> (i32, i32, i32) {
    %c0_i32 = arith.constant 0 : i32
    %c0_i32_0 = arith.constant 0 : i32
    return %arg1, %c0_i32, %arg2 : i32, i32, i32
  }
  func.func @transform_3(%arg0: i32, %arg1: i32, %arg2: i32, %arg3: i32) -> (i32, i32) {
    %c0_i32 = arith.constant 0 : i32
    return %arg0, %arg2 : i32, i32
  }
  func.func @transform_4(%arg0: i32, %arg1: i32, %arg2: i32, %arg3: i32) -> (i32, i32, i32) {
    %c0_i32 = arith.constant 0 : i32
    return %arg1, %arg0, %arg2 : i32, i32, i32
  }
}

module attributes {stable_mosaic.version = 11 : i64} {
  func.func @_ffn_kernel(%arg0: i32, %arg1: memref<16x32xbf16, #tpu.memory_space<vmem>>, %arg2: memref<1x32xbf16, #tpu.memory_space<vmem>>, %arg3: memref<1x32xbf16, #tpu.memory_space<vmem>>, %arg4: memref<32x64xbf16, #tpu.memory_space<vmem>>, %arg5: memref<1x64xbf16, #tpu.memory_space<vmem>>, %arg6: memref<64x32xbf16, #tpu.memory_space<vmem>>, %arg7: memref<1x32xbf16, #tpu.memory_space<vmem>>, %arg8: memref<16x32xbf16, #tpu.memory_space<vmem>>, %arg9: memref<16x32xbf16, #tpu.memory_space<vmem>>) attributes {dimension_semantics = [#tpu.dimension_semantics<parallel>], iteration_bounds = array<i64: 1>, scalar_prefetch = 0 : i64, scratch_operands = 0 : i64, tpu.core_type = #tpu.core_type<tc>, window_params = [{transform_indices = @transform_0, window_bounds = array<i64: 16, 32>}, {pipeline_mode = #tpu.pipeline_mode<synchronous>, transform_indices = @transform_1, window_bounds = array<i64: 1, 32>}, {pipeline_mode = #tpu.pipeline_mode<synchronous>, transform_indices = @transform_2, window_bounds = array<i64: 1, 32>}, {pipeline_mode = #tpu.pipeline_mode<synchronous>, transform_indices = @transform_3, window_bounds = array<i64: 32, 64>}, {pipeline_mode = #tpu.pipeline_mode<synchronous>, transform_indices = @transform_4, window_bounds = array<i64: 1, 64>}, {pipeline_mode = #tpu.pipeline_mode<synchronous>, transform_indices = @transform_5, window_bounds = array<i64: 64, 32>}, {pipeline_mode = #tpu.pipeline_mode<synchronous>, transform_indices = @transform_6, window_bounds = array<i64: 1, 32>}, {transform_indices = @transform_7, window_bounds = array<i64: 16, 32>}, {transform_indices = @transform_8, window_bounds = array<i64: 16, 32>}]} {
    %c0 = arith.constant 0 : index
    %c0_0 = arith.constant 0 : index
    %0 = vector.load %arg1[%c0, %c0_0] : memref<16x32xbf16, #tpu.memory_space<vmem>>, vector<16x32xbf16>
    %1 = arith.extf %0 : vector<16x32xbf16> to vector<16x32xf32>
    %cst = arith.constant dense<0.000000e+00> : vector<16xf32>
    %2 = vector.multi_reduction <add>, %1, %cst [1] : vector<16x32xf32> to vector<16xf32>
    %3 = vector.shape_cast %2 : vector<16xf32> to vector<16x1xf32>
    %cst_1 = arith.constant 3.200000e+01 : f32
    %4 = vector.broadcast %cst_1 : f32 to vector<16x1xf32>
    %5 = arith.divf %3, %4 : vector<16x1xf32>
    %6 = vector.broadcast %5 : vector<16x1xf32> to vector<16x32xf32>
    %7 = arith.subf %1, %6 : vector<16x32xf32>
    %8 = arith.mulf %7, %7 : vector<16x32xf32>
    %cst_2 = arith.constant dense<0.000000e+00> : vector<16xf32>
    %9 = vector.multi_reduction <add>, %8, %cst_2 [1] : vector<16x32xf32> to vector<16xf32>
    %10 = vector.shape_cast %9 : vector<16xf32> to vector<16x1xf32>
    %cst_3 = arith.constant 3.200000e+01 : f32
    %11 = vector.broadcast %cst_3 : f32 to vector<16x1xf32>
    %12 = arith.divf %10, %11 : vector<16x1xf32>
    %cst_4 = arith.constant 9.99999974E-6 : f32
    %13 = vector.broadcast %cst_4 : f32 to vector<16x1xf32>
    %14 = arith.addf %12, %13 : vector<16x1xf32>
    %15 = math.rsqrt %14 : vector<16x1xf32>
    %16 = vector.broadcast %15 : vector<16x1xf32> to vector<16x32xf32>
    %17 = arith.mulf %7, %16 : vector<16x32xf32>
    %c0_5 = arith.constant 0 : index
    %c0_6 = arith.constant 0 : index
    %18 = vector.load %arg2[%c0_5, %c0_6] : memref<1x32xbf16, #tpu.memory_space<vmem>>, vector<1x32xbf16>
    %19 = arith.extf %18 : vector<1x32xbf16> to vector<1x32xf32>
    %20 = vector.broadcast %19 : vector<1x32xf32> to vector<16x32xf32>
    %21 = arith.mulf %17, %20 : vector<16x32xf32>
    %c0_7 = arith.constant 0 : index
    %c0_8 = arith.constant 0 : index
    %22 = vector.load %arg3[%c0_7, %c0_8] : memref<1x32xbf16, #tpu.memory_space<vmem>>, vector<1x32xbf16>
    %23 = arith.extf %22 : vector<1x32xbf16> to vector<1x32xf32>
    %24 = vector.broadcast %23 : vector<1x32xf32> to vector<16x32xf32>
    %25 = arith.addf %21, %24 : vector<16x32xf32>
    %26 = arith.truncf %25 : vector<16x32xf32> to vector<16x32xbf16>
    %c0_9 = arith.constant 0 : index
    %c0_10 = arith.constant 0 : index
    %27 = vector.load %arg4[%c0_9, %c0_10] : memref<32x64xbf16, #tpu.memory_space<vmem>>, vector<32x64xbf16>
    %cst_11 = arith.constant dense<0.000000e+00> : vector<16x64xf32>
    %28 = tpu.matmul %26, %27, %cst_11 {dimension_numbers = #tpu.dot_dimension_numbers<[1], [0], [0], [1], [0, 0, 1, 1], [], []>} : vector<16x32xbf16>, vector<32x64xbf16>, vector<16x64xf32> -> vector<16x64xf32>
    %c0_12 = arith.constant 0 : index
    %c0_13 = arith.constant 0 : index
    %29 = vector.load %arg5[%c0_12, %c0_13] : memref<1x64xbf16, #tpu.memory_space<vmem>>, vector<1x64xbf16>
    %30 = arith.extf %29 : vector<1x64xbf16> to vector<1x64xf32>
    %31 = vector.broadcast %30 : vector<1x64xf32> to vector<16x64xf32>
    %32 = arith.addf %28, %31 : vector<16x64xf32>
    %cst_14 = arith.constant 5.000000e-01 : f32
    %33 = vector.broadcast %cst_14 : f32 to vector<16x64xf32>
    %34 = arith.mulf %33, %32 : vector<16x64xf32>
    %cst_15 = arith.constant 0.707106769 : f32
    %35 = vector.broadcast %cst_15 : f32 to vector<16x64xf32>
    %36 = arith.mulf %32, %35 : vector<16x64xf32>
    %37 = math.erf %36 : vector<16x64xf32>
    %cst_16 = arith.constant 1.000000e+00 : f32
    %38 = vector.broadcast %cst_16 : f32 to vector<16x64xf32>
    %39 = arith.addf %38, %37 : vector<16x64xf32>
    %40 = arith.mulf %34, %39 : vector<16x64xf32>
    %41 = arith.truncf %40 : vector<16x64xf32> to vector<16x64xbf16>
    %c0_17 = arith.constant 0 : index
    %c0_18 = arith.constant 0 : index
    %42 = vector.load %arg6[%c0_17, %c0_18] : memref<64x32xbf16, #tpu.memory_space<vmem>>, vector<64x32xbf16>
    %cst_19 = arith.constant dense<0.000000e+00> : vector<16x32xf32>
    %43 = tpu.matmul %41, %42, %cst_19 {dimension_numbers = #tpu.dot_dimension_numbers<[1], [0], [0], [1], [0, 0, 1, 1], [], []>} : vector<16x64xbf16>, vector<64x32xbf16>, vector<16x32xf32> -> vector<16x32xf32>
    %c0_20 = arith.constant 0 : index
    %c0_21 = arith.constant 0 : index
    %44 = vector.load %arg7[%c0_20, %c0_21] : memref<1x32xbf16, #tpu.memory_space<vmem>>, vector<1x32xbf16>
    %45 = arith.extf %44 : vector<1x32xbf16> to vector<1x32xf32>
    %46 = vector.broadcast %45 : vector<1x32xf32> to vector<16x32xf32>
    %47 = arith.addf %43, %46 : vector<16x32xf32>
    %c0_22 = arith.constant 0 : index
    %c0_23 = arith.constant 0 : index
    %48 = vector.load %arg8[%c0_22, %c0_23] : memref<16x32xbf16, #tpu.memory_space<vmem>>, vector<16x32xbf16>
    %49 = arith.extf %48 : vector<16x32xbf16> to vector<16x32xf32>
    %50 = arith.addf %47, %49 : vector<16x32xf32>
    %51 = arith.truncf %50 : vector<16x32xf32> to vector<16x32xbf16>
    %c0_24 = arith.constant 0 : index
    %c0_25 = arith.constant 0 : index
    %52 = vector.load %arg9[%c0_24, %c0_25] : memref<16x32xbf16, #tpu.memory_space<vmem>>, vector<16x32xbf16>
    tpu.vector_store %arg9[%c0_24, %c0_25], %51 {strides = array<i32>} : memref<16x32xbf16, #tpu.memory_space<vmem>>, vector<16x32xbf16>,
    return
  }
  func.func @transform_0(%arg0: i32) -> (i32, i32) {
    %c0_i32 = arith.constant 0 : i32
    %c0_i32_0 = arith.constant 0 : i32
    return %arg0, %c0_i32 : i32, i32
  }
  func.func @transform_1(%arg0: i32) -> (i32, i32) {
    %c0_i32 = arith.constant 0 : i32
    %c0_i32_0 = arith.constant 0 : i32
    %c0_i32_1 = arith.constant 0 : i32
    return %c0_i32, %c0_i32_0 : i32, i32
  }
  func.func @transform_2(%arg0: i32) -> (i32, i32) {
    %c0_i32 = arith.constant 0 : i32
    %c0_i32_0 = arith.constant 0 : i32
    %c0_i32_1 = arith.constant 0 : i32
    return %c0_i32, %c0_i32_0 : i32, i32
  }
  func.func @transform_3(%arg0: i32) -> (i32, i32) {
    %c0_i32 = arith.constant 0 : i32
    %c0_i32_0 = arith.constant 0 : i32
    %c0_i32_1 = arith.constant 0 : i32
    return %c0_i32, %c0_i32_0 : i32, i32
  }
  func.func @transform_4(%arg0: i32) -> (i32, i32) {
    %c0_i32 = arith.constant 0 : i32
    %c0_i32_0 = arith.constant 0 : i32
    %c0_i32_1 = arith.constant 0 : i32
    return %c0_i32, %c0_i32_0 : i32, i32
  }
  func.func @transform_5(%arg0: i32) -> (i32, i32) {
    %c0_i32 = arith.constant 0 : i32
    %c0_i32_0 = arith.constant 0 : i32
    %c0_i32_1 = arith.constant 0 : i32
    return %c0_i32, %c0_i32_0 : i32, i32
  }
  func.func @transform_6(%arg0: i32) -> (i32, i32) {
    %c0_i32 = arith.constant 0 : i32
    %c0_i32_0 = arith.constant 0 : i32
    %c0_i32_1 = arith.constant 0 : i32
    return %c0_i32, %c0_i32_0 : i32, i32
  }
  func.func @transform_7(%arg0: i32) -> (i32, i32) {
    %c0_i32 = arith.constant 0 : i32
    %c0_i32_0 = arith.constant 0 : i32
    return %arg0, %c0_i32 : i32, i32
  }
  func.func @transform_8(%arg0: i32) -> (i32, i32) {
    %c0_i32 = arith.constant 0 : i32
    %c0_i32_0 = arith.constant 0 : i32
    return %arg0, %c0_i32 : i32, i32
  }
}

module attributes {stable_mosaic.version = 11 : i64} {
  func.func @_ffn_kernel(%arg0: i32, %arg1: memref<16x32xbf16, #tpu.memory_space<vmem>>, %arg2: memref<1x32xbf16, #tpu.memory_space<vmem>>, %arg3: memref<1x32xbf16, #tpu.memory_space<vmem>>, %arg4: memref<32x64xbf16, #tpu.memory_space<vmem>>, %arg5: memref<1x64xbf16, #tpu.memory_space<vmem>>, %arg6: memref<64x32xbf16, #tpu.memory_space<vmem>>, %arg7: memref<1x32xbf16, #tpu.memory_space<vmem>>, %arg8: memref<16x32xbf16, #tpu.memory_space<vmem>>, %arg9: memref<16x32xbf16, #tpu.memory_space<vmem>>) attributes {dimension_semantics = [#tpu.dimension_semantics<parallel>], iteration_bounds = array<i64: 1>, scalar_prefetch = 0 : i64, scratch_operands = 0 : i64, tpu.core_type = #tpu.core_type<tc>, window_params = [{transform_indices = @transform_0, window_bounds = array<i64: 16, 32>}, {pipeline_mode = #tpu.pipeline_mode<synchronous>, transform_indices = @transform_1, window_bounds = array<i64: 1, 32>}, {pipeline_mode = #tpu.pipeline_mode<synchronous>, transform_indices = @transform_2, window_bounds = array<i64: 1, 32>}, {pipeline_mode = #tpu.pipeline_mode<synchronous>, transform_indices = @transform_3, window_bounds = array<i64: 32, 64>}, {pipeline_mode = #tpu.pipeline_mode<synchronous>, transform_indices = @transform_4, window_bounds = array<i64: 1, 64>}, {pipeline_mode = #tpu.pipeline_mode<synchronous>, transform_indices = @transform_5, window_bounds = array<i64: 64, 32>}, {pipeline_mode = #tpu.pipeline_mode<synchronous>, transform_indices = @transform_6, window_bounds = array<i64: 1, 32>}, {transform_indices = @transform_7, window_bounds = array<i64: 16, 32>}, {transform_indices = @transform_8, window_bounds = array<i64: 16, 32>}]} {
    %c0 = arith.constant 0 : index
    %c0_0 = arith.constant 0 : index
    %0 = vector.load %arg1[%c0, %c0_0] : memref<16x32xbf16, #tpu.memory_space<vmem>>, vector<16x32xbf16>
    %1 = arith.extf %0 : vector<16x32xbf16> to vector<16x32xf32>
    %cst = arith.constant dense<0.000000e+00> : vector<16xf32>
    %2 = vector.multi_reduction <add>, %1, %cst [1] : vector<16x32xf32> to vector<16xf32>
    %3 = vector.shape_cast %2 : vector<16xf32> to vector<16x1xf32>
    %cst_1 = arith.constant 3.200000e+01 : f32
    %4 = vector.broadcast %cst_1 : f32 to vector<16x1xf32>
    %5 = arith.divf %3, %4 : vector<16x1xf32>
    %6 = vector.broadcast %5 : vector<16x1xf32> to vector<16x32xf32>
    %7 = arith.subf %1, %6 : vector<16x32xf32>
    %8 = arith.mulf %7, %7 : vector<16x32xf32>
    %cst_2 = arith.constant dense<0.000000e+00> : vector<16xf32>
    %9 = vector.multi_reduction <add>, %8, %cst_2 [1] : vector<16x32xf32> to vector<16xf32>
    %10 = vector.shape_cast %9 : vector<16xf32> to vector<16x1xf32>
    %cst_3 = arith.constant 3.200000e+01 : f32
    %11 = vector.broadcast %cst_3 : f32 to vector<16x1xf32>
    %12 = arith.divf %10, %11 : vector<16x1xf32>
    %cst_4 = arith.constant 9.99999974E-6 : f32
    %13 = vector.broadcast %cst_4 : f32 to vector<16x1xf32>
    %14 = arith.addf %12, %13 : vector<16x1xf32>
    %15 = math.rsqrt %14 : vector<16x1xf32>
    %16 = vector.broadcast %15 : vector<16x1xf32> to vector<16x32xf32>
    %17 = arith.mulf %7, %16 : vector<16x32xf32>
    %c0_5 = arith.constant 0 : index
    %c0_6 = arith.constant 0 : index
    %18 = vector.load %arg2[%c0_5, %c0_6] : memref<1x32xbf16, #tpu.memory_space<vmem>>, vector<1x32xbf16>
    %19 = arith.extf %18 : vector<1x32xbf16> to vector<1x32xf32>
    %20 = vector.broadcast %19 : vector<1x32xf32> to vector<16x32xf32>
    %21 = arith.mulf %17, %20 : vector<16x32xf32>
    %c0_7 = arith.constant 0 : index
    %c0_8 = arith.constant 0 : index
    %22 = vector.load %arg3[%c0_7, %c0_8] : memref<1x32xbf16, #tpu.memory_space<vmem>>, vector<1x32xbf16>
    %23 = arith.extf %22 : vector<1x32xbf16> to vector<1x32xf32>
    %24 = vector.broadcast %23 : vector<1x32xf32> to vector<16x32xf32>
    %25 = arith.addf %21, %24 : vector<16x32xf32>
    %26 = arith.truncf %25 : vector<16x32xf32> to vector<16x32xbf16>
    %c0_9 = arith.constant 0 : index
    %c0_10 = arith.constant 0 : index
    %27 = vector.load %arg4[%c0_9, %c0_10] : memref<32x64xbf16, #tpu.memory_space<vmem>>, vector<32x64xbf16>
    %cst_11 = arith.constant dense<0.000000e+00> : vector<16x64xf32>
    %28 = tpu.matmul %26, %27, %cst_11 {dimension_numbers = #tpu.dot_dimension_numbers<[1], [0], [0], [1], [0, 0, 1, 1], [], []>} : vector<16x32xbf16>, vector<32x64xbf16>, vector<16x64xf32> -> vector<16x64xf32>
    %c0_12 = arith.constant 0 : index
    %c0_13 = arith.constant 0 : index
    %29 = vector.load %arg5[%c0_12, %c0_13] : memref<1x64xbf16, #tpu.memory_space<vmem>>, vector<1x64xbf16>
    %30 = arith.extf %29 : vector<1x64xbf16> to vector<1x64xf32>
    %31 = vector.broadcast %30 : vector<1x64xf32> to vector<16x64xf32>
    %32 = arith.addf %28, %31 : vector<16x64xf32>
    %cst_14 = arith.constant 5.000000e-01 : f32
    %33 = vector.broadcast %cst_14 : f32 to vector<16x64xf32>
    %34 = arith.mulf %33, %32 : vector<16x64xf32>
    %cst_15 = arith.constant 0.707106769 : f32
    %35 = vector.broadcast %cst_15 : f32 to vector<16x64xf32>
    %36 = arith.mulf %32, %35 : vector<16x64xf32>
    %37 = math.erf %36 : vector<16x64xf32>
    %cst_16 = arith.constant 1.000000e+00 : f32
    %38 = vector.broadcast %cst_16 : f32 to vector<16x64xf32>
    %39 = arith.addf %38, %37 : vector<16x64xf32>
    %40 = arith.mulf %34, %39 : vector<16x64xf32>
    %41 = arith.truncf %40 : vector<16x64xf32> to vector<16x64xbf16>
    %c0_17 = arith.constant 0 : index
    %c0_18 = arith.constant 0 : index
    %42 = vector.load %arg6[%c0_17, %c0_18] : memref<64x32xbf16, #tpu.memory_space<vmem>>, vector<64x32xbf16>
    %cst_19 = arith.constant dense<0.000000e+00> : vector<16x32xf32>
    %43 = tpu.matmul %41, %42, %cst_19 {dimension_numbers = #tpu.dot_dimension_numbers<[1], [0], [0], [1], [0, 0, 1, 1], [], []>} : vector<16x64xbf16>, vector<64x32xbf16>, vector<16x32xf32> -> vector<16x32xf32>
    %c0_20 = arith.constant 0 : index
    %c0_21 = arith.constant 0 : index
    %44 = vector.load %arg7[%c0_20, %c0_21] : memref<1x32xbf16, #tpu.memory_space<vmem>>, vector<1x32xbf16>
    %45 = arith.extf %44 : vector<1x32xbf16> to vector<1x32xf32>
    %46 = vector.broadcast %45 : vector<1x32xf32> to vector<16x32xf32>
    %47 = arith.addf %43, %46 : vector<16x32xf32>
    %c0_22 = arith.constant 0 : index
    %c0_23 = arith.constant 0 : index
    %48 = vector.load %arg8[%c0_22, %c0_23] : memref<16x32xbf16, #tpu.memory_space<vmem>>, vector<16x32xbf16>
    %49 = arith.extf %48 : vector<16x32xbf16> to vector<16x32xf32>
    %50 = arith.addf %47, %49 : vector<16x32xf32>
    %51 = arith.truncf %50 : vector<16x32xf32> to vector<16x32xbf16>
    %c0_24 = arith.constant 0 : index
    %c0_25 = arith.constant 0 : index
    %52 = vector.load %arg9[%c0_24, %c0_25] : memref<16x32xbf16, #tpu.memory_space<vmem>>, vector<16x32xbf16>
    tpu.vector_store %arg9[%c0_24, %c0_25], %51 {strides = array<i32>} : memref<16x32xbf16, #tpu.memory_space<vmem>>, vector<16x32xbf16>,
    return
  }
  func.func @transform_0(%arg0: i32) -> (i32, i32) {
    %c0_i32 = arith.constant 0 : i32
    %c0_i32_0 = arith.constant 0 : i32
    return %arg0, %c0_i32 : i32, i32
  }
  func.func @transform_1(%arg0: i32) -> (i32, i32) {
    %c0_i32 = arith.constant 0 : i32
    %c0_i32_0 = arith.constant 0 : i32
    %c0_i32_1 = arith.constant 0 : i32
    return %c0_i32, %c0_i32_0 : i32, i32
  }
  func.func @transform_2(%arg0: i32) -> (i32, i32) {
    %c0_i32 = arith.constant 0 : i32
    %c0_i32_0 = arith.constant 0 : i32
    %c0_i32_1 = arith.constant 0 : i32
    return %c0_i32, %c0_i32_0 : i32, i32
  }
  func.func @transform_3(%arg0: i32) -> (i32, i32) {
    %c0_i32 = arith.constant 0 : i32
    %c0_i32_0 = arith.constant 0 : i32
    %c0_i32_1 = arith.constant 0 : i32
    return %c0_i32, %c0_i32_0 : i32, i32
  }
  func.func @transform_4(%arg0: i32) -> (i32, i32) {
    %c0_i32 = arith.constant 0 : i32
    %c0_i32_0 = arith.constant 0 : i32
    %c0_i32_1 = arith.constant 0 : i32
    return %c0_i32, %c0_i32_0 : i32, i32
  }
  func.func @transform_5(%arg0: i32) -> (i32, i32) {
    %c0_i32 = arith.constant 0 : i32
    %c0_i32_0 = arith.constant 0 : i32
    %c0_i32_1 = arith.constant 0 : i32
    return %c0_i32, %c0_i32_0 : i32, i32
  }
  func.func @transform_6(%arg0: i32) -> (i32, i32) {
    %c0_i32 = arith.constant 0 : i32
    %c0_i32_0 = arith.constant 0 : i32
    %c0_i32_1 = arith.constant 0 : i32
    return %c0_i32, %c0_i32_0 : i32, i32
  }
  func.func @transform_7(%arg0: i32) -> (i32, i32) {
    %c0_i32 = arith.constant 0 : i32
    %c0_i32_0 = arith.constant 0 : i32
    return %arg0, %c0_i32 : i32, i32
  }
  func.func @transform_8(%arg0: i32) -> (i32, i32) {
    %c0_i32 = arith.constant 0 : i32
    %c0_i32_0 = arith.constant 0 : i32
    return %arg0, %c0_i32 : i32, i32
  }
}

module attributes {stable_mosaic.version = 11 : i64} {
  func.func @_mm_kernel(%arg0: i32, %arg1: i32, %arg2: i32, %arg3: i32, %arg4: memref<32x32xbf16, #tpu.memory_space<vmem>>, %arg5: memref<1x32xbf16, #tpu.memory_space<vmem>>, %arg6: memref<1x32xbf16, #tpu.memory_space<vmem>>, %arg7: memref<1x32x128xbf16, #tpu.memory_space<vmem>>, %arg8: memref<1x1x128xbf16, #tpu.memory_space<vmem>>, %arg9: memref<1x32x128xbf16, #tpu.memory_space<vmem>>, %arg10: memref<32x32xbf16, #tpu.memory_space<vmem>>) attributes {dimension_semantics = [#tpu.dimension_semantics<parallel>, #tpu.dimension_semantics<arbitrary>, #tpu.dimension_semantics<arbitrary>, #tpu.dimension_semantics<arbitrary>], iteration_bounds = array<i64: 1, 1, 1, 1>, scalar_prefetch = 0 : i64, scratch_operands = 1 : i64, tpu.core_type = #tpu.core_type<tc>, window_params = [{transform_indices = @transform_0, window_bounds = array<i64: 32, 32>}, {pipeline_mode = #tpu.pipeline_mode<synchronous>, transform_indices = @transform_1, window_bounds = array<i64: 1, 32>}, {pipeline_mode = #tpu.pipeline_mode<synchronous>, transform_indices = @transform_2, window_bounds = array<i64: 1, 32>}, {transform_indices = @transform_3, window_bounds = array<i64: 1, 32, 128>}, {transform_indices = @transform_4, window_bounds = array<i64: 1, 1, 128>}, {transform_indices = @transform_5, window_bounds = array<i64: 1, 32, 128>}]} {
    %c0_i32 = arith.constant 0 : i32
    %0 = arith.cmpi eq, %arg1, %c0_i32 : i32
    %c0_i32_0 = arith.constant 0 : i32
    %1 = arith.cmpi eq, %arg2, %c0_i32_0 : i32
    %2 = arith.andi %0, %1 : i1
    %c0_i32_1 = arith.constant 0 : i32
    %3 = arith.cmpi eq, %arg3, %c0_i32_1 : i32
    %4 = arith.andi %2, %3 : i1
    %5 = arith.extui %4 : i1 to i32
    %c0_i32_2 = arith.constant 0 : i32
    %6 = arith.cmpi ne, %5, %c0_i32_2 : i32
    scf.if %6 {
      %c0_13 = arith.constant 0 : index
      %c0_14 = arith.constant 0 : index
      %20 = vector.load %arg4[%c0_13, %c0_14] : memref<32x32xbf16, #tpu.memory_space<vmem>>, vector<32x32xbf16>
      %21 = arith.extf %20 : vector<32x32xbf16> to vector<32x32xf32>
      %cst_15 = arith.constant dense<0.000000e+00> : vector<32xf32>
      %22 = vector.multi_reduction <add>, %21, %cst_15 [1] : vector<32x32xf32> to vector<32xf32>
      %23 = vector.shape_cast %22 : vector<32xf32> to vector<32x1xf32>
      %cst_16 = arith.constant 3.200000e+01 : f32
      %24 = vector.broadcast %cst_16 : f32 to vector<32x1xf32>
      %25 = arith.divf %23, %24 : vector<32x1xf32>
      %26 = vector.broadcast %25 : vector<32x1xf32> to vector<32x32xf32>
      %27 = arith.subf %21, %26 : vector<32x32xf32>
      %28 = arith.mulf %27, %27 : vector<32x32xf32>
      %cst_17 = arith.constant dense<0.000000e+00> : vector<32xf32>
      %29 = vector.multi_reduction <add>, %28, %cst_17 [1] : vector<32x32xf32> to vector<32xf32>
      %30 = vector.shape_cast %29 : vector<32xf32> to vector<32x1xf32>
      %cst_18 = arith.constant 3.200000e+01 : f32
      %31 = vector.broadcast %cst_18 : f32 to vector<32x1xf32>
      %32 = arith.divf %30, %31 : vector<32x1xf32>
      %cst_19 = arith.constant 9.99999974E-6 : f32
      %33 = vector.broadcast %cst_19 : f32 to vector<32x1xf32>
      %34 = arith.addf %32, %33 : vector<32x1xf32>
      %35 = math.rsqrt %34 : vector<32x1xf32>
      %36 = vector.broadcast %35 : vector<32x1xf32> to vector<32x32xf32>
      %37 = arith.mulf %27, %36 : vector<32x32xf32>
      %c0_20 = arith.constant 0 : index
      %c0_21 = arith.constant 0 : index
      %38 = vector.load %arg5[%c0_20, %c0_21] : memref<1x32xbf16, #tpu.memory_space<vmem>>, vector<1x32xbf16>
      %39 = arith.extf %38 : vector<1x32xbf16> to vector<1x32xf32>
      %40 = vector.broadcast %39 : vector<1x32xf32> to vector<32x32xf32>
      %41 = arith.mulf %37, %40 : vector<32x32xf32>
      %c0_22 = arith.constant 0 : index
      %c0_23 = arith.constant 0 : index
      %42 = vector.load %arg6[%c0_22, %c0_23] : memref<1x32xbf16, #tpu.memory_space<vmem>>, vector<1x32xbf16>
      %43 = arith.extf %42 : vector<1x32xbf16> to vector<1x32xf32>
      %44 = vector.broadcast %43 : vector<1x32xf32> to vector<32x32xf32>
      %45 = arith.addf %41, %44 : vector<32x32xf32>
      %46 = arith.truncf %45 : vector<32x32xf32> to vector<32x32xbf16>
      %c0_24 = arith.constant 0 : index
      %c0_25 = arith.constant 0 : index
      %47 = vector.load %arg10[%c0_24, %c0_25] : memref<32x32xbf16, #tpu.memory_space<vmem>>, vector<32x32xbf16>
      tpu.vector_store %arg10[%c0_24, %c0_25], %46 {strides = array<i32>} : memref<32x32xbf16, #tpu.memory_space<vmem>>, vector<32x32xbf16>,
    } else {
    }
    %c0 = arith.constant 0 : index
    %c0_3 = arith.constant 0 : index
    %7 = vector.load %arg10[%c0, %c0_3] : memref<32x32xbf16, #tpu.memory_space<vmem>>, vector<32x32xbf16>
    %c0_4 = arith.constant 0 : index
    %c0_5 = arith.constant 0 : index
    %c0_6 = arith.constant 0 : index
    %8 = vector.load %arg7[%c0_4, %c0_5, %c0_6] : memref<1x32x128xbf16, #tpu.memory_space<vmem>>, vector<1x32x128xbf16>
    %9 = vector.shape_cast %8 : vector<1x32x128xbf16> to vector<32x128xbf16>
    %cst = arith.constant dense<0.000000e+00> : vector<32x128xf32>
    %10 = tpu.matmul %7, %9, %cst {dimension_numbers = #tpu.dot_dimension_numbers<[1], [0], [0], [1], [0, 0, 1, 1], [], []>} : vector<32x32xbf16>, vector<32x128xbf16>, vector<32x128xf32> -> vector<32x128xf32>
    %c0_7 = arith.constant 0 : index
    %c0_8 = arith.constant 0 : index
    %c0_9 = arith.constant 0 : index
    %11 = vector.load %arg8[%c0_7, %c0_8, %c0_9] : memref<1x1x128xbf16, #tpu.memory_space<vmem>>, vector<1x1x128xbf16>
    %12 = vector.shape_cast %11 : vector<1x1x128xbf16> to vector<1x128xbf16>
    %13 = arith.extf %12 : vector<1x128xbf16> to vector<1x128xf32>
    %14 = vector.broadcast %13 : vector<1x128xf32> to vector<32x128xf32>
    %15 = arith.addf %10, %14 : vector<32x128xf32>
    %16 = arith.truncf %15 : vector<32x128xf32> to vector<32x128xbf16>
    %c0_10 = arith.constant 0 : index
    %c0_11 = arith.constant 0 : index
    %c0_12 = arith.constant 0 : index
    %17 = vector.load %arg9[%c0_10, %c0_11, %c0_12] : memref<1x32x128xbf16, #tpu.memory_space<vmem>>, vector<1x32x128xbf16>
    %18 = vector.shape_cast %17 : vector<1x32x128xbf16> to vector<32x128xbf16>
    %19 = vector.shape_cast %16 : vector<32x128xbf16> to vector<1x32x128xbf16>
    tpu.vector_store %arg9[%c0_10, %c0_11, %c0_12], %19 {strides = array<i32>} : memref<1x32x128xbf16, #tpu.memory_space<vmem>>, vector<1x32x128xbf16>,
    return
  }
  func.func @transform_0(%arg0: i32, %arg1: i32, %arg2: i32, %arg3: i32) -> (i32, i32) {
    %c0_i32 = arith.constant 0 : i32
    return %arg0, %arg3 : i32, i32
  }
  func.func @transform_1(%arg0: i32, %arg1: i32, %arg2: i32, %arg3: i32) -> (i32, i32) {
    %c0_i32 = arith.constant 0 : i32
    %c0_i32_0 = arith.constant 0 : i32
    %c0_i32_1 = arith.constant 0 : i32
    return %c0_i32, %c0_i32_0 : i32, i32
  }
  func.func @transform_2(%arg0: i32, %arg1: i32, %arg2: i32, %arg3: i32) -> (i32, i32) {
    %c0_i32 = arith.constant 0 : i32
    %c0_i32_0 = arith.constant 0 : i32
    %c0_i32_1 = arith.constant 0 : i32
    return %c0_i32, %c0_i32_0 : i32, i32
  }
  func.func @transform_3(%arg0: i32, %arg1: i32, %arg2: i32, %arg3: i32) -> (i32, i32, i32) {
    %c0_i32 = arith.constant 0 : i32
    return %arg1, %arg3, %arg2 : i32, i32, i32
  }
  func.func @transform_4(%arg0: i32, %arg1: i32, %arg2: i32, %arg3: i32) -> (i32, i32, i32) {
    %c0_i32 = arith.constant 0 : i32
    %c0_i32_0 = arith.constant 0 : i32
    return %arg1, %c0_i32, %arg2 : i32, i32, i32
  }
  func.func @transform_5(%arg0: i32, %arg1: i32, %arg2: i32, %arg3: i32) -> (i32, i32, i32) {
    %c0_i32 = arith.constant 0 : i32
    return %arg1, %arg0, %arg2 : i32, i32, i32
  }
}

</mosaic_0001>

<bundles_post_ra>
// kernel: _lambda_.64
= control target key start
LH: loop header
LB: loop body
LE: loop exit
PB: predicated region body
PF: predicated region fallthrough
CT: control target
= control target key end

     0   :  { %s631_s12 = smov 0   ;;  %s633_s13 = smov 0   ;;  %s670_s0 = inlined_call_operand.vmem [shape: bf16[16,32], index: 0, kind: input, shape index: {}]   ;;  %s671_s1 = inlined_call_operand.vmem [shape: bf16[3,32,32], index: 1, kind: input, shape index: {}]   ;;  %s672_s2 = inlined_call_operand.vmem [shape: bf16[3,1,32], index: 2, kind: input, shape index: {}]   ;;  %s673_s3 = inlined_call_operand.vmem [shape: bf16[3,16,32], index: 3, kind: output, shape index: {}]  }
   0x1   :  { %s635_s14 = smov 0  }
   0x2 LB: > { %s35_s15 = sadd.s32 1, %s603_s13  ;;  %p528_p0 = scmp.ge.s32.totalorder %s607_s14, 1  ;;  %s607_s14 = sphi %s635_s14, %s13_s14   ;;  %s603_s13 = sphi %s633_s13, %s675_s13   ;;  %s599_s12 = sphi %s631_s12, %s674_s12  }
   0x3   : > { %p37_p1 = scmp.ge.s32.totalorder %s35_s15, 3  ;;  %p208_p2 = scmp.lt.s32.totalorder %s607_s14, 4 }
   0x5   : > { %s677_s15 = smov (%p37_p1, %s35_s15), 0  ;;  %p209_p3 = pnand %p528_p0, %p208_p2 }
   0x6   : > { %p270_p4 = scmp.lt.s32.totalorder (!%p209_p3), %s599_s12, 2  ;;  %v609_v0 = vmov (!%p209_p3), 0.0   ;;  %vm610_vm0 = vmmov (!%p209_p3), 0   ;;  %v584_v3 = vld [vmem:[%s670_s0] sm:$0xff] (!%p209_p3)   ;;  %vm331_vm1 = vcmask (!%p209_p3), 261120   ;;  %v310_v4 = vlaneseq (!%p209_p3) }
   0x7   : > { %212 = sbr.rel (%p209_p3) target bundleno = 244 (0xf4), region = 32  ;;  %548 = vmatprep.subr.bf16.mxu0 (!%p209_p3), %v609_v0  ;;  %552 = vmatprep.mubr.msk.bf16.mxu0 (!%p209_p3), %vm610_vm0, %v609_v0  ;;  %vm384_vm2 = vcmask (!%p209_p3), 257024  }
   0x8   : > { %v311_v5 = vshrl.u32 (!%p209_p3), %v310_v4, 7 }
   0xa   : > { %v312_v8 = vsub.s32 (!%p209_p3), 0, %v311_v5 }
   0xe   : > { %s679_s12 = smov (!%p270_p4, %s599_s12), 2 }
   0xf   : > { %s541_s16 = sshll.u32 %s679_s12, 4  ;;  %s287_s24 = scalar_lea.vmem %s672_s2, %s679_s12 }
  0x10   : > { %s280_s19 = scalar_lea.vmem %s671_s1, %s541_s16  ;;  %v308_v6 = vld [vmem:[%s287_s24] sm:$0x1]  ;;  %s542_s25 = sshll.u32 %s679_s12, 3 }
  0x11   : > { %v582_v1 = vld [vmem:[%s280_s19] sm:$0xff]   ;;  %v583_v2 = vld [vmem:[%s280_s19 + $0x8] sm:$0xff]   ;;  %v309_v7 = vunpack.c.l.bf16 %v308_v6  ;;  %s299_s28 = scalar_lea.vmem %s673_s3, %s542_s25 }
  0x12   : > { %549 = vmatpush3.bf16.msra.mxu0 %v582_v1 }
  0x13   : > { %550 = vmatprep.subr.bf16.mxu0 %v609_v0  ;;  %v313_v9 = vrot.slane %v309_v7, %v312_v8 }
  0x16   : > { %551 = vmatpush3.bf16.msra.mxu0 %v583_v2 }
  0x19   : > { %553 = vmatmul.mubr.msk.bf16.vlgmr.msra.gmra.mrb[0].mxu0 %vm331_vm1, %v584_v3 }
  0xec   : > { %v369_v10 = vpop.f32.mrb[0].mxu0 }
  0xed   : > { %v370_v11 = vadd.f32 %v369_v10, %v313_v9  ;;  %v554_v12 = vpop.f32.mrb[1].mxu0 }
  0xee   : > { %v372_v13 = vpop.f32.mrb[2].mxu0 }
  0xef   : > { %v543_v14 = vpack.c.bf16 %v370_v11, %v370_v11  ;;  %v373_v15 = vadd.f32 %v372_v13, %v313_v9  ;;  %v555_v16 = vpop.f32.mrb[3].mxu0 }
  0xf1   : > { %385 = vst.msk [vmem:[%s299_s28] sm:$0xf] %vm384_vm2, %v543_v14  ;;  %v544_v17 = vpack.c.bf16 %v373_v15, %v373_v15 }
  0xf3   : > { %386 = vst.msk [vmem:[%s299_s28 + $0x4] sm:$0xf] %vm384_vm2, %v544_v17 }
  0xf4 PF: > { %s13_s14 = sadd.s32 1, %s607_s14   ;;  %s674_s12 = smov %s603_s13 }
  0xf5   : > { %p10_p5 = scmp.ge.s32.totalorder %s13_s14, 5   ;;  %s675_s13 = smov %s677_s15 }
  0xf7   :  { %12 = sbr.rel (!%p10_p5) target bundleno = 2 (0x2), region = 68 }

// kernel: _lambda_.63
= control target key start
LH: loop header
LB: loop body
LE: loop exit
PB: predicated region body
PF: predicated region fallthrough
CT: control target
= control target key end

     0   :  { %8 = vsyncpa [#allocation3], 0  ;;  %s156_s12 = smov [#allocation2]   ;;  %s203_s0 = inlined_call_operand.vmem [shape: bf16[16,12], index: 0, kind: input, shape index: {}]   ;;  %s204_s1 = inlined_call_operand.vmem [shape: bf16[1,12,32], index: 1, kind: input, shape index: {}]   ;;  %s205_s2 = inlined_call_operand.hbm [shape: bf16[1,1,32], index: 2, kind: input, shape index: {}]   ;;  %s206_s3 = inlined_call_operand.vmem [shape: bf16[1,16,32], index: 3, kind: output, shape index: {}]  }
   0x1   :  { %s19_s13 = sshll.u32 %s156_s12, 4  ;;  %s132_s16 = scalar_lea.hbm %s205_s2, 16  ;;  %s20_s13 = int_to_ptr.vmem [resolvable:$true] %s19_s13 }
   0x2   :  { %p133_p0 = scmp.ne.s32.totalorder %s205_s2, %s132_s16  ;;  %p136_p1 = scmp.lt.u32.totalorder %s132_s16, %s205_s2 }
   0x4   :  { %p138_p2 = pnand %p136_p1, %p133_p0 }
   0x6   :  { %141 = shalt.err (!%p138_p2)
}
   0x7   :  { %s142_s21 = scalar_lea.vmem %s20_s13, 16  ;;  %s146_s22 = scalar_lea.vmem %s20_s13, 32 }
   0x8   :  { %p143_p3 = scmp.ne.s32.totalorder %s20_s13, %s142_s21  ;;  %p147_p4 = scmp.lt.s32.totalorder %s20_s13, %s20_s13 }
   0x9   :  { %p148_p5 = scmp.lt.s32.totalorder %s146_s22, %s142_s21 }
   0xb   :  { %p149_p6 = por %p148_p5, %p147_p4 }
   0xd   :  { %p150_p7 = pnand %p149_p6, %p143_p3 }
   0xf   :  { %153 = shalt.err (!%p150_p7)
}
  0x10   :  { %22 = dma.hbm_to_vmem [thread:$0]  %s205_s2, 16, %s20_s13, [#allocation3]  }
  0x11   :  { %154 = dma.done.wait [#allocation3], 16  }
  0x12   :  { %155 = vsyncadd [#allocation3], 4294967280  ;;  %v157_v0 = vmov 0.0   ;;  %vm158_vm0 = vmmov 0   ;;  %vm51_vm1 = vcmask 1045504   ;;  %v131_v3 = vld [vmem:[%s203_s0] sm:$0xff]   ;;  %v33_v4 = vlaneseq }
  0x13   :  { %121 = vmatprep.subr.bf16.mxu0 %v157_v0  ;;  %123 = vmatprep.mubr.msk.bf16.mxu0 %vm158_vm0, %v157_v0  ;;  %v130_v1 = vld [vmem:[%s204_s1] sm:$0x3f]   ;;  %vm47_vm2 = vcmask 97280   ;;  %vm104_vm3 = vcmask 257024  }
  0x14   :  { %v53_v2 = vsel %vm51_vm1, %v130_v1, 0  ;;  %v34_v5 = vshrl.u32 %v33_v4, 7  ;;  %v31_v6 = vld [vmem:[#allocation2] sm:$0x1] }
  0x15   :  { %122 = vmatpush3.bf16.msra.mxu0 %v53_v2  ;;  %v32_v7 = vunpack.c.l.bf16 %v31_v6 }
  0x16   :  { %v35_v8 = vsub.s32 0, %v34_v5 }
  0x18   :  { %124 = vmatmul.mubr.msk.bf16.vlgmr.msra.gmra.mrb[0].mxu0 %vm47_vm2, %v131_v3  ;;  %v36_v9 = vrot.slane %v32_v7, %v35_v8 }
  0xeb   :  { %v89_v10 = vpop.f32.mrb[0].mxu0 }
  0xec   :  { %v90_v11 = vadd.f32 %v89_v10, %v36_v9  ;;  %v125_v12 = vpop.f32.mrb[1].mxu0 }
  0xed   :  { %v92_v13 = vpop.f32.mrb[2].mxu0 }
  0xee   :  { %v117_v14 = vpack.c.bf16 %v90_v11, %v90_v11  ;;  %v93_v15 = vadd.f32 %v92_v13, %v36_v9  ;;  %v126_v16 = vpop.f32.mrb[3].mxu0 }
  0xf0   :  { %105 = vst.msk [vmem:[%s206_s3] sm:$0xf] %vm104_vm3, %v117_v14  ;;  %v118_v17 = vpack.c.bf16 %v93_v15, %v93_v15 }
  0xf2   :  { %106 = vst.msk [vmem:[%s206_s3 + $0x4] sm:$0xf] %vm104_vm3, %v118_v17 }
  0xf3   :  { %111 = vsyncpa [#allocation3], 1 }

// kernel: _lambda_.67
= control target key start
LH: loop header
LB: loop body
LE: loop exit
PB: predicated region body
PF: predicated region fallthrough
CT: control target
= control target key end

     0   :  { %9 = vsyncpa [#allocation3], 0  ;;  %s700_s15 = smov 0   ;;  %s702_s16 = smov 0   ;;  %s782_s0 = inlined_call_operand.vmem [shape: bf16[16,12], index: 0, kind: input, shape index: {}]   ;;  %s783_s1 = inlined_call_operand.vmem [shape: bf16[1,12,32], index: 1, kind: input, shape index: {}]   ;;  %s784_s2 = inlined_call_operand.hbm [shape: bf16[1,1,32], index: 2, kind: input, shape index: {}]   ;;  %s785_s3 = inlined_call_operand.vmem [shape: bf16[8,32], index: 3, kind: input, shape index: {}]   ;;  %s786_s4 = inlined_call_operand.vmem [shape: bf16[1,16,32], index: 4, kind: output, shape index: {}]  }
   0x1   :  { %s704_s17 = smov 0  }
   0x2 LB: > { %s555_s18 = sadd.s32 4294967295, %s670_s17   ;;  %s41_s19 = sadd.s32 1, %s666_s16  ;;  %s670_s17 = sphi %s704_s17, %s15_s17   ;;  %s666_s16 = sphi %s702_s16, %s796_s16   ;;  %s662_s15 = sphi %s700_s15, %s795_s15  }
   0x3   : > { %p43_p0 = scmp.ge.s32.totalorder %s41_s19, 2  ;;  %p557_p1 = scmp.ge.s32.totalorder %s670_s17, 1 }
   0x4   : > { %p188_p2 = scmp.lt.s32.totalorder %s670_s17, 3  ;;  %p725_p4 = scmp.eq.s32.totalorder %s555_s18, 0 }
   0x5   : > { %s798_s19 = smov (%p43_p0, %s41_s19), 0  ;;  %s672_s22 = smov [#allocation2]  }
   0x6   : > { %p721_p3 = pnand %p557_p1, %p188_p2  ;;  %s220_s23 = sshll.u32 %s672_s22, 4  ;;  %s221_s23 = int_to_ptr.vmem [resolvable:$true] %s220_s23 }
   0x7   : > { %s791_s21 = scalar_select %p725_p4, 1, 0 }
   0x8   : > { %s790_s20 = scalar_select %p721_p3, 1, 0 }
   0x9   : > { %p582_p5 = pneg %p721_p3  ;;  %s616_s27 = scalar_lea.hbm %s784_s2, 16 }
   0xa   : > { %p617_p7 = scmp.ne.s32.totalorder %s784_s2, %s616_s27  ;;  %p623_p11 = scmp.lt.u32.totalorder %s616_s27, %s784_s2 }
   0xb   : > { %p733_p6 = pnand %p725_p4, %p582_p5 }
   0xd   : > { %p618_p8 = pneg %p733_p6 }
   0xf   : > { %p619_p9 = pnand %p618_p8, %p617_p7 }
  0x11   : > { %p620_p10 = pneg %p619_p9 }
  0x13   : > { %p625_p12 = pnand %p623_p11, %p620_p10 }
  0x15   : > { %628 = shalt.err (!%p625_p12)
}
  0x16   : > { %s629_s6 = scalar_lea.vmem %s221_s23, 16  ;;  %s636_s7 = scalar_lea.vmem %s221_s23, 32 }
  0x17   : > { %p630_p13 = scmp.ne.s32.totalorder %s221_s23, %s629_s6  ;;  %p637_p2 = scmp.lt.s32.totalorder %s221_s23, %s221_s23 }
  0x18   : > { %p638_p5 = scmp.lt.s32.totalorder %s636_s7, %s629_s6 }
  0x19   : > { %p632_p0 = pnand %p630_p13, %p618_p8 }
  0x1a   : > { %p639_p4 = por %p638_p5, %p637_p2 }
  0x1b   : > { %p633_p1 = pneg %p632_p0 }
  0x1d   : > { %p640_p3 = pnand %p639_p4, %p633_p1 }
  0x1f   : > { %643 = shalt.err (!%p640_p3)
}
  0x20   : > { %585 = dma.hbm_to_vmem [thread:$0]  (!%p733_p6), %s784_s2, 16, %s221_s23, [#allocation3]  }
  0x21   : > { %p793_p7 = scmp.ne.s32.totalorder %s790_s20, 0 }
  0x22   : > { %p794_p9 = scmp.ne.s32.totalorder (!%p793_p7), %s791_s21, 0 }
  0x23   : > { %250 = sbr.rel (%p793_p7) target bundleno = 268 (0x10c), region = 36 }
  0x2a   : > { %657 = dma.done.wait (%p794_p9), [#allocation3], 16  }
  0x2b   : > { %659 = vsyncadd (%p794_p9), [#allocation3], 4294967280  ;;  %p300_p8 = scmp.lt.s32.totalorder %s662_s15, 1  ;;  %v673_v0 = vmov 0.0   ;;  %vm674_vm0 = vmmov 0   ;;  %vm354_vm1 = vcmask 1045504   ;;  %v341_v4 = vlaneseq }
  0x2c   : > { %572 = vmatprep.subr.bf16.mxu0 %v673_v0  ;;  %574 = vmatprep.mubr.msk.bf16.mxu0 %vm674_vm0, %v673_v0  ;;  %v615_v1 = vld [vmem:[%s783_s1] sm:$0x3f]   ;;  %vm350_vm2 = vcmask 97280   ;;  %vm402_vm3 = vcmask 257024  }
  0x2d   : > { %s800_s15 = smov (!%p300_p8, %s662_s15), 1  ;;  %v356_v2 = vsel %vm354_vm1, %v615_v1, 0  ;;  %v342_v5 = vshrl.u32 %v341_v4, 7  ;;  %v339_v6 = vld [vmem:[#allocation2] sm:$0x1] }
  0x2e   : > { %s564_s10 = sshll.u32 %s800_s15, 2  ;;  %573 = vmatpush3.bf16.msra.mxu0 %v356_v2  ;;  %v340_v7 = vunpack.c.l.bf16 %v339_v6  ;;  %v398_v9 = vld [vmem:[%s785_s3] sm:$0xf] }
  0x2f   : > { %s306_s18 = scalar_lea.vmem %s782_s0, %s564_s10  ;;  %v343_v8 = vsub.s32 0, %v342_v5  ;;  %v399_v11 = vunpack.c.l.bf16 %v398_v9  ;;  %s334_s23 = scalar_lea.vmem %s786_s4, %s564_s10 }
  0x30   : > { %v336_v3 = vld [vmem:[%s306_s18] sm:$0xf] }
  0x31   : > { %575 = vmatmul.mubr.msk.bf16.vlgmr.msra.gmra.mrb[0].mxu0 %vm350_vm2, %v336_v3  ;;  %v344_v10 = vrot.slane %v340_v7, %v343_v8 }
 0x104   : > { %v392_v12 = vpop.f32.mrb[0].mxu0 }
 0x105   : > { %v393_v13 = vadd.f32 %v392_v12, %v344_v10  ;;  %v576_v14 = vpop.f32.mrb[1].mxu0 }
 0x106   : > { %v395_v15 = vpop.f32.mrb[2].mxu0 }
 0x107   : > { %v400_v16 = vadd.f32 %v399_v11, %v393_v13  ;;  %v577_v17 = vpop.f32.mrb[3].mxu0 }
 0x109   : > { %v401_v18 = vpack.c.bf16 %v400_v16, %v400_v16 }
 0x10b   : > { %403 = vst.msk [vmem:[%s334_s23] sm:$0xf] %vm402_vm3, %v401_v18 }
 0x10c PF: > { %s15_s17 = sadd.s32 1, %s670_s17   ;;  %s795_s15 = smov %s666_s16 }
 0x10d   : > { %p12_p3 = scmp.ge.s32.totalorder %s15_s17, 4   ;;  %s796_s16 = smov %s798_s19 }
 0x10f   :  { %14 = sbr.rel (!%p12_p3) target bundleno = 2 (0x2), region = 78 }
 0x116   :  { %437 = vsyncpa [#allocation3], 1 }
 0x117   :  { %439 = vsyncpa [#allocation3 + $0x1], 1 }

// kernel: _lambda_.66
= control target key start
LH: loop header
LB: loop body
LE: loop exit
PB: predicated region body
PF: predicated region fallthrough
CT: control target
= control target key end

     0   :  { %12 = vsyncpa [#allocation3], 0  ;;  %s1171_s0 = inlined_call_operand.vmem [shape: bf16[16,32], index: 0, kind: input, shape index: {}]   ;;  %s1172_s1 = inlined_call_operand.vmem [shape: bf16[1,32,32], index: 1, kind: input, shape index: {}]   ;;  %s1173_s2 = inlined_call_operand.hbm [shape: bf16[1,1,32], index: 2, kind: input, shape index: {}]   ;;  %s1174_s3 = inlined_call_operand.vmem [shape: bf16[16,32], index: 3, kind: input, shape index: {}]   ;;  %s1175_s4 = inlined_call_operand.vmem [shape: bf16[8,32], index: 4, kind: input, shape index: {}]   ;;  %s1176_s5 = inlined_call_operand.hbm [shape: bf16[1,32], index: 5, kind: input, shape index: {}]   ;;  %s1177_s6 = inlined_call_operand.hbm [shape: bf16[1,32], index: 6, kind: input, shape index: {}]   ;;  %s1178_s7 = inlined_call_operand.vmem [shape: bf16[1,16,32], index: 7, kind: output, shape index: {}]  }
   0x1   :  { %13 = vsyncpa [#allocation5], 0  ;;  %s1013_s24 = smov 0   ;;  %s1015_s25 = smov 0  }
   0x2   :  { %s1017_s26 = smov 0  }
   0x3 LB: > { %s968_s27 = smov [#allocation4]   ;;  %s759_s29 = sadd.s32 4294967295, %s966_s26   ;;  %s966_s26 = sphi %s1017_s26, %s19_s26   ;;  %s962_s25 = sphi %s1015_s25, %s1191_s25   ;;  %s958_s24 = sphi %s1013_s24, %s1190_s24  }
   0x4   : > { %s312_s28 = sshll.u32 %s968_s27, 4  ;;  %p761_p0 = scmp.ge.s32.totalorder %s966_s26, 1  ;;  %s313_s28 = int_to_ptr.vmem [resolvable:$true] %s312_s28 }
   0x5   : > { %p262_p1 = scmp.lt.s32.totalorder %s966_s26, 3  ;;  %p1031_p2 = scmp.eq.s32.totalorder %s759_s29, 0 }
   0x6   : > { %s45_s9 = sadd.s32 1, %s962_s25  ;;  %s969_s12 = smov [#allocation2]  }
   0x7   : > { %s1182_s30 = scalar_select %p1031_p2, 1, 0 }
   0x8   : > { %p1035_p3 = pnand %p761_p0, %p262_p1  ;;  %p1048_p6 = scmp.ge.s32.totalorder %s45_s9, 2 }
   0x9   : > { %s294_s13 = sshll.u32 %s969_s12, 4  ;;  %s852_s16 = scalar_lea.hbm %s1176_s5, 16  ;;  %s1052_s13 = int_to_ptr.vmem [resolvable:$true] %s294_s13 }
   0xa   : > { %s1183_s8 = scalar_select %p1035_p3, 1, 0 }
   0xb   : > { %p803_p4 = pneg %p1035_p3  ;;  %p853_p7 = scmp.ne.s32.totalorder %s1176_s5, %s852_s16 }
   0xc   : > { %s1185_s11 = scalar_select %p1048_p6, 1, 0 }
   0xd   : > { %p1044_p5 = pnand %p1031_p2, %p803_p4  ;;  %p859_p11 = scmp.lt.u32.totalorder %s852_s16, %s1176_s5 }
   0xf   : > { %p1062_p8 = pneg %p1044_p5 }
  0x11   : > { %p855_p9 = pnand %p1062_p8, %p853_p7 }
  0x13   : > { %p856_p10 = pneg %p855_p9 }
  0x15   : > { %p861_p12 = pnand %p859_p11, %p856_p10 }
  0x17   : > { %864 = shalt.err (!%p861_p12)
}
  0x18   : > { %s865_s22 = scalar_lea.vmem %s313_s28, 16  ;;  %s872_s23 = scalar_lea.vmem %s313_s28, 32 }
  0x19   : > { %p866_p13 = scmp.ne.s32.totalorder %s313_s28, %s865_s22  ;;  %p873_p4 = scmp.lt.s32.totalorder %s313_s28, %s313_s28 }
  0x1a   : > { %p874_p2 = scmp.lt.s32.totalorder %s872_s23, %s865_s22 }
  0x1b   : > { %p868_p0 = pnand %p866_p13, %p1062_p8 }
  0x1c   : > { %p875_p3 = por %p874_p2, %p873_p4 }
  0x1d   : > { %p869_p1 = pneg %p868_p0 }
  0x1f   : > { %p876_p6 = pnand %p875_p3, %p869_p1 }
  0x21   : > { %879 = shalt.err (!%p876_p6)
}
  0x22   : > { %809 = dma.hbm_to_vmem [thread:$0]  (!%p1044_p5), %s1176_s5, 16, %s313_s28, [#allocation5]  }
  0x23   : > { %p1187_p7 = scmp.ne.s32.totalorder %s1185_s11, 0  ;;  %s880_s15 = scalar_lea.hbm %s1173_s2, 16 }
  0x24   : > { %p881_p2 = scmp.ne.s32.totalorder %s1173_s2, %s880_s15  ;;  %p887_p9 = scmp.lt.u32.totalorder %s880_s15, %s1173_s2 }
  0x25   : > { %s1193_s9 = smov (%p1187_p7, %s45_s9), 0 }
  0x26   : > { %p883_p3 = pnand %p881_p2, %p1062_p8 }
  0x28   : > { %p884_p6 = pneg %p883_p3 }
  0x2a   : > { %p889_p10 = pnand %p887_p9, %p884_p6 }
  0x2c   : > { %892 = shalt.err (!%p889_p10)
}
  0x2d   : > { %s893_s28 = scalar_lea.vmem %s1052_s13, 16  ;;  %s900_s11 = scalar_lea.vmem %s1052_s13, 32 }
  0x2e   : > { %p894_p11 = scmp.ne.s32.totalorder %s1052_s13, %s893_s28  ;;  %p901_p0 = scmp.lt.s32.totalorder %s1052_s13, %s1052_s13 }
  0x2f   : > { %p902_p1 = scmp.lt.s32.totalorder %s900_s11, %s893_s28 }
  0x30   : > { %p896_p12 = pnand %p894_p11, %p1062_p8 }
  0x31   : > { %p903_p4 = por %p902_p1, %p901_p0 }
  0x32   : > { %p897_p13 = pneg %p896_p12 }
  0x34   : > { %p904_p7 = pnand %p903_p4, %p897_p13 }
  0x36   : > { %907 = shalt.err (!%p904_p7)
}
  0x37   : > { %806 = dma.hbm_to_vmem [thread:$0]  (!%p1044_p5), %s1173_s2, 16, %s1052_s13, [#allocation3]  }
  0x38   : > { %s970_s23 = smov [#allocation6]   ;;  %s908_s14 = scalar_lea.hbm %s1177_s6, 16 }
  0x39   : > { %s323_s27 = sshll.u32 %s970_s23, 4  ;;  %p909_p2 = scmp.ne.s32.totalorder %s1177_s6, %s908_s14  ;;  %s324_s27 = int_to_ptr.vmem [resolvable:$true] %s323_s27 }
  0x3a   : > { %p915_p9 = scmp.lt.u32.totalorder %s908_s14, %s1177_s6 }
  0x3b   : > { %p911_p3 = pnand %p909_p2, %p1062_p8 }
  0x3d   : > { %p912_p6 = pneg %p911_p3 }
  0x3f   : > { %p917_p10 = pnand %p915_p9, %p912_p6 }
  0x41   : > { %920 = shalt.err (!%p917_p10)
}
  0x42   : > { %s921_s13 = scalar_lea.vmem %s324_s27, 16  ;;  %s928_s20 = scalar_lea.vmem %s324_s27, 32 }
  0x43   : > { %p922_p11 = scmp.ne.s32.totalorder %s324_s27, %s921_s13  ;;  %p929_p0 = scmp.lt.s32.totalorder %s324_s27, %s324_s27 }
  0x44   : > { %p930_p1 = scmp.lt.s32.totalorder %s928_s20, %s921_s13 }
  0x45   : > { %p924_p12 = pnand %p922_p11, %p1062_p8 }
  0x46   : > { %p931_p4 = por %p930_p1, %p929_p0 }
  0x47   : > { %p925_p13 = pneg %p924_p12 }
  0x49   : > { %p932_p7 = pnand %p931_p4, %p925_p13 }
  0x4b   : > { %935 = shalt.err (!%p932_p7)
}
  0x4c   : > { %812 = dma.hbm_to_vmem [thread:$0]  (!%p1044_p5), %s1177_s6, 16, %s324_s27, [#allocation5]  }
  0x4d   : > { %p1188_p2 = scmp.ne.s32.totalorder %s1183_s8, 0 }
  0x4e   : > { %p1189_p3 = scmp.ne.s32.totalorder (!%p1188_p2), %s1182_s30, 0 }
  0x4f   : > { %356 = sbr.rel (%p1188_p2) target bundleno = 632 (0x278), region = 48 }
  0x56   : > { %949 = dma.done.wait (%p1189_p3), [#allocation3], 16  }
  0x57   : > { %951 = vsyncadd (%p1189_p3), [#allocation3], 4294967280 }
  0x58   : > { %953 = dma.done.wait (%p1189_p3), [#allocation5], 32  }
  0x59   : > { %955 = vsyncadd (%p1189_p3), [#allocation5], 4294967264  ;;  %p427_p8 = scmp.lt.s32.totalorder %s958_s24, 1  ;;  %v971_v0 = vmov 0.0   ;;  %vm972_vm0 = vmmov 0   ;;  %v848_v1 = vld [vmem:[%s1172_s1] sm:$0xff]   ;;  %v477_v4 = vlaneseq }
  0x5a   : > { %783 = vmatprep.subr.bf16.mxu0 %v971_v0  ;;  %787 = vmatprep.mubr.msk.bf16.mxu0 %vm972_vm0, %v971_v0  ;;  %v849_v2 = vld [vmem:[%s1172_s1 + $0x8] sm:$0xff]   ;;  %vm493_vm1 = vcmask 261120   ;;  %v475_v6 = vld [vmem:[#allocation2] sm:$0x1]  ;;  %v554_v27 = vld [vmem:[#allocation4] sm:$0x1] }
  0x5b   : > { %s1195_s24 = smov (!%p427_p8, %s958_s24), 1  ;;  %784 = vmatpush3.bf16.msra.mxu0 %v848_v1  ;;  %v478_v5 = vshrl.u32 %v477_v4, 7  ;;  %v476_v7 = vunpack.c.l.bf16 %v475_v6  ;;  %v561_v28 = vld [vmem:[#allocation6] sm:$0x1]  ;;  %v555_v29 = vunpack.c.l.bf16 %v554_v27  ;;  %v568_v33 = vld [vmem:[%s1175_s4] sm:$0xf] }
  0x5c   : > { %s1139_s19 = sshll.u32 %s1195_s24, 2  ;;  %785 = vmatprep.subr.bf16.mxu0 %v971_v0  ;;  %v562_v30 = vunpack.c.l.bf16 %v561_v28  ;;  %v569_v36 = vunpack.c.l.bf16 %v568_v33  ;;  %vm572_vm2 = vcmask 257024  }
  0x5d   : > { %s433_s27 = scalar_lea.vmem %s1171_s0, %s1139_s19  ;;  %v479_v8 = vsub.s32 0, %v478_v5  ;;  %s453_s12 = scalar_lea.vmem %s1174_s3, %s1139_s19 }
  0x5e   : > { %v470_v3 = vld [vmem:[%s433_s27] sm:$0xf]  ;;  %s468_s18 = scalar_lea.vmem %s1178_s7, %s1139_s19 }
  0x5f   : > { %786 = vmatpush3.bf16.msra.mxu0 %v849_v2  ;;  %v537_v9 = vld [vmem:[%s453_s12] sm:$0xf]  ;;  %v480_v10 = vrot.slane %v476_v7, %v479_v8  ;;  %v559_v31 = vrot.slane %v555_v29, %v479_v8  ;;  %v566_v34 = vrot.slane %v562_v30, %v479_v8 }
  0x60   : > { %v538_v11 = vunpack.c.l.bf16 %v537_v9 }
  0x62   : > { %788 = vmatmul.mubr.msk.bf16.vlgmr.msra.gmra.mrb[0].mxu0 %vm493_vm1, %v470_v3 }
 0x135   : > { %v531_v12 = vpop.f32.mrb[0].mxu0 }
 0x136   : > { %v532_v13 = vadd.f32 %v531_v12, %v480_v10  ;;  %v789_v14 = vpop.f32.mrb[1].mxu0 }
 0x137   : > { %v534_v15 = vpop.f32.mrb[2].mxu0 }
 0x138   : > { %v790_v16 = vpop.f32.mrb[3].mxu0  ;;  %v539_v17 = vadd.f32 %v538_v11, %v532_v13 }
 0x13a   : > { %v540_v18 = vsel %vm493_vm1, %v539_v17, 0.0 }
 0x13b   : > { %541 = vadd.xlane.f32.xlu0 %v540_v18 }
 0x1c8   : > { %v542_v19 = vpop.xlane.xlu0 %541 }
 0x1c9   : > { %v544_v20 = vmul.f32 0.03125, %v542_v19 }
 0x1cb   : > { %v545_v21 = vsub.f32 %v539_v17, %v544_v20 }
 0x1cd   : > { %v546_v22 = vmul.f32 %v545_v21, %v545_v21 }
 0x1cf   : > { %v547_v23 = vsel %vm493_vm1, %v546_v22, 0.0 }
 0x1d0   : > { %548 = vadd.xlane.f32.xlu0 %v547_v23 }
 0x25d   : > { %v549_v24 = vpop.xlane.xlu0 %548 }
 0x25e   : > { %v550_v25 = vmul.f32 0.03125, %v549_v24 }
 0x260   : > { %v551_v26 = vadd.f32 1e-05, %v550_v25 }
 0x262   : > { %850 = vrsqrt.f32 %v551_v26 }
 0x26c   : > { %v851_v32 = vpop.eup %850 }
 0x26d   : > { %v553_v35 = vmul.f32 %v851_v32, %v545_v21 }
 0x26f   : > { %v560_v37 = vmul.f32 %v559_v31, %v553_v35 }
 0x271   : > { %v567_v38 = vadd.f32 %v566_v34, %v560_v37 }
 0x273   : > { %v570_v39 = vadd.f32 %v569_v36, %v567_v38 }
 0x275   : > { %v571_v40 = vpack.c.bf16 %v570_v39, %v570_v39 }
 0x277   : > { %573 = vst.msk [vmem:[%s468_s18] sm:$0xf] %vm572_vm2, %v571_v40 }
 0x278 PF: > { %s19_s26 = sadd.s32 1, %s966_s26   ;;  %s1190_s24 = smov %s962_s25 }
 0x279   : > { %p16_p5 = scmp.ge.s32.totalorder %s19_s26, 4   ;;  %s1191_s25 = smov %s1193_s9 }
 0x27b   :  { %18 = sbr.rel (!%p16_p5) target bundleno = 3 (0x3), region = 101 }
 0x282   :  { %607 = vsyncpa [#allocation3], 1 }
 0x283   :  { %609 = vsyncpa [#allocation3 + $0x1], 1 }
 0x284   :  { %610 = vsyncpa [#allocation5], 1 }

// kernel: _lambda_.65
= control target key start
LH: loop header
LB: loop body
LE: loop exit
PB: predicated region body
PF: predicated region fallthrough
CT: control target
= control target key end

     0   :  { %s1036_s12 = smov 0   ;;  %s1038_s13 = smov 0   ;;  %s1161_s0 = inlined_call_operand.vmem [shape: bf16[3,2,8,32], index: 0, kind: input, shape index: {}, may-alias: {0,1,2}]   ;;  %s1162_s1 = inlined_call_operand.vmem [shape: bf16[3,2,8,32], index: 1, kind: input, shape index: {}, may-alias: {0,1,2}]   ;;  %s1163_s2 = inlined_call_operand.vmem [shape: bf16[3,2,8,32], index: 2, kind: input, shape index: {}, may-alias: {0,1,2}]   ;;  %s1164_s3 = inlined_call_operand.vmem [shape: bf16[2,8,32], index: 3, kind: output, shape index: {}]  }
   0x1   :  { %s1040_s14 = smov 0  }
   0x2 LB: > { %s25_s15 = sadd.s32 1, %s1002_s13  ;;  %p843_p0 = scmp.ge.s32.totalorder %s1006_s14, 1  ;;  %s1006_s14 = sphi %s1040_s14, %s13_s14   ;;  %s1002_s13 = sphi %s1038_s13, %s1168_s13   ;;  %s998_s12 = sphi %s1036_s12, %s1167_s12  }
   0x3   : > { %p27_p1 = scmp.ge.s32.totalorder %s25_s15, 2  ;;  %p175_p2 = scmp.lt.s32.totalorder %s1006_s14, 3 }
   0x5   : > { %s1170_s15 = smov (%p27_p1, %s25_s15), 0  ;;  %p176_p3 = pnand %p843_p0, %p175_p2 }
   0x6   : > { %p213_p4 = scmp.lt.s32.totalorder (!%p176_p3), %s998_s12, 1  ;;  %v1008_v0 = vmov (!%p176_p3), 0.0   ;;  %vm1009_vm0 = vmmov (!%p176_p3), 0   ;;  %vm252_vm1 = vcmask (!%p176_p3), 64512   ;;  %v242_v4 = vlaneseq (!%p176_p3)  ;;  %s1010_s23 = smov (!%p176_p3), 120  }
   0x7   : > { %179 = sbr.rel (%p176_p3) target bundleno = 1479 (0x5c7), region = 32  ;;  %885 = vmatprep.subr.bf16.mxu0 (!%p176_p3), %v1008_v0  ;;  %887 = vmatprep.mubr.msk.bf16.mxu0 (!%p176_p3), %vm1009_vm0, %v1008_v0  ;;  %s1011_s24 = smov (!%p176_p3), 112   ;;  %vm316_vm5 = vcmask (!%p176_p3), 1043456   ;;  %vm361_vm6 = vcmask (!%p176_p3), 60416   ;;  %vm491_vm7 = vcmask (!%p176_p3), 126016   ;;  %vm612_vm8 = vcmask (!%p176_p3), 191616  }
   0x8   : > { %891 = vmatprep.subr.bf16.mxu1 (!%p176_p3), %v1008_v0  ;;  %893 = vmatprep.mubr.msk.bf16.mxu1 (!%p176_p3), %vm1009_vm0, %v1008_v0  ;;  %v243_v5 = vshrl.u32 (!%p176_p3), %v242_v4, 7  ;;  %v247_v6 = vand.u32 (!%p176_p3), 127, %v242_v4  ;;  %s1012_s25 = smov (!%p176_p3), 104   ;;  %s1013_s5 = smov (!%p176_p3), 8   ;;  %vm733_vm9 = vcmask (!%p176_p3), 257216  }
   0x9   : > { %s1014_s6 = smov (!%p176_p3), 16   ;;  %s1015_s7 = smov (!%p176_p3), 24  }
   0xa   : > { %v249_v7 = vadd.s32 (!%p176_p3), 50, %v243_v5  ;;  %vm248_vm2 = vcmp.ge.s32.totalorder (!%p176_p3), %v247_v6, %v243_v5 }
   0xc   : > { %vm250_vm3 = vcmp.le.s32.totalorder (!%p176_p3), %v247_v6, %v249_v7 }
   0xd   : > { %vm1075_vm4 = vmand (!%p176_p3), %vm248_vm2, %vm250_vm3 }
   0xe   : > { %s1172_s12 = smov (!%p213_p4, %s998_s12), 1 }
   0xf   : > { %s1060_s16 = sshll.u32 %s1172_s12, 2 }
  0x10   : > { %s785_s19 = scalar_lea.vmem %s1162_s1, %s1060_s16  ;;  %s219_s22 = scalar_lea.vmem %s1161_s0, %s1060_s16 }
  0x11   : > { %v848_v1 = vld [vmem:[%s785_s19 + $0x8] sm:$0xf]  ;;  %v238_v3 = vld [vmem:[%s219_s22] sm:$0xf]  ;;  %s788_s28 = scalar_lea.vmem %s1163_s2, %s1060_s16  ;;  %s1117_s4 = scalar_lea.vmem %s1164_s3, %s1060_s16 }
  0x12   : > { %v257_v2 = vsel %vm252_vm1, %v848_v1, 0  ;;  %v853_v16 = vcombine.low %v848_v1, %v848_v1  ;;  %v852_v17 = vcombine.low %v238_v3, %v238_v3  ;;  %v1092_v23 = vld [vmem:[%s788_s28 + $0x10] sm:$0xf] }
  0x13   : > { %886 = vmatpush3.bf16.xpose.msra.mxu0 %v257_v2  ;;  %v318_v24 = vsel %vm316_vm5, %v1092_v23, 0 }
  0x14   : > { %903 = vmatprep.subr.bf16.mxu0 %v1008_v0  ;;  %371 = vrot.lane.b32.xlu1 %v853_v16, %s1010_s23 }
  0x15   : > { %892 = vmatpush3.bf16.msra.mxu1 %v318_v24 }
  0x16   : > { %897 = vmatprep.subr.bf16.mxu1 %v1008_v0 }
  0x18   : > { %366 = vrot.lane.b32.xlu1 %v852_v17, %s1010_s23 }
  0x1a   : > { %888 = vmatmul.mubr.msk.bf16.vlgmr.msra.gmra.mrb[0].mxu0 %vm252_vm1, %v238_v3 }
  0x1b   : > { %905 = vmatprep.mubr.msk.bf16.mxu0 %vm1009_vm0, %v1008_v0 }
  0x1c   : > { %493 = vrot.lane.b32.xlu1 %v852_v17, %s1011_s24 }
  0x20   : > { %616 = vrot.lane.b32.xlu1 %v853_v16, %s1012_s25 }
  0x24   : > { %614 = vrot.lane.b32.xlu1 %v852_v17, %s1012_s25 }
  0x86   : > { %v372_v27 = vpop.permute.xlu1 %371 }
  0x87   : > { %v377_v29 = vsel %vm252_vm1, %v372_v27, 0 }
  0x8a   : > { %v367_v31 = vpop.permute.xlu1 %366 }
  0x8e   : > { %v494_v33 = vpop.permute.xlu1 %493 }
  0x92   : > { %v617_v35 = vpop.permute.xlu1 %616 }
  0x93   : > { %v622_v36 = vsel %vm252_vm1, %v617_v35, 0 }
  0x96   : > { %v615_v37 = vpop.permute.xlu1 %614 }
  0xed   : > { %v293_v8 = vpop.f32.mrb[0].mxu0 }
  0xee   : > { %v299_v10 = vmul.f32 0.35355338, %v293_v8  ;;  %v889_v11 = vpop.f32.mrb[1].mxu0 }
  0xef   : > { %v296_v12 = vpop.f32.mrb[2].mxu0  ;;  %v855_v11 = vcombine.low %v1092_v23, %v1092_v23 }
  0xf0   : > { %v890_v13 = vpop.f32.mrb[3].mxu0  ;;  %v300_v14 = vsel %vm1075_vm4, %v299_v10, -1e+30 }
  0xf1   : > { %v301_v15 = vsel %vm252_vm1, %v300_v14, -inf }
  0xf2   : > { %302 = vmax.xlane.f32.xlu0 %v301_v15 }
 0x17f   : > { %v303_v18 = vpop.xlane.xlu0 %302 }
 0x180   : > { %v304_v19 = vsub.f32 %v300_v14, %v303_v18 }
 0x182   : > { %v305_v20 = vmul.f32 1.442695, %v304_v19 }
 0x184   : > { %968 = vpow2.f32 %v305_v20 }
 0x18e   : > { %v969_v21 = vpop.eup %968 }
 0x18f   : > { %v307_v22 = vsel %vm252_vm1, %v969_v21, 0.0 }
 0x190   : > { %308 = vadd.xlane.f32.xlu0 %v307_v22 }
 0x1a6   : > { %495 = vrot.lane.b32.xlu0 %v853_v16, %s1011_s24 }
 0x21d   : > { %v309_v25 = vpop.xlane.xlu0 %308 }
 0x21e   : > { %970 = vrcp.f32 %v309_v25 }
 0x221   : > { %v496_v32 = vpop.permute.xlu0 %495 }
 0x222   : > { %v501_v34 = vsel %vm252_vm1, %v496_v32, 0 }
 0x228   : > { %v971_v26 = vpop.eup %970 }
 0x229   : > { %v311_v28 = vmul.f32 %v971_v26, %v969_v21 }
 0x22b   : > { %v312_v30 = vpack.c.bf16 %v311_v28, %v311_v28 }
 0x22d   : > { %894 = vmatmul.mubr.msk.bf16.vlgmr.msra.gmra.mrb[0].mxu1 %vm252_vm1, %v312_v30 }
 0x22e   : > { %898 = vmatpush3.bf16.xpose.msra.mxu1 %v377_v29  ;;  %899 = vmatprep.mubr.msk.bf16.mxu1 %vm1009_vm0, %v1008_v0 }
 0x22f   : > { %909 = vmatprep.subr.bf16.mxu1 %v1008_v0 }
 0x235   : > { %900 = vmatmul.mubr.msk.bf16.vlgmr.msra.gmra.mrb[4].mxu1 %vm252_vm1, %v367_v31 }
 0x236   : > { %910 = vmatpush3.bf16.xpose.msra.mxu1 %v501_v34  ;;  %911 = vmatprep.mubr.msk.bf16.mxu1 %vm1009_vm0, %v1008_v0 }
 0x237   : > { %921 = vmatprep.subr.bf16.mxu1 %v1008_v0 }
 0x23d   : > { %912 = vmatmul.mubr.msk.bf16.vlgmr.msra.gmra.mrb[8].mxu1 %vm252_vm1, %v494_v33 }
 0x23e   : > { %922 = vmatpush3.bf16.xpose.msra.mxu1 %v622_v36  ;;  %923 = vmatprep.mubr.msk.bf16.mxu1 %vm1009_vm0, %v1008_v0 }
 0x245   : > { %924 = vmatmul.mubr.msk.bf16.vlgmr.msra.gmra.mrb[12].mxu1 %vm252_vm1, %v615_v37 }
 0x300   : > { %v354_v38 = vpop.f32.mrb[0].mxu1 }
 0x301   : > { %v360_v39 = vpack.c.bf16 %v354_v38, %v354_v38  ;;  %v895_v40 = vpop.f32.mrb[1].mxu1 }
 0x302   : > { %v357_v41 = vpop.f32.mrb[2].mxu1 }
 0x303   : > { %362 = vst.msk [vmem:[%s1117_s4] sm:$0xf] %vm361_vm6, %v360_v39  ;;  %v896_v42 = vpop.f32.mrb[3].mxu1 }
 0x308   : > { %v413_v43 = vpop.f32.mrb[4].mxu1 }
 0x309   : > { %v419_v44 = vmul.f32 0.35355338, %v413_v43  ;;  %v901_v45 = vpop.f32.mrb[5].mxu1 }
 0x30a   : > { %v416_v46 = vpop.f32.mrb[6].mxu1 }
 0x30b   : > { %v902_v47 = vpop.f32.mrb[7].mxu1  ;;  %v420_v48 = vsel %vm1075_vm4, %v419_v44, -1e+30 }
 0x30c   : > { %v421_v49 = vsel %vm252_vm1, %v420_v48, -inf }
 0x30d   : > { %422 = vmax.xlane.f32.xlu1 %v421_v49 }
 0x310   : > { %v537_v50 = vpop.f32.mrb[8].mxu1 }
 0x311   : > { %v543_v51 = vmul.f32 0.35355338, %v537_v50  ;;  %v913_v52 = vpop.f32.mrb[9].mxu1 }
 0x312   : > { %v540_v53 = vpop.f32.mrb[10].mxu1 }
 0x313   : > { %v544_v54 = vsel %vm1075_vm4, %v543_v51, -1e+30  ;;  %v914_v55 = vpop.f32.mrb[11].mxu1 }
 0x314   : > { %v545_v56 = vsel %vm252_vm1, %v544_v54, -inf }
 0x315   : > { %546 = vmax.xlane.f32.xlu0 %v545_v56 }
 0x318   : > { %v658_v57 = vpop.f32.mrb[12].mxu1 }
 0x319   : > { %v664_v58 = vmul.f32 0.35355338, %v658_v57  ;;  %v925_v59 = vpop.f32.mrb[13].mxu1 }
 0x31a   : > { %v661_v60 = vpop.f32.mrb[14].mxu1 }
 0x31b   : > { %v665_v61 = vsel %vm1075_vm4, %v664_v58, -1e+30  ;;  %v926_v62 = vpop.f32.mrb[15].mxu1 }
 0x31c   : > { %v666_v63 = vsel %vm252_vm1, %v665_v61, -inf }
 0x31d   : > { %667 = vmax.xlane.f32.xlu1 %v666_v63 }
 0x39a   : > { %v423_v1 = vpop.xlane.xlu1 %422 }
 0x39b   : > { %v424_v2 = vsub.f32 %v420_v48, %v423_v1 }
 0x39d   : > { %v425_v3 = vmul.f32 1.442695, %v424_v2 }
 0x39f   : > { %972 = vpow2.f32 %v425_v3 }
 0x3a2   : > { %v547_v4 = vpop.xlane.xlu0 %546 }
 0x3a3   : > { %v548_v5 = vsub.f32 %v544_v54, %v547_v4 }
 0x3a5   : > { %v549_v6 = vmul.f32 1.442695, %v548_v5 }
 0x3a7   : > { %974 = vpow2.f32 %v549_v6 }
 0x3a9   : > { %v973_v7 = vpop.eup %972 }
 0x3aa   : > { %v427_v8 = vsel %vm252_vm1, %v973_v7, 0.0  ;;  %v668_v12 = vpop.xlane.xlu1 %667 }
 0x3ab   : > { %428 = vadd.xlane.f32.xlu1 %v427_v8  ;;  %v669_v13 = vsub.f32 %v665_v61, %v668_v12 }
 0x3ad   : > { %v670_v14 = vmul.f32 1.442695, %v669_v13 }
 0x3af   : > { %976 = vpow2.f32 %v670_v14 }
 0x3b1   : > { %v975_v10 = vpop.eup %974 }
 0x3b2   : > { %v551_v9 = vsel %vm252_vm1, %v975_v10, 0.0 }
 0x3b3   : > { %552 = vadd.xlane.f32.xlu0 %v551_v9 }
 0x3b9   : > { %v977_v15 = vpop.eup %976 }
 0x3ba   : > { %v672_v16 = vsel %vm252_vm1, %v977_v15, 0.0 }
 0x3bc   : > { %557 = vrot.lane.b32.xlu1 %v855_v11, %s1011_s24 }
 0x3c9   : > { %436 = vrot.lane.b32.xlu0 %v855_v11, %s1010_s23 }
 0x3e0   : > { %673 = vadd.xlane.f32.xlu1 %v672_v16 }
 0x3f1   : > { %678 = vrot.lane.b32.xlu1 %v855_v11, %s1012_s25 }
 0x438   : > { %v429_v17 = vpop.xlane.xlu1 %428 }
 0x439   : > { %978 = vrcp.f32 %v429_v17 }
 0x43c   : > { %v558_v23 = vpop.permute.xlu1 %557 }
 0x43d   : > { %v563_v25 = vsel %vm316_vm5, %v558_v23, 0 }
 0x440   : > { %v553_v18 = vpop.xlane.xlu0 %552 }
 0x441   : > { %980 = vrcp.f32 %v553_v18 }
 0x443   : > { %v979_v19 = vpop.eup %978 }
 0x444   : > { %v431_v20 = vmul.f32 %v979_v19, %v973_v7  ;;  %v437_v21 = vpop.permute.xlu0 %436 }
 0x445   : > { %v442_v22 = vsel %vm316_vm5, %v437_v21, 0 }
 0x446   : > { %904 = vmatpush3.bf16.msra.mxu0 %v442_v22  ;;  %v432_v24 = vpack.c.bf16 %v431_v20, %v431_v20 }
 0x447   : > { %915 = vmatprep.subr.bf16.mxu0 %v1008_v0 }
 0x449   : > { %906 = vmatmul.mubr.msk.bf16.vlgmr.msra.gmra.mrb[4].mxu0 %vm252_vm1, %v432_v24 }
 0x44a   : > { %916 = vmatpush3.bf16.msra.mxu0 %v563_v25  ;;  %917 = vmatprep.mubr.msk.bf16.mxu0 %vm1009_vm0, %v1008_v0 }
 0x44b   : > { %v981_v26 = vpop.eup %980  ;;  %927 = vmatprep.subr.bf16.mxu0 %v1008_v0 }
 0x44c   : > { %v555_v27 = vmul.f32 %v981_v26, %v975_v10 }
 0x44e   : > { %v556_v28 = vpack.c.bf16 %v555_v27, %v555_v27 }
 0x451   : > { %918 = vmatmul.mubr.msk.bf16.vlgmr.msra.gmra.mrb[8].mxu0 %vm252_vm1, %v556_v28 }
 0x452   : > { %929 = vmatprep.mubr.msk.bf16.mxu0 %vm1009_vm0, %v1008_v0 }
 0x46d   : > { %v674_v29 = vpop.xlane.xlu1 %673 }
 0x46e   : > { %982 = vrcp.f32 %v674_v29 }
 0x471   : > { %v679_v30 = vpop.permute.xlu1 %678 }
 0x472   : > { %v684_v31 = vsel %vm316_vm5, %v679_v30, 0 }
 0x473   : > { %928 = vmatpush3.bf16.msra.mxu0 %v684_v31 }
 0x478   : > { %v983_v32 = vpop.eup %982 }
 0x479   : > { %v676_v33 = vmul.f32 %v983_v32, %v977_v15 }
 0x47b   : > { %v677_v34 = vpack.c.bf16 %v676_v33, %v676_v33 }
 0x47d   : > { %930 = vmatmul.mubr.msk.bf16.vlgmr.msra.gmra.mrb[12].mxu0 %vm252_vm1, %v677_v34 }
 0x51c   : > { %v478_v35 = vpop.f32.mrb[4].mxu0 }
 0x51d   : > { %v866_v36 = vpack.c.bf16 %v478_v35, %v478_v35  ;;  %v907_v37 = vpop.f32.mrb[5].mxu0 }
 0x51e   : > { %v481_v38 = vpop.f32.mrb[6].mxu0 }
 0x51f   : > { %488 = vrot.lane.b32.xlu0 %v866_v36, %s1013_s5  ;;  %v908_v39 = vpop.f32.mrb[7].mxu0 }
 0x524   : > { %v599_v40 = vpop.f32.mrb[8].mxu0 }
 0x525   : > { %v867_v0 = vpack.c.bf16 %v599_v40, %v599_v40  ;;  %v919_v41 = vpop.f32.mrb[9].mxu0 }
 0x526   : > { %v602_v42 = vpop.f32.mrb[10].mxu0 }
 0x527   : > { %609 = vrot.lane.b32.xlu1 %v867_v0, %s1014_s6  ;;  %v920_v43 = vpop.f32.mrb[11].mxu0 }
 0x550   : > { %v720_v44 = vpop.f32.mrb[12].mxu0 }
 0x551   : > { %v868_v45 = vpack.c.bf16 %v720_v44, %v720_v44  ;;  %v931_v46 = vpop.f32.mrb[13].mxu0 }
 0x552   : > { %v723_v47 = vpop.f32.mrb[14].mxu0 }
 0x553   : > { %730 = vrot.lane.b32.xlu0 %v868_v45, %s1015_s7  ;;  %v932_v48 = vpop.f32.mrb[15].mxu0 }
 0x591   : > { %v489_v49 = vpop.permute.xlu0 %488 }
 0x592   : > { %492 = vst.msk [vmem:[%s1117_s4] sm:$0xf] %vm491_vm7, %v489_v49 }
 0x599   : > { %v610_v50 = vpop.permute.xlu1 %609 }
 0x59a   : > { %613 = vst.msk [vmem:[%s1117_s4] sm:$0xf] %vm612_vm8, %v610_v50 }
 0x5c5   : > { %v731_v51 = vpop.permute.xlu0 %730 }
 0x5c6   : > { %734 = vst.msk [vmem:[%s1117_s4] sm:$0xf] %vm733_vm9, %v731_v51 }
 0x5c7 PF: > { %s13_s14 = sadd.s32 1, %s1006_s14   ;;  %s1167_s12 = smov %s1002_s13 }
 0x5c8   : > { %p10_p5 = scmp.ge.s32.totalorder %s13_s14, 4   ;;  %s1168_s13 = smov %s1170_s15 }
 0x5ca   :  { %12 = sbr.rel (!%p10_p5) target bundleno = 2 (0x2), region = 68 }

// kernel: _lambda_.85
= control target key start
LH: loop header
LB: loop body
LE: loop exit
PB: predicated region body
PF: predicated region fallthrough
CT: control target
= control target key end

     0   :  { %10 = vsyncpa [#allocation4], 0  ;;  %s1041_s0 = inlined_call_operand.vmem [shape: bf16[16,32], index: 0, kind: input, shape index: {}]   ;;  %s1042_s1 = inlined_call_operand.hbm [shape: bf16[1,32], index: 1, kind: input, shape index: {}]   ;;  %s1043_s2 = inlined_call_operand.hbm [shape: bf16[1,32], index: 2, kind: input, shape index: {}]   ;;  %s1044_s3 = inlined_call_operand.vmem [shape: bf16[3,32,32], index: 3, kind: input, shape index: {}]   ;;  %s1045_s4 = inlined_call_operand.vmem [shape: bf16[3,1,32], index: 4, kind: input, shape index: {}]   ;;  %s1046_s5 = inlined_call_operand.vmem [shape: bf16[3,16,32], index: 5, kind: output, shape index: {}]  }
   0x1   :  { %11 = vsyncpa [#allocation6], 0  ;;  %s897_s18 = smov 0   ;;  %s899_s19 = smov 0  }
   0x2   :  { %s901_s20 = smov 0  }
   0x3 LB: > { %s678_s21 = sadd.s32 4294967295, %s861_s20   ;;  %s39_s22 = sadd.s32 1, %s857_s19  ;;  %s861_s20 = sphi %s901_s20, %s17_s20   ;;  %s857_s19 = sphi %s899_s19, %s1056_s19   ;;  %s853_s18 = sphi %s897_s18, %s1055_s18  }
   0x4   : > { %p41_p0 = scmp.ge.s32.totalorder %s39_s22, 3  ;;  %p680_p1 = scmp.ge.s32.totalorder %s861_s20, 1 }
   0x5   : > { %p206_p2 = scmp.lt.s32.totalorder %s861_s20, 4  ;;  %p922_p4 = scmp.eq.s32.totalorder %s678_s21, 0 }
   0x6   : > { %s1058_s22 = smov (%p41_p0, %s39_s22), 0  ;;  %s863_s25 = smov [#allocation3]  }
   0x7   : > { %p918_p3 = pnand %p680_p1, %p206_p2  ;;  %s231_s26 = sshll.u32 %s863_s25, 4  ;;  %s232_s26 = int_to_ptr.vmem [resolvable:$true] %s231_s26 }
   0x8   : > { %s1051_s24 = scalar_select %p922_p4, 1, 0 }
   0x9   : > { %s1050_s23 = scalar_select %p918_p3, 1, 0 }
   0xa   : > { %p730_p5 = pneg %p918_p3  ;;  %s864_s27 = smov [#allocation5]  }
   0xb   : > { %s242_s28 = sshll.u32 %s864_s27, 4  ;;  %s775_s7 = scalar_lea.hbm %s1042_s1, 16  ;;  %s934_s28 = int_to_ptr.vmem [resolvable:$true] %s242_s28 }
   0xc   : > { %p930_p6 = pnand %p922_p4, %p730_p5  ;;  %p776_p7 = scmp.ne.s32.totalorder %s1042_s1, %s775_s7 }
   0xd   : > { %p782_p11 = scmp.lt.u32.totalorder %s775_s7, %s1042_s1 }
   0xe   : > { %p777_p8 = pneg %p930_p6 }
  0x10   : > { %p778_p9 = pnand %p777_p8, %p776_p7 }
  0x12   : > { %p779_p10 = pneg %p778_p9 }
  0x14   : > { %p784_p12 = pnand %p782_p11, %p779_p10 }
  0x16   : > { %787 = shalt.err (!%p784_p12)
}
  0x17   : > { %s788_s12 = scalar_lea.vmem %s232_s26, 16  ;;  %s795_s13 = scalar_lea.vmem %s232_s26, 32 }
  0x18   : > { %p789_p13 = scmp.ne.s32.totalorder %s232_s26, %s788_s12  ;;  %p796_p2 = scmp.lt.s32.totalorder %s232_s26, %s232_s26 }
  0x19   : > { %p797_p5 = scmp.lt.s32.totalorder %s795_s13, %s788_s12 }
  0x1a   : > { %p791_p0 = pnand %p789_p13, %p777_p8 }
  0x1b   : > { %p798_p4 = por %p797_p5, %p796_p2 }
  0x1c   : > { %p792_p1 = pneg %p791_p0 }
  0x1e   : > { %p799_p3 = pnand %p798_p4, %p792_p1 }
  0x20   : > { %802 = shalt.err (!%p799_p3)
}
  0x21   : > { %733 = dma.hbm_to_vmem [thread:$0]  (!%p930_p6), %s1042_s1, 16, %s232_s26, [#allocation4]  }
  0x22   : > { %s803_s21 = scalar_lea.hbm %s1043_s2, 16 }
  0x23   : > { %p804_p7 = scmp.ne.s32.totalorder %s1043_s2, %s803_s21  ;;  %p810_p3 = scmp.lt.u32.totalorder %s803_s21, %s1043_s2 }
  0x25   : > { %p806_p9 = pnand %p804_p7, %p777_p8 }
  0x27   : > { %p807_p4 = pneg %p806_p9 }
  0x29   : > { %p812_p10 = pnand %p810_p3, %p807_p4 }
  0x2b   : > { %815 = shalt.err (!%p812_p10)
}
  0x2c   : > { %s816_s26 = scalar_lea.vmem %s934_s28, 16  ;;  %s823_s7 = scalar_lea.vmem %s934_s28, 32 }
  0x2d   : > { %p817_p11 = scmp.ne.s32.totalorder %s934_s28, %s816_s26  ;;  %p824_p0 = scmp.lt.s32.totalorder %s934_s28, %s934_s28 }
  0x2e   : > { %p825_p1 = scmp.lt.s32.totalorder %s823_s7, %s816_s26 }
  0x2f   : > { %p819_p12 = pnand %p817_p11, %p777_p8 }
  0x30   : > { %p826_p2 = por %p825_p1, %p824_p0 }
  0x31   : > { %p820_p13 = pneg %p819_p12 }
  0x33   : > { %p827_p5 = pnand %p826_p2, %p820_p13 }
  0x35   : > { %830 = shalt.err (!%p827_p5)
}
  0x36   : > { %736 = dma.hbm_to_vmem [thread:$0]  (!%p930_p6), %s1043_s2, 16, %s934_s28, [#allocation6]  }
  0x37   : > { %p1053_p7 = scmp.ne.s32.totalorder %s1050_s23, 0 }
  0x38   : > { %p1054_p8 = scmp.ne.s32.totalorder (!%p1053_p7), %s1051_s24, 0 }
  0x39   : > { %280 = sbr.rel (%p1053_p7) target bundleno = 620 (0x26c), region = 40 }
  0x40   : > { %844 = dma.done.wait (%p1054_p8), [#allocation4], 16  }
  0x41   : > { %846 = vsyncadd (%p1054_p8), [#allocation4], 4294967280 }
  0x42   : > { %848 = dma.done.wait (%p1054_p8), [#allocation6], 16  }
  0x43   : > { %850 = vsyncadd (%p1054_p8), [#allocation6], 4294967280  ;;  %p350_p9 = scmp.lt.s32.totalorder %s853_s18, 2  ;;  %p382_p6 = scmp.eq.s32.totalorder %s853_s18, 0 }
  0x44   : > { %v708_v0 = vld [vmem:[%s1041_s0] sm:$0xff] (%p382_p6)   ;;  %vm395_vm0 = vcmask (%p382_p6), 261120   ;;  %v425_v18 = vlaneseq (%p382_p6)  ;;  %v423_v23 = vld [vmem:[#allocation3] sm:$0x1] (%p382_p6)  ;;  %v431_v26 = vld [vmem:[#allocation5] sm:$0x1] (%p382_p6) }
  0x45   : > { %s1060_s18 = smov (!%p350_p9, %s853_s18), 2  ;;  %390 = sbr.rel (!%p382_p6) target bundleno = 392 (0x188), region = 52 }
  0x46   : > { %s701_s23 = sshll.u32 %s1060_s18, 4  ;;  %s367_s10 = scalar_lea.vmem %s1045_s4, %s1060_s18  ;;  %v709_v1 = vunpack.c.l.bf16 (%p382_p6), %v708_v0  ;;  %v710_v2 = vunpack.c.h.bf16 (%p382_p6), %v708_v0  ;;  %v426_v22 = vshrl.u32 (%p382_p6), %v425_v18, 7  ;;  %v424_v24 = vunpack.c.l.bf16 (%p382_p6), %v423_v23 }
  0x47   : > { %s1007_s24 = scalar_lea.vmem %s1044_s3, %s701_s23  ;;  %s702_s13 = sshll.u32 %s1060_s18, 3  ;;  %v432_v29 = vunpack.c.l.bf16 (%p382_p6), %v431_v26 }
  0x48   : > { %s1013_s16 = scalar_lea.vmem %s1046_s5, %s702_s13  ;;  %v396_v3 = vsel (%p382_p6), %vm395_vm0, %v709_v1, 0.0  ;;  %v399_v4 = vsel (%p382_p6), %vm395_vm0, %v710_v2, 0.0  ;;  %v427_v25 = vsub.s32 (%p382_p6), 0, %v426_v22 }
  0x49   : > { %397 = vadd.xlane.f32.xlu0 (%p382_p6), %v396_v3 }
  0x4a   : > { %v428_v28 = vrot.slane (%p382_p6), %v424_v24, %v427_v25  ;;  %v436_v32 = vrot.slane (%p382_p6), %v432_v29, %v427_v25 }
  0x4d   : > { %400 = vadd.xlane.f32.xlu0 %v399_v4 }
  0xd6   : > { %v398_v5 = vpop.xlane.xlu0 %397 }
  0xd7   : > { %v403_v6 = vmul.f32 0.03125, %v398_v5 }
  0xd9   : > { %v405_v7 = vsub.f32 %v709_v1, %v403_v6 }
  0xda   : > { %v401_v8 = vpop.xlane.xlu0 %400 }
  0xdb   : > { %v404_v9 = vmul.f32 0.03125, %v401_v8  ;;  %v407_v10 = vmul.f32 %v405_v7, %v405_v7 }
  0xdd   : > { %v406_v11 = vsub.f32 %v710_v2, %v404_v9  ;;  %v409_v12 = vsel %vm395_vm0, %v407_v10, 0.0 }
  0xde   : > { %410 = vadd.xlane.f32.xlu1 %v409_v12 }
  0xdf   : > { %v408_v13 = vmul.f32 %v406_v11, %v406_v11 }
  0xe1   : > { %v412_v14 = vsel %vm395_vm0, %v408_v13, 0.0 }
  0xe2   : > { %413 = vadd.xlane.f32.xlu1 %v412_v14 }
 0x16b   : > { %v411_v15 = vpop.xlane.xlu1 %410 }
 0x16c   : > { %v415_v16 = vmul.f32 0.03125, %v411_v15 }
 0x16e   : > { %v417_v17 = vadd.f32 1e-05, %v415_v16 }
 0x16f   : > { %v414_v19 = vpop.xlane.xlu1 %413 }
 0x170   : > { %769 = vrsqrt.f32 %v417_v17  ;;  %v416_v20 = vmul.f32 0.03125, %v414_v19 }
 0x172   : > { %v418_v21 = vadd.f32 1e-05, %v416_v20 }
 0x174   : > { %771 = vrsqrt.f32 %v418_v21 }
 0x17a   : > { %v770_v27 = vpop.eup %769 }
 0x17b   : > { %v421_v30 = vmul.f32 %v770_v27, %v405_v7 }
 0x17d   : > { %v429_v33 = vmul.f32 %v428_v28, %v421_v30 }
 0x17e   : > { %v772_v31 = vpop.eup %771 }
 0x17f   : > { %v422_v34 = vmul.f32 %v772_v31, %v406_v11  ;;  %v437_v36 = vadd.f32 %v436_v32, %v429_v33 }
 0x181   : > { %v430_v35 = vmul.f32 %v428_v28, %v422_v34 }
 0x183   : > { %v438_v37 = vadd.f32 %v436_v32, %v430_v35 }
 0x185   : > { %v439_v38 = vpack.c.bf16 %v438_v37, %v437_v36 }
 0x187   : > { %440 = vst.msk [vmem:[#allocation2] sm:$0xff] %vm395_vm0, %v439_v38 }
 0x188 PF: > { %v773_v39 = vld [vmem:[%s1007_s24] sm:$0xff]   ;;  %v865_v40 = vmov 0.0   ;;  %v774_v41 = vld [vmem:[%s1007_s24 + $0x8] sm:$0xff]   ;;  %vm866_vm1 = vmmov 0   ;;  %vm464_vm2 = vcmask 261120   ;;  %v448_v43 = vlaneseq }
 0x189   : > { %714 = vmatprep.subr.bf16.mxu0 %v865_v40  ;;  %718 = vmatprep.mubr.msk.bf16.mxu0 %vm866_vm1, %v865_v40  ;;  %v446_v45 = vld [vmem:[%s367_s10] sm:$0x1]  ;;  %vm517_vm3 = vcmask 257024  }
 0x18a   : > { %715 = vmatpush3.bf16.msra.mxu0 %v773_v39  ;;  %v449_v44 = vshrl.u32 %v448_v43, 7  ;;  %v447_v46 = vunpack.c.l.bf16 %v446_v45 }
 0x18b   : > { %716 = vmatprep.subr.bf16.mxu0 %v865_v40 }
 0x18c   : > { %v450_v47 = vsub.s32 0, %v449_v44 }
 0x18e   : > { %717 = vmatpush3.bf16.msra.mxu0 %v774_v41  ;;  %v441_v42 = vld [vmem:[#allocation2] sm:$0xff]  ;;  %v451_v48 = vrot.slane %v447_v46, %v450_v47 }
 0x191   : > { %719 = vmatmul.mubr.msk.bf16.vlgmr.msra.gmra.mrb[0].mxu0 %vm464_vm2, %v441_v42 }
 0x264   : > { %v502_v49 = vpop.f32.mrb[0].mxu0 }
 0x265   : > { %v503_v50 = vadd.f32 %v502_v49, %v451_v48  ;;  %v720_v51 = vpop.f32.mrb[1].mxu0 }
 0x266   : > { %v505_v52 = vpop.f32.mrb[2].mxu0 }
 0x267   : > { %v705_v53 = vpack.c.bf16 %v503_v50, %v503_v50  ;;  %v506_v54 = vadd.f32 %v505_v52, %v451_v48  ;;  %v721_v55 = vpop.f32.mrb[3].mxu0 }
 0x269   : > { %518 = vst.msk [vmem:[%s1013_s16] sm:$0xf] %vm517_vm3, %v705_v53  ;;  %v706_v56 = vpack.c.bf16 %v506_v54, %v506_v54 }
 0x26b   : > { %519 = vst.msk [vmem:[%s1013_s16 + $0x4] sm:$0xf] %vm517_vm3, %v706_v56 }
 0x26c PF: > { %s17_s20 = sadd.s32 1, %s861_s20   ;;  %s1055_s18 = smov %s857_s19 }
 0x26d   : > { %p14_p4 = scmp.ge.s32.totalorder %s17_s20, 5   ;;  %s1056_s19 = smov %s1058_s22 }
 0x26f   :  { %16 = sbr.rel (!%p14_p4) target bundleno = 3 (0x3), region = 89 }
 0x276   :  { %556 = vsyncpa [#allocation4], 1 }
 0x277   :  { %558 = vsyncpa [#allocation4 + $0x1], 1 }
 0x278   :  { %559 = vsyncpa [#allocation6], 1 }

// kernel: _lambda_.87
= control target key start
LH: loop header
LB: loop body
LE: loop exit
PB: predicated region body
PF: predicated region fallthrough
CT: control target
= control target key end

     0   :  { %9 = vsyncpa [#allocation3], 0  ;;  %s288_s0 = inlined_call_operand.vmem [shape: bf16[16,32], index: 0, kind: input, shape index: {}]   ;;  %s289_s1 = inlined_call_operand.hbm [shape: bf16[1,32,32], index: 1, kind: input, shape index: {}]   ;;  %s290_s2 = inlined_call_operand.hbm [shape: bf16[1,1,32], index: 2, kind: input, shape index: {}]   ;;  %s291_s3 = inlined_call_operand.vmem [shape: bf16[16,32], index: 3, kind: input, shape index: {}]   ;;  %s292_s4 = inlined_call_operand.vmem [shape: bf16[1,16,32], index: 4, kind: output, shape index: {}]  }
   0x1   :  { %10 = vsyncpa [#allocation5], 0  ;;  %s221_s15 = smov [#allocation2]   ;;  %s173_s19 = scalar_lea.hbm %s289_s1, 256 }
   0x2   :  { %s18_s16 = sshll.u32 %s221_s15, 4  ;;  %p174_p0 = scmp.ne.s32.totalorder %s289_s1, %s173_s19  ;;  %s19_s16 = int_to_ptr.vmem [resolvable:$true] %s18_s16 }
   0x3   :  { %p177_p1 = scmp.lt.u32.totalorder %s173_s19, %s289_s1 }
   0x5   :  { %p179_p2 = pnand %p177_p1, %p174_p0 }
   0x7   :  { %182 = shalt.err (!%p179_p2)
}
   0x8   :  { %s183_s24 = scalar_lea.vmem %s19_s16, 256  ;;  %p188_p4 = scmp.lt.s32.totalorder %s19_s16, %s19_s16 }
   0x9   :  { %p184_p3 = scmp.ne.s32.totalorder %s19_s16, %s183_s24  ;;  %p189_p5 = scmp.lt.s32.totalorder %s183_s24, %s183_s24 }
   0xb   :  { %p190_p6 = por %p189_p5, %p188_p4 }
   0xd   :  { %p191_p7 = pnand %p190_p6, %p184_p3 }
   0xf   :  { %194 = shalt.err (!%p191_p7)
}
  0x10   :  { %s222_s25 = smov 64   ;;  %s223_s26 = smov 4  }
  0x11   :  { %24 = dma.hbm_to_vmem [thread:$0]  %s289_s1, 256, %s19_s16, [#allocation3], %s222_s25, %s222_s25, %s223_s26  }
  0x12   :  { %s224_s29 = smov [#allocation4]   ;;  %s195_s7 = scalar_lea.hbm %s290_s2, 16 }
  0x13   :  { %s31_s30 = sshll.u32 %s224_s29, 4  ;;  %p196_p8 = scmp.ne.s32.totalorder %s290_s2, %s195_s7  ;;  %s32_s30 = int_to_ptr.vmem [resolvable:$true] %s31_s30 }
  0x14   :  { %p199_p9 = scmp.lt.u32.totalorder %s195_s7, %s290_s2 }
  0x16   :  { %p201_p10 = pnand %p199_p9, %p196_p8 }
  0x18   :  { %204 = shalt.err (!%p201_p10)
}
  0x19   :  { %s205_s12 = scalar_lea.vmem %s32_s30, 16  ;;  %s209_s1 = scalar_lea.vmem %s32_s30, 32 }
  0x1a   :  { %p206_p11 = scmp.ne.s32.totalorder %s32_s30, %s205_s12  ;;  %p210_p12 = scmp.lt.s32.totalorder %s32_s30, %s32_s30 }
  0x1b   :  { %p211_p13 = scmp.lt.s32.totalorder %s209_s1, %s205_s12 }
  0x1d   :  { %p212_p0 = por %p211_p13, %p210_p12 }
  0x1f   :  { %p213_p1 = pnand %p212_p0, %p206_p11 }
  0x21   :  { %216 = shalt.err (!%p213_p1)
}
  0x22   :  { %34 = dma.hbm_to_vmem [thread:$0]  %s290_s2, 16, %s32_s30, [#allocation5]  }
  0x23   :  { %217 = dma.done.wait [#allocation3], 256  }
  0x24   :  { %218 = vsyncadd [#allocation3], 4294967040 }
  0x25   :  { %219 = dma.done.wait [#allocation5], 16  }
  0x26   :  { %220 = vsyncadd [#allocation5], 4294967280  ;;  %v225_v0 = vmov 0.0   ;;  %vm226_vm0 = vmmov 0   ;;  %v170_v1 = vld [vmem:[#allocation2] sm:$0xff]   ;;  %v171_v2 = vld [vmem:[#allocation2 + $0x8] sm:$0xff]   ;;  %v52_v4 = vlaneseq }
  0x27   :  { %156 = vmatprep.subr.bf16.mxu0 %v225_v0  ;;  %160 = vmatprep.mubr.msk.bf16.mxu0 %vm226_vm0, %v225_v0  ;;  %v172_v3 = vld [vmem:[%s288_s0] sm:$0xff]   ;;  %vm73_vm1 = vcmask 261120   ;;  %v50_v6 = vld [vmem:[#allocation4] sm:$0x1]  ;;  %vm132_vm2 = vcmask 257024  }
  0x28   :  { %157 = vmatpush3.bf16.msra.mxu0 %v170_v1  ;;  %v53_v5 = vshrl.u32 %v52_v4, 7  ;;  %v51_v7 = vunpack.c.l.bf16 %v50_v6  ;;  %v150_v9 = vld [vmem:[%s291_s3] sm:$0xff]  }
  0x29   :  { %158 = vmatprep.subr.bf16.mxu0 %v225_v0  ;;  %v151_v11 = vunpack.c.l.bf16 %v150_v9  ;;  %v152_v15 = vunpack.c.h.bf16 %v150_v9 }
  0x2a   :  { %v54_v8 = vsub.s32 0, %v53_v5 }
  0x2c   :  { %159 = vmatpush3.bf16.msra.mxu0 %v171_v2  ;;  %v55_v10 = vrot.slane %v51_v7, %v54_v8 }
  0x2f   :  { %161 = vmatmul.mubr.msk.bf16.vlgmr.msra.gmra.mrb[0].mxu0 %vm73_vm1, %v172_v3 }
 0x102   :  { %v111_v12 = vpop.f32.mrb[0].mxu0 }
 0x103   :  { %v112_v13 = vadd.f32 %v111_v12, %v55_v10  ;;  %v162_v14 = vpop.f32.mrb[1].mxu0 }
 0x104   :  { %v114_v16 = vpop.f32.mrb[2].mxu0 }
 0x105   :  { %v122_v17 = vadd.f32 %v151_v11, %v112_v13  ;;  %v115_v18 = vadd.f32 %v114_v16, %v55_v10  ;;  %v163_v19 = vpop.f32.mrb[3].mxu0 }
 0x107   :  { %v147_v20 = vpack.c.bf16 %v122_v17, %v122_v17  ;;  %v123_v21 = vadd.f32 %v152_v15, %v115_v18 }
 0x109   :  { %133 = vst.msk [vmem:[%s292_s4] sm:$0xf] %vm132_vm2, %v147_v20  ;;  %v148_v22 = vpack.c.bf16 %v123_v21, %v123_v21 }
 0x10b   :  { %134 = vst.msk [vmem:[%s292_s4 + $0x4] sm:$0xf] %vm132_vm2, %v148_v22 }
 0x10c   :  { %139 = vsyncpa [#allocation3], 1 }
 0x10d   :  { %140 = vsyncpa [#allocation5], 1 }

// kernel: _lambda_.86
= control target key start
LH: loop header
LB: loop body
LE: loop exit
PB: predicated region body
PF: predicated region fallthrough
CT: control target
= control target key end

     0   :  { %s1090_s15 = smov 0   ;;  %s1092_s16 = smov 0   ;;  %s1217_s0 = inlined_call_operand.vmem [shape: bf16[3,2,8,32], index: 0, kind: input, shape index: {}, may-alias: {0,1,2}]   ;;  %s1218_s1 = inlined_call_operand.vmem [shape: bf16[3,2,8,32], index: 1, kind: input, shape index: {}, may-alias: {0,1,2}]   ;;  %s1219_s2 = inlined_call_operand.vmem [shape: bf16[3,2,8,32], index: 2, kind: input, shape index: {}, may-alias: {0,1,2}]   ;;  %s1220_s3 = inlined_call_operand.vmem [shape: f32[2,1,8], index: 3, kind: input, shape index: {}]   ;;  %s1221_s4 = inlined_call_operand.vmem [shape: bf16[2,8,32], index: 4, kind: output, shape index: {}]  }
   0x1   :  { %s1094_s17 = smov 0  }
   0x2 LB: > { %s26_s18 = sadd.s32 1, %s1050_s16  ;;  %p890_p0 = scmp.ge.s32.totalorder %s1054_s17, 1  ;;  %s1054_s17 = sphi %s1094_s17, %s14_s17   ;;  %s1050_s16 = sphi %s1092_s16, %s1223_s16   ;;  %s1046_s15 = sphi %s1090_s15, %s1222_s15  }
   0x3   : > { %p28_p1 = scmp.ge.s32.totalorder %s26_s18, 2  ;;  %p208_p2 = scmp.lt.s32.totalorder %s1054_s17, 3 }
   0x5   : > { %s1225_s18 = smov (%p28_p1, %s26_s18), 0  ;;  %p209_p3 = pnand %p890_p0, %p208_p2 }
   0x6   : > { %p251_p4 = scmp.lt.s32.totalorder (!%p209_p3), %s1046_s15, 1  ;;  %v1056_v0 = vmov (!%p209_p3), 0.0   ;;  %vm1057_vm0 = vmmov (!%p209_p3), 0   ;;  %vm284_vm1 = vcmask (!%p209_p3), 64512   ;;  %v333_v4 = vlaneseq (!%p209_p3)  ;;  %s1059_s29 = smov (!%p209_p3), 120  }
   0x7   : > { %212 = sbr.rel (%p209_p3) target bundleno = 1479 (0x5c7), region = 36  ;;  %932 = vmatprep.subr.bf16.mxu0 (!%p209_p3), %v1056_v0  ;;  %934 = vmatprep.mubr.msk.bf16.mxu0 (!%p209_p3), %vm1057_vm0, %v1056_v0  ;;  %v1058_v8 = vmov (!%p209_p3), 0   ;;  %s1060_s30 = smov (!%p209_p3), 112   ;;  %vm354_vm4 = vcmask (!%p209_p3), 1043456   ;;  %vm399_vm5 = vcmask (!%p209_p3), 60416   ;;  %vm529_vm6 = vcmask (!%p209_p3), 126016  }
   0x8   : > { %938 = vmatprep.subr.bf16.mxu1 (!%p209_p3), %v1056_v0  ;;  %940 = vmatprep.mubr.msk.bf16.mxu1 (!%p209_p3), %vm1057_vm0, %v1056_v0  ;;  %v334_v6 = vshrl.u32 (!%p209_p3), %v333_v4, 7  ;;  %s1061_s5 = smov (!%p209_p3), 104   ;;  %s1062_s12 = smov (!%p209_p3), 8   ;;  %vm650_vm7 = vcmask (!%p209_p3), 191616   ;;  %vm771_vm8 = vcmask (!%p209_p3), 257216  }
   0x9   : > { %s1063_s13 = smov (!%p209_p3), 16   ;;  %s1064_s14 = smov (!%p209_p3), 24  }
   0xa   : > { %v335_v7 = vsub.s32 (!%p209_p3), 0, %v334_v6 }
   0xe   : > { %s1227_s15 = smov (!%p251_p4, %s1046_s15), 1 }
   0xf   : > { %s1114_s19 = sshll.u32 %s1227_s15, 2  ;;  %s270_s28 = scalar_lea.vmem %s1220_s3, %s1227_s15 }
  0x10   : > { %s825_s22 = scalar_lea.vmem %s1218_s1, %s1114_s19  ;;  %s257_s25 = scalar_lea.vmem %s1217_s0, %s1114_s19  ;;  %v282_v5 = vld [vmem:[%s270_s28] sm:$0x1] }
  0x11   : > { %v895_v1 = vld [vmem:[%s825_s22 + $0x8] sm:$0xf]  ;;  %v279_v3 = vld [vmem:[%s257_s25] sm:$0xf]  ;;  %vm283_vm2 = vcmp.gt.f32.partialorder %v282_v5, 0.5  ;;  %s828_s8 = scalar_lea.vmem %s1219_s2, %s1114_s19  ;;  %s1173_s11 = scalar_lea.vmem %s1221_s4, %s1114_s19 }
  0x12   : > { %v289_v2 = vsel %vm284_vm1, %v895_v1, 0  ;;  %v332_v9 = vsel %vm283_vm2, 1, %v1058_v8  ;;  %v900_v18 = vcombine.low %v895_v1, %v895_v1  ;;  %v899_v19 = vcombine.low %v279_v3, %v279_v3  ;;  %v1148_v25 = vld [vmem:[%s828_s8 + $0x10] sm:$0xf] }
  0x13   : > { %933 = vmatpush3.bf16.xpose.msra.mxu0 %v289_v2  ;;  %v1132_v10 = vrot.slane %v332_v9, %v335_v7  ;;  %v356_v26 = vsel %vm354_vm4, %v1148_v25, 0 }
  0x14   : > { %950 = vmatprep.subr.bf16.mxu0 %v1056_v0  ;;  %409 = vrot.lane.b32.xlu1 %v900_v18, %s1059_s29 }
  0x15   : > { %vm337_vm3 = vcmp.eq.s32.totalorder %v1132_v10, 1  ;;  %939 = vmatpush3.bf16.msra.mxu1 %v356_v26 }
  0x16   : > { %944 = vmatprep.subr.bf16.mxu1 %v1056_v0 }
  0x18   : > { %404 = vrot.lane.b32.xlu1 %v899_v19, %s1059_s29 }
  0x1a   : > { %935 = vmatmul.mubr.msk.bf16.vlgmr.msra.gmra.mrb[0].mxu0 %vm284_vm1, %v279_v3 }
  0x1b   : > { %952 = vmatprep.mubr.msk.bf16.mxu0 %vm1057_vm0, %v1056_v0 }
  0x1c   : > { %531 = vrot.lane.b32.xlu1 %v899_v19, %s1060_s30 }
  0x20   : > { %654 = vrot.lane.b32.xlu1 %v900_v18, %s1061_s5 }
  0x24   : > { %652 = vrot.lane.b32.xlu1 %v899_v19, %s1061_s5 }
  0x86   : > { %v410_v29 = vpop.permute.xlu1 %409 }
  0x87   : > { %v415_v31 = vsel %vm284_vm1, %v410_v29, 0 }
  0x8a   : > { %v405_v33 = vpop.permute.xlu1 %404 }
  0x8e   : > { %v532_v35 = vpop.permute.xlu1 %531 }
  0x92   : > { %v655_v37 = vpop.permute.xlu1 %654 }
  0x93   : > { %v660_v38 = vsel %vm284_vm1, %v655_v37, 0 }
  0x96   : > { %v653_v39 = vpop.permute.xlu1 %652 }
  0xed   : > { %v325_v11 = vpop.f32.mrb[0].mxu0 }
  0xee   : > { %v331_v12 = vmul.f32 0.35355338, %v325_v11  ;;  %v936_v13 = vpop.f32.mrb[1].mxu0 }
  0xef   : > { %v328_v14 = vpop.f32.mrb[2].mxu0  ;;  %v902_v13 = vcombine.low %v1148_v25, %v1148_v25 }
  0xf0   : > { %v937_v15 = vpop.f32.mrb[3].mxu0  ;;  %v338_v16 = vsel %vm337_vm3, %v331_v12, -1e+30 }
  0xf1   : > { %v339_v17 = vsel %vm284_vm1, %v338_v16, -inf }
  0xf2   : > { %340 = vmax.xlane.f32.xlu0 %v339_v17 }
 0x17f   : > { %v341_v20 = vpop.xlane.xlu0 %340 }
 0x180   : > { %v342_v21 = vsub.f32 %v338_v16, %v341_v20 }
 0x182   : > { %v343_v22 = vmul.f32 1.442695, %v342_v21 }
 0x184   : > { %1016 = vpow2.f32 %v343_v22 }
 0x18e   : > { %v1017_v23 = vpop.eup %1016 }
 0x18f   : > { %v345_v24 = vsel %vm284_vm1, %v1017_v23, 0.0 }
 0x190   : > { %346 = vadd.xlane.f32.xlu0 %v345_v24 }
 0x1a6   : > { %533 = vrot.lane.b32.xlu0 %v900_v18, %s1060_s30 }
 0x21d   : > { %v347_v27 = vpop.xlane.xlu0 %346 }
 0x21e   : > { %1018 = vrcp.f32 %v347_v27 }
 0x221   : > { %v534_v34 = vpop.permute.xlu0 %533 }
 0x222   : > { %v539_v36 = vsel %vm284_vm1, %v534_v34, 0 }
 0x228   : > { %v1019_v28 = vpop.eup %1018 }
 0x229   : > { %v349_v30 = vmul.f32 %v1019_v28, %v1017_v23 }
 0x22b   : > { %v350_v32 = vpack.c.bf16 %v349_v30, %v349_v30 }
 0x22d   : > { %941 = vmatmul.mubr.msk.bf16.vlgmr.msra.gmra.mrb[0].mxu1 %vm284_vm1, %v350_v32 }
 0x22e   : > { %945 = vmatpush3.bf16.xpose.msra.mxu1 %v415_v31  ;;  %946 = vmatprep.mubr.msk.bf16.mxu1 %vm1057_vm0, %v1056_v0 }
 0x22f   : > { %956 = vmatprep.subr.bf16.mxu1 %v1056_v0 }
 0x235   : > { %947 = vmatmul.mubr.msk.bf16.vlgmr.msra.gmra.mrb[4].mxu1 %vm284_vm1, %v405_v33 }
 0x236   : > { %957 = vmatpush3.bf16.xpose.msra.mxu1 %v539_v36  ;;  %958 = vmatprep.mubr.msk.bf16.mxu1 %vm1057_vm0, %v1056_v0 }
 0x237   : > { %968 = vmatprep.subr.bf16.mxu1 %v1056_v0 }
 0x23d   : > { %959 = vmatmul.mubr.msk.bf16.vlgmr.msra.gmra.mrb[8].mxu1 %vm284_vm1, %v532_v35 }
 0x23e   : > { %969 = vmatpush3.bf16.xpose.msra.mxu1 %v660_v38  ;;  %970 = vmatprep.mubr.msk.bf16.mxu1 %vm1057_vm0, %v1056_v0 }
 0x245   : > { %971 = vmatmul.mubr.msk.bf16.vlgmr.msra.gmra.mrb[12].mxu1 %vm284_vm1, %v653_v39 }
 0x300   : > { %v392_v40 = vpop.f32.mrb[0].mxu1 }
 0x301   : > { %v398_v41 = vpack.c.bf16 %v392_v40, %v392_v40  ;;  %v942_v42 = vpop.f32.mrb[1].mxu1 }
 0x302   : > { %v395_v43 = vpop.f32.mrb[2].mxu1 }
 0x303   : > { %400 = vst.msk [vmem:[%s1173_s11] sm:$0xf] %vm399_vm5, %v398_v41  ;;  %v943_v44 = vpop.f32.mrb[3].mxu1 }
 0x308   : > { %v451_v45 = vpop.f32.mrb[4].mxu1 }
 0x309   : > { %v457_v46 = vmul.f32 0.35355338, %v451_v45  ;;  %v948_v47 = vpop.f32.mrb[5].mxu1 }
 0x30a   : > { %v454_v48 = vpop.f32.mrb[6].mxu1 }
 0x30b   : > { %v949_v49 = vpop.f32.mrb[7].mxu1  ;;  %v458_v50 = vsel %vm337_vm3, %v457_v46, -1e+30 }
 0x30c   : > { %v459_v51 = vsel %vm284_vm1, %v458_v50, -inf }
 0x30d   : > { %460 = vmax.xlane.f32.xlu1 %v459_v51 }
 0x310   : > { %v575_v52 = vpop.f32.mrb[8].mxu1 }
 0x311   : > { %v581_v53 = vmul.f32 0.35355338, %v575_v52  ;;  %v960_v54 = vpop.f32.mrb[9].mxu1 }
 0x312   : > { %v578_v55 = vpop.f32.mrb[10].mxu1 }
 0x313   : > { %v582_v56 = vsel %vm337_vm3, %v581_v53, -1e+30  ;;  %v961_v57 = vpop.f32.mrb[11].mxu1 }
 0x314   : > { %v583_v58 = vsel %vm284_vm1, %v582_v56, -inf }
 0x315   : > { %584 = vmax.xlane.f32.xlu0 %v583_v58 }
 0x318   : > { %v696_v59 = vpop.f32.mrb[12].mxu1 }
 0x319   : > { %v702_v60 = vmul.f32 0.35355338, %v696_v59  ;;  %v972_v61 = vpop.f32.mrb[13].mxu1 }
 0x31a   : > { %v699_v62 = vpop.f32.mrb[14].mxu1 }
 0x31b   : > { %v703_v63 = vsel %vm337_vm3, %v702_v60, -1e+30  ;;  %v973_v1 = vpop.f32.mrb[15].mxu1 }
 0x31c   : > { %v704_v2 = vsel %vm284_vm1, %v703_v63, -inf }
 0x31d   : > { %705 = vmax.xlane.f32.xlu1 %v704_v2 }
 0x39a   : > { %v461_v3 = vpop.xlane.xlu1 %460 }
 0x39b   : > { %v462_v4 = vsub.f32 %v458_v50, %v461_v3 }
 0x39d   : > { %v463_v5 = vmul.f32 1.442695, %v462_v4 }
 0x39f   : > { %1020 = vpow2.f32 %v463_v5 }
 0x3a2   : > { %v585_v6 = vpop.xlane.xlu0 %584 }
 0x3a3   : > { %v586_v7 = vsub.f32 %v582_v56, %v585_v6 }
 0x3a5   : > { %v587_v8 = vmul.f32 1.442695, %v586_v7 }
 0x3a7   : > { %1022 = vpow2.f32 %v587_v8 }
 0x3a9   : > { %v1021_v9 = vpop.eup %1020 }
 0x3aa   : > { %v465_v11 = vsel %vm284_vm1, %v1021_v9, 0.0  ;;  %v706_v14 = vpop.xlane.xlu1 %705 }
 0x3ab   : > { %466 = vadd.xlane.f32.xlu1 %v465_v11  ;;  %v707_v15 = vsub.f32 %v703_v63, %v706_v14 }
 0x3ad   : > { %v708_v16 = vmul.f32 1.442695, %v707_v15 }
 0x3af   : > { %1024 = vpow2.f32 %v708_v16 }
 0x3b1   : > { %v1023_v12 = vpop.eup %1022 }
 0x3b2   : > { %v589_v10 = vsel %vm284_vm1, %v1023_v12, 0.0 }
 0x3b3   : > { %590 = vadd.xlane.f32.xlu0 %v589_v10 }
 0x3b9   : > { %v1025_v17 = vpop.eup %1024 }
 0x3ba   : > { %v710_v18 = vsel %vm284_vm1, %v1025_v17, 0.0 }
 0x3bc   : > { %595 = vrot.lane.b32.xlu1 %v902_v13, %s1060_s30 }
 0x3c9   : > { %474 = vrot.lane.b32.xlu0 %v902_v13, %s1059_s29 }
 0x3e0   : > { %711 = vadd.xlane.f32.xlu1 %v710_v18 }
 0x3f1   : > { %716 = vrot.lane.b32.xlu1 %v902_v13, %s1061_s5 }
 0x438   : > { %v467_v19 = vpop.xlane.xlu1 %466 }
 0x439   : > { %1026 = vrcp.f32 %v467_v19 }
 0x43c   : > { %v596_v25 = vpop.permute.xlu1 %595 }
 0x43d   : > { %v601_v27 = vsel %vm354_vm4, %v596_v25, 0 }
 0x440   : > { %v591_v20 = vpop.xlane.xlu0 %590 }
 0x441   : > { %1028 = vrcp.f32 %v591_v20 }
 0x443   : > { %v1027_v21 = vpop.eup %1026 }
 0x444   : > { %v469_v22 = vmul.f32 %v1027_v21, %v1021_v9  ;;  %v475_v23 = vpop.permute.xlu0 %474 }
 0x445   : > { %v480_v24 = vsel %vm354_vm4, %v475_v23, 0 }
 0x446   : > { %951 = vmatpush3.bf16.msra.mxu0 %v480_v24  ;;  %v470_v26 = vpack.c.bf16 %v469_v22, %v469_v22 }
 0x447   : > { %962 = vmatprep.subr.bf16.mxu0 %v1056_v0 }
 0x449   : > { %953 = vmatmul.mubr.msk.bf16.vlgmr.msra.gmra.mrb[4].mxu0 %vm284_vm1, %v470_v26 }
 0x44a   : > { %963 = vmatpush3.bf16.msra.mxu0 %v601_v27  ;;  %964 = vmatprep.mubr.msk.bf16.mxu0 %vm1057_vm0, %v1056_v0 }
 0x44b   : > { %v1029_v28 = vpop.eup %1028  ;;  %974 = vmatprep.subr.bf16.mxu0 %v1056_v0 }
 0x44c   : > { %v593_v29 = vmul.f32 %v1029_v28, %v1023_v12 }
 0x44e   : > { %v594_v30 = vpack.c.bf16 %v593_v29, %v593_v29 }
 0x451   : > { %965 = vmatmul.mubr.msk.bf16.vlgmr.msra.gmra.mrb[8].mxu0 %vm284_vm1, %v594_v30 }
 0x452   : > { %976 = vmatprep.mubr.msk.bf16.mxu0 %vm1057_vm0, %v1056_v0 }
 0x46d   : > { %v712_v31 = vpop.xlane.xlu1 %711 }
 0x46e   : > { %1030 = vrcp.f32 %v712_v31 }
 0x471   : > { %v717_v32 = vpop.permute.xlu1 %716 }
 0x472   : > { %v722_v33 = vsel %vm354_vm4, %v717_v32, 0 }
 0x473   : > { %975 = vmatpush3.bf16.msra.mxu0 %v722_v33 }
 0x478   : > { %v1031_v34 = vpop.eup %1030 }
 0x479   : > { %v714_v35 = vmul.f32 %v1031_v34, %v1025_v17 }
 0x47b   : > { %v715_v36 = vpack.c.bf16 %v714_v35, %v714_v35 }
 0x47d   : > { %977 = vmatmul.mubr.msk.bf16.vlgmr.msra.gmra.mrb[12].mxu0 %vm284_vm1, %v715_v36 }
 0x51c   : > { %v516_v37 = vpop.f32.mrb[4].mxu0 }
 0x51d   : > { %v913_v38 = vpack.c.bf16 %v516_v37, %v516_v37  ;;  %v954_v39 = vpop.f32.mrb[5].mxu0 }
 0x51e   : > { %v519_v40 = vpop.f32.mrb[6].mxu0 }
 0x51f   : > { %526 = vrot.lane.b32.xlu0 %v913_v38, %s1062_s12  ;;  %v955_v41 = vpop.f32.mrb[7].mxu0 }
 0x524   : > { %v637_v42 = vpop.f32.mrb[8].mxu0 }
 0x525   : > { %v914_v0 = vpack.c.bf16 %v637_v42, %v637_v42  ;;  %v966_v43 = vpop.f32.mrb[9].mxu0 }
 0x526   : > { %v640_v44 = vpop.f32.mrb[10].mxu0 }
 0x527   : > { %647 = vrot.lane.b32.xlu1 %v914_v0, %s1063_s13  ;;  %v967_v45 = vpop.f32.mrb[11].mxu0 }
 0x550   : > { %v758_v46 = vpop.f32.mrb[12].mxu0 }
 0x551   : > { %v915_v47 = vpack.c.bf16 %v758_v46, %v758_v46  ;;  %v978_v48 = vpop.f32.mrb[13].mxu0 }
 0x552   : > { %v761_v49 = vpop.f32.mrb[14].mxu0 }
 0x553   : > { %768 = vrot.lane.b32.xlu0 %v915_v47, %s1064_s14  ;;  %v979_v50 = vpop.f32.mrb[15].mxu0 }
 0x591   : > { %v527_v51 = vpop.permute.xlu0 %526 }
 0x592   : > { %530 = vst.msk [vmem:[%s1173_s11] sm:$0xf] %vm529_vm6, %v527_v51 }
 0x599   : > { %v648_v52 = vpop.permute.xlu1 %647 }
 0x59a   : > { %651 = vst.msk [vmem:[%s1173_s11] sm:$0xf] %vm650_vm7, %v648_v52 }
 0x5c5   : > { %v769_v53 = vpop.permute.xlu0 %768 }
 0x5c6   : > { %772 = vst.msk [vmem:[%s1173_s11] sm:$0xf] %vm771_vm8, %v769_v53 }
 0x5c7 PF: > { %s14_s17 = sadd.s32 1, %s1054_s17   ;;  %s1222_s15 = smov %s1050_s16 }
 0x5c8   : > { %p11_p5 = scmp.ge.s32.totalorder %s14_s17, 4   ;;  %s1223_s16 = smov %s1225_s18 }
 0x5ca   :  { %13 = sbr.rel (!%p11_p5) target bundleno = 2 (0x2), region = 75 }

// kernel: _lambda_.68
= control target key start
LH: loop header
LB: loop body
LE: loop exit
PB: predicated region body
PF: predicated region fallthrough
CT: control target
= control target key end

     0   :  { %9 = vsyncpa [#allocation3], 0  ;;  %s736_s15 = smov 0   ;;  %s738_s16 = smov 0   ;;  %s827_s0 = inlined_call_operand.vmem [shape: bf16[16,64], index: 0, kind: input, shape index: {}]   ;;  %s828_s1 = inlined_call_operand.vmem [shape: bf16[1,64,32], index: 1, kind: input, shape index: {}]   ;;  %s829_s2 = inlined_call_operand.hbm [shape: bf16[1,1,32], index: 2, kind: input, shape index: {}]   ;;  %s830_s3 = inlined_call_operand.vmem [shape: bf16[8,32], index: 3, kind: input, shape index: {}]   ;;  %s831_s4 = inlined_call_operand.vmem [shape: bf16[1,16,32], index: 4, kind: output, shape index: {}]  }
   0x1   :  { %s740_s17 = smov 0  }
   0x2 LB: > { %s576_s18 = sadd.s32 4294967295, %s706_s17   ;;  %s41_s19 = sadd.s32 1, %s702_s16  ;;  %s706_s17 = sphi %s740_s17, %s15_s17   ;;  %s702_s16 = sphi %s738_s16, %s841_s16   ;;  %s698_s15 = sphi %s736_s15, %s840_s15  }
   0x3   : > { %p43_p0 = scmp.ge.s32.totalorder %s41_s19, 2  ;;  %p578_p1 = scmp.ge.s32.totalorder %s706_s17, 1 }
   0x4   : > { %p188_p2 = scmp.lt.s32.totalorder %s706_s17, 3  ;;  %p761_p4 = scmp.eq.s32.totalorder %s576_s18, 0 }
   0x5   : > { %s843_s19 = smov (%p43_p0, %s41_s19), 0  ;;  %s708_s22 = smov [#allocation2]  }
   0x6   : > { %p757_p3 = pnand %p578_p1, %p188_p2  ;;  %s220_s23 = sshll.u32 %s708_s22, 4  ;;  %s221_s23 = int_to_ptr.vmem [resolvable:$true] %s220_s23 }
   0x7   : > { %s836_s21 = scalar_select %p761_p4, 1, 0 }
   0x8   : > { %s835_s20 = scalar_select %p757_p3, 1, 0 }
   0x9   : > { %p615_p5 = pneg %p757_p3  ;;  %s652_s27 = scalar_lea.hbm %s829_s2, 16 }
   0xa   : > { %p653_p7 = scmp.ne.s32.totalorder %s829_s2, %s652_s27  ;;  %p659_p11 = scmp.lt.u32.totalorder %s652_s27, %s829_s2 }
   0xb   : > { %p769_p6 = pnand %p761_p4, %p615_p5 }
   0xd   : > { %p654_p8 = pneg %p769_p6 }
   0xf   : > { %p655_p9 = pnand %p654_p8, %p653_p7 }
  0x11   : > { %p656_p10 = pneg %p655_p9 }
  0x13   : > { %p661_p12 = pnand %p659_p11, %p656_p10 }
  0x15   : > { %664 = shalt.err (!%p661_p12)
}
  0x16   : > { %s665_s6 = scalar_lea.vmem %s221_s23, 16  ;;  %s672_s7 = scalar_lea.vmem %s221_s23, 32 }
  0x17   : > { %p666_p13 = scmp.ne.s32.totalorder %s221_s23, %s665_s6  ;;  %p673_p2 = scmp.lt.s32.totalorder %s221_s23, %s221_s23 }
  0x18   : > { %p674_p5 = scmp.lt.s32.totalorder %s672_s7, %s665_s6 }
  0x19   : > { %p668_p0 = pnand %p666_p13, %p654_p8 }
  0x1a   : > { %p675_p4 = por %p674_p5, %p673_p2 }
  0x1b   : > { %p669_p1 = pneg %p668_p0 }
  0x1d   : > { %p676_p3 = pnand %p675_p4, %p669_p1 }
  0x1f   : > { %679 = shalt.err (!%p676_p3)
}
  0x20   : > { %618 = dma.hbm_to_vmem [thread:$0]  (!%p769_p6), %s829_s2, 16, %s221_s23, [#allocation3]  }
  0x21   : > { %p838_p7 = scmp.ne.s32.totalorder %s835_s20, 0 }
  0x22   : > { %p839_p9 = scmp.ne.s32.totalorder (!%p838_p7), %s836_s21, 0 }
  0x23   : > { %250 = sbr.rel (%p838_p7) target bundleno = 279 (0x117), region = 36 }
  0x2a   : > { %693 = dma.done.wait (%p839_p9), [#allocation3], 16  }
  0x2b   : > { %695 = vsyncadd (%p839_p9), [#allocation3], 4294967280  ;;  %v709_v0 = vmov 0.0   ;;  %vm710_vm0 = vmmov 0   ;;  %v648_v1 = vld [vmem:[%s828_s1] sm:$0xff]   ;;  %p300_p3 = scmp.lt.s32.totalorder %s698_s15, 1  ;;  %v347_v6 = vlaneseq }
  0x2c   : > { %599 = vmatprep.subr.bf16.mxu0 %v709_v0  ;;  %607 = vmatprep.mubr.msk.bf16.mxu0 %vm710_vm0, %v709_v0  ;;  %v649_v2 = vld [vmem:[%s828_s1 + $0x8] sm:$0xff]   ;;  %v650_v3 = vld [vmem:[%s828_s1 + $0x10] sm:$0xff]   ;;  %v651_v4 = vld [vmem:[%s828_s1 + $0x18] sm:$0xff]   ;;  %vm375_vm1 = vcmask 523264   ;;  %vm423_vm2 = vcmask 257024  }
  0x2d   : > { %600 = vmatpush3.bf16.msra.mxu0 %v648_v1  ;;  %s845_s15 = smov (!%p300_p3, %s698_s15), 1  ;;  %v348_v7 = vshrl.u32 %v347_v6, 7  ;;  %v345_v8 = vld [vmem:[#allocation2] sm:$0x1] }
  0x2e   : > { %601 = vmatprep.subr.bf16.mxu0 %v709_v0  ;;  %s585_s20 = sshll.u32 %s845_s15, 2  ;;  %v346_v9 = vunpack.c.l.bf16 %v345_v8  ;;  %v419_v11 = vld [vmem:[%s830_s3] sm:$0xf] }
  0x2f   : > { %s306_s25 = scalar_lea.vmem %s827_s0, %s585_s20  ;;  %v349_v10 = vsub.s32 0, %v348_v7  ;;  %v420_v13 = vunpack.c.l.bf16 %v419_v11  ;;  %s334_s29 = scalar_lea.vmem %s831_s4, %s585_s20 }
  0x30   : > { %v336_v5 = vld [vmem:[%s306_s25] sm:$0xf] }
  0x31   : > { %602 = vmatpush3.bf16.msra.mxu0 %v649_v2  ;;  %v350_v12 = vrot.slane %v346_v9, %v349_v10 }
  0x32   : > { %603 = vmatprep.subr.bf16.mxu0 %v709_v0 }
  0x35   : > { %604 = vmatpush3.bf16.msra.mxu0 %v650_v3 }
  0x36   : > { %605 = vmatprep.subr.bf16.mxu0 %v709_v0 }
  0x39   : > { %606 = vmatpush3.bf16.msra.mxu0 %v651_v4 }
  0x3c   : > { %608 = vmatmul.mubr.msk.bf16.vlgmr.msra.gmra.mrb[0].mxu0 %vm375_vm1, %v336_v5 }
 0x10f   : > { %v413_v14 = vpop.f32.mrb[0].mxu0 }
 0x110   : > { %v414_v15 = vadd.f32 %v413_v14, %v350_v12  ;;  %v609_v16 = vpop.f32.mrb[1].mxu0 }
 0x111   : > { %v416_v17 = vpop.f32.mrb[2].mxu0 }
 0x112   : > { %v421_v18 = vadd.f32 %v420_v13, %v414_v15  ;;  %v610_v19 = vpop.f32.mrb[3].mxu0 }
 0x114   : > { %v422_v20 = vpack.c.bf16 %v421_v18, %v421_v18 }
 0x116   : > { %424 = vst.msk [vmem:[%s334_s29] sm:$0xf] %vm423_vm2, %v422_v20 }
 0x117 PF: > { %s15_s17 = sadd.s32 1, %s706_s17   ;;  %s840_s15 = smov %s702_s16 }
 0x118   : > { %p12_p4 = scmp.ge.s32.totalorder %s15_s17, 4   ;;  %s841_s16 = smov %s843_s19 }
 0x11a   :  { %14 = sbr.rel (!%p12_p4) target bundleno = 2 (0x2), region = 78 }
 0x121   :  { %458 = vsyncpa [#allocation3], 1 }
 0x122   :  { %460 = vsyncpa [#allocation3 + $0x1], 1 }

// kernel: _lambda_.88
= control target key start
LH: loop header
LB: loop body
LE: loop exit
PB: predicated region body
PF: predicated region fallthrough
CT: control target
= control target key end

     0   :  { %10 = vsyncpa [#allocation4], 0  ;;  %s446_s0 = inlined_call_operand.vmem [shape: bf16[16,32], index: 0, kind: input, shape index: {}]   ;;  %s447_s1 = inlined_call_operand.hbm [shape: bf16[1,32], index: 1, kind: input, shape index: {}]   ;;  %s448_s2 = inlined_call_operand.hbm [shape: bf16[1,32], index: 2, kind: input, shape index: {}]   ;;  %s449_s3 = inlined_call_operand.hbm [shape: bf16[1,32,32], index: 3, kind: input, shape index: {}]   ;;  %s450_s4 = inlined_call_operand.hbm [shape: bf16[1,1,32], index: 4, kind: input, shape index: {}]   ;;  %s451_s5 = inlined_call_operand.vmem [shape: bf16[1,16,32], index: 5, kind: output, shape index: {}]  }
   0x1   :  { %11 = vsyncpa [#allocation6], 0 }
   0x2   :  { %12 = vsyncpa [#allocation9], 0  ;;  %s345_s18 = smov [#allocation5]   ;;  %s346_s20 = smov [#allocation3]  }
   0x3   :  { %s31_s19 = sshll.u32 %s345_s18, 4  ;;  %s21_s21 = sshll.u32 %s346_s20, 4  ;;  %s32_s19 = int_to_ptr.vmem [resolvable:$true] %s31_s19  ;;  %s22_s21 = int_to_ptr.vmem [resolvable:$true] %s21_s21 }
   0x4   :  { %s251_s24 = scalar_lea.hbm %s448_s2, 16 }
   0x5   :  { %p252_p0 = scmp.ne.s32.totalorder %s448_s2, %s251_s24  ;;  %p255_p1 = scmp.lt.u32.totalorder %s251_s24, %s448_s2 }
   0x7   :  { %p257_p2 = pnand %p255_p1, %p252_p0 }
   0x9   :  { %260 = shalt.err (!%p257_p2)
}
   0xa   :  { %s261_s29 = scalar_lea.vmem %s32_s19, 16  ;;  %s265_s30 = scalar_lea.vmem %s32_s19, 32 }
   0xb   :  { %p262_p3 = scmp.ne.s32.totalorder %s32_s19, %s261_s29  ;;  %p266_p4 = scmp.lt.s32.totalorder %s32_s19, %s32_s19 }
   0xc   :  { %p267_p5 = scmp.lt.s32.totalorder %s265_s30, %s261_s29 }
   0xe   :  { %p268_p6 = por %p267_p5, %p266_p4 }
  0x10   :  { %p269_p7 = pnand %p268_p6, %p262_p3 }
  0x12   :  { %272 = shalt.err (!%p269_p7)
}
  0x13   :  { %34 = dma.hbm_to_vmem [thread:$0]  %s448_s2, 16, %s32_s19, [#allocation6]  }
  0x14   :  { %s273_s10 = scalar_lea.hbm %s447_s1, 16 }
  0x15   :  { %p274_p8 = scmp.ne.s32.totalorder %s447_s1, %s273_s10  ;;  %p277_p9 = scmp.lt.u32.totalorder %s273_s10, %s447_s1 }
  0x17   :  { %p279_p10 = pnand %p277_p9, %p274_p8 }
  0x19   :  { %282 = shalt.err (!%p279_p10)
}
  0x1a   :  { %s283_s15 = scalar_lea.vmem %s22_s21, 16  ;;  %s287_s16 = scalar_lea.vmem %s22_s21, 32 }
  0x1b   :  { %p284_p11 = scmp.ne.s32.totalorder %s22_s21, %s283_s15  ;;  %p288_p12 = scmp.lt.s32.totalorder %s22_s21, %s22_s21 }
  0x1c   :  { %p289_p13 = scmp.lt.s32.totalorder %s287_s16, %s283_s15 }
  0x1e   :  { %p290_p0 = por %p289_p13, %p288_p12 }
  0x20   :  { %p291_p1 = pnand %p290_p0, %p284_p11 }
  0x22   :  { %294 = shalt.err (!%p291_p1)
}
  0x23   :  { %24 = dma.hbm_to_vmem [thread:$0]  %s447_s1, 16, %s22_s21, [#allocation4]  }
  0x24   :  { %s347_s18 = smov [#allocation7]   ;;  %s295_s23 = scalar_lea.hbm %s449_s3, 256 }
  0x25   :  { %s40_s19 = sshll.u32 %s347_s18, 4  ;;  %p296_p2 = scmp.ne.s32.totalorder %s449_s3, %s295_s23  ;;  %s41_s19 = int_to_ptr.vmem [resolvable:$true] %s40_s19 }
  0x26   :  { %p299_p3 = scmp.lt.u32.totalorder %s295_s23, %s449_s3 }
  0x28   :  { %p301_p4 = pnand %p299_p3, %p296_p2 }
  0x2a   :  { %304 = shalt.err (!%p301_p4)
}
  0x2b   :  { %s305_s28 = scalar_lea.vmem %s41_s19, 256  ;;  %p310_p6 = scmp.lt.s32.totalorder %s41_s19, %s41_s19 }
  0x2c   :  { %p306_p5 = scmp.ne.s32.totalorder %s41_s19, %s305_s28  ;;  %p311_p7 = scmp.lt.s32.totalorder %s305_s28, %s305_s28 }
  0x2e   :  { %p312_p8 = por %p311_p7, %p310_p6 }
  0x30   :  { %p313_p9 = pnand %p312_p8, %p306_p5 }
  0x32   :  { %316 = shalt.err (!%p313_p9)
}
  0x33   :  { %s348_s1 = smov 64   ;;  %s349_s21 = smov 4  }
  0x34   :  { %46 = dma.hbm_to_vmem [thread:$0]  %s449_s3, 256, %s41_s19, [#allocation6], %s348_s1, %s348_s1, %s349_s21  }
  0x35   :  { %s350_s6 = smov [#allocation8]   ;;  %s317_s10 = scalar_lea.hbm %s450_s4, 16 }
  0x36   :  { %s53_s7 = sshll.u32 %s350_s6, 4  ;;  %p318_p10 = scmp.ne.s32.totalorder %s450_s4, %s317_s10  ;;  %s54_s7 = int_to_ptr.vmem [resolvable:$true] %s53_s7 }
  0x37   :  { %p321_p11 = scmp.lt.u32.totalorder %s317_s10, %s450_s4 }
  0x39   :  { %p323_p12 = pnand %p321_p11, %p318_p10 }
  0x3b   :  { %326 = shalt.err (!%p323_p12)
}
  0x3c   :  { %s327_s15 = scalar_lea.vmem %s54_s7, 16  ;;  %s331_s3 = scalar_lea.vmem %s54_s7, 32 }
  0x3d   :  { %p328_p13 = scmp.ne.s32.totalorder %s54_s7, %s327_s15  ;;  %p332_p0 = scmp.lt.s32.totalorder %s54_s7, %s54_s7 }
  0x3e   :  { %p333_p1 = scmp.lt.s32.totalorder %s331_s3, %s327_s15 }
  0x40   :  { %p334_p2 = por %p333_p1, %p332_p0 }
  0x42   :  { %p335_p3 = pnand %p334_p2, %p328_p13 }
  0x44   :  { %338 = shalt.err (!%p335_p3)
}
  0x45   :  { %56 = dma.hbm_to_vmem [thread:$0]  %s450_s4, 16, %s54_s7, [#allocation9]  }
  0x46   :  { %339 = dma.done.wait [#allocation4], 16  }
  0x47   :  { %340 = vsyncadd [#allocation4], 4294967280 }
  0x48   :  { %341 = dma.done.wait [#allocation6], 272  }
  0x49   :  { %342 = vsyncadd [#allocation6], 4294967024 }
  0x4a   :  { %343 = dma.done.wait [#allocation9], 16  }
  0x4b   :  { %344 = vsyncadd [#allocation9], 4294967280  ;;  %v223_v0 = vld [vmem:[%s446_s0] sm:$0xff]   ;;  %vm83_vm0 = vcmask 261120   ;;  %v245_v15 = vld [vmem:[#allocation7] sm:$0xff]   ;;  %v351_v16 = vmov 0.0   ;;  %v113_v21 = vlaneseq }
  0x4c   :  { %v224_v1 = vunpack.c.l.bf16 %v223_v0  ;;  %v225_v2 = vunpack.c.h.bf16 %v223_v0  ;;  %229 = vmatprep.subr.bf16.mxu0 %v351_v16  ;;  %v246_v17 = vld [vmem:[#allocation7 + $0x8] sm:$0xff]   ;;  %vm352_vm1 = vmmov 0   ;;  %v111_v26 = vld [vmem:[#allocation3] sm:$0x1]  ;;  %v119_v29 = vld [vmem:[#allocation5] sm:$0x1] }
  0x4d   :  { %230 = vmatpush3.bf16.msra.mxu0 %v245_v15  ;;  %233 = vmatprep.mubr.msk.bf16.mxu0 %vm352_vm1, %v351_v16  ;;  %v114_v25 = vshrl.u32 %v113_v21, 7  ;;  %v112_v27 = vunpack.c.l.bf16 %v111_v26  ;;  %v120_v32 = vunpack.c.l.bf16 %v119_v29  ;;  %v134_v43 = vld [vmem:[#allocation8] sm:$0x1]  ;;  %vm205_vm2 = vcmask 257024  }
  0x4e   :  { %v84_v3 = vsel %vm83_vm0, %v224_v1, 0.0  ;;  %v87_v4 = vsel %vm83_vm0, %v225_v2, 0.0  ;;  %231 = vmatprep.subr.bf16.mxu0 %v351_v16  ;;  %v135_v44 = vunpack.c.l.bf16 %v134_v43 }
  0x4f   :  { %85 = vadd.xlane.f32.xlu0 %v84_v3  ;;  %v115_v28 = vsub.s32 0, %v114_v25 }
  0x51   :  { %232 = vmatpush3.bf16.msra.mxu0 %v246_v17  ;;  %v116_v31 = vrot.slane %v112_v27, %v115_v28  ;;  %v124_v35 = vrot.slane %v120_v32, %v115_v28  ;;  %v139_v45 = vrot.slane %v135_v44, %v115_v28 }
  0x53   :  { %88 = vadd.xlane.f32.xlu0 %v87_v4 }
  0xdc   :  { %v86_v5 = vpop.xlane.xlu0 %85 }
  0xdd   :  { %v91_v6 = vmul.f32 0.03125, %v86_v5 }
  0xdf   :  { %v93_v7 = vsub.f32 %v224_v1, %v91_v6 }
  0xe0   :  { %v89_v8 = vpop.xlane.xlu0 %88 }
  0xe1   :  { %v92_v9 = vmul.f32 0.03125, %v89_v8  ;;  %v95_v10 = vmul.f32 %v93_v7, %v93_v7 }
  0xe3   :  { %v94_v11 = vsub.f32 %v225_v2, %v92_v9  ;;  %v97_v12 = vsel %vm83_vm0, %v95_v10, 0.0 }
  0xe4   :  { %98 = vadd.xlane.f32.xlu1 %v97_v12 }
  0xe5   :  { %v96_v13 = vmul.f32 %v94_v11, %v94_v11 }
  0xe7   :  { %v100_v14 = vsel %vm83_vm0, %v96_v13, 0.0 }
  0xe8   :  { %101 = vadd.xlane.f32.xlu1 %v100_v14 }
 0x171   :  { %v99_v18 = vpop.xlane.xlu1 %98 }
 0x172   :  { %v103_v19 = vmul.f32 0.03125, %v99_v18 }
 0x174   :  { %v105_v20 = vadd.f32 1e-05, %v103_v19 }
 0x175   :  { %v102_v22 = vpop.xlane.xlu1 %101 }
 0x176   :  { %247 = vrsqrt.f32 %v105_v20  ;;  %v104_v23 = vmul.f32 0.03125, %v102_v22 }
 0x178   :  { %v106_v24 = vadd.f32 1e-05, %v104_v23 }
 0x17a   :  { %249 = vrsqrt.f32 %v106_v24 }
 0x180   :  { %v248_v30 = vpop.eup %247 }
 0x181   :  { %v109_v33 = vmul.f32 %v248_v30, %v93_v7 }
 0x183   :  { %v117_v36 = vmul.f32 %v116_v31, %v109_v33 }
 0x184   :  { %v250_v34 = vpop.eup %249 }
 0x185   :  { %v110_v37 = vmul.f32 %v250_v34, %v94_v11  ;;  %v125_v39 = vadd.f32 %v124_v35, %v117_v36 }
 0x187   :  { %v118_v38 = vmul.f32 %v116_v31, %v110_v37 }
 0x189   :  { %v126_v40 = vadd.f32 %v124_v35, %v118_v38 }
 0x18b   :  { %v127_v41 = vpack.c.bf16 %v126_v40, %v125_v39 }
 0x18d   :  { %128 = vst.msk [vmem:[#allocation2] sm:$0xff] %vm83_vm0, %v127_v41 }
 0x194   :  { %v129_v42 = vld [vmem:[#allocation2] sm:$0xff] }
 0x195   :  { %234 = vmatmul.mubr.msk.bf16.vlgmr.msra.gmra.mrb[0].mxu0 %vm83_vm0, %v129_v42 }
 0x268   :  { %v190_v46 = vpop.f32.mrb[0].mxu0 }
 0x269   :  { %v191_v47 = vadd.f32 %v190_v46, %v139_v45  ;;  %v235_v48 = vpop.f32.mrb[1].mxu0 }
 0x26a   :  { %v193_v49 = vpop.f32.mrb[2].mxu0 }
 0x26b   :  { %v220_v50 = vpack.c.bf16 %v191_v47, %v191_v47  ;;  %v194_v51 = vadd.f32 %v193_v49, %v139_v45  ;;  %v236_v52 = vpop.f32.mrb[3].mxu0 }
 0x26d   :  { %206 = vst.msk [vmem:[%s451_s5] sm:$0xf] %vm205_vm2, %v220_v50  ;;  %v221_v53 = vpack.c.bf16 %v194_v51, %v194_v51 }
 0x26f   :  { %207 = vst.msk [vmem:[%s451_s5 + $0x4] sm:$0xf] %vm205_vm2, %v221_v53 }
 0x270   :  { %212 = vsyncpa [#allocation4], 1 }
 0x271   :  { %213 = vsyncpa [#allocation6], 1 }
 0x272   :  { %214 = vsyncpa [#allocation9], 1 }

// kernel: _lambda_.71
= control target key start
LH: loop header
LB: loop body
LE: loop exit
PB: predicated region body
PF: predicated region fallthrough
CT: control target
= control target key end

     0   :  { %11 = vsyncpa [#allocation3], 0  ;;  %s461_s0 = inlined_call_operand.vmem [shape: bf16[16,32], index: 0, kind: input, shape index: {}]   ;;  %s462_s1 = inlined_call_operand.hbm [shape: bf16[1,32,32], index: 1, kind: input, shape index: {}]   ;;  %s463_s2 = inlined_call_operand.hbm [shape: bf16[1,1,32], index: 2, kind: input, shape index: {}]   ;;  %s464_s3 = inlined_call_operand.vmem [shape: bf16[16,32], index: 3, kind: input, shape index: {}]   ;;  %s465_s4 = inlined_call_operand.hbm [shape: bf16[1,32], index: 4, kind: input, shape index: {}]   ;;  %s466_s5 = inlined_call_operand.hbm [shape: bf16[1,32], index: 5, kind: input, shape index: {}]   ;;  %s467_s6 = inlined_call_operand.vmem [shape: bf16[1,16,32], index: 6, kind: output, shape index: {}]  }
   0x1   :  { %12 = vsyncpa [#allocation5], 0 }
   0x2   :  { %13 = vsyncpa [#allocation8], 0  ;;  %s346_s21 = smov [#allocation4]   ;;  %s347_s23 = smov [#allocation2]  }
   0x3   :  { %s34_s22 = sshll.u32 %s346_s21, 4  ;;  %s21_s24 = sshll.u32 %s347_s23, 4  ;;  %s35_s22 = int_to_ptr.vmem [resolvable:$true] %s34_s22  ;;  %s389_s24 = int_to_ptr.vmem [resolvable:$true] %s21_s24 }
   0x4   :  { %s252_s27 = scalar_lea.hbm %s463_s2, 16 }
   0x5   :  { %p253_p0 = scmp.ne.s32.totalorder %s463_s2, %s252_s27  ;;  %p256_p1 = scmp.lt.u32.totalorder %s252_s27, %s463_s2 }
   0x7   :  { %p258_p2 = pnand %p256_p1, %p253_p0 }
   0x9   :  { %261 = shalt.err (!%p258_p2)
}
   0xa   :  { %s262_s8 = scalar_lea.vmem %s35_s22, 16  ;;  %s266_s9 = scalar_lea.vmem %s35_s22, 32 }
   0xb   :  { %p263_p3 = scmp.ne.s32.totalorder %s35_s22, %s262_s8  ;;  %p267_p4 = scmp.lt.s32.totalorder %s35_s22, %s35_s22 }
   0xc   :  { %p268_p5 = scmp.lt.s32.totalorder %s266_s9, %s262_s8 }
   0xe   :  { %p269_p6 = por %p268_p5, %p267_p4 }
  0x10   :  { %p270_p7 = pnand %p269_p6, %p263_p3 }
  0x12   :  { %273 = shalt.err (!%p270_p7)
}
  0x13   :  { %37 = dma.hbm_to_vmem [thread:$0]  %s463_s2, 16, %s35_s22, [#allocation5]  }
  0x14   :  { %s274_s14 = scalar_lea.hbm %s462_s1, 256 }
  0x15   :  { %p275_p8 = scmp.ne.s32.totalorder %s462_s1, %s274_s14  ;;  %p278_p9 = scmp.lt.u32.totalorder %s274_s14, %s462_s1 }
  0x17   :  { %p280_p10 = pnand %p278_p9, %p275_p8 }
  0x19   :  { %283 = shalt.err (!%p280_p10)
}
  0x1a   :  { %s284_s19 = scalar_lea.vmem %s389_s24, 256  ;;  %p289_p12 = scmp.lt.s32.totalorder %s389_s24, %s389_s24 }
  0x1b   :  { %p285_p11 = scmp.ne.s32.totalorder %s389_s24, %s284_s19  ;;  %p290_p13 = scmp.lt.s32.totalorder %s284_s19, %s284_s19 }
  0x1d   :  { %p291_p0 = por %p290_p13, %p289_p12 }
  0x1f   :  { %p292_p1 = pnand %p291_p0, %p285_p11 }
  0x21   :  { %295 = shalt.err (!%p292_p1)
}
  0x22   :  { %s348_s2 = smov 64   ;;  %s349_s20 = smov 4  }
  0x23   :  { %27 = dma.hbm_to_vmem [thread:$0]  %s462_s1, 256, %s389_s24, [#allocation3], %s348_s2, %s348_s2, %s349_s20  }
  0x24   :  { %s350_s23 = smov [#allocation6]   ;;  %s351_s26 = smov [#allocation7]  }
  0x25   :  { %s46_s25 = sshll.u32 %s350_s23, 4  ;;  %s56_s27 = sshll.u32 %s351_s26, 4  ;;  %s47_s25 = int_to_ptr.vmem [resolvable:$true] %s46_s25  ;;  %s57_s27 = int_to_ptr.vmem [resolvable:$true] %s56_s27 }
  0x26   :  { %s296_s30 = scalar_lea.hbm %s465_s4, 16 }
  0x27   :  { %p297_p2 = scmp.ne.s32.totalorder %s465_s4, %s296_s30  ;;  %p300_p3 = scmp.lt.u32.totalorder %s296_s30, %s465_s4 }
  0x29   :  { %p302_p4 = pnand %p300_p3, %p297_p2 }
  0x2b   :  { %305 = shalt.err (!%p302_p4)
}
  0x2c   :  { %s306_s1 = scalar_lea.vmem %s47_s25, 16  ;;  %s310_s24 = scalar_lea.vmem %s47_s25, 32 }
  0x2d   :  { %p307_p5 = scmp.ne.s32.totalorder %s47_s25, %s306_s1  ;;  %p311_p6 = scmp.lt.s32.totalorder %s47_s25, %s47_s25 }
  0x2e   :  { %p312_p7 = scmp.lt.s32.totalorder %s310_s24, %s306_s1 }
  0x30   :  { %p313_p8 = por %p312_p7, %p311_p6 }
  0x32   :  { %p314_p9 = pnand %p313_p8, %p307_p5 }
  0x34   :  { %317 = shalt.err (!%p314_p9)
}
  0x35   :  { %49 = dma.hbm_to_vmem [thread:$0]  %s465_s4, 16, %s47_s25, [#allocation5]  }
  0x36   :  { %s318_s15 = scalar_lea.hbm %s466_s5, 16 }
  0x37   :  { %p319_p10 = scmp.ne.s32.totalorder %s466_s5, %s318_s15  ;;  %p322_p11 = scmp.lt.u32.totalorder %s318_s15, %s466_s5 }
  0x39   :  { %p324_p12 = pnand %p322_p11, %p319_p10 }
  0x3b   :  { %327 = shalt.err (!%p324_p12)
}
  0x3c   :  { %s328_s2 = scalar_lea.vmem %s57_s27, 16  ;;  %s332_s20 = scalar_lea.vmem %s57_s27, 32 }
  0x3d   :  { %p329_p13 = scmp.ne.s32.totalorder %s57_s27, %s328_s2  ;;  %p333_p0 = scmp.lt.s32.totalorder %s57_s27, %s57_s27 }
  0x3e   :  { %p334_p1 = scmp.lt.s32.totalorder %s332_s20, %s328_s2 }
  0x40   :  { %p335_p2 = por %p334_p1, %p333_p0 }
  0x42   :  { %p336_p3 = pnand %p335_p2, %p329_p13 }
  0x44   :  { %339 = shalt.err (!%p336_p3)
}
  0x45   :  { %59 = dma.hbm_to_vmem [thread:$0]  %s466_s5, 16, %s57_s27, [#allocation8]  }
  0x46   :  { %340 = dma.done.wait [#allocation3], 256  }
  0x47   :  { %341 = vsyncadd [#allocation3], 4294967040 }
  0x48   :  { %342 = dma.done.wait [#allocation5], 32  }
  0x49   :  { %343 = vsyncadd [#allocation5], 4294967264 }
  0x4a   :  { %344 = dma.done.wait [#allocation8], 16  }
  0x4b   :  { %345 = vsyncadd [#allocation8], 4294967280  ;;  %v352_v0 = vmov 0.0   ;;  %vm353_vm0 = vmmov 0   ;;  %v245_v1 = vld [vmem:[#allocation2] sm:$0xff]   ;;  %v246_v2 = vld [vmem:[#allocation2 + $0x8] sm:$0xff]   ;;  %v81_v4 = vlaneseq }
  0x4c   :  { %229 = vmatprep.subr.bf16.mxu0 %v352_v0  ;;  %233 = vmatprep.mubr.msk.bf16.mxu0 %vm353_vm0, %v352_v0  ;;  %v247_v3 = vld [vmem:[%s461_s0] sm:$0xff]   ;;  %vm102_vm1 = vcmask 261120   ;;  %v79_v6 = vld [vmem:[#allocation4] sm:$0x1]  ;;  %v180_v38 = vld [vmem:[#allocation6] sm:$0x1] }
  0x4d   :  { %230 = vmatpush3.bf16.msra.mxu0 %v245_v1  ;;  %v82_v5 = vshrl.u32 %v81_v4, 7  ;;  %v80_v7 = vunpack.c.l.bf16 %v79_v6  ;;  %v223_v9 = vld [vmem:[%s464_s3] sm:$0xff]   ;;  %v188_v40 = vld [vmem:[#allocation7] sm:$0x1]  ;;  %v181_v41 = vunpack.c.l.bf16 %v180_v38  ;;  %vm204_vm2 = vcmask 257024  }
  0x4e   :  { %231 = vmatprep.subr.bf16.mxu0 %v352_v0  ;;  %v224_v11 = vunpack.c.l.bf16 %v223_v9  ;;  %v225_v15 = vunpack.c.h.bf16 %v223_v9  ;;  %v189_v42 = vunpack.c.l.bf16 %v188_v40 }
  0x4f   :  { %v83_v8 = vsub.s32 0, %v82_v5 }
  0x51   :  { %232 = vmatpush3.bf16.msra.mxu0 %v246_v2  ;;  %v84_v10 = vrot.slane %v80_v7, %v83_v8  ;;  %v185_v43 = vrot.slane %v181_v41, %v83_v8  ;;  %v193_v45 = vrot.slane %v189_v42, %v83_v8 }
  0x54   :  { %234 = vmatmul.mubr.msk.bf16.vlgmr.msra.gmra.mrb[0].mxu0 %vm102_vm1, %v247_v3 }
 0x127   :  { %v140_v12 = vpop.f32.mrb[0].mxu0 }
 0x128   :  { %v141_v13 = vadd.f32 %v140_v12, %v84_v10  ;;  %v235_v14 = vpop.f32.mrb[1].mxu0 }
 0x129   :  { %v143_v16 = vpop.f32.mrb[2].mxu0 }
 0x12a   :  { %v144_v17 = vadd.f32 %v143_v16, %v84_v10  ;;  %v236_v18 = vpop.f32.mrb[3].mxu0  ;;  %v151_v19 = vadd.f32 %v224_v11, %v141_v13 }
 0x12c   :  { %v153_v20 = vsel %vm102_vm1, %v151_v19, 0.0  ;;  %v152_v21 = vadd.f32 %v225_v15, %v144_v17 }
 0x12d   :  { %154 = vadd.xlane.f32.xlu0 %v153_v20 }
 0x12e   :  { %v156_v22 = vsel %vm102_vm1, %v152_v21, 0.0 }
 0x131   :  { %157 = vadd.xlane.f32.xlu0 %v156_v22 }
 0x1ba   :  { %v155_v23 = vpop.xlane.xlu0 %154 }
 0x1bb   :  { %v160_v24 = vmul.f32 0.03125, %v155_v23 }
 0x1bd   :  { %v162_v25 = vsub.f32 %v151_v19, %v160_v24 }
 0x1be   :  { %v158_v26 = vpop.xlane.xlu0 %157 }
 0x1bf   :  { %v161_v27 = vmul.f32 0.03125, %v158_v26  ;;  %v164_v28 = vmul.f32 %v162_v25, %v162_v25 }
 0x1c1   :  { %v163_v29 = vsub.f32 %v152_v21, %v161_v27  ;;  %v166_v30 = vsel %vm102_vm1, %v164_v28, 0.0 }
 0x1c2   :  { %167 = vadd.xlane.f32.xlu1 %v166_v30 }
 0x1c3   :  { %v165_v31 = vmul.f32 %v163_v29, %v163_v29 }
 0x1c5   :  { %v169_v32 = vsel %vm102_vm1, %v165_v31, 0.0 }
 0x1c6   :  { %170 = vadd.xlane.f32.xlu1 %v169_v32 }
 0x24f   :  { %v168_v33 = vpop.xlane.xlu1 %167 }
 0x250   :  { %v172_v34 = vmul.f32 0.03125, %v168_v33 }
 0x252   :  { %v174_v35 = vadd.f32 1e-05, %v172_v34 }
 0x253   :  { %v171_v36 = vpop.xlane.xlu1 %170 }
 0x254   :  { %248 = vrsqrt.f32 %v174_v35  ;;  %v173_v37 = vmul.f32 0.03125, %v171_v36 }
 0x256   :  { %v175_v39 = vadd.f32 1e-05, %v173_v37 }
 0x258   :  { %250 = vrsqrt.f32 %v175_v39 }
 0x25e   :  { %v249_v44 = vpop.eup %248 }
 0x25f   :  { %v178_v46 = vmul.f32 %v249_v44, %v162_v25 }
 0x261   :  { %v186_v47 = vmul.f32 %v185_v43, %v178_v46 }
 0x262   :  { %v251_v48 = vpop.eup %250 }
 0x263   :  { %v194_v49 = vadd.f32 %v193_v45, %v186_v47  ;;  %v179_v50 = vmul.f32 %v251_v48, %v163_v29 }
 0x265   :  { %v220_v51 = vpack.c.bf16 %v194_v49, %v194_v49  ;;  %v187_v52 = vmul.f32 %v185_v43, %v179_v50 }
 0x267   :  { %205 = vst.msk [vmem:[%s467_s6] sm:$0xf] %vm204_vm2, %v220_v51  ;;  %v195_v53 = vadd.f32 %v193_v45, %v187_v52 }
 0x269   :  { %v221_v54 = vpack.c.bf16 %v195_v53, %v195_v53 }
 0x26b   :  { %206 = vst.msk [vmem:[%s467_s6 + $0x4] sm:$0xf] %vm204_vm2, %v221_v54 }
 0x26c   :  { %211 = vsyncpa [#allocation3], 1 }
 0x26d   :  { %212 = vsyncpa [#allocation5], 1 }
 0x26e   :  { %213 = vsyncpa [#allocation8], 1 }

// kernel: _lambda_.70
= control target key start
LH: loop header
LB: loop body
LE: loop exit
PB: predicated region body
PF: predicated region fallthrough
CT: control target
= control target key end

     0   :  { %s1614_s12 = smov 0   ;;  %s1616_s13 = smov 0   ;;  %s1803_s0 = inlined_call_operand.vmem [shape: bf16[3,2,8,32], index: 0, kind: input, shape index: {}, may-alias: {0,1,2}]   ;;  %s1804_s1 = inlined_call_operand.vmem [shape: bf16[3,2,8,32], index: 1, kind: input, shape index: {}, may-alias: {0,1,2}]   ;;  %s1805_s2 = inlined_call_operand.vmem [shape: bf16[3,2,8,32], index: 2, kind: input, shape index: {}, may-alias: {0,1,2}]   ;;  %s1806_s3 = inlined_call_operand.vmem [shape: bf16[2,8,32], index: 3, kind: output, shape index: {}]  }
   0x1   :  { %s1618_s14 = smov 0  }
   0x2 LB: > { %s25_s15 = sadd.s32 1, %s1572_s13  ;;  %p1309_p0 = scmp.ge.s32.totalorder %s1576_s14, 1  ;;  %s1576_s14 = sphi %s1618_s14, %s13_s14   ;;  %s1572_s13 = sphi %s1616_s13, %s1808_s13   ;;  %s1568_s12 = sphi %s1614_s12, %s1807_s12  }
   0x3   : > { %p27_p1 = scmp.ge.s32.totalorder %s25_s15, 2  ;;  %p175_p2 = scmp.lt.s32.totalorder %s1576_s14, 3 }
   0x5   : > { %s1810_s15 = smov (%p27_p1, %s25_s15), 0  ;;  %p176_p3 = pnand %p1309_p0, %p175_p2 }
   0x6   : > { %p213_p4 = scmp.lt.s32.totalorder (!%p176_p3), %s1568_s12, 1  ;;  %v1578_v0 = vmov (!%p176_p3), 0.0   ;;  %vm1579_vm0 = vmmov (!%p176_p3), 0   ;;  %vm241_vm1 = vcmask (!%p176_p3), 31744   ;;  %vm289_vm2 = vcmask (!%p176_p3), 64512   ;;  %s1580_s23 = smov (!%p176_p3), 124  }
   0x7   : > { %179 = sbr.rel (%p176_p3) target bundleno = 1509 (0x5e5), region = 32  ;;  %1383 = vmatprep.subr.bf16.mxu0 (!%p176_p3), %v1578_v0  ;;  %1385 = vmatprep.mubr.msk.bf16.mxu0 (!%p176_p3), %vm1579_vm0, %v1578_v0  ;;  %s1581_s24 = smov (!%p176_p3), 120   ;;  %vm305_vm3 = vcmask (!%p176_p3), 1043456   ;;  %vm350_vm4 = vcmask (!%p176_p3), 27648   ;;  %vm479_vm5 = vcmask (!%p176_p3), 60448   ;;  %vm599_vm6 = vcmask (!%p176_p3), 93248  }
   0x8   : > { %1389 = vmatprep.subr.bf16.mxu1 (!%p176_p3), %v1578_v0  ;;  %1391 = vmatprep.mubr.msk.bf16.mxu1 (!%p176_p3), %vm1579_vm0, %v1578_v0  ;;  %s1582_s25 = smov (!%p176_p3), 116   ;;  %s1583_s26 = smov (!%p176_p3), 112   ;;  %vm719_vm7 = vcmask (!%p176_p3), 126048   ;;  %vm839_vm8 = vcmask (!%p176_p3), 158848   ;;  %vm959_vm9 = vcmask (!%p176_p3), 191648   ;;  %vm1079_vm10 = vcmask (!%p176_p3), 224448  }
   0x9   : > { %s1584_s27 = smov (!%p176_p3), 108   ;;  %s1585_s28 = smov (!%p176_p3), 104   ;;  %vm1199_vm11 = vcmask (!%p176_p3), 257248  }
   0xa   : > { %s1586_s29 = smov (!%p176_p3), 100   ;;  %s1587_s9 = smov (!%p176_p3), 4  }
   0xb   : > { %s1588_s10 = smov (!%p176_p3), 8   ;;  %s1589_s11 = smov (!%p176_p3), 12  }
   0xc   : > { %s1592_s17 = smov (!%p176_p3), 24   ;;  %s1593_s18 = smov (!%p176_p3), 28  }
   0xe   : > { %s1812_s12 = smov (!%p213_p4, %s1568_s12), 1 }
   0xf   : > { %s1638_s16 = sshll.u32 %s1812_s12, 2  ;;  %s1590_s12 = smov 16  }
  0x10   : > { %s1251_s19 = scalar_lea.vmem %s1804_s1, %s1638_s16  ;;  %s219_s22 = scalar_lea.vmem %s1803_s0, %s1638_s16 }
  0x11   : > { %v1314_v1 = vld [vmem:[%s1251_s19 + $0x8] sm:$0xf]  ;;  %v238_v3 = vld [vmem:[%s219_s22] sm:$0xf]  ;;  %s1254_s5 = scalar_lea.vmem %s1805_s2, %s1638_s16  ;;  %s1717_s8 = scalar_lea.vmem %s1806_s3, %s1638_s16 }
  0x12   : > { %v246_v2 = vsel %vm241_vm1, %v1314_v1, 0  ;;  %v1319_v10 = vcombine.low %v1314_v1, %v1314_v1  ;;  %v1318_v11 = vcombine.low %v238_v3, %v238_v3  ;;  %v1669_v17 = vld [vmem:[%s1254_s5 + $0x10] sm:$0xf]  ;;  %s1591_s16 = smov 20  }
  0x13   : > { %1384 = vmatpush3.bf16.xpose.msra.mxu0 %v246_v2  ;;  %v307_v18 = vsel %vm305_vm3, %v1669_v17, 0 }
  0x14   : > { %1401 = vmatprep.subr.bf16.mxu0 %v1578_v0  ;;  %360 = vrot.lane.b32.xlu1 %v1319_v10, %s1580_s23 }
  0x15   : > { %1390 = vmatpush3.bf16.msra.mxu1 %v307_v18 }
  0x16   : > { %1395 = vmatprep.subr.bf16.mxu1 %v1578_v0 }
  0x18   : > { %355 = vrot.lane.b32.xlu1 %v1318_v11, %s1580_s23 }
  0x1a   : > { %1386 = vmatmul.mubr.msk.bf16.vlgmr.msra.gmra.mrb[0].mxu0 %vm241_vm1, %v238_v3 }
  0x1b   : > { %1403 = vmatprep.mubr.msk.bf16.mxu0 %vm1579_vm0, %v1578_v0 }
  0x1c   : > { %481 = vrot.lane.b32.xlu1 %v1318_v11, %s1581_s24 }
  0x20   : > { %603 = vrot.lane.b32.xlu1 %v1319_v10, %s1582_s25 }
  0x24   : > { %601 = vrot.lane.b32.xlu1 %v1318_v11, %s1582_s25 }
  0x28   : > { %723 = vrot.lane.b32.xlu1 %v1319_v10, %s1583_s26 }
  0x2c   : > { %721 = vrot.lane.b32.xlu1 %v1318_v11, %s1583_s26 }
  0x30   : > { %843 = vrot.lane.b32.xlu1 %v1319_v10, %s1584_s27 }
  0x34   : > { %963 = vrot.lane.b32.xlu1 %v1319_v10, %s1585_s28 }
  0x38   : > { %1083 = vrot.lane.b32.xlu1 %v1319_v10, %s1586_s29 }
  0x86   : > { %v361_v20 = vpop.permute.xlu1 %360 }
  0x87   : > { %v366_v25 = vsel %vm241_vm1, %v361_v20, 0 }
  0x8a   : > { %v356_v21 = vpop.permute.xlu1 %355 }
  0x8e   : > { %v482_v24 = vpop.permute.xlu1 %481 }
  0x92   : > { %v604_v28 = vpop.permute.xlu1 %603 }
  0x93   : > { %v609_v31 = vsel %vm241_vm1, %v604_v28, 0 }
  0x96   : > { %v602_v30 = vpop.permute.xlu1 %601 }
  0x9a   : > { %v724_v32 = vpop.permute.xlu1 %723 }
  0x9b   : > { %v729_v34 = vsel %vm241_vm1, %v724_v32, 0 }
  0x9e   : > { %v722_v33 = vpop.permute.xlu1 %721 }
  0xa2   : > { %v844_v35 = vpop.permute.xlu1 %843 }
  0xa3   : > { %v849_v36 = vsel %vm241_vm1, %v844_v35, 0 }
  0xa6   : > { %v964_v37 = vpop.permute.xlu1 %963 }
  0xa7   : > { %v969_v39 = vsel %vm241_vm1, %v964_v37, 0 }
  0xaa   : > { %v1084_v40 = vpop.permute.xlu1 %1083 }
  0xab   : > { %v1089_v42 = vsel %vm241_vm1, %v1084_v40, 0 }
  0xed   : > { %v282_v4 = vpop.f32.mrb[0].mxu0 }
  0xee   : > { %v288_v5 = vmul.f32 0.5, %v282_v4  ;;  %v1387_v6 = vpop.f32.mrb[1].mxu0 }
  0xef   : > { %v285_v7 = vpop.f32.mrb[2].mxu0 }
  0xf0   : > { %v1388_v8 = vpop.f32.mrb[3].mxu0  ;;  %v290_v9 = vsel %vm289_vm2, %v288_v5, -inf }
  0xf1   : > { %291 = vmax.xlane.f32.xlu0 %v290_v9 }
 0x17e   : > { %v292_v12 = vpop.xlane.xlu0 %291 }
 0x17f   : > { %v293_v13 = vsub.f32 %v288_v5, %v292_v12 }
 0x181   : > { %v294_v14 = vmul.f32 1.442695, %v293_v13 }
 0x183   : > { %1522 = vpow2.f32 %v294_v14 }
 0x18d   : > { %v1523_v15 = vpop.eup %1522 }
 0x18e   : > { %v296_v16 = vsel %vm289_vm2, %v1523_v15, 0.0 }
 0x18f   : > { %297 = vadd.xlane.f32.xlu0 %v296_v16 }
 0x1a5   : > { %483 = vrot.lane.b32.xlu0 %v1319_v10, %s1581_s24 }
 0x1a9   : > { %841 = vrot.lane.b32.xlu0 %v1318_v11, %s1584_s27 }
 0x1ad   : > { %961 = vrot.lane.b32.xlu0 %v1318_v11, %s1585_s28 }
 0x1b1   : > { %1081 = vrot.lane.b32.xlu0 %v1318_v11, %s1586_s29 }
 0x21c   : > { %v298_v19 = vpop.xlane.xlu0 %297 }
 0x21d   : > { %1524 = vrcp.f32 %v298_v19 }
 0x220   : > { %v484_v27 = vpop.permute.xlu0 %483 }
 0x221   : > { %v489_v29 = vsel %vm241_vm1, %v484_v27, 0 }
 0x224   : > { %v842_v38 = vpop.permute.xlu0 %841 }
 0x227   : > { %v1525_v22 = vpop.eup %1524 }
 0x228   : > { %v300_v23 = vmul.f32 %v1525_v22, %v1523_v15  ;;  %v962_v41 = vpop.permute.xlu0 %961 }
 0x22a   : > { %v301_v26 = vpack.c.bf16 %v300_v23, %v300_v23 }
 0x22c   : > { %1392 = vmatmul.mubr.msk.bf16.vlgmr.msra.gmra.mrb[0].mxu1 %vm289_vm2, %v301_v26  ;;  %v1082_v43 = vpop.permute.xlu0 %1081 }
 0x22d   : > { %1396 = vmatpush3.bf16.xpose.msra.mxu1 %v366_v25  ;;  %1397 = vmatprep.mubr.msk.bf16.mxu1 %vm1579_vm0, %v1578_v0 }
 0x22e   : > { %1407 = vmatprep.subr.bf16.mxu1 %v1578_v0 }
 0x234   : > { %1398 = vmatmul.mubr.msk.bf16.vlgmr.msra.gmra.mrb[4].mxu1 %vm241_vm1, %v356_v21 }
 0x235   : > { %1408 = vmatpush3.bf16.xpose.msra.mxu1 %v489_v29  ;;  %1409 = vmatprep.mubr.msk.bf16.mxu1 %vm1579_vm0, %v1578_v0  ;;  %v1321_v29 = vcombine.low %v1669_v17, %v1669_v17 }
 0x236   : > { %1419 = vmatprep.subr.bf16.mxu1 %v1578_v0 }
 0x23c   : > { %1410 = vmatmul.mubr.msk.bf16.vlgmr.msra.gmra.mrb[8].mxu1 %vm241_vm1, %v482_v24 }
 0x23d   : > { %1420 = vmatpush3.bf16.xpose.msra.mxu1 %v609_v31  ;;  %1421 = vmatprep.mubr.msk.bf16.mxu1 %vm1579_vm0, %v1578_v0 }
 0x23e   : > { %1431 = vmatprep.subr.bf16.mxu1 %v1578_v0 }
 0x244   : > { %1422 = vmatmul.mubr.msk.bf16.vlgmr.msra.gmra.mrb[12].mxu1 %vm241_vm1, %v602_v30 }
 0x245   : > { %1432 = vmatpush3.bf16.xpose.msra.mxu1 %v729_v34  ;;  %1433 = vmatprep.mubr.msk.bf16.mxu1 %vm1579_vm0, %v1578_v0 }
 0x246   : > { %1443 = vmatprep.subr.bf16.mxu1 %v1578_v0 }
 0x24c   : > { %1434 = vmatmul.mubr.msk.bf16.vlgmr.msra.gmra.mrb[16].mxu1 %vm241_vm1, %v722_v33 }
 0x24d   : > { %1444 = vmatpush3.bf16.xpose.msra.mxu1 %v849_v36  ;;  %1445 = vmatprep.mubr.msk.bf16.mxu1 %vm1579_vm0, %v1578_v0 }
 0x24e   : > { %1455 = vmatprep.subr.bf16.mxu1 %v1578_v0 }
 0x254   : > { %1446 = vmatmul.mubr.msk.bf16.vlgmr.msra.gmra.mrb[20].mxu1 %vm241_vm1, %v842_v38 }
 0x255   : > { %1456 = vmatpush3.bf16.xpose.msra.mxu1 %v969_v39  ;;  %1457 = vmatprep.mubr.msk.bf16.mxu1 %vm1579_vm0, %v1578_v0 }
 0x256   : > { %1467 = vmatprep.subr.bf16.mxu1 %v1578_v0 }
 0x25c   : > { %1458 = vmatmul.mubr.msk.bf16.vlgmr.msra.gmra.mrb[24].mxu1 %vm241_vm1, %v962_v41 }
 0x25d   : > { %1468 = vmatpush3.bf16.xpose.msra.mxu1 %v1089_v42  ;;  %1469 = vmatprep.mubr.msk.bf16.mxu1 %vm1579_vm0, %v1578_v0 }
 0x264   : > { %1470 = vmatmul.mubr.msk.bf16.vlgmr.msra.gmra.mrb[28].mxu1 %vm241_vm1, %v1082_v43 }
 0x2ff   : > { %v343_v44 = vpop.f32.mrb[0].mxu1 }
 0x300   : > { %v349_v45 = vpack.c.bf16 %v343_v44, %v343_v44  ;;  %v1393_v46 = vpop.f32.mrb[1].mxu1 }
 0x301   : > { %v346_v47 = vpop.f32.mrb[2].mxu1 }
 0x302   : > { %351 = vst.msk [vmem:[%s1717_s8] sm:$0xf] %vm350_vm4, %v349_v45  ;;  %v1394_v48 = vpop.f32.mrb[3].mxu1 }
 0x307   : > { %v402_v49 = vpop.f32.mrb[4].mxu1 }
 0x308   : > { %v408_v50 = vmul.f32 0.5, %v402_v49  ;;  %v1399_v51 = vpop.f32.mrb[5].mxu1 }
 0x309   : > { %v405_v52 = vpop.f32.mrb[6].mxu1 }
 0x30a   : > { %v1400_v53 = vpop.f32.mrb[7].mxu1  ;;  %v409_v54 = vsel %vm289_vm2, %v408_v50, -inf }
 0x30b   : > { %410 = vmax.xlane.f32.xlu1 %v409_v54 }
 0x30f   : > { %v525_v55 = vpop.f32.mrb[8].mxu1 }
 0x310   : > { %v531_v56 = vmul.f32 0.5, %v525_v55  ;;  %v1411_v57 = vpop.f32.mrb[9].mxu1 }
 0x311   : > { %v528_v58 = vpop.f32.mrb[10].mxu1 }
 0x312   : > { %v1412_v59 = vpop.f32.mrb[11].mxu1  ;;  %v532_v60 = vsel %vm289_vm2, %v531_v56, -inf }
 0x313   : > { %533 = vmax.xlane.f32.xlu0 %v532_v60 }
 0x317   : > { %v645_v61 = vpop.f32.mrb[12].mxu1 }
 0x318   : > { %v651_v62 = vmul.f32 0.5, %v645_v61  ;;  %v1423_v63 = vpop.f32.mrb[13].mxu1 }
 0x319   : > { %v648_v1 = vpop.f32.mrb[14].mxu1 }
 0x31a   : > { %v652_v2 = vsel %vm289_vm2, %v651_v62, -inf  ;;  %v1424_v3 = vpop.f32.mrb[15].mxu1 }
 0x31b   : > { %653 = vmax.xlane.f32.xlu0 %v652_v2 }
 0x31f   : > { %v765_v4 = vpop.f32.mrb[16].mxu1 }
 0x320   : > { %v771_v5 = vmul.f32 0.5, %v765_v4  ;;  %v1435_v6 = vpop.f32.mrb[17].mxu1 }
 0x321   : > { %v768_v7 = vpop.f32.mrb[18].mxu1 }
 0x322   : > { %v772_v8 = vsel %vm289_vm2, %v771_v5, -inf  ;;  %v1436_v9 = vpop.f32.mrb[19].mxu1 }
 0x323   : > { %773 = vmax.xlane.f32.xlu1 %v772_v8 }
 0x327   : > { %v885_v10 = vpop.f32.mrb[20].mxu1 }
 0x328   : > { %v891_v11 = vmul.f32 0.5, %v885_v10  ;;  %v1447_v12 = vpop.f32.mrb[21].mxu1 }
 0x329   : > { %v888_v13 = vpop.f32.mrb[22].mxu1 }
 0x32a   : > { %v892_v14 = vsel %vm289_vm2, %v891_v11, -inf  ;;  %v1448_v15 = vpop.f32.mrb[23].mxu1 }
 0x32b   : > { %893 = vmax.xlane.f32.xlu0 %v892_v14 }
 0x32f   : > { %v1005_v16 = vpop.f32.mrb[24].mxu1 }
 0x330   : > { %v1011_v18 = vmul.f32 0.5, %v1005_v16  ;;  %v1459_v19 = vpop.f32.mrb[25].mxu1 }
 0x331   : > { %v1008_v20 = vpop.f32.mrb[26].mxu1 }
 0x332   : > { %v1012_v21 = vsel %vm289_vm2, %v1011_v18, -inf  ;;  %v1460_v22 = vpop.f32.mrb[27].mxu1 }
 0x333   : > { %1013 = vmax.xlane.f32.xlu1 %v1012_v21 }
 0x337   : > { %v1125_v23 = vpop.f32.mrb[28].mxu1 }
 0x338   : > { %v1131_v24 = vmul.f32 0.5, %v1125_v23  ;;  %v1471_v25 = vpop.f32.mrb[29].mxu1 }
 0x339   : > { %v1128_v26 = vpop.f32.mrb[30].mxu1 }
 0x33a   : > { %v1132_v27 = vsel %vm289_vm2, %v1131_v24, -inf  ;;  %v1472_v28 = vpop.f32.mrb[31].mxu1 }
 0x33b   : > { %1133 = vmax.xlane.f32.xlu0 %v1132_v27 }
 0x344   : > { %424 = vrot.lane.b32.xlu1 %v1321_v29, %s1580_s23 }
 0x351   : > { %544 = vrot.lane.b32.xlu0 %v1321_v29, %s1581_s24 }
 0x398   : > { %v411_v30 = vpop.xlane.xlu1 %410 }
 0x399   : > { %v412_v31 = vsub.f32 %v408_v50, %v411_v30 }
 0x39b   : > { %v413_v32 = vmul.f32 1.442695, %v412_v31 }
 0x39d   : > { %1526 = vpow2.f32 %v413_v32 }
 0x3a0   : > { %v534_v33 = vpop.xlane.xlu0 %533 }
 0x3a1   : > { %v535_v34 = vsub.f32 %v531_v56, %v534_v33 }
 0x3a3   : > { %v536_v35 = vmul.f32 1.442695, %v535_v34 }
 0x3a5   : > { %1528 = vpow2.f32 %v536_v35 }
 0x3a7   : > { %v1527_v36 = vpop.eup %1526 }
 0x3a8   : > { %v654_v37 = vpop.xlane.xlu0 %653  ;;  %v415_v38 = vsel %vm289_vm2, %v1527_v36, 0.0 }
 0x3a9   : > { %v655_v39 = vsub.f32 %v651_v62, %v654_v37  ;;  %416 = vadd.xlane.f32.xlu1 %v415_v38 }
 0x3ab   : > { %v656_v40 = vmul.f32 1.442695, %v655_v39 }
 0x3ad   : > { %1530 = vpow2.f32 %v656_v40 }
 0x3af   : > { %v1529_v17 = vpop.eup %1528 }
 0x3b0   : > { %v538_v41 = vsel %vm289_vm2, %v1529_v17, 0.0  ;;  %v774_v44 = vpop.xlane.xlu1 %773 }
 0x3b1   : > { %539 = vadd.xlane.f32.xlu0 %v538_v41  ;;  %v775_v48 = vsub.f32 %v771_v5, %v774_v44 }
 0x3b3   : > { %v776_v50 = vmul.f32 1.442695, %v775_v48 }
 0x3b5   : > { %1532 = vpow2.f32 %v776_v50 }
 0x3b7   : > { %v1733_v42 = vpop.eup %1530 }
 0x3b8   : > { %v658_v43 = vsel %vm289_vm2, %v1733_v42, 0.0  ;;  %v894_v49 = vpop.xlane.xlu0 %893 }
 0x3b9   : > { %659 = vadd.xlane.f32.xlu1 %v658_v43  ;;  %v895_v51 = vsub.f32 %v891_v11, %v894_v49 }
 0x3bb   : > { %v896_v54 = vmul.f32 1.442695, %v895_v51 }
 0x3bd   : > { %1534 = vpow2.f32 %v896_v54 }
 0x3bf   : > { %v1533_v58 = vpop.eup %1532 }
 0x3c0   : > { %v1014_v45 = vpop.xlane.xlu1 %1013  ;;  %v778_v59 = vsel %vm289_vm2, %v1533_v58, 0.0 }
 0x3c1   : > { %v1015_v53 = vsub.f32 %v1011_v18, %v1014_v45 }
 0x3c3   : > { %v1016_v56 = vmul.f32 1.442695, %v1015_v53 }
 0x3c4   : > { %v425_v46 = vpop.permute.xlu1 %424 }
 0x3c5   : > { %v430_v47 = vsel %vm305_vm3, %v425_v46, 0  ;;  %1536 = vpow2.f32 %v1016_v56 }
 0x3c6   : > { %1402 = vmatpush3.bf16.msra.mxu0 %v430_v47 }
 0x3c7   : > { %664 = vrot.lane.b32.xlu0 %v1321_v29, %s1582_s25  ;;  %1413 = vmatprep.subr.bf16.mxu0 %v1578_v0  ;;  %v1535_v60 = vpop.eup %1534 }
 0x3c8   : > { %v1134_v52 = vpop.xlane.xlu0 %1133  ;;  %v898_v62 = vsel %vm289_vm2, %v1535_v60, 0.0 }
 0x3c9   : > { %v1135_v55 = vsub.f32 %v1131_v24, %v1134_v52 }
 0x3ca   : > { %784 = vrot.lane.b32.xlu1 %v1321_v29, %s1583_s26 }
 0x3cb   : > { %v1136_v57 = vmul.f32 1.442695, %v1135_v55 }
 0x3cc   : > { %v545_v4 = vpop.permute.xlu0 %544 }
 0x3cd   : > { %1538 = vpow2.f32 %v1136_v57  ;;  %v550_v9 = vsel %vm305_vm3, %v545_v4, 0 }
 0x3cf   : > { %v1742_v61 = vpop.eup %1536 }
 0x3d0   : > { %v1018_v1 = vsel %vm289_vm2, %v1742_v61, 0.0 }
 0x3d7   : > { %v1745_v63 = vpop.eup %1538 }
 0x3d8   : > { %v1138_v2 = vsel %vm289_vm2, %v1745_v63, 0.0 }
 0x3e6   : > { %779 = vadd.xlane.f32.xlu0 %v778_v59 }
 0x3ea   : > { %899 = vadd.xlane.f32.xlu0 %v898_v62 }
 0x3ee   : > { %1019 = vadd.xlane.f32.xlu1 %v1018_v1  ;;  %1139 = vadd.xlane.f32.xlu0 %v1138_v2 }
 0x3ff   : > { %1024 = vrot.lane.b32.xlu1 %v1321_v29, %s1585_s28 }
 0x403   : > { %1144 = vrot.lane.b32.xlu1 %v1321_v29, %s1586_s29 }
 0x404   : > { %904 = vrot.lane.b32.xlu0 %v1321_v29, %s1584_s27 }
 0x436   : > { %v417_v3 = vpop.xlane.xlu1 %416 }
 0x437   : > { %1540 = vrcp.f32 %v417_v3 }
 0x43e   : > { %v540_v5 = vpop.xlane.xlu0 %539 }
 0x43f   : > { %1542 = vrcp.f32 %v540_v5 }
 0x441   : > { %v1541_v6 = vpop.eup %1540 }
 0x442   : > { %v419_v7 = vmul.f32 %v1541_v6, %v1527_v36  ;;  %v665_v13 = vpop.permute.xlu0 %664 }
 0x443   : > { %v670_v15 = vsel %vm305_vm3, %v665_v13, 0 }
 0x444   : > { %v420_v8 = vpack.c.bf16 %v419_v7, %v419_v7 }
 0x446   : > { %1404 = vmatmul.mubr.msk.bf16.vlgmr.msra.gmra.mrb[4].mxu0 %vm289_vm2, %v420_v8  ;;  %v660_v10 = vpop.xlane.xlu1 %659 }
 0x447   : > { %1544 = vrcp.f32 %v660_v10  ;;  %1414 = vmatpush3.bf16.msra.mxu0 %v550_v9  ;;  %1415 = vmatprep.mubr.msk.bf16.mxu0 %vm1579_vm0, %v1578_v0 }
 0x448   : > { %1425 = vmatprep.subr.bf16.mxu0 %v1578_v0 }
 0x449   : > { %v1543_v11 = vpop.eup %1542 }
 0x44a   : > { %v542_v12 = vmul.f32 %v1543_v11, %v1529_v17  ;;  %v785_v19 = vpop.permute.xlu1 %784 }
 0x44b   : > { %v790_v21 = vsel %vm305_vm3, %v785_v19, 0 }
 0x44c   : > { %v543_v14 = vpack.c.bf16 %v542_v12, %v542_v12 }
 0x44e   : > { %1416 = vmatmul.mubr.msk.bf16.vlgmr.msra.gmra.mrb[8].mxu0 %vm289_vm2, %v543_v14 }
 0x44f   : > { %1426 = vmatpush3.bf16.msra.mxu0 %v670_v15  ;;  %1427 = vmatprep.mubr.msk.bf16.mxu0 %vm1579_vm0, %v1578_v0 }
 0x450   : > { %1437 = vmatprep.subr.bf16.mxu0 %v1578_v0 }
 0x451   : > { %v1545_v16 = vpop.eup %1544 }
 0x452   : > { %v662_v18 = vmul.f32 %v1545_v16, %v1733_v42 }
 0x454   : > { %v663_v20 = vpack.c.bf16 %v662_v18, %v662_v18 }
 0x456   : > { %1428 = vmatmul.mubr.msk.bf16.vlgmr.msra.gmra.mrb[12].mxu0 %vm289_vm2, %v663_v20 }
 0x457   : > { %1438 = vmatpush3.bf16.msra.mxu0 %v790_v21  ;;  %1439 = vmatprep.mubr.msk.bf16.mxu0 %vm1579_vm0, %v1578_v0 }
 0x458   : > { %1449 = vmatprep.subr.bf16.mxu0 %v1578_v0 }
 0x473   : > { %v780_v22 = vpop.xlane.xlu0 %779 }
 0x474   : > { %1546 = vrcp.f32 %v780_v22 }
 0x477   : > { %v900_v23 = vpop.xlane.xlu0 %899 }
 0x478   : > { %1548 = vrcp.f32 %v900_v23 }
 0x47b   : > { %v1140_v24 = vpop.xlane.xlu0 %1139  ;;  %v1020_v25 = vpop.xlane.xlu1 %1019 }
 0x47c   : > { %1550 = vrcp.f32 %v1020_v25 }
 0x47d   : > { %1552 = vrcp.f32 %v1140_v24 }
 0x47e   : > { %v1547_v26 = vpop.eup %1546 }
 0x47f   : > { %v782_v27 = vmul.f32 %v1547_v26, %v1533_v58  ;;  %v905_v28 = vpop.permute.xlu0 %904  ;;  %v1025_v33 = vpop.permute.xlu1 %1024 }
 0x480   : > { %v910_v29 = vsel %vm305_vm3, %v905_v28, 0  ;;  %v1030_v34 = vsel %vm305_vm3, %v1025_v33, 0 }
 0x481   : > { %v783_v30 = vpack.c.bf16 %v782_v27, %v782_v27 }
 0x482   : > { %v1549_v31 = vpop.eup %1548 }
 0x483   : > { %1440 = vmatmul.mubr.msk.bf16.vlgmr.msra.gmra.mrb[16].mxu0 %vm289_vm2, %v783_v30  ;;  %v902_v32 = vmul.f32 %v1549_v31, %v1535_v60  ;;  %v1145_v38 = vpop.permute.xlu1 %1144 }
 0x484   : > { %1450 = vmatpush3.bf16.msra.mxu0 %v910_v29  ;;  %1451 = vmatprep.mubr.msk.bf16.mxu0 %vm1579_vm0, %v1578_v0  ;;  %v1150_v39 = vsel %vm305_vm3, %v1145_v38, 0 }
 0x485   : > { %1461 = vmatprep.subr.bf16.mxu0 %v1578_v0  ;;  %v903_v35 = vpack.c.bf16 %v902_v32, %v902_v32 }
 0x486   : > { %v1551_v36 = vpop.eup %1550 }
 0x487   : > { %v1022_v37 = vmul.f32 %v1551_v36, %v1742_v61  ;;  %v1553_v17 = vpop.eup %1552 }
 0x488   : > { %v1142_v41 = vmul.f32 %v1553_v17, %v1745_v63 }
 0x489   : > { %v1023_v40 = vpack.c.bf16 %v1022_v37, %v1022_v37 }
 0x48a   : > { %v1143_v42 = vpack.c.bf16 %v1142_v41, %v1142_v41 }
 0x48b   : > { %1452 = vmatmul.mubr.msk.bf16.vlgmr.msra.gmra.mrb[20].mxu0 %vm289_vm2, %v903_v35 }
 0x48c   : > { %1462 = vmatpush3.bf16.msra.mxu0 %v1030_v34  ;;  %1463 = vmatprep.mubr.msk.bf16.mxu0 %vm1579_vm0, %v1578_v0 }
 0x48d   : > { %1473 = vmatprep.subr.bf16.mxu0 %v1578_v0 }
 0x493   : > { %1464 = vmatmul.mubr.msk.bf16.vlgmr.msra.gmra.mrb[24].mxu0 %vm289_vm2, %v1023_v40 }
 0x494   : > { %1474 = vmatpush3.bf16.msra.mxu0 %v1150_v39  ;;  %1475 = vmatprep.mubr.msk.bf16.mxu0 %vm1579_vm0, %v1578_v0 }
 0x49b   : > { %1476 = vmatmul.mubr.msk.bf16.vlgmr.msra.gmra.mrb[28].mxu0 %vm289_vm2, %v1143_v42 }
 0x519   : > { %v466_v43 = vpop.f32.mrb[4].mxu0 }
 0x51a   : > { %v1344_v44 = vpack.c.bf16 %v466_v43, %v466_v43  ;;  %v1405_v45 = vpop.f32.mrb[5].mxu0 }
 0x51b   : > { %v469_v46 = vpop.f32.mrb[6].mxu0 }
 0x51c   : > { %476 = vrot.lane.b32.xlu1 %v1344_v44, %s1587_s9  ;;  %v1406_v47 = vpop.f32.mrb[7].mxu0 }
 0x521   : > { %v586_v48 = vpop.f32.mrb[8].mxu0 }
 0x522   : > { %v1345_v49 = vpack.c.bf16 %v586_v48, %v586_v48  ;;  %v1417_v50 = vpop.f32.mrb[9].mxu0 }
 0x523   : > { %v589_v51 = vpop.f32.mrb[10].mxu0 }
 0x524   : > { %596 = vrot.lane.b32.xlu1 %v1345_v49, %s1588_s10  ;;  %v1418_v52 = vpop.f32.mrb[11].mxu0 }
 0x529   : > { %v706_v0 = vpop.f32.mrb[12].mxu0 }
 0x52a   : > { %v1346_v53 = vpack.c.bf16 %v706_v0, %v706_v0  ;;  %v1429_v54 = vpop.f32.mrb[13].mxu0 }
 0x52b   : > { %v709_v55 = vpop.f32.mrb[14].mxu0 }
 0x52c   : > { %716 = vrot.lane.b32.xlu0 %v1346_v53, %s1589_s11  ;;  %v1430_v56 = vpop.f32.mrb[15].mxu0 }
 0x556   : > { %v826_v57 = vpop.f32.mrb[16].mxu0 }
 0x557   : > { %v1347_v58 = vpack.c.bf16 %v826_v57, %v826_v57  ;;  %v1441_v59 = vpop.f32.mrb[17].mxu0 }
 0x558   : > { %v829_v60 = vpop.f32.mrb[18].mxu0 }
 0x559   : > { %836 = vrot.lane.b32.xlu1 %v1347_v58, %s1590_s12  ;;  %v1442_v61 = vpop.f32.mrb[19].mxu0 }
 0x55e   : > { %v946_v62 = vpop.f32.mrb[20].mxu0 }
 0x55f   : > { %v1348_v63 = vpack.c.bf16 %v946_v62, %v946_v62  ;;  %v1453_v1 = vpop.f32.mrb[21].mxu0 }
 0x560   : > { %v949_v2 = vpop.f32.mrb[22].mxu0 }
 0x561   : > { %956 = vrot.lane.b32.xlu0 %v1348_v63, %s1591_s16  ;;  %v1454_v3 = vpop.f32.mrb[23].mxu0 }
 0x566   : > { %v1066_v4 = vpop.f32.mrb[24].mxu0 }
 0x567   : > { %v1349_v5 = vpack.c.bf16 %v1066_v4, %v1066_v4  ;;  %v1465_v6 = vpop.f32.mrb[25].mxu0 }
 0x568   : > { %v1069_v7 = vpop.f32.mrb[26].mxu0 }
 0x569   : > { %1076 = vrot.lane.b32.xlu1 %v1349_v5, %s1592_s17  ;;  %v1466_v8 = vpop.f32.mrb[27].mxu0 }
 0x56e   : > { %v1186_v9 = vpop.f32.mrb[28].mxu0 }
 0x56f   : > { %v1350_v10 = vpack.c.bf16 %v1186_v9, %v1186_v9  ;;  %v1477_v11 = vpop.f32.mrb[29].mxu0 }
 0x570   : > { %v1189_v12 = vpop.f32.mrb[30].mxu0 }
 0x571   : > { %1196 = vrot.lane.b32.xlu0 %v1350_v10, %s1593_s18  ;;  %v1478_v13 = vpop.f32.mrb[31].mxu0 }
 0x58e   : > { %v477_v14 = vpop.permute.xlu1 %476 }
 0x58f   : > { %480 = vst.msk [vmem:[%s1717_s8] sm:$0xf] %vm479_vm5, %v477_v14 }
 0x596   : > { %v597_v15 = vpop.permute.xlu1 %596 }
 0x597   : > { %600 = vst.msk [vmem:[%s1717_s8] sm:$0xf] %vm599_vm6, %v597_v15 }
 0x59e   : > { %v717_v16 = vpop.permute.xlu0 %716 }
 0x59f   : > { %720 = vst.msk [vmem:[%s1717_s8] sm:$0xf] %vm719_vm7, %v717_v16 }
 0x5cb   : > { %v837_v18 = vpop.permute.xlu1 %836 }
 0x5cc   : > { %840 = vst.msk [vmem:[%s1717_s8] sm:$0xf] %vm839_vm8, %v837_v18 }
 0x5d3   : > { %v957_v19 = vpop.permute.xlu0 %956 }
 0x5d4   : > { %960 = vst.msk [vmem:[%s1717_s8] sm:$0xf] %vm959_vm9, %v957_v19 }
 0x5db   : > { %v1077_v20 = vpop.permute.xlu1 %1076 }
 0x5dc   : > { %1080 = vst.msk [vmem:[%s1717_s8] sm:$0xf] %vm1079_vm10, %v1077_v20 }
 0x5e3   : > { %v1197_v21 = vpop.permute.xlu0 %1196 }
 0x5e4   : > { %1200 = vst.msk [vmem:[%s1717_s8] sm:$0xf] %vm1199_vm11, %v1197_v21 }
 0x5e5 PF: > { %s13_s14 = sadd.s32 1, %s1576_s14   ;;  %s1807_s12 = smov %s1572_s13 }
 0x5e6   : > { %p10_p5 = scmp.ge.s32.totalorder %s13_s14, 4   ;;  %s1808_s13 = smov %s1810_s15 }
 0x5e8   :  { %12 = sbr.rel (!%p10_p5) target bundleno = 2 (0x2), region = 68 }

// kernel: _lambda_.89
= control target key start
LH: loop header
LB: loop body
LE: loop exit
PB: predicated region body
PF: predicated region fallthrough
CT: control target
= control target key end

     0   :  { %s631_s12 = smov 0   ;;  %s633_s13 = smov 0   ;;  %s670_s0 = inlined_call_operand.vmem [shape: bf16[16,32], index: 0, kind: input, shape index: {}]   ;;  %s671_s1 = inlined_call_operand.vmem [shape: bf16[2,32,32], index: 1, kind: input, shape index: {}]   ;;  %s672_s2 = inlined_call_operand.vmem [shape: bf16[2,1,32], index: 2, kind: input, shape index: {}]   ;;  %s673_s3 = inlined_call_operand.vmem [shape: bf16[2,16,32], index: 3, kind: output, shape index: {}]  }
   0x1   :  { %s635_s14 = smov 0  }
   0x2 LB: > { %s35_s15 = sadd.s32 1, %s603_s13  ;;  %p528_p0 = scmp.ge.s32.totalorder %s607_s14, 1  ;;  %s607_s14 = sphi %s635_s14, %s13_s14   ;;  %s603_s13 = sphi %s633_s13, %s675_s13   ;;  %s599_s12 = sphi %s631_s12, %s674_s12  }
   0x3   : > { %p37_p1 = scmp.ge.s32.totalorder %s35_s15, 2  ;;  %p208_p2 = scmp.lt.s32.totalorder %s607_s14, 3 }
   0x5   : > { %s677_s15 = smov (%p37_p1, %s35_s15), 0  ;;  %p209_p3 = pnand %p528_p0, %p208_p2 }
   0x6   : > { %p270_p4 = scmp.lt.s32.totalorder (!%p209_p3), %s599_s12, 1  ;;  %v609_v0 = vmov (!%p209_p3), 0.0   ;;  %vm610_vm0 = vmmov (!%p209_p3), 0   ;;  %v584_v3 = vld [vmem:[%s670_s0] sm:$0xff] (!%p209_p3)   ;;  %vm331_vm1 = vcmask (!%p209_p3), 261120   ;;  %v310_v4 = vlaneseq (!%p209_p3) }
   0x7   : > { %212 = sbr.rel (%p209_p3) target bundleno = 244 (0xf4), region = 32  ;;  %548 = vmatprep.subr.bf16.mxu0 (!%p209_p3), %v609_v0  ;;  %552 = vmatprep.mubr.msk.bf16.mxu0 (!%p209_p3), %vm610_vm0, %v609_v0  ;;  %vm384_vm2 = vcmask (!%p209_p3), 257024  }
   0x8   : > { %v311_v5 = vshrl.u32 (!%p209_p3), %v310_v4, 7 }
   0xa   : > { %v312_v8 = vsub.s32 (!%p209_p3), 0, %v311_v5 }
   0xe   : > { %s679_s12 = smov (!%p270_p4, %s599_s12), 1 }
   0xf   : > { %s541_s16 = sshll.u32 %s679_s12, 4  ;;  %s287_s24 = scalar_lea.vmem %s672_s2, %s679_s12 }
  0x10   : > { %s280_s19 = scalar_lea.vmem %s671_s1, %s541_s16  ;;  %v308_v6 = vld [vmem:[%s287_s24] sm:$0x1]  ;;  %s542_s25 = sshll.u32 %s679_s12, 3 }
  0x11   : > { %v582_v1 = vld [vmem:[%s280_s19] sm:$0xff]   ;;  %v583_v2 = vld [vmem:[%s280_s19 + $0x8] sm:$0xff]   ;;  %v309_v7 = vunpack.c.l.bf16 %v308_v6  ;;  %s299_s28 = scalar_lea.vmem %s673_s3, %s542_s25 }
  0x12   : > { %549 = vmatpush3.bf16.msra.mxu0 %v582_v1 }
  0x13   : > { %550 = vmatprep.subr.bf16.mxu0 %v609_v0  ;;  %v313_v9 = vrot.slane %v309_v7, %v312_v8 }
  0x16   : > { %551 = vmatpush3.bf16.msra.mxu0 %v583_v2 }
  0x19   : > { %553 = vmatmul.mubr.msk.bf16.vlgmr.msra.gmra.mrb[0].mxu0 %vm331_vm1, %v584_v3 }
  0xec   : > { %v369_v10 = vpop.f32.mrb[0].mxu0 }
  0xed   : > { %v370_v11 = vadd.f32 %v369_v10, %v313_v9  ;;  %v554_v12 = vpop.f32.mrb[1].mxu0 }
  0xee   : > { %v372_v13 = vpop.f32.mrb[2].mxu0 }
  0xef   : > { %v543_v14 = vpack.c.bf16 %v370_v11, %v370_v11  ;;  %v373_v15 = vadd.f32 %v372_v13, %v313_v9  ;;  %v555_v16 = vpop.f32.mrb[3].mxu0 }
  0xf1   : > { %385 = vst.msk [vmem:[%s299_s28] sm:$0xf] %vm384_vm2, %v543_v14  ;;  %v544_v17 = vpack.c.bf16 %v373_v15, %v373_v15 }
  0xf3   : > { %386 = vst.msk [vmem:[%s299_s28 + $0x4] sm:$0xf] %vm384_vm2, %v544_v17 }
  0xf4 PF: > { %s13_s14 = sadd.s32 1, %s607_s14   ;;  %s674_s12 = smov %s603_s13 }
  0xf5   : > { %p10_p5 = scmp.ge.s32.totalorder %s13_s14, 4   ;;  %s675_s13 = smov %s677_s15 }
  0xf7   :  { %12 = sbr.rel (!%p10_p5) target bundleno = 2 (0x2), region = 68 }

// kernel: _lambda_.72
= control target key start
LH: loop header
LB: loop body
LE: loop exit
PB: predicated region body
PF: predicated region fallthrough
CT: control target
= control target key end

     0   :  { %13 = vsyncpa [#allocation3], 0  ;;  %s612_s0 = inlined_call_operand.vmem [shape: bf16[16,32], index: 0, kind: input, shape index: {}, may-alias: {0,5}]   ;;  %s613_s1 = inlined_call_operand.vmem [shape: bf16[32,64], index: 1, kind: input, shape index: {}]   ;;  %s614_s2 = inlined_call_operand.hbm [shape: bf16[1,64], index: 2, kind: input, shape index: {}]   ;;  %s615_s3 = inlined_call_operand.vmem [shape: bf16[64,32], index: 3, kind: input, shape index: {}]   ;;  %s616_s4 = inlined_call_operand.hbm [shape: bf16[1,32], index: 4, kind: input, shape index: {}]   ;;  %s617_s5 = inlined_call_operand.vmem [shape: bf16[16,32], index: 5, kind: input, shape index: {}, may-alias: {0,5}]   ;;  %s618_s6 = inlined_call_operand.hbm [shape: bf16[1,32], index: 6, kind: input, shape index: {}]   ;;  %s619_s7 = inlined_call_operand.hbm [shape: bf16[1,32], index: 7, kind: input, shape index: {}]   ;;  %s620_s8 = inlined_call_operand.vmem [shape: bf16[16,32], index: 8, kind: output, shape index: {}]  }
   0x1   :  { %14 = vsyncpa [#allocation5], 0 }
   0x2   :  { %15 = vsyncpa [#allocation8], 0  ;;  %s472_s27 = smov [#allocation4]   ;;  %s473_s29 = smov [#allocation2]  }
   0x3   :  { %s38_s28 = sshll.u32 %s472_s27, 4  ;;  %s26_s30 = sshll.u32 %s473_s29, 4  ;;  %s39_s28 = int_to_ptr.vmem [resolvable:$true] %s38_s28  ;;  %s27_s30 = int_to_ptr.vmem [resolvable:$true] %s26_s30 }
   0x4   :  { %s378_s11 = scalar_lea.hbm %s616_s4, 16 }
   0x5   :  { %p379_p0 = scmp.ne.s32.totalorder %s616_s4, %s378_s11  ;;  %p382_p1 = scmp.lt.u32.totalorder %s378_s11, %s616_s4 }
   0x7   :  { %p384_p2 = pnand %p382_p1, %p379_p0 }
   0x9   :  { %387 = shalt.err (!%p384_p2)
}
   0xa   :  { %s388_s16 = scalar_lea.vmem %s39_s28, 16  ;;  %s392_s17 = scalar_lea.vmem %s39_s28, 32 }
   0xb   :  { %p389_p3 = scmp.ne.s32.totalorder %s39_s28, %s388_s16  ;;  %p393_p4 = scmp.lt.s32.totalorder %s39_s28, %s39_s28 }
   0xc   :  { %p394_p5 = scmp.lt.s32.totalorder %s392_s17, %s388_s16 }
   0xe   :  { %p395_p6 = por %p394_p5, %p393_p4 }
  0x10   :  { %p396_p7 = pnand %p395_p6, %p389_p3 }
  0x12   :  { %399 = shalt.err (!%p396_p7)
}
  0x13   :  { %41 = dma.hbm_to_vmem [thread:$0]  %s616_s4, 16, %s39_s28, [#allocation5]  }
  0x14   :  { %s400_s22 = scalar_lea.hbm %s614_s2, 16 }
  0x15   :  { %p401_p8 = scmp.ne.s32.totalorder %s614_s2, %s400_s22  ;;  %p404_p9 = scmp.lt.u32.totalorder %s400_s22, %s614_s2 }
  0x17   :  { %p406_p10 = pnand %p404_p9, %p401_p8 }
  0x19   :  { %409 = shalt.err (!%p406_p10)
}
  0x1a   :  { %s410_s27 = scalar_lea.vmem %s27_s30, 16  ;;  %s414_s29 = scalar_lea.vmem %s27_s30, 32 }
  0x1b   :  { %p411_p11 = scmp.ne.s32.totalorder %s27_s30, %s410_s27  ;;  %p415_p12 = scmp.lt.s32.totalorder %s27_s30, %s27_s30 }
  0x1c   :  { %p416_p13 = scmp.lt.s32.totalorder %s414_s29, %s410_s27 }
  0x1e   :  { %p417_p0 = por %p416_p13, %p415_p12 }
  0x20   :  { %p418_p1 = pnand %p417_p0, %p411_p11 }
  0x22   :  { %421 = shalt.err (!%p418_p1)
}
  0x23   :  { %29 = dma.hbm_to_vmem [thread:$0]  %s614_s2, 16, %s27_s30, [#allocation3]  }
  0x24   :  { %s474_s9 = smov [#allocation6]   ;;  %s475_s11 = smov [#allocation7]  }
  0x25   :  { %s50_s10 = sshll.u32 %s474_s9, 4  ;;  %s60_s12 = sshll.u32 %s475_s11, 4  ;;  %s51_s10 = int_to_ptr.vmem [resolvable:$true] %s50_s10  ;;  %s61_s12 = int_to_ptr.vmem [resolvable:$true] %s60_s12 }
  0x26   :  { %s422_s15 = scalar_lea.hbm %s618_s6, 16 }
  0x27   :  { %p423_p2 = scmp.ne.s32.totalorder %s618_s6, %s422_s15  ;;  %p426_p3 = scmp.lt.u32.totalorder %s422_s15, %s618_s6 }
  0x29   :  { %p428_p4 = pnand %p426_p3, %p423_p2 }
  0x2b   :  { %431 = shalt.err (!%p428_p4)
}
  0x2c   :  { %s432_s2 = scalar_lea.vmem %s51_s10, 16  ;;  %s436_s30 = scalar_lea.vmem %s51_s10, 32 }
  0x2d   :  { %p433_p5 = scmp.ne.s32.totalorder %s51_s10, %s432_s2  ;;  %p437_p6 = scmp.lt.s32.totalorder %s51_s10, %s51_s10 }
  0x2e   :  { %p438_p7 = scmp.lt.s32.totalorder %s436_s30, %s432_s2 }
  0x30   :  { %p439_p8 = por %p438_p7, %p437_p6 }
  0x32   :  { %p440_p9 = pnand %p439_p8, %p433_p5 }
  0x34   :  { %443 = shalt.err (!%p440_p9)
}
  0x35   :  { %53 = dma.hbm_to_vmem [thread:$0]  %s618_s6, 16, %s51_s10, [#allocation5]  }
  0x36   :  { %s444_s24 = scalar_lea.hbm %s619_s7, 16 }
  0x37   :  { %p445_p10 = scmp.ne.s32.totalorder %s619_s7, %s444_s24  ;;  %p448_p11 = scmp.lt.u32.totalorder %s444_s24, %s619_s7 }
  0x39   :  { %p450_p12 = pnand %p448_p11, %p445_p10 }
  0x3b   :  { %453 = shalt.err (!%p450_p12)
}
  0x3c   :  { %s454_s4 = scalar_lea.vmem %s61_s12, 16  ;;  %s458_s28 = scalar_lea.vmem %s61_s12, 32 }
  0x3d   :  { %p455_p13 = scmp.ne.s32.totalorder %s61_s12, %s454_s4  ;;  %p459_p0 = scmp.lt.s32.totalorder %s61_s12, %s61_s12 }
  0x3e   :  { %p460_p1 = scmp.lt.s32.totalorder %s458_s28, %s454_s4 }
  0x40   :  { %p461_p2 = por %p460_p1, %p459_p0 }
  0x42   :  { %p462_p3 = pnand %p461_p2, %p455_p13 }
  0x44   :  { %465 = shalt.err (!%p462_p3)
}
  0x45   :  { %63 = dma.hbm_to_vmem [thread:$0]  %s619_s7, 16, %s61_s12, [#allocation8]  }
  0x46   :  { %466 = dma.done.wait [#allocation3], 16  }
  0x47   :  { %467 = vsyncadd [#allocation3], 4294967280 }
  0x48   :  { %468 = dma.done.wait [#allocation5], 32  }
  0x49   :  { %469 = vsyncadd [#allocation5], 4294967264 }
  0x4a   :  { %470 = dma.done.wait [#allocation8], 16  }
  0x4b   :  { %471 = vsyncadd [#allocation8], 4294967280  ;;  %v476_v0 = vmov 0.0   ;;  %vm477_vm0 = vmmov 0   ;;  %v363_v1 = vld [vmem:[%s613_s1] sm:$0xff]   ;;  %v364_v2 = vld [vmem:[%s613_s1 + $0x8] sm:$0xff]   ;;  %v85_v8 = vlaneseq }
  0x4c   :  { %337 = vmatprep.subr.bf16.mxu0 %v476_v0  ;;  %341 = vmatprep.mubr.msk.bf16.mxu0 %vm477_vm0, %v476_v0  ;;  %v365_v3 = vld [vmem:[%s612_s0] sm:$0xff]   ;;  %vm106_vm1 = vcmask 261120   ;;  %v367_v5 = vld [vmem:[%s615_s3 + $0x8] sm:$0xff]   ;;  %v368_v6 = vld [vmem:[%s615_s3 + $0x10] sm:$0xff]   ;;  %vm200_vm2 = vcmask 523264   ;;  %vm302_vm3 = vcmask 257024  }
  0x4d   :  { %345 = vmatprep.subr.bf16.mxu1 %v476_v0  ;;  %353 = vmatprep.mubr.msk.bf16.mxu1 %vm477_vm0, %v476_v0  ;;  %v366_v4 = vld [vmem:[%s615_s3] sm:$0xff]   ;;  %v369_v7 = vld [vmem:[%s615_s3 + $0x18] sm:$0xff]   ;;  %v86_v9 = vshrl.u32 %v85_v8, 7 }
  0x4e   :  { %338 = vmatpush3.bf16.msra.mxu0 %v363_v1  ;;  %346 = vmatpush3.bf16.msra.mxu1 %v366_v4  ;;  %v83_v10 = vld [vmem:[#allocation2] sm:$0x1]  ;;  %v170_v31 = vld [vmem:[#allocation4] sm:$0x1]  ;;  %v278_v62 = vld [vmem:[#allocation6] sm:$0x1] }
  0x4f   :  { %339 = vmatprep.subr.bf16.mxu0 %v476_v0  ;;  %347 = vmatprep.subr.bf16.mxu1 %v476_v0  ;;  %v84_v11 = vunpack.c.l.bf16 %v83_v10  ;;  %v593_v12 = vsub.s32 0, %v86_v9  ;;  %v171_v32 = vunpack.c.l.bf16 %v170_v31  ;;  %v326_v33 = vld [vmem:[%s617_s5] sm:$0xff]   ;;  %v279_v1 = vunpack.c.l.bf16 %v278_v62 }
  0x50   :  { %v327_v35 = vunpack.c.l.bf16 %v326_v33  ;;  %v328_v39 = vunpack.c.h.bf16 %v326_v33 }
  0x51   :  { %v88_v13 = vrot.slane %v84_v11, %v593_v12  ;;  %v175_v34 = vrot.slane %v171_v32, %v593_v12 }
  0x52   :  { %340 = vmatpush3.bf16.msra.mxu0 %v364_v2  ;;  %348 = vmatpush3.bf16.msra.mxu1 %v367_v5 }
  0x53   :  { %349 = vmatprep.subr.bf16.mxu1 %v476_v0 }
  0x55   :  { %342 = vmatmul.mubr.msk.bf16.vlgmr.msra.gmra.mrb[0].mxu0 %vm106_vm1, %v365_v3  ;;  %v283_v3 = vrot.slane %v279_v1, %v593_v12 }
  0x56   :  { %350 = vmatpush3.bf16.msra.mxu1 %v368_v6 }
  0x57   :  { %351 = vmatprep.subr.bf16.mxu1 %v476_v0  ;;  %v286_v0 = vld [vmem:[#allocation7] sm:$0x1] }
  0x58   :  { %v287_v2 = vunpack.c.l.bf16 %v286_v0 }
  0x5a   :  { %352 = vmatpush3.bf16.msra.mxu1 %v369_v7  ;;  %v291_v5 = vrot.slane %v287_v2, %v593_v12 }
 0x128   :  { %v144_v14 = vpop.f32.mrb[0].mxu0 }
 0x129   :  { %v145_v15 = vadd.f32 %v144_v14, %v88_v13  ;;  %v343_v16 = vpop.f32.mrb[1].mxu0 }
 0x12a   :  { %v147_v17 = vpop.f32.mrb[2].mxu0 }
 0x12b   :  { %v153_v18 = vmul.f32 0.70710677, %v145_v15  ;;  %v148_v19 = vadd.f32 %v147_v17, %v88_v13  ;;  %v344_v20 = vpop.f32.mrb[3].mxu0  ;;  %v151_v25 = vmul.f32 0.5, %v145_v15 }
 0x12d   :  { %370 = verf.f32 %v153_v18  ;;  %v154_v21 = vmul.f32 0.70710677, %v148_v19  ;;  %v152_v26 = vmul.f32 0.5, %v148_v19 }
 0x12f   :  { %372 = verf.f32 %v154_v21 }
 0x137   :  { %v371_v22 = vpop.eup %370 }
 0x138   :  { %v157_v23 = vadd.f32 1.0, %v371_v22 }
 0x139   :  { %v373_v24 = vpop.eup %372 }
 0x13a   :  { %v158_v27 = vadd.f32 1.0, %v373_v24  ;;  %v159_v28 = vmul.f32 %v157_v23, %v151_v25 }
 0x13c   :  { %v160_v29 = vmul.f32 %v158_v27, %v152_v26 }
 0x13e   :  { %v161_v30 = vpack.c.bf16 %v160_v29, %v159_v28 }
 0x140   :  { %354 = vmatmul.mubr.msk.bf16.vlgmr.msra.gmra.mrb[0].mxu1 %vm200_vm2, %v161_v30 }
 0x213   :  { %v238_v36 = vpop.f32.mrb[0].mxu1 }
 0x214   :  { %v239_v37 = vadd.f32 %v238_v36, %v175_v34  ;;  %v355_v38 = vpop.f32.mrb[1].mxu1 }
 0x215   :  { %v241_v40 = vpop.f32.mrb[2].mxu1 }
 0x216   :  { %v242_v41 = vadd.f32 %v241_v40, %v175_v34  ;;  %v356_v42 = vpop.f32.mrb[3].mxu1  ;;  %v249_v43 = vadd.f32 %v327_v35, %v239_v37 }
 0x218   :  { %v251_v44 = vsel %vm106_vm1, %v249_v43, 0.0  ;;  %v250_v45 = vadd.f32 %v328_v39, %v242_v41 }
 0x219   :  { %252 = vadd.xlane.f32.xlu0 %v251_v44 }
 0x21a   :  { %v254_v46 = vsel %vm106_vm1, %v250_v45, 0.0 }
 0x21d   :  { %255 = vadd.xlane.f32.xlu0 %v254_v46 }
 0x2a6   :  { %v253_v47 = vpop.xlane.xlu0 %252 }
 0x2a7   :  { %v258_v48 = vmul.f32 0.03125, %v253_v47 }
 0x2a9   :  { %v260_v49 = vsub.f32 %v249_v43, %v258_v48 }
 0x2aa   :  { %v256_v50 = vpop.xlane.xlu0 %255 }
 0x2ab   :  { %v259_v51 = vmul.f32 0.03125, %v256_v50  ;;  %v262_v52 = vmul.f32 %v260_v49, %v260_v49 }
 0x2ad   :  { %v261_v53 = vsub.f32 %v250_v45, %v259_v51  ;;  %v264_v54 = vsel %vm106_vm1, %v262_v52, 0.0 }
 0x2ae   :  { %265 = vadd.xlane.f32.xlu1 %v264_v54 }
 0x2af   :  { %v263_v55 = vmul.f32 %v261_v53, %v261_v53 }
 0x2b1   :  { %v267_v56 = vsel %vm106_vm1, %v263_v55, 0.0 }
 0x2b2   :  { %268 = vadd.xlane.f32.xlu1 %v267_v56 }
 0x33b   :  { %v266_v57 = vpop.xlane.xlu1 %265 }
 0x33c   :  { %v270_v58 = vmul.f32 0.03125, %v266_v57 }
 0x33e   :  { %v272_v59 = vadd.f32 1e-05, %v270_v58 }
 0x33f   :  { %v269_v60 = vpop.xlane.xlu1 %268 }
 0x340   :  { %374 = vrsqrt.f32 %v272_v59  ;;  %v271_v61 = vmul.f32 0.03125, %v269_v60 }
 0x342   :  { %v273_v63 = vadd.f32 1e-05, %v271_v61 }
 0x344   :  { %376 = vrsqrt.f32 %v273_v63 }
 0x34a   :  { %v375_v4 = vpop.eup %374 }
 0x34b   :  { %v276_v6 = vmul.f32 %v375_v4, %v260_v49 }
 0x34d   :  { %v284_v7 = vmul.f32 %v283_v3, %v276_v6 }
 0x34e   :  { %v377_v8 = vpop.eup %376 }
 0x34f   :  { %v292_v9 = vadd.f32 %v291_v5, %v284_v7  ;;  %v277_v10 = vmul.f32 %v377_v8, %v261_v53 }
 0x351   :  { %v323_v11 = vpack.c.bf16 %v292_v9, %v292_v9  ;;  %v285_v13 = vmul.f32 %v283_v3, %v277_v10 }
 0x353   :  { %303 = vst.msk [vmem:[%s620_s8] sm:$0xf] %vm302_vm3, %v323_v11  ;;  %v293_v14 = vadd.f32 %v291_v5, %v285_v13 }
 0x355   :  { %v324_v15 = vpack.c.bf16 %v293_v14, %v293_v14 }
 0x357   :  { %304 = vst.msk [vmem:[%s620_s8 + $0x4] sm:$0xf] %vm302_vm3, %v324_v15 }
 0x358   :  { %309 = vsyncpa [#allocation3], 1 }
 0x359   :  { %310 = vsyncpa [#allocation5], 1 }
 0x35a   :  { %311 = vsyncpa [#allocation8], 1 }

// kernel: _lambda_.90
= control target key start
LH: loop header
LB: loop body
LE: loop exit
PB: predicated region body
PF: predicated region fallthrough
CT: control target
= control target key end

     0   :  { %s1083_s15 = smov 0   ;;  %s1085_s16 = smov 0   ;;  %s1210_s0 = inlined_call_operand.vmem [shape: bf16[1,2,8,32], index: 0, kind: input, shape index: {}]   ;;  %s1211_s1 = inlined_call_operand.vmem [shape: bf16[2,2,8,32], index: 1, kind: input, shape index: {}, may-alias: {1,2}]   ;;  %s1212_s2 = inlined_call_operand.vmem [shape: bf16[2,2,8,32], index: 2, kind: input, shape index: {}, may-alias: {1,2}]   ;;  %s1213_s3 = inlined_call_operand.vmem [shape: f32[2,1,8], index: 3, kind: input, shape index: {}]   ;;  %s1214_s4 = inlined_call_operand.vmem [shape: bf16[2,8,32], index: 4, kind: output, shape index: {}]  }
   0x1   :  { %s1087_s17 = smov 0  }
   0x2 LB: > { %s26_s18 = sadd.s32 1, %s1043_s16  ;;  %p884_p0 = scmp.ge.s32.totalorder %s1047_s17, 1  ;;  %s1047_s17 = sphi %s1087_s17, %s14_s17   ;;  %s1043_s16 = sphi %s1085_s16, %s1216_s16   ;;  %s1039_s15 = sphi %s1083_s15, %s1215_s15  }
   0x3   : > { %p28_p1 = scmp.ge.s32.totalorder %s26_s18, 2  ;;  %p207_p2 = scmp.lt.s32.totalorder %s1047_s17, 3 }
   0x5   : > { %s1218_s18 = smov (%p28_p1, %s26_s18), 0  ;;  %p208_p3 = pnand %p884_p0, %p207_p2 }
   0x6   : > { %p249_p4 = scmp.lt.s32.totalorder (!%p208_p3), %s1039_s15, 1  ;;  %v1049_v0 = vmov (!%p208_p3), 0.0   ;;  %vm1050_vm0 = vmmov (!%p208_p3), 0   ;;  %vm281_vm1 = vcmask (!%p208_p3), 64512   ;;  %v330_v4 = vlaneseq (!%p208_p3)  ;;  %s1052_s29 = smov (!%p208_p3), 120  }
   0x7   : > { %211 = sbr.rel (%p208_p3) target bundleno = 1479 (0x5c7), region = 36  ;;  %925 = vmatprep.subr.bf16.mxu0 (!%p208_p3), %v1049_v0  ;;  %927 = vmatprep.mubr.msk.bf16.mxu0 (!%p208_p3), %vm1050_vm0, %v1049_v0  ;;  %v1051_v8 = vmov (!%p208_p3), 0   ;;  %s1053_s30 = smov (!%p208_p3), 112   ;;  %vm351_vm4 = vcmask (!%p208_p3), 1043456   ;;  %vm396_vm5 = vcmask (!%p208_p3), 60416   ;;  %vm526_vm6 = vcmask (!%p208_p3), 126016  }
   0x8   : > { %931 = vmatprep.subr.bf16.mxu1 (!%p208_p3), %v1049_v0  ;;  %933 = vmatprep.mubr.msk.bf16.mxu1 (!%p208_p3), %vm1050_vm0, %v1049_v0  ;;  %v331_v6 = vshrl.u32 (!%p208_p3), %v330_v4, 7  ;;  %s1054_s5 = smov (!%p208_p3), 104   ;;  %s1055_s12 = smov (!%p208_p3), 8   ;;  %vm647_vm7 = vcmask (!%p208_p3), 191616   ;;  %vm768_vm8 = vcmask (!%p208_p3), 257216  }
   0x9   : > { %s1056_s13 = smov (!%p208_p3), 16   ;;  %s1057_s14 = smov (!%p208_p3), 24  }
   0xa   : > { %v332_v7 = vsub.s32 (!%p208_p3), 0, %v331_v6 }
   0xe   : > { %s1220_s15 = smov (!%p249_p4, %s1039_s15), 1 }
   0xf   : > { %s1107_s19 = sshll.u32 %s1220_s15, 2  ;;  %s267_s28 = scalar_lea.vmem %s1213_s3, %s1220_s15 }
  0x10   : > { %s259_s22 = scalar_lea.vmem %s1211_s1, %s1107_s19  ;;  %s255_s25 = scalar_lea.vmem %s1210_s0, %s1107_s19  ;;  %v279_v5 = vld [vmem:[%s267_s28] sm:$0x1] }
  0x11   : > { %v277_v1 = vld [vmem:[%s259_s22] sm:$0xf]  ;;  %vm280_vm2 = vcmp.gt.f32.partialorder %v279_v5, 0.5  ;;  %s822_s8 = scalar_lea.vmem %s1212_s2, %s1107_s19  ;;  %s1166_s11 = scalar_lea.vmem %s1214_s4, %s1107_s19 }
  0x12   : > { %v286_v2 = vsel %vm281_vm1, %v277_v1, 0  ;;  %v276_v3 = vld [vmem:[%s255_s25] sm:$0xf]  ;;  %v329_v9 = vsel %vm280_vm2, 1, %v1051_v8  ;;  %v893_v18 = vcombine.low %v277_v1, %v277_v1  ;;  %v1141_v25 = vld [vmem:[%s822_s8 + $0x8] sm:$0xf] }
  0x13   : > { %926 = vmatpush3.bf16.xpose.msra.mxu0 %v286_v2  ;;  %v1125_v10 = vrot.slane %v329_v9, %v332_v7  ;;  %v892_v19 = vcombine.low %v276_v3, %v276_v3  ;;  %v353_v26 = vsel %vm351_vm4, %v1141_v25, 0 }
  0x14   : > { %943 = vmatprep.subr.bf16.mxu0 %v1049_v0  ;;  %406 = vrot.lane.b32.xlu1 %v893_v18, %s1052_s29 }
  0x15   : > { %vm334_vm3 = vcmp.eq.s32.totalorder %v1125_v10, 1  ;;  %932 = vmatpush3.bf16.msra.mxu1 %v353_v26 }
  0x16   : > { %937 = vmatprep.subr.bf16.mxu1 %v1049_v0 }
  0x18   : > { %401 = vrot.lane.b32.xlu1 %v892_v19, %s1052_s29 }
  0x1a   : > { %928 = vmatmul.mubr.msk.bf16.vlgmr.msra.gmra.mrb[0].mxu0 %vm281_vm1, %v276_v3 }
  0x1b   : > { %945 = vmatprep.mubr.msk.bf16.mxu0 %vm1050_vm0, %v1049_v0 }
  0x1c   : > { %528 = vrot.lane.b32.xlu1 %v892_v19, %s1053_s30 }
  0x20   : > { %651 = vrot.lane.b32.xlu1 %v893_v18, %s1054_s5 }
  0x24   : > { %649 = vrot.lane.b32.xlu1 %v892_v19, %s1054_s5 }
  0x86   : > { %v407_v29 = vpop.permute.xlu1 %406 }
  0x87   : > { %v412_v31 = vsel %vm281_vm1, %v407_v29, 0 }
  0x8a   : > { %v402_v33 = vpop.permute.xlu1 %401 }
  0x8e   : > { %v529_v35 = vpop.permute.xlu1 %528 }
  0x92   : > { %v652_v37 = vpop.permute.xlu1 %651 }
  0x93   : > { %v657_v38 = vsel %vm281_vm1, %v652_v37, 0 }
  0x96   : > { %v650_v39 = vpop.permute.xlu1 %649 }
  0xed   : > { %v322_v11 = vpop.f32.mrb[0].mxu0 }
  0xee   : > { %v328_v12 = vmul.f32 0.35355338, %v322_v11  ;;  %v929_v13 = vpop.f32.mrb[1].mxu0 }
  0xef   : > { %v325_v14 = vpop.f32.mrb[2].mxu0  ;;  %v895_v13 = vcombine.low %v1141_v25, %v1141_v25 }
  0xf0   : > { %v930_v15 = vpop.f32.mrb[3].mxu0  ;;  %v335_v16 = vsel %vm334_vm3, %v328_v12, -1e+30 }
  0xf1   : > { %v336_v17 = vsel %vm281_vm1, %v335_v16, -inf }
  0xf2   : > { %337 = vmax.xlane.f32.xlu0 %v336_v17 }
 0x17f   : > { %v338_v20 = vpop.xlane.xlu0 %337 }
 0x180   : > { %v339_v21 = vsub.f32 %v335_v16, %v338_v20 }
 0x182   : > { %v340_v22 = vmul.f32 1.442695, %v339_v21 }
 0x184   : > { %1009 = vpow2.f32 %v340_v22 }
 0x18e   : > { %v1010_v23 = vpop.eup %1009 }
 0x18f   : > { %v342_v24 = vsel %vm281_vm1, %v1010_v23, 0.0 }
 0x190   : > { %343 = vadd.xlane.f32.xlu0 %v342_v24 }
 0x1a6   : > { %530 = vrot.lane.b32.xlu0 %v893_v18, %s1053_s30 }
 0x21d   : > { %v344_v27 = vpop.xlane.xlu0 %343 }
 0x21e   : > { %1011 = vrcp.f32 %v344_v27 }
 0x221   : > { %v531_v34 = vpop.permute.xlu0 %530 }
 0x222   : > { %v536_v36 = vsel %vm281_vm1, %v531_v34, 0 }
 0x228   : > { %v1012_v28 = vpop.eup %1011 }
 0x229   : > { %v346_v30 = vmul.f32 %v1012_v28, %v1010_v23 }
 0x22b   : > { %v347_v32 = vpack.c.bf16 %v346_v30, %v346_v30 }
 0x22d   : > { %934 = vmatmul.mubr.msk.bf16.vlgmr.msra.gmra.mrb[0].mxu1 %vm281_vm1, %v347_v32 }
 0x22e   : > { %938 = vmatpush3.bf16.xpose.msra.mxu1 %v412_v31  ;;  %939 = vmatprep.mubr.msk.bf16.mxu1 %vm1050_vm0, %v1049_v0 }
 0x22f   : > { %949 = vmatprep.subr.bf16.mxu1 %v1049_v0 }
 0x235   : > { %940 = vmatmul.mubr.msk.bf16.vlgmr.msra.gmra.mrb[4].mxu1 %vm281_vm1, %v402_v33 }
 0x236   : > { %950 = vmatpush3.bf16.xpose.msra.mxu1 %v536_v36  ;;  %951 = vmatprep.mubr.msk.bf16.mxu1 %vm1050_vm0, %v1049_v0 }
 0x237   : > { %961 = vmatprep.subr.bf16.mxu1 %v1049_v0 }
 0x23d   : > { %952 = vmatmul.mubr.msk.bf16.vlgmr.msra.gmra.mrb[8].mxu1 %vm281_vm1, %v529_v35 }
 0x23e   : > { %962 = vmatpush3.bf16.xpose.msra.mxu1 %v657_v38  ;;  %963 = vmatprep.mubr.msk.bf16.mxu1 %vm1050_vm0, %v1049_v0 }
 0x245   : > { %964 = vmatmul.mubr.msk.bf16.vlgmr.msra.gmra.mrb[12].mxu1 %vm281_vm1, %v650_v39 }
 0x300   : > { %v389_v40 = vpop.f32.mrb[0].mxu1 }
 0x301   : > { %v395_v41 = vpack.c.bf16 %v389_v40, %v389_v40  ;;  %v935_v42 = vpop.f32.mrb[1].mxu1 }
 0x302   : > { %v392_v43 = vpop.f32.mrb[2].mxu1 }
 0x303   : > { %397 = vst.msk [vmem:[%s1166_s11] sm:$0xf] %vm396_vm5, %v395_v41  ;;  %v936_v44 = vpop.f32.mrb[3].mxu1 }
 0x308   : > { %v448_v45 = vpop.f32.mrb[4].mxu1 }
 0x309   : > { %v454_v46 = vmul.f32 0.35355338, %v448_v45  ;;  %v941_v47 = vpop.f32.mrb[5].mxu1 }
 0x30a   : > { %v451_v48 = vpop.f32.mrb[6].mxu1 }
 0x30b   : > { %v942_v49 = vpop.f32.mrb[7].mxu1  ;;  %v455_v50 = vsel %vm334_vm3, %v454_v46, -1e+30 }
 0x30c   : > { %v456_v51 = vsel %vm281_vm1, %v455_v50, -inf }
 0x30d   : > { %457 = vmax.xlane.f32.xlu1 %v456_v51 }
 0x310   : > { %v572_v52 = vpop.f32.mrb[8].mxu1 }
 0x311   : > { %v578_v53 = vmul.f32 0.35355338, %v572_v52  ;;  %v953_v54 = vpop.f32.mrb[9].mxu1 }
 0x312   : > { %v575_v55 = vpop.f32.mrb[10].mxu1 }
 0x313   : > { %v579_v56 = vsel %vm334_vm3, %v578_v53, -1e+30  ;;  %v954_v57 = vpop.f32.mrb[11].mxu1 }
 0x314   : > { %v580_v58 = vsel %vm281_vm1, %v579_v56, -inf }
 0x315   : > { %581 = vmax.xlane.f32.xlu0 %v580_v58 }
 0x318   : > { %v693_v59 = vpop.f32.mrb[12].mxu1 }
 0x319   : > { %v699_v60 = vmul.f32 0.35355338, %v693_v59  ;;  %v965_v61 = vpop.f32.mrb[13].mxu1 }
 0x31a   : > { %v696_v62 = vpop.f32.mrb[14].mxu1 }
 0x31b   : > { %v700_v63 = vsel %vm334_vm3, %v699_v60, -1e+30  ;;  %v966_v1 = vpop.f32.mrb[15].mxu1 }
 0x31c   : > { %v701_v2 = vsel %vm281_vm1, %v700_v63, -inf }
 0x31d   : > { %702 = vmax.xlane.f32.xlu1 %v701_v2 }
 0x39a   : > { %v458_v3 = vpop.xlane.xlu1 %457 }
 0x39b   : > { %v459_v4 = vsub.f32 %v455_v50, %v458_v3 }
 0x39d   : > { %v460_v5 = vmul.f32 1.442695, %v459_v4 }
 0x39f   : > { %1013 = vpow2.f32 %v460_v5 }
 0x3a2   : > { %v582_v6 = vpop.xlane.xlu0 %581 }
 0x3a3   : > { %v583_v7 = vsub.f32 %v579_v56, %v582_v6 }
 0x3a5   : > { %v584_v8 = vmul.f32 1.442695, %v583_v7 }
 0x3a7   : > { %1015 = vpow2.f32 %v584_v8 }
 0x3a9   : > { %v1014_v9 = vpop.eup %1013 }
 0x3aa   : > { %v462_v11 = vsel %vm281_vm1, %v1014_v9, 0.0  ;;  %v703_v14 = vpop.xlane.xlu1 %702 }
 0x3ab   : > { %463 = vadd.xlane.f32.xlu1 %v462_v11  ;;  %v704_v15 = vsub.f32 %v700_v63, %v703_v14 }
 0x3ad   : > { %v705_v16 = vmul.f32 1.442695, %v704_v15 }
 0x3af   : > { %1017 = vpow2.f32 %v705_v16 }
 0x3b1   : > { %v1016_v12 = vpop.eup %1015 }
 0x3b2   : > { %v586_v10 = vsel %vm281_vm1, %v1016_v12, 0.0 }
 0x3b3   : > { %587 = vadd.xlane.f32.xlu0 %v586_v10 }
 0x3b9   : > { %v1018_v17 = vpop.eup %1017 }
 0x3ba   : > { %v707_v18 = vsel %vm281_vm1, %v1018_v17, 0.0 }
 0x3bc   : > { %592 = vrot.lane.b32.xlu1 %v895_v13, %s1053_s30 }
 0x3c9   : > { %471 = vrot.lane.b32.xlu0 %v895_v13, %s1052_s29 }
 0x3e0   : > { %708 = vadd.xlane.f32.xlu1 %v707_v18 }
 0x3f1   : > { %713 = vrot.lane.b32.xlu1 %v895_v13, %s1054_s5 }
 0x438   : > { %v464_v19 = vpop.xlane.xlu1 %463 }
 0x439   : > { %1019 = vrcp.f32 %v464_v19 }
 0x43c   : > { %v593_v25 = vpop.permute.xlu1 %592 }
 0x43d   : > { %v598_v27 = vsel %vm351_vm4, %v593_v25, 0 }
 0x440   : > { %v588_v20 = vpop.xlane.xlu0 %587 }
 0x441   : > { %1021 = vrcp.f32 %v588_v20 }
 0x443   : > { %v1020_v21 = vpop.eup %1019 }
 0x444   : > { %v466_v22 = vmul.f32 %v1020_v21, %v1014_v9  ;;  %v472_v23 = vpop.permute.xlu0 %471 }
 0x445   : > { %v477_v24 = vsel %vm351_vm4, %v472_v23, 0 }
 0x446   : > { %944 = vmatpush3.bf16.msra.mxu0 %v477_v24  ;;  %v467_v26 = vpack.c.bf16 %v466_v22, %v466_v22 }
 0x447   : > { %955 = vmatprep.subr.bf16.mxu0 %v1049_v0 }
 0x449   : > { %946 = vmatmul.mubr.msk.bf16.vlgmr.msra.gmra.mrb[4].mxu0 %vm281_vm1, %v467_v26 }
 0x44a   : > { %956 = vmatpush3.bf16.msra.mxu0 %v598_v27  ;;  %957 = vmatprep.mubr.msk.bf16.mxu0 %vm1050_vm0, %v1049_v0 }
 0x44b   : > { %v1022_v28 = vpop.eup %1021  ;;  %967 = vmatprep.subr.bf16.mxu0 %v1049_v0 }
 0x44c   : > { %v590_v29 = vmul.f32 %v1022_v28, %v1016_v12 }
 0x44e   : > { %v591_v30 = vpack.c.bf16 %v590_v29, %v590_v29 }
 0x451   : > { %958 = vmatmul.mubr.msk.bf16.vlgmr.msra.gmra.mrb[8].mxu0 %vm281_vm1, %v591_v30 }
 0x452   : > { %969 = vmatprep.mubr.msk.bf16.mxu0 %vm1050_vm0, %v1049_v0 }
 0x46d   : > { %v709_v31 = vpop.xlane.xlu1 %708 }
 0x46e   : > { %1023 = vrcp.f32 %v709_v31 }
 0x471   : > { %v714_v32 = vpop.permute.xlu1 %713 }
 0x472   : > { %v719_v33 = vsel %vm351_vm4, %v714_v32, 0 }
 0x473   : > { %968 = vmatpush3.bf16.msra.mxu0 %v719_v33 }
 0x478   : > { %v1024_v34 = vpop.eup %1023 }
 0x479   : > { %v711_v35 = vmul.f32 %v1024_v34, %v1018_v17 }
 0x47b   : > { %v712_v36 = vpack.c.bf16 %v711_v35, %v711_v35 }
 0x47d   : > { %970 = vmatmul.mubr.msk.bf16.vlgmr.msra.gmra.mrb[12].mxu0 %vm281_vm1, %v712_v36 }
 0x51c   : > { %v513_v37 = vpop.f32.mrb[4].mxu0 }
 0x51d   : > { %v906_v38 = vpack.c.bf16 %v513_v37, %v513_v37  ;;  %v947_v39 = vpop.f32.mrb[5].mxu0 }
 0x51e   : > { %v516_v40 = vpop.f32.mrb[6].mxu0 }
 0x51f   : > { %523 = vrot.lane.b32.xlu0 %v906_v38, %s1055_s12  ;;  %v948_v41 = vpop.f32.mrb[7].mxu0 }
 0x524   : > { %v634_v42 = vpop.f32.mrb[8].mxu0 }
 0x525   : > { %v907_v0 = vpack.c.bf16 %v634_v42, %v634_v42  ;;  %v959_v43 = vpop.f32.mrb[9].mxu0 }
 0x526   : > { %v637_v44 = vpop.f32.mrb[10].mxu0 }
 0x527   : > { %644 = vrot.lane.b32.xlu1 %v907_v0, %s1056_s13  ;;  %v960_v45 = vpop.f32.mrb[11].mxu0 }
 0x550   : > { %v755_v46 = vpop.f32.mrb[12].mxu0 }
 0x551   : > { %v908_v47 = vpack.c.bf16 %v755_v46, %v755_v46  ;;  %v971_v48 = vpop.f32.mrb[13].mxu0 }
 0x552   : > { %v758_v49 = vpop.f32.mrb[14].mxu0 }
 0x553   : > { %765 = vrot.lane.b32.xlu0 %v908_v47, %s1057_s14  ;;  %v972_v50 = vpop.f32.mrb[15].mxu0 }
 0x591   : > { %v524_v51 = vpop.permute.xlu0 %523 }
 0x592   : > { %527 = vst.msk [vmem:[%s1166_s11] sm:$0xf] %vm526_vm6, %v524_v51 }
 0x599   : > { %v645_v52 = vpop.permute.xlu1 %644 }
 0x59a   : > { %648 = vst.msk [vmem:[%s1166_s11] sm:$0xf] %vm647_vm7, %v645_v52 }
 0x5c5   : > { %v766_v53 = vpop.permute.xlu0 %765 }
 0x5c6   : > { %769 = vst.msk [vmem:[%s1166_s11] sm:$0xf] %vm768_vm8, %v766_v53 }
 0x5c7 PF: > { %s14_s17 = sadd.s32 1, %s1047_s17   ;;  %s1215_s15 = smov %s1043_s16 }
 0x5c8   : > { %p11_p5 = scmp.ge.s32.totalorder %s14_s17, 4   ;;  %s1216_s16 = smov %s1218_s18 }
 0x5ca   :  { %13 = sbr.rel (!%p11_p5) target bundleno = 2 (0x2), region = 75 }

// kernel: _lambda_.95
= control target key start
LH: loop header
LB: loop body
LE: loop exit
PB: predicated region body
PF: predicated region fallthrough
CT: control target
= control target key end

     0   :  { %9 = vsyncpa [#allocation3], 0  ;;  %s179_s15 = smov [#allocation2]   ;;  %s237_s0 = inlined_call_operand.vmem [shape: bf16[16,32], index: 0, kind: input, shape index: {}]   ;;  %s238_s1 = inlined_call_operand.vmem [shape: bf16[1,32,32], index: 1, kind: input, shape index: {}]   ;;  %s239_s2 = inlined_call_operand.hbm [shape: bf16[1,1,32], index: 2, kind: input, shape index: {}]   ;;  %s240_s3 = inlined_call_operand.vmem [shape: bf16[16,32], index: 3, kind: input, shape index: {}]   ;;  %s241_s4 = inlined_call_operand.vmem [shape: bf16[1,16,32], index: 4, kind: output, shape index: {}]  }
   0x1   :  { %s20_s16 = sshll.u32 %s179_s15, 4  ;;  %s155_s19 = scalar_lea.hbm %s239_s2, 16  ;;  %s21_s16 = int_to_ptr.vmem [resolvable:$true] %s20_s16 }
   0x2   :  { %p156_p0 = scmp.ne.s32.totalorder %s239_s2, %s155_s19  ;;  %p159_p1 = scmp.lt.u32.totalorder %s155_s19, %s239_s2 }
   0x4   :  { %p161_p2 = pnand %p159_p1, %p156_p0 }
   0x6   :  { %164 = shalt.err (!%p161_p2)
}
   0x7   :  { %s165_s24 = scalar_lea.vmem %s21_s16, 16  ;;  %s169_s25 = scalar_lea.vmem %s21_s16, 32 }
   0x8   :  { %p166_p3 = scmp.ne.s32.totalorder %s21_s16, %s165_s24  ;;  %p170_p4 = scmp.lt.s32.totalorder %s21_s16, %s21_s16 }
   0x9   :  { %p171_p5 = scmp.lt.s32.totalorder %s169_s25, %s165_s24 }
   0xb   :  { %p172_p6 = por %p171_p5, %p170_p4 }
   0xd   :  { %p173_p7 = pnand %p172_p6, %p166_p3 }
   0xf   :  { %176 = shalt.err (!%p173_p7)
}
  0x10   :  { %23 = dma.hbm_to_vmem [thread:$0]  %s239_s2, 16, %s21_s16, [#allocation3]  }
  0x11   :  { %177 = dma.done.wait [#allocation3], 16  }
  0x12   :  { %178 = vsyncadd [#allocation3], 4294967280  ;;  %v180_v0 = vmov 0.0   ;;  %vm181_vm0 = vmmov 0   ;;  %v152_v1 = vld [vmem:[%s238_s1] sm:$0xff]   ;;  %v153_v2 = vld [vmem:[%s238_s1 + $0x8] sm:$0xff]   ;;  %v38_v4 = vlaneseq }
  0x13   :  { %141 = vmatprep.subr.bf16.mxu0 %v180_v0  ;;  %145 = vmatprep.mubr.msk.bf16.mxu0 %vm181_vm0, %v180_v0  ;;  %v154_v3 = vld [vmem:[%s237_s0] sm:$0xff]   ;;  %vm59_vm1 = vcmask 261120   ;;  %vm118_vm2 = vcmask 257024  }
  0x14   :  { %142 = vmatpush3.bf16.msra.mxu0 %v152_v1  ;;  %v39_v5 = vshrl.u32 %v38_v4, 7  ;;  %v36_v6 = vld [vmem:[#allocation2] sm:$0x1] }
  0x15   :  { %143 = vmatprep.subr.bf16.mxu0 %v180_v0  ;;  %v37_v7 = vunpack.c.l.bf16 %v36_v6  ;;  %v135_v9 = vld [vmem:[%s240_s3] sm:$0xff]  }
  0x16   :  { %v40_v8 = vsub.s32 0, %v39_v5  ;;  %v136_v11 = vunpack.c.l.bf16 %v135_v9  ;;  %v137_v15 = vunpack.c.h.bf16 %v135_v9 }
  0x18   :  { %144 = vmatpush3.bf16.msra.mxu0 %v153_v2  ;;  %v41_v10 = vrot.slane %v37_v7, %v40_v8 }
  0x1b   :  { %146 = vmatmul.mubr.msk.bf16.vlgmr.msra.gmra.mrb[0].mxu0 %vm59_vm1, %v154_v3 }
  0xee   :  { %v97_v12 = vpop.f32.mrb[0].mxu0 }
  0xef   :  { %v98_v13 = vadd.f32 %v97_v12, %v41_v10  ;;  %v147_v14 = vpop.f32.mrb[1].mxu0 }
  0xf0   :  { %v100_v16 = vpop.f32.mrb[2].mxu0 }
  0xf1   :  { %v108_v17 = vadd.f32 %v136_v11, %v98_v13  ;;  %v101_v18 = vadd.f32 %v100_v16, %v41_v10  ;;  %v148_v19 = vpop.f32.mrb[3].mxu0 }
  0xf3   :  { %v132_v20 = vpack.c.bf16 %v108_v17, %v108_v17  ;;  %v109_v21 = vadd.f32 %v137_v15, %v101_v18 }
  0xf5   :  { %119 = vst.msk [vmem:[%s241_s4] sm:$0xf] %vm118_vm2, %v132_v20  ;;  %v133_v22 = vpack.c.bf16 %v109_v21, %v109_v21 }
  0xf7   :  { %120 = vst.msk [vmem:[%s241_s4 + $0x4] sm:$0xf] %vm118_vm2, %v133_v22 }
  0xf8   :  { %125 = vsyncpa [#allocation3], 1 }

// kernel: _lambda_.96
= control target key start
LH: loop header
LB: loop body
LE: loop exit
PB: predicated region body
PF: predicated region fallthrough
CT: control target
= control target key end

     0   :  { %10 = vsyncpa [#allocation4], 0  ;;  %s395_s0 = inlined_call_operand.vmem [shape: bf16[16,32], index: 0, kind: input, shape index: {}]   ;;  %s396_s1 = inlined_call_operand.hbm [shape: bf16[1,32], index: 1, kind: input, shape index: {}]   ;;  %s397_s2 = inlined_call_operand.hbm [shape: bf16[1,32], index: 2, kind: input, shape index: {}]   ;;  %s398_s3 = inlined_call_operand.vmem [shape: bf16[1,32,32], index: 3, kind: input, shape index: {}]   ;;  %s399_s4 = inlined_call_operand.hbm [shape: bf16[1,1,32], index: 4, kind: input, shape index: {}]   ;;  %s400_s5 = inlined_call_operand.vmem [shape: bf16[1,16,32], index: 5, kind: output, shape index: {}]  }
   0x1   :  { %11 = vsyncpa [#allocation6], 0  ;;  %s303_s18 = smov [#allocation5]   ;;  %s304_s20 = smov [#allocation3]  }
   0x2   :  { %s30_s19 = sshll.u32 %s303_s18, 4  ;;  %s20_s21 = sshll.u32 %s304_s20, 4  ;;  %s31_s19 = int_to_ptr.vmem [resolvable:$true] %s30_s19  ;;  %s21_s21 = int_to_ptr.vmem [resolvable:$true] %s20_s21 }
   0x3   :  { %s233_s24 = scalar_lea.hbm %s397_s2, 16 }
   0x4   :  { %p234_p0 = scmp.ne.s32.totalorder %s397_s2, %s233_s24  ;;  %p237_p1 = scmp.lt.u32.totalorder %s233_s24, %s397_s2 }
   0x6   :  { %p239_p2 = pnand %p237_p1, %p234_p0 }
   0x8   :  { %242 = shalt.err (!%p239_p2)
}
   0x9   :  { %s243_s29 = scalar_lea.vmem %s31_s19, 16  ;;  %s247_s30 = scalar_lea.vmem %s31_s19, 32 }
   0xa   :  { %p244_p3 = scmp.ne.s32.totalorder %s31_s19, %s243_s29  ;;  %p248_p4 = scmp.lt.s32.totalorder %s31_s19, %s31_s19 }
   0xb   :  { %p249_p5 = scmp.lt.s32.totalorder %s247_s30, %s243_s29 }
   0xd   :  { %p250_p6 = por %p249_p5, %p248_p4 }
   0xf   :  { %p251_p7 = pnand %p250_p6, %p244_p3 }
  0x11   :  { %254 = shalt.err (!%p251_p7)
}
  0x12   :  { %33 = dma.hbm_to_vmem [thread:$0]  %s397_s2, 16, %s31_s19, [#allocation6]  }
  0x13   :  { %s255_s10 = scalar_lea.hbm %s396_s1, 16 }
  0x14   :  { %p256_p8 = scmp.ne.s32.totalorder %s396_s1, %s255_s10  ;;  %p259_p9 = scmp.lt.u32.totalorder %s255_s10, %s396_s1 }
  0x16   :  { %p261_p10 = pnand %p259_p9, %p256_p8 }
  0x18   :  { %264 = shalt.err (!%p261_p10)
}
  0x19   :  { %s265_s15 = scalar_lea.vmem %s21_s21, 16  ;;  %s269_s16 = scalar_lea.vmem %s21_s21, 32 }
  0x1a   :  { %p266_p11 = scmp.ne.s32.totalorder %s21_s21, %s265_s15  ;;  %p270_p12 = scmp.lt.s32.totalorder %s21_s21, %s21_s21 }
  0x1b   :  { %p271_p13 = scmp.lt.s32.totalorder %s269_s16, %s265_s15 }
  0x1d   :  { %p272_p0 = por %p271_p13, %p270_p12 }
  0x1f   :  { %p273_p1 = pnand %p272_p0, %p266_p11 }
  0x21   :  { %276 = shalt.err (!%p273_p1)
}
  0x22   :  { %23 = dma.hbm_to_vmem [thread:$0]  %s396_s1, 16, %s21_s21, [#allocation4]  }
  0x23   :  { %s305_s18 = smov [#allocation7]   ;;  %s277_s23 = scalar_lea.hbm %s399_s4, 16 }
  0x24   :  { %s42_s19 = sshll.u32 %s305_s18, 4  ;;  %p278_p2 = scmp.ne.s32.totalorder %s399_s4, %s277_s23  ;;  %s43_s19 = int_to_ptr.vmem [resolvable:$true] %s42_s19 }
  0x25   :  { %p281_p3 = scmp.lt.u32.totalorder %s277_s23, %s399_s4 }
  0x27   :  { %p283_p4 = pnand %p281_p3, %p278_p2 }
  0x29   :  { %286 = shalt.err (!%p283_p4)
}
  0x2a   :  { %s287_s28 = scalar_lea.vmem %s43_s19, 16  ;;  %s291_s1 = scalar_lea.vmem %s43_s19, 32 }
  0x2b   :  { %p288_p5 = scmp.ne.s32.totalorder %s43_s19, %s287_s28  ;;  %p292_p6 = scmp.lt.s32.totalorder %s43_s19, %s43_s19 }
  0x2c   :  { %p293_p7 = scmp.lt.s32.totalorder %s291_s1, %s287_s28 }
  0x2e   :  { %p294_p8 = por %p293_p7, %p292_p6 }
  0x30   :  { %p295_p9 = pnand %p294_p8, %p288_p5 }
  0x32   :  { %298 = shalt.err (!%p295_p9)
}
  0x33   :  { %45 = dma.hbm_to_vmem [thread:$0]  %s399_s4, 16, %s43_s19, [#allocation6]  }
  0x34   :  { %299 = dma.done.wait [#allocation4], 16  }
  0x35   :  { %300 = vsyncadd [#allocation4], 4294967280 }
  0x36   :  { %301 = dma.done.wait [#allocation6], 32  }
  0x37   :  { %302 = vsyncadd [#allocation6], 4294967264  ;;  %v208_v0 = vld [vmem:[%s395_s0] sm:$0xff]   ;;  %vm69_vm0 = vcmask 261120   ;;  %v306_v16 = vmov 0.0   ;;  %v228_v17 = vld [vmem:[%s398_s3 + $0x8] sm:$0xff]   ;;  %v99_v21 = vlaneseq }
  0x38   :  { %v209_v1 = vunpack.c.l.bf16 %v208_v0  ;;  %v210_v2 = vunpack.c.h.bf16 %v208_v0  ;;  %v227_v15 = vld [vmem:[%s398_s3] sm:$0xff]   ;;  %214 = vmatprep.subr.bf16.mxu0 %v306_v16  ;;  %vm307_vm1 = vmmov 0   ;;  %v97_v26 = vld [vmem:[#allocation3] sm:$0x1]  ;;  %v105_v29 = vld [vmem:[#allocation5] sm:$0x1] }
  0x39   :  { %215 = vmatpush3.bf16.msra.mxu0 %v227_v15  ;;  %218 = vmatprep.mubr.msk.bf16.mxu0 %vm307_vm1, %v306_v16  ;;  %v100_v25 = vshrl.u32 %v99_v21, 7  ;;  %v98_v27 = vunpack.c.l.bf16 %v97_v26  ;;  %v106_v32 = vunpack.c.l.bf16 %v105_v29  ;;  %v120_v43 = vld [vmem:[#allocation7] sm:$0x1]  ;;  %vm191_vm2 = vcmask 257024  }
  0x3a   :  { %v70_v3 = vsel %vm69_vm0, %v209_v1, 0.0  ;;  %v73_v4 = vsel %vm69_vm0, %v210_v2, 0.0  ;;  %216 = vmatprep.subr.bf16.mxu0 %v306_v16  ;;  %v121_v44 = vunpack.c.l.bf16 %v120_v43 }
  0x3b   :  { %71 = vadd.xlane.f32.xlu0 %v70_v3  ;;  %v101_v28 = vsub.s32 0, %v100_v25 }
  0x3d   :  { %217 = vmatpush3.bf16.msra.mxu0 %v228_v17  ;;  %v102_v31 = vrot.slane %v98_v27, %v101_v28  ;;  %v110_v35 = vrot.slane %v106_v32, %v101_v28  ;;  %v125_v45 = vrot.slane %v121_v44, %v101_v28 }
  0x3f   :  { %74 = vadd.xlane.f32.xlu0 %v73_v4 }
  0xc8   :  { %v72_v5 = vpop.xlane.xlu0 %71 }
  0xc9   :  { %v77_v6 = vmul.f32 0.03125, %v72_v5 }
  0xcb   :  { %v79_v7 = vsub.f32 %v209_v1, %v77_v6 }
  0xcc   :  { %v75_v8 = vpop.xlane.xlu0 %74 }
  0xcd   :  { %v78_v9 = vmul.f32 0.03125, %v75_v8  ;;  %v81_v10 = vmul.f32 %v79_v7, %v79_v7 }
  0xcf   :  { %v80_v11 = vsub.f32 %v210_v2, %v78_v9  ;;  %v83_v12 = vsel %vm69_vm0, %v81_v10, 0.0 }
  0xd0   :  { %84 = vadd.xlane.f32.xlu1 %v83_v12 }
  0xd1   :  { %v82_v13 = vmul.f32 %v80_v11, %v80_v11 }
  0xd3   :  { %v86_v14 = vsel %vm69_vm0, %v82_v13, 0.0 }
  0xd4   :  { %87 = vadd.xlane.f32.xlu1 %v86_v14 }
 0x15d   :  { %v85_v18 = vpop.xlane.xlu1 %84 }
 0x15e   :  { %v89_v19 = vmul.f32 0.03125, %v85_v18 }
 0x160   :  { %v91_v20 = vadd.f32 1e-05, %v89_v19 }
 0x161   :  { %v88_v22 = vpop.xlane.xlu1 %87 }
 0x162   :  { %229 = vrsqrt.f32 %v91_v20  ;;  %v90_v23 = vmul.f32 0.03125, %v88_v22 }
 0x164   :  { %v92_v24 = vadd.f32 1e-05, %v90_v23 }
 0x166   :  { %231 = vrsqrt.f32 %v92_v24 }
 0x16c   :  { %v230_v30 = vpop.eup %229 }
 0x16d   :  { %v95_v33 = vmul.f32 %v230_v30, %v79_v7 }
 0x16f   :  { %v103_v36 = vmul.f32 %v102_v31, %v95_v33 }
 0x170   :  { %v232_v34 = vpop.eup %231 }
 0x171   :  { %v96_v37 = vmul.f32 %v232_v34, %v80_v11  ;;  %v111_v39 = vadd.f32 %v110_v35, %v103_v36 }
 0x173   :  { %v104_v38 = vmul.f32 %v102_v31, %v96_v37 }
 0x175   :  { %v112_v40 = vadd.f32 %v110_v35, %v104_v38 }
 0x177   :  { %v113_v41 = vpack.c.bf16 %v112_v40, %v111_v39 }
 0x179   :  { %114 = vst.msk [vmem:[#allocation2] sm:$0xff] %vm69_vm0, %v113_v41 }
 0x180   :  { %v115_v42 = vld [vmem:[#allocation2] sm:$0xff] }
 0x181   :  { %219 = vmatmul.mubr.msk.bf16.vlgmr.msra.gmra.mrb[0].mxu0 %vm69_vm0, %v115_v42 }
 0x254   :  { %v176_v46 = vpop.f32.mrb[0].mxu0 }
 0x255   :  { %v177_v47 = vadd.f32 %v176_v46, %v125_v45  ;;  %v220_v48 = vpop.f32.mrb[1].mxu0 }
 0x256   :  { %v179_v49 = vpop.f32.mrb[2].mxu0 }
 0x257   :  { %v205_v50 = vpack.c.bf16 %v177_v47, %v177_v47  ;;  %v180_v51 = vadd.f32 %v179_v49, %v125_v45  ;;  %v221_v52 = vpop.f32.mrb[3].mxu0 }
 0x259   :  { %192 = vst.msk [vmem:[%s400_s5] sm:$0xf] %vm191_vm2, %v205_v50  ;;  %v206_v53 = vpack.c.bf16 %v180_v51, %v180_v51 }
 0x25b   :  { %193 = vst.msk [vmem:[%s400_s5 + $0x4] sm:$0xf] %vm191_vm2, %v206_v53 }
 0x25c   :  { %198 = vsyncpa [#allocation4], 1 }
 0x25d   :  { %199 = vsyncpa [#allocation6], 1 }

// kernel: _lambda_.92
= control target key start
LH: loop header
LB: loop body
LE: loop exit
PB: predicated region body
PF: predicated region fallthrough
CT: control target
= control target key end

     0   :  { %13 = vsyncpa [#allocation3], 0  ;;  %s606_s0 = inlined_call_operand.vmem [shape: bf16[16,32], index: 0, kind: input, shape index: {}, may-alias: {0,7}]   ;;  %s607_s1 = inlined_call_operand.hbm [shape: bf16[1,32], index: 1, kind: input, shape index: {}]   ;;  %s608_s2 = inlined_call_operand.hbm [shape: bf16[1,32], index: 2, kind: input, shape index: {}]   ;;  %s609_s3 = inlined_call_operand.vmem [shape: bf16[32,64], index: 3, kind: input, shape index: {}]   ;;  %s610_s4 = inlined_call_operand.hbm [shape: bf16[1,64], index: 4, kind: input, shape index: {}]   ;;  %s611_s5 = inlined_call_operand.vmem [shape: bf16[64,32], index: 5, kind: input, shape index: {}]   ;;  %s612_s6 = inlined_call_operand.hbm [shape: bf16[1,32], index: 6, kind: input, shape index: {}]   ;;  %s613_s7 = inlined_call_operand.vmem [shape: bf16[16,32], index: 7, kind: input, shape index: {}, may-alias: {0,7}]   ;;  %s614_s8 = inlined_call_operand.vmem [shape: bf16[16,32], index: 8, kind: output, shape index: {}]  }
   0x1   :  { %14 = vsyncpa [#allocation5], 0 }
   0x2   :  { %15 = vsyncpa [#allocation8], 0  ;;  %s472_s27 = smov [#allocation4]   ;;  %s473_s29 = smov [#allocation2]  }
   0x3   :  { %s34_s28 = sshll.u32 %s472_s27, 4  ;;  %s24_s30 = sshll.u32 %s473_s29, 4  ;;  %s35_s28 = int_to_ptr.vmem [resolvable:$true] %s34_s28  ;;  %s25_s30 = int_to_ptr.vmem [resolvable:$true] %s24_s30 }
   0x4   :  { %s378_s11 = scalar_lea.hbm %s608_s2, 16 }
   0x5   :  { %p379_p0 = scmp.ne.s32.totalorder %s608_s2, %s378_s11  ;;  %p382_p1 = scmp.lt.u32.totalorder %s378_s11, %s608_s2 }
   0x7   :  { %p384_p2 = pnand %p382_p1, %p379_p0 }
   0x9   :  { %387 = shalt.err (!%p384_p2)
}
   0xa   :  { %s388_s16 = scalar_lea.vmem %s35_s28, 16  ;;  %s392_s17 = scalar_lea.vmem %s35_s28, 32 }
   0xb   :  { %p389_p3 = scmp.ne.s32.totalorder %s35_s28, %s388_s16  ;;  %p393_p4 = scmp.lt.s32.totalorder %s35_s28, %s35_s28 }
   0xc   :  { %p394_p5 = scmp.lt.s32.totalorder %s392_s17, %s388_s16 }
   0xe   :  { %p395_p6 = por %p394_p5, %p393_p4 }
  0x10   :  { %p396_p7 = pnand %p395_p6, %p389_p3 }
  0x12   :  { %399 = shalt.err (!%p396_p7)
}
  0x13   :  { %37 = dma.hbm_to_vmem [thread:$0]  %s608_s2, 16, %s35_s28, [#allocation5]  }
  0x14   :  { %s400_s22 = scalar_lea.hbm %s607_s1, 16 }
  0x15   :  { %p401_p8 = scmp.ne.s32.totalorder %s607_s1, %s400_s22  ;;  %p404_p9 = scmp.lt.u32.totalorder %s400_s22, %s607_s1 }
  0x17   :  { %p406_p10 = pnand %p404_p9, %p401_p8 }
  0x19   :  { %409 = shalt.err (!%p406_p10)
}
  0x1a   :  { %s410_s27 = scalar_lea.vmem %s25_s30, 16  ;;  %s414_s29 = scalar_lea.vmem %s25_s30, 32 }
  0x1b   :  { %p411_p11 = scmp.ne.s32.totalorder %s25_s30, %s410_s27  ;;  %p415_p12 = scmp.lt.s32.totalorder %s25_s30, %s25_s30 }
  0x1c   :  { %p416_p13 = scmp.lt.s32.totalorder %s414_s29, %s410_s27 }
  0x1e   :  { %p417_p0 = por %p416_p13, %p415_p12 }
  0x20   :  { %p418_p1 = pnand %p417_p0, %p411_p11 }
  0x22   :  { %421 = shalt.err (!%p418_p1)
}
  0x23   :  { %27 = dma.hbm_to_vmem [thread:$0]  %s607_s1, 16, %s25_s30, [#allocation3]  }
  0x24   :  { %s474_s9 = smov [#allocation6]   ;;  %s475_s11 = smov [#allocation7]  }
  0x25   :  { %s46_s10 = sshll.u32 %s474_s9, 4  ;;  %s58_s12 = sshll.u32 %s475_s11, 4  ;;  %s47_s10 = int_to_ptr.vmem [resolvable:$true] %s46_s10  ;;  %s59_s12 = int_to_ptr.vmem [resolvable:$true] %s58_s12 }
  0x26   :  { %s422_s15 = scalar_lea.hbm %s610_s4, 16 }
  0x27   :  { %p423_p2 = scmp.ne.s32.totalorder %s610_s4, %s422_s15  ;;  %p426_p3 = scmp.lt.u32.totalorder %s422_s15, %s610_s4 }
  0x29   :  { %p428_p4 = pnand %p426_p3, %p423_p2 }
  0x2b   :  { %431 = shalt.err (!%p428_p4)
}
  0x2c   :  { %s432_s1 = scalar_lea.vmem %s47_s10, 16  ;;  %s436_s30 = scalar_lea.vmem %s47_s10, 32 }
  0x2d   :  { %p433_p5 = scmp.ne.s32.totalorder %s47_s10, %s432_s1  ;;  %p437_p6 = scmp.lt.s32.totalorder %s47_s10, %s47_s10 }
  0x2e   :  { %p438_p7 = scmp.lt.s32.totalorder %s436_s30, %s432_s1 }
  0x30   :  { %p439_p8 = por %p438_p7, %p437_p6 }
  0x32   :  { %p440_p9 = pnand %p439_p8, %p433_p5 }
  0x34   :  { %443 = shalt.err (!%p440_p9)
}
  0x35   :  { %49 = dma.hbm_to_vmem [thread:$0]  %s610_s4, 16, %s47_s10, [#allocation5]  }
  0x36   :  { %s444_s24 = scalar_lea.hbm %s612_s6, 16 }
  0x37   :  { %p445_p10 = scmp.ne.s32.totalorder %s612_s6, %s444_s24  ;;  %p448_p11 = scmp.lt.u32.totalorder %s444_s24, %s612_s6 }
  0x39   :  { %p450_p12 = pnand %p448_p11, %p445_p10 }
  0x3b   :  { %453 = shalt.err (!%p450_p12)
}
  0x3c   :  { %s454_s2 = scalar_lea.vmem %s59_s12, 16  ;;  %s458_s28 = scalar_lea.vmem %s59_s12, 32 }
  0x3d   :  { %p455_p13 = scmp.ne.s32.totalorder %s59_s12, %s454_s2  ;;  %p459_p0 = scmp.lt.s32.totalorder %s59_s12, %s59_s12 }
  0x3e   :  { %p460_p1 = scmp.lt.s32.totalorder %s458_s28, %s454_s2 }
  0x40   :  { %p461_p2 = por %p460_p1, %p459_p0 }
  0x42   :  { %p462_p3 = pnand %p461_p2, %p455_p13 }
  0x44   :  { %465 = shalt.err (!%p462_p3)
}
  0x45   :  { %61 = dma.hbm_to_vmem [thread:$0]  %s612_s6, 16, %s59_s12, [#allocation8]  }
  0x46   :  { %466 = dma.done.wait [#allocation3], 16  }
  0x47   :  { %467 = vsyncadd [#allocation3], 4294967280 }
  0x48   :  { %468 = dma.done.wait [#allocation5], 32  }
  0x49   :  { %469 = vsyncadd [#allocation5], 4294967264 }
  0x4a   :  { %470 = dma.done.wait [#allocation8], 16  }
  0x4b   :  { %471 = vsyncadd [#allocation8], 4294967280  ;;  %v323_v0 = vld [vmem:[%s606_s0] sm:$0xff]   ;;  %vm81_vm0 = vcmask 261120   ;;  %v476_v16 = vmov 0.0   ;;  %v365_v17 = vld [vmem:[%s609_s3 + $0x8] sm:$0xff]   ;;  %v111_v22 = vlaneseq }
  0x4c   :  { %v324_v1 = vunpack.c.l.bf16 %v323_v0  ;;  %v325_v2 = vunpack.c.h.bf16 %v323_v0  ;;  %v364_v15 = vld [vmem:[%s609_s3] sm:$0xff]   ;;  %338 = vmatprep.subr.bf16.mxu0 %v476_v16  ;;  %346 = vmatprep.subr.bf16.mxu1 %v476_v16  ;;  %vm477_vm1 = vmmov 0   ;;  %v367_v43 = vld [vmem:[%s611_s5 + $0x8] sm:$0xff]   ;;  %v368_v44 = vld [vmem:[%s611_s5 + $0x10] sm:$0xff]   ;;  %vm241_vm2 = vcmask 523264  }
  0x4d   :  { %339 = vmatpush3.bf16.msra.mxu0 %v364_v15  ;;  %342 = vmatprep.mubr.msk.bf16.mxu0 %vm477_vm1, %v476_v16  ;;  %v112_v25 = vshrl.u32 %v111_v22, 7  ;;  %v109_v26 = vld [vmem:[#allocation2] sm:$0x1]  ;;  %v117_v29 = vld [vmem:[#allocation4] sm:$0x1]  ;;  %v369_v45 = vld [vmem:[%s611_s5 + $0x18] sm:$0xff]  }
  0x4e   :  { %v82_v3 = vsel %vm81_vm0, %v324_v1, 0.0  ;;  %v85_v4 = vsel %vm81_vm0, %v325_v2, 0.0  ;;  %340 = vmatprep.subr.bf16.mxu0 %v476_v16  ;;  %354 = vmatprep.mubr.msk.bf16.mxu1 %vm477_vm1, %v476_v16  ;;  %v110_v27 = vunpack.c.l.bf16 %v109_v26  ;;  %v118_v33 = vunpack.c.l.bf16 %v117_v29  ;;  %v366_v42 = vld [vmem:[%s611_s5] sm:$0xff]  }
  0x4f   :  { %83 = vadd.xlane.f32.xlu0 %v82_v3  ;;  %v113_v28 = vsub.s32 0, %v112_v25  ;;  %347 = vmatpush3.bf16.msra.mxu1 %v366_v42  ;;  %v130_v46 = vld [vmem:[#allocation6] sm:$0x1]  ;;  %vm300_vm3 = vcmask 257024  }
  0x50   :  { %348 = vmatprep.subr.bf16.mxu1 %v476_v16  ;;  %v131_v47 = vunpack.c.l.bf16 %v130_v46 }
  0x51   :  { %341 = vmatpush3.bf16.msra.mxu0 %v365_v17  ;;  %v114_v32 = vrot.slane %v110_v27, %v113_v28  ;;  %v122_v37 = vrot.slane %v118_v33, %v113_v28 }
  0x52   :  { %v135_v48 = vrot.slane %v131_v47, %v113_v28 }
  0x53   :  { %86 = vadd.xlane.f32.xlu0 %v85_v4  ;;  %349 = vmatpush3.bf16.msra.mxu1 %v367_v43  ;;  %v327_v4 = vld [vmem:[%s613_s7] sm:$0xff]  }
  0x54   :  { %350 = vmatprep.subr.bf16.mxu1 %v476_v16 }
  0x57   :  { %351 = vmatpush3.bf16.msra.mxu1 %v368_v44 }
  0x58   :  { %352 = vmatprep.subr.bf16.mxu1 %v476_v16 }
  0x5b   :  { %353 = vmatpush3.bf16.msra.mxu1 %v369_v45 }
  0xdc   :  { %v84_v5 = vpop.xlane.xlu0 %83 }
  0xdd   :  { %v89_v6 = vmul.f32 0.03125, %v84_v5 }
  0xdf   :  { %v91_v7 = vsub.f32 %v324_v1, %v89_v6  ;;  %v328_v6 = vunpack.c.l.bf16 %v327_v4 }
  0xe0   :  { %v87_v8 = vpop.xlane.xlu0 %86 }
  0xe1   :  { %v90_v9 = vmul.f32 0.03125, %v87_v8  ;;  %v93_v10 = vmul.f32 %v91_v7, %v91_v7 }
  0xe3   :  { %v92_v11 = vsub.f32 %v325_v2, %v90_v9  ;;  %v95_v12 = vsel %vm81_vm0, %v93_v10, 0.0  ;;  %v211_v2 = vld [vmem:[#allocation7] sm:$0x1]  ;;  %v329_v10 = vunpack.c.h.bf16 %v327_v4 }
  0xe4   :  { %96 = vadd.xlane.f32.xlu1 %v95_v12  ;;  %v212_v3 = vunpack.c.l.bf16 %v211_v2 }
  0xe5   :  { %v94_v13 = vmul.f32 %v92_v11, %v92_v11 }
  0xe6   :  { %v216_v5 = vrot.slane %v212_v3, %v113_v28 }
  0xe7   :  { %v98_v14 = vsel %vm81_vm0, %v94_v13, 0.0 }
  0xe8   :  { %99 = vadd.xlane.f32.xlu1 %v98_v14 }
 0x171   :  { %v97_v18 = vpop.xlane.xlu1 %96 }
 0x172   :  { %v101_v19 = vmul.f32 0.03125, %v97_v18 }
 0x174   :  { %v103_v20 = vadd.f32 1e-05, %v101_v19 }
 0x175   :  { %v100_v21 = vpop.xlane.xlu1 %99 }
 0x176   :  { %370 = vrsqrt.f32 %v103_v20  ;;  %v102_v23 = vmul.f32 0.03125, %v100_v21 }
 0x178   :  { %v104_v24 = vadd.f32 1e-05, %v102_v23 }
 0x17a   :  { %372 = vrsqrt.f32 %v104_v24 }
 0x180   :  { %v371_v30 = vpop.eup %370 }
 0x181   :  { %v107_v31 = vmul.f32 %v371_v30, %v91_v7 }
 0x183   :  { %v115_v36 = vmul.f32 %v114_v32, %v107_v31 }
 0x184   :  { %v373_v34 = vpop.eup %372 }
 0x185   :  { %v108_v35 = vmul.f32 %v373_v34, %v92_v11  ;;  %v123_v39 = vadd.f32 %v122_v37, %v115_v36 }
 0x187   :  { %v116_v38 = vmul.f32 %v114_v32, %v108_v35 }
 0x189   :  { %v124_v40 = vadd.f32 %v122_v37, %v116_v38 }
 0x18b   :  { %v125_v41 = vpack.c.bf16 %v124_v40, %v123_v39 }
 0x18d   :  { %343 = vmatmul.mubr.msk.bf16.vlgmr.msra.gmra.mrb[0].mxu0 %vm81_vm0, %v125_v41 }
 0x260   :  { %v185_v49 = vpop.f32.mrb[0].mxu0 }
 0x261   :  { %v186_v50 = vadd.f32 %v185_v49, %v135_v48  ;;  %v344_v51 = vpop.f32.mrb[1].mxu0 }
 0x262   :  { %v188_v52 = vpop.f32.mrb[2].mxu0 }
 0x263   :  { %v194_v53 = vmul.f32 0.70710677, %v186_v50  ;;  %v189_v54 = vadd.f32 %v188_v52, %v135_v48  ;;  %v345_v55 = vpop.f32.mrb[3].mxu0  ;;  %v192_v60 = vmul.f32 0.5, %v186_v50 }
 0x265   :  { %374 = verf.f32 %v194_v53  ;;  %v195_v56 = vmul.f32 0.70710677, %v189_v54  ;;  %v193_v61 = vmul.f32 0.5, %v189_v54 }
 0x267   :  { %376 = verf.f32 %v195_v56 }
 0x26f   :  { %v375_v57 = vpop.eup %374 }
 0x270   :  { %v198_v58 = vadd.f32 1.0, %v375_v57 }
 0x271   :  { %v377_v59 = vpop.eup %376 }
 0x272   :  { %v199_v62 = vadd.f32 1.0, %v377_v59  ;;  %v200_v63 = vmul.f32 %v198_v58, %v192_v60 }
 0x274   :  { %v201_v0 = vmul.f32 %v199_v62, %v193_v61 }
 0x276   :  { %v202_v1 = vpack.c.bf16 %v201_v0, %v200_v63 }
 0x278   :  { %355 = vmatmul.mubr.msk.bf16.vlgmr.msra.gmra.mrb[0].mxu1 %vm241_vm2, %v202_v1 }
 0x34b   :  { %v279_v7 = vpop.f32.mrb[0].mxu1 }
 0x34c   :  { %v280_v8 = vadd.f32 %v279_v7, %v216_v5  ;;  %v356_v9 = vpop.f32.mrb[1].mxu1 }
 0x34d   :  { %v282_v11 = vpop.f32.mrb[2].mxu1 }
 0x34e   :  { %v290_v12 = vadd.f32 %v328_v6, %v280_v8  ;;  %v283_v13 = vadd.f32 %v282_v11, %v216_v5  ;;  %v357_v14 = vpop.f32.mrb[3].mxu1 }
 0x350   :  { %v320_v15 = vpack.c.bf16 %v290_v12, %v290_v12  ;;  %v291_v16 = vadd.f32 %v329_v10, %v283_v13 }
 0x352   :  { %301 = vst.msk [vmem:[%s614_s8] sm:$0xf] %vm300_vm3, %v320_v15  ;;  %v321_v17 = vpack.c.bf16 %v291_v16, %v291_v16 }
 0x354   :  { %302 = vst.msk [vmem:[%s614_s8 + $0x4] sm:$0xf] %vm300_vm3, %v321_v17 }
 0x355   :  { %307 = vsyncpa [#allocation3], 1 }
 0x356   :  { %308 = vsyncpa [#allocation5], 1 }
 0x357   :  { %309 = vsyncpa [#allocation8], 1 }

// kernel: _lambda_.112
= control target key start
LH: loop header
LB: loop body
LE: loop exit
PB: predicated region body
PF: predicated region fallthrough
CT: control target
= control target key end

     0   :  { %13 = vsyncpa [#allocation3], 0  ;;  %s362_s27 = smov [#allocation2]   ;;  %s466_s0 = inlined_call_operand.vmem [shape: bf16[16,32], index: 0, kind: input, shape index: {}, may-alias: {0,7}]   ;;  %s467_s1 = inlined_call_operand.vmem [shape: bf16[1,32], index: 1, kind: input, shape index: {}]   ;;  %s468_s2 = inlined_call_operand.vmem [shape: bf16[1,32], index: 2, kind: input, shape index: {}]   ;;  %s469_s3 = inlined_call_operand.vmem [shape: bf16[32,64], index: 3, kind: input, shape index: {}]   ;;  %s470_s4 = inlined_call_operand.vmem [shape: bf16[1,64], index: 4, kind: input, shape index: {}]   ;;  %s471_s5 = inlined_call_operand.vmem [shape: bf16[64,32], index: 5, kind: input, shape index: {}]   ;;  %s472_s6 = inlined_call_operand.hbm [shape: bf16[1,32], index: 6, kind: input, shape index: {}]   ;;  %s473_s7 = inlined_call_operand.vmem [shape: bf16[16,32], index: 7, kind: input, shape index: {}, may-alias: {0,7}]   ;;  %s474_s8 = inlined_call_operand.vmem [shape: bf16[16,32], index: 8, kind: output, shape index: {}]  }
   0x1   :  { %s32_s28 = sshll.u32 %s362_s27, 4  ;;  %s338_s9 = scalar_lea.hbm %s472_s6, 16  ;;  %s33_s28 = int_to_ptr.vmem [resolvable:$true] %s32_s28 }
   0x2   :  { %p339_p0 = scmp.ne.s32.totalorder %s472_s6, %s338_s9  ;;  %p342_p1 = scmp.lt.u32.totalorder %s338_s9, %s472_s6 }
   0x4   :  { %p344_p2 = pnand %p342_p1, %p339_p0 }
   0x6   :  { %347 = shalt.err (!%p344_p2)
}
   0x7   :  { %s348_s14 = scalar_lea.vmem %s33_s28, 16  ;;  %s352_s15 = scalar_lea.vmem %s33_s28, 32 }
   0x8   :  { %p349_p3 = scmp.ne.s32.totalorder %s33_s28, %s348_s14  ;;  %p353_p4 = scmp.lt.s32.totalorder %s33_s28, %s33_s28 }
   0x9   :  { %p354_p5 = scmp.lt.s32.totalorder %s352_s15, %s348_s14 }
   0xb   :  { %p355_p6 = por %p354_p5, %p353_p4 }
   0xd   :  { %p356_p7 = pnand %p355_p6, %p349_p3 }
   0xf   :  { %359 = shalt.err (!%p356_p7)
}
  0x10   :  { %35 = dma.hbm_to_vmem [thread:$0]  %s472_s6, 16, %s33_s28, [#allocation3]  }
  0x11   :  { %360 = dma.done.wait [#allocation3], 16  }
  0x12   :  { %361 = vsyncadd [#allocation3], 4294967280  ;;  %v286_v0 = vld [vmem:[%s466_s0] sm:$0xff]   ;;  %vm46_vm0 = vcmask 261120   ;;  %v363_v16 = vmov 0.0   ;;  %v325_v17 = vld [vmem:[%s469_s3 + $0x8] sm:$0xff]   ;;  %v76_v22 = vlaneseq }
  0x13   :  { %v287_v1 = vunpack.c.l.bf16 %v286_v0  ;;  %v288_v2 = vunpack.c.h.bf16 %v286_v0  ;;  %v324_v15 = vld [vmem:[%s469_s3] sm:$0xff]   ;;  %301 = vmatprep.subr.bf16.mxu0 %v363_v16  ;;  %309 = vmatprep.subr.bf16.mxu1 %v363_v16  ;;  %vm364_vm1 = vmmov 0   ;;  %v327_v43 = vld [vmem:[%s471_s5 + $0x8] sm:$0xff]   ;;  %v328_v44 = vld [vmem:[%s471_s5 + $0x10] sm:$0xff]   ;;  %vm206_vm2 = vcmask 523264  }
  0x14   :  { %302 = vmatpush3.bf16.msra.mxu0 %v324_v15  ;;  %305 = vmatprep.mubr.msk.bf16.mxu0 %vm364_vm1, %v363_v16  ;;  %v77_v25 = vshrl.u32 %v76_v22, 7  ;;  %v74_v26 = vld [vmem:[%s467_s1] sm:$0x1]  ;;  %v329_v45 = vld [vmem:[%s471_s5 + $0x18] sm:$0xff]   ;;  %vm265_vm3 = vcmask 257024  }
  0x15   :  { %v47_v3 = vsel %vm46_vm0, %v287_v1, 0.0  ;;  %v50_v4 = vsel %vm46_vm0, %v288_v2, 0.0  ;;  %303 = vmatprep.subr.bf16.mxu0 %v363_v16  ;;  %317 = vmatprep.mubr.msk.bf16.mxu1 %vm364_vm1, %v363_v16  ;;  %v75_v27 = vunpack.c.l.bf16 %v74_v26  ;;  %v82_v29 = vld [vmem:[%s468_s2] sm:$0x1] }
  0x16   :  { %48 = vadd.xlane.f32.xlu0 %v47_v3  ;;  %v78_v28 = vsub.s32 0, %v77_v25  ;;  %v83_v33 = vunpack.c.l.bf16 %v82_v29  ;;  %v326_v42 = vld [vmem:[%s471_s5] sm:$0xff]  }
  0x17   :  { %310 = vmatpush3.bf16.msra.mxu1 %v326_v42  ;;  %v95_v46 = vld [vmem:[%s470_s4] sm:$0x1] }
  0x18   :  { %304 = vmatpush3.bf16.msra.mxu0 %v325_v17  ;;  %v79_v32 = vrot.slane %v75_v27, %v78_v28  ;;  %v87_v37 = vrot.slane %v83_v33, %v78_v28  ;;  %311 = vmatprep.subr.bf16.mxu1 %v363_v16  ;;  %v96_v47 = vunpack.c.l.bf16 %v95_v46 }
  0x1a   :  { %51 = vadd.xlane.f32.xlu0 %v50_v4  ;;  %v100_v48 = vrot.slane %v96_v47, %v78_v28  ;;  %v290_v4 = vld [vmem:[%s473_s7] sm:$0xff]  }
  0x1b   :  { %312 = vmatpush3.bf16.msra.mxu1 %v327_v43 }
  0x1c   :  { %313 = vmatprep.subr.bf16.mxu1 %v363_v16 }
  0x1f   :  { %314 = vmatpush3.bf16.msra.mxu1 %v328_v44 }
  0x20   :  { %315 = vmatprep.subr.bf16.mxu1 %v363_v16 }
  0x23   :  { %316 = vmatpush3.bf16.msra.mxu1 %v329_v45 }
  0xa3   :  { %v49_v5 = vpop.xlane.xlu0 %48 }
  0xa4   :  { %v54_v6 = vmul.f32 0.03125, %v49_v5 }
  0xa6   :  { %v56_v7 = vsub.f32 %v287_v1, %v54_v6  ;;  %v291_v6 = vunpack.c.l.bf16 %v290_v4 }
  0xa7   :  { %v52_v8 = vpop.xlane.xlu0 %51 }
  0xa8   :  { %v55_v9 = vmul.f32 0.03125, %v52_v8  ;;  %v58_v10 = vmul.f32 %v56_v7, %v56_v7 }
  0xaa   :  { %v57_v11 = vsub.f32 %v288_v2, %v55_v9  ;;  %v60_v12 = vsel %vm46_vm0, %v58_v10, 0.0  ;;  %v176_v2 = vld [vmem:[#allocation2] sm:$0x1]  ;;  %v292_v10 = vunpack.c.h.bf16 %v290_v4 }
  0xab   :  { %61 = vadd.xlane.f32.xlu1 %v60_v12  ;;  %v177_v3 = vunpack.c.l.bf16 %v176_v2 }
  0xac   :  { %v59_v13 = vmul.f32 %v57_v11, %v57_v11 }
  0xad   :  { %v181_v5 = vrot.slane %v177_v3, %v78_v28 }
  0xae   :  { %v63_v14 = vsel %vm46_vm0, %v59_v13, 0.0 }
  0xaf   :  { %64 = vadd.xlane.f32.xlu1 %v63_v14 }
 0x138   :  { %v62_v18 = vpop.xlane.xlu1 %61 }
 0x139   :  { %v66_v19 = vmul.f32 0.03125, %v62_v18 }
 0x13b   :  { %v68_v20 = vadd.f32 1e-05, %v66_v19 }
 0x13c   :  { %v65_v21 = vpop.xlane.xlu1 %64 }
 0x13d   :  { %330 = vrsqrt.f32 %v68_v20  ;;  %v67_v23 = vmul.f32 0.03125, %v65_v21 }
 0x13f   :  { %v69_v24 = vadd.f32 1e-05, %v67_v23 }
 0x141   :  { %332 = vrsqrt.f32 %v69_v24 }
 0x147   :  { %v331_v30 = vpop.eup %330 }
 0x148   :  { %v72_v31 = vmul.f32 %v331_v30, %v56_v7 }
 0x14a   :  { %v80_v36 = vmul.f32 %v79_v32, %v72_v31 }
 0x14b   :  { %v333_v34 = vpop.eup %332 }
 0x14c   :  { %v73_v35 = vmul.f32 %v333_v34, %v57_v11  ;;  %v88_v39 = vadd.f32 %v87_v37, %v80_v36 }
 0x14e   :  { %v81_v38 = vmul.f32 %v79_v32, %v73_v35 }
 0x150   :  { %v89_v40 = vadd.f32 %v87_v37, %v81_v38 }
 0x152   :  { %v90_v41 = vpack.c.bf16 %v89_v40, %v88_v39 }
 0x154   :  { %306 = vmatmul.mubr.msk.bf16.vlgmr.msra.gmra.mrb[0].mxu0 %vm46_vm0, %v90_v41 }
 0x227   :  { %v150_v49 = vpop.f32.mrb[0].mxu0 }
 0x228   :  { %v151_v50 = vadd.f32 %v150_v49, %v100_v48  ;;  %v307_v51 = vpop.f32.mrb[1].mxu0 }
 0x229   :  { %v153_v52 = vpop.f32.mrb[2].mxu0 }
 0x22a   :  { %v159_v53 = vmul.f32 0.70710677, %v151_v50  ;;  %v154_v54 = vadd.f32 %v153_v52, %v100_v48  ;;  %v308_v55 = vpop.f32.mrb[3].mxu0  ;;  %v157_v60 = vmul.f32 0.5, %v151_v50 }
 0x22c   :  { %334 = verf.f32 %v159_v53  ;;  %v160_v56 = vmul.f32 0.70710677, %v154_v54  ;;  %v158_v61 = vmul.f32 0.5, %v154_v54 }
 0x22e   :  { %336 = verf.f32 %v160_v56 }
 0x236   :  { %v335_v57 = vpop.eup %334 }
 0x237   :  { %v163_v58 = vadd.f32 1.0, %v335_v57 }
 0x238   :  { %v337_v59 = vpop.eup %336 }
 0x239   :  { %v164_v62 = vadd.f32 1.0, %v337_v59  ;;  %v165_v63 = vmul.f32 %v163_v58, %v157_v60 }
 0x23b   :  { %v166_v0 = vmul.f32 %v164_v62, %v158_v61 }
 0x23d   :  { %v167_v1 = vpack.c.bf16 %v166_v0, %v165_v63 }
 0x23f   :  { %318 = vmatmul.mubr.msk.bf16.vlgmr.msra.gmra.mrb[0].mxu1 %vm206_vm2, %v167_v1 }
 0x312   :  { %v244_v7 = vpop.f32.mrb[0].mxu1 }
 0x313   :  { %v245_v8 = vadd.f32 %v244_v7, %v181_v5  ;;  %v319_v9 = vpop.f32.mrb[1].mxu1 }
 0x314   :  { %v247_v11 = vpop.f32.mrb[2].mxu1 }
 0x315   :  { %v255_v12 = vadd.f32 %v291_v6, %v245_v8  ;;  %v248_v13 = vadd.f32 %v247_v11, %v181_v5  ;;  %v320_v14 = vpop.f32.mrb[3].mxu1 }
 0x317   :  { %v283_v15 = vpack.c.bf16 %v255_v12, %v255_v12  ;;  %v256_v16 = vadd.f32 %v292_v10, %v248_v13 }
 0x319   :  { %266 = vst.msk [vmem:[%s474_s8] sm:$0xf] %vm265_vm3, %v283_v15  ;;  %v284_v17 = vpack.c.bf16 %v256_v16, %v256_v16 }
 0x31b   :  { %267 = vst.msk [vmem:[%s474_s8 + $0x4] sm:$0xf] %vm265_vm3, %v284_v17 }
 0x31c   :  { %272 = vsyncpa [#allocation3], 1 }

// kernel: _lambda_.124
= control target key start
LH: loop header
LB: loop body
LE: loop exit
PB: predicated region body
PF: predicated region fallthrough
CT: control target
= control target key end

     0   :  { %vm34_vm0 = vcmask 261120   ;;  %v324_v16 = vmov 0.0   ;;  %vm325_vm1 = vmmov 0   ;;  %v64_v22 = vlaneseq  ;;  %s418_s0 = inlined_call_operand.vmem [shape: bf16[16,32], index: 0, kind: input, shape index: {}, may-alias: {0,7}]   ;;  %s419_s3 = inlined_call_operand.vmem [shape: bf16[32,64], index: 3, kind: input, shape index: {}]   ;;  %s420_s1 = inlined_call_operand.vmem [shape: bf16[1,32], index: 1, kind: input, shape index: {}]   ;;  %s421_s2 = inlined_call_operand.vmem [shape: bf16[1,32], index: 2, kind: input, shape index: {}]   ;;  %s422_s5 = inlined_call_operand.vmem [shape: bf16[64,32], index: 5, kind: input, shape index: {}]   ;;  %s423_s4 = inlined_call_operand.vmem [shape: bf16[1,64], index: 4, kind: input, shape index: {}]   ;;  %s424_s6 = inlined_call_operand.vmem [shape: bf16[1,32], index: 6, kind: input, shape index: {}]   ;;  %s425_s7 = inlined_call_operand.vmem [shape: bf16[16,32], index: 7, kind: input, shape index: {}, may-alias: {0,7}]   ;;  %s426_s8 = inlined_call_operand.vmem [shape: bf16[16,32], index: 8, kind: output, shape index: {}]  }
   0x1   :  { %v273_v0 = vld [vmem:[%s418_s0] sm:$0xff]   ;;  %288 = vmatprep.subr.bf16.mxu0 %v324_v16  ;;  %296 = vmatprep.subr.bf16.mxu1 %v324_v16  ;;  %v311_v17 = vld [vmem:[%s419_s3 + $0x8] sm:$0xff]   ;;  %v314_v44 = vld [vmem:[%s422_s5 + $0x10] sm:$0xff]   ;;  %vm194_vm2 = vcmask 523264   ;;  %vm253_vm3 = vcmask 257024  }
   0x2   :  { %v274_v1 = vunpack.c.l.bf16 %v273_v0  ;;  %v275_v2 = vunpack.c.h.bf16 %v273_v0  ;;  %v310_v15 = vld [vmem:[%s419_s3] sm:$0xff]   ;;  %292 = vmatprep.mubr.msk.bf16.mxu0 %vm325_vm1, %v324_v16  ;;  %304 = vmatprep.mubr.msk.bf16.mxu1 %vm325_vm1, %v324_v16  ;;  %v65_v25 = vshrl.u32 %v64_v22, 7  ;;  %v313_v43 = vld [vmem:[%s422_s5 + $0x8] sm:$0xff]   ;;  %v315_v45 = vld [vmem:[%s422_s5 + $0x18] sm:$0xff]  }
   0x3   :  { %289 = vmatpush3.bf16.msra.mxu0 %v310_v15  ;;  %v62_v26 = vld [vmem:[%s420_s1] sm:$0x1] }
   0x4   :  { %v35_v3 = vsel %vm34_vm0, %v274_v1, 0.0  ;;  %v38_v4 = vsel %vm34_vm0, %v275_v2, 0.0  ;;  %290 = vmatprep.subr.bf16.mxu0 %v324_v16  ;;  %v63_v27 = vunpack.c.l.bf16 %v62_v26  ;;  %v66_v28 = vsub.s32 0, %v65_v25  ;;  %v70_v29 = vld [vmem:[%s421_s2] sm:$0x1] }
   0x5   :  { %36 = vadd.xlane.f32.xlu0 %v35_v3  ;;  %v71_v33 = vunpack.c.l.bf16 %v70_v29  ;;  %v312_v42 = vld [vmem:[%s422_s5] sm:$0xff]  }
   0x6   :  { %v67_v32 = vrot.slane %v63_v27, %v66_v28  ;;  %297 = vmatpush3.bf16.msra.mxu1 %v312_v42  ;;  %v83_v46 = vld [vmem:[%s423_s4] sm:$0x1] }
   0x7   :  { %291 = vmatpush3.bf16.msra.mxu0 %v311_v17  ;;  %v75_v37 = vrot.slane %v71_v33, %v66_v28  ;;  %298 = vmatprep.subr.bf16.mxu1 %v324_v16  ;;  %v84_v47 = vunpack.c.l.bf16 %v83_v46 }
   0x9   :  { %39 = vadd.xlane.f32.xlu0 %v38_v4  ;;  %v88_v48 = vrot.slane %v84_v47, %v66_v28  ;;  %v277_v4 = vld [vmem:[%s425_s7] sm:$0xff]  }
   0xa   :  { %299 = vmatpush3.bf16.msra.mxu1 %v313_v43 }
   0xb   :  { %300 = vmatprep.subr.bf16.mxu1 %v324_v16 }
   0xe   :  { %301 = vmatpush3.bf16.msra.mxu1 %v314_v44 }
   0xf   :  { %302 = vmatprep.subr.bf16.mxu1 %v324_v16 }
  0x12   :  { %303 = vmatpush3.bf16.msra.mxu1 %v315_v45 }
  0x92   :  { %v37_v5 = vpop.xlane.xlu0 %36 }
  0x93   :  { %v42_v6 = vmul.f32 0.03125, %v37_v5 }
  0x95   :  { %v44_v7 = vsub.f32 %v274_v1, %v42_v6  ;;  %v278_v6 = vunpack.c.l.bf16 %v277_v4 }
  0x96   :  { %v40_v8 = vpop.xlane.xlu0 %39 }
  0x97   :  { %v43_v9 = vmul.f32 0.03125, %v40_v8  ;;  %v46_v10 = vmul.f32 %v44_v7, %v44_v7 }
  0x99   :  { %v45_v11 = vsub.f32 %v275_v2, %v43_v9  ;;  %v48_v12 = vsel %vm34_vm0, %v46_v10, 0.0  ;;  %v164_v2 = vld [vmem:[%s424_s6] sm:$0x1]  ;;  %v279_v10 = vunpack.c.h.bf16 %v277_v4 }
  0x9a   :  { %49 = vadd.xlane.f32.xlu1 %v48_v12  ;;  %v165_v3 = vunpack.c.l.bf16 %v164_v2 }
  0x9b   :  { %v47_v13 = vmul.f32 %v45_v11, %v45_v11 }
  0x9c   :  { %v169_v5 = vrot.slane %v165_v3, %v66_v28 }
  0x9d   :  { %v51_v14 = vsel %vm34_vm0, %v47_v13, 0.0 }
  0x9e   :  { %52 = vadd.xlane.f32.xlu1 %v51_v14 }
 0x127   :  { %v50_v18 = vpop.xlane.xlu1 %49 }
 0x128   :  { %v54_v19 = vmul.f32 0.03125, %v50_v18 }
 0x12a   :  { %v56_v20 = vadd.f32 1e-05, %v54_v19 }
 0x12b   :  { %v53_v21 = vpop.xlane.xlu1 %52 }
 0x12c   :  { %316 = vrsqrt.f32 %v56_v20  ;;  %v55_v23 = vmul.f32 0.03125, %v53_v21 }
 0x12e   :  { %v57_v24 = vadd.f32 1e-05, %v55_v23 }
 0x130   :  { %318 = vrsqrt.f32 %v57_v24 }
 0x136   :  { %v317_v30 = vpop.eup %316 }
 0x137   :  { %v60_v31 = vmul.f32 %v317_v30, %v44_v7 }
 0x139   :  { %v68_v36 = vmul.f32 %v67_v32, %v60_v31 }
 0x13a   :  { %v319_v34 = vpop.eup %318 }
 0x13b   :  { %v61_v35 = vmul.f32 %v319_v34, %v45_v11  ;;  %v76_v39 = vadd.f32 %v75_v37, %v68_v36 }
 0x13d   :  { %v69_v38 = vmul.f32 %v67_v32, %v61_v35 }
 0x13f   :  { %v77_v40 = vadd.f32 %v75_v37, %v69_v38 }
 0x141   :  { %v78_v41 = vpack.c.bf16 %v77_v40, %v76_v39 }
 0x143   :  { %293 = vmatmul.mubr.msk.bf16.vlgmr.msra.gmra.mrb[0].mxu0 %vm34_vm0, %v78_v41 }
 0x216   :  { %v138_v49 = vpop.f32.mrb[0].mxu0 }
 0x217   :  { %v139_v50 = vadd.f32 %v138_v49, %v88_v48  ;;  %v294_v51 = vpop.f32.mrb[1].mxu0 }
 0x218   :  { %v141_v52 = vpop.f32.mrb[2].mxu0 }
 0x219   :  { %v147_v53 = vmul.f32 0.70710677, %v139_v50  ;;  %v142_v54 = vadd.f32 %v141_v52, %v88_v48  ;;  %v295_v55 = vpop.f32.mrb[3].mxu0  ;;  %v145_v60 = vmul.f32 0.5, %v139_v50 }
 0x21b   :  { %320 = verf.f32 %v147_v53  ;;  %v148_v56 = vmul.f32 0.70710677, %v142_v54  ;;  %v146_v61 = vmul.f32 0.5, %v142_v54 }
 0x21d   :  { %322 = verf.f32 %v148_v56 }
 0x225   :  { %v321_v57 = vpop.eup %320 }
 0x226   :  { %v151_v58 = vadd.f32 1.0, %v321_v57 }
 0x227   :  { %v323_v59 = vpop.eup %322 }
 0x228   :  { %v152_v62 = vadd.f32 1.0, %v323_v59  ;;  %v153_v63 = vmul.f32 %v151_v58, %v145_v60 }
 0x22a   :  { %v154_v0 = vmul.f32 %v152_v62, %v146_v61 }
 0x22c   :  { %v155_v1 = vpack.c.bf16 %v154_v0, %v153_v63 }
 0x22e   :  { %305 = vmatmul.mubr.msk.bf16.vlgmr.msra.gmra.mrb[0].mxu1 %vm194_vm2, %v155_v1 }
 0x301   :  { %v232_v7 = vpop.f32.mrb[0].mxu1 }
 0x302   :  { %v233_v8 = vadd.f32 %v232_v7, %v169_v5  ;;  %v306_v9 = vpop.f32.mrb[1].mxu1 }
 0x303   :  { %v235_v11 = vpop.f32.mrb[2].mxu1 }
 0x304   :  { %v243_v12 = vadd.f32 %v278_v6, %v233_v8  ;;  %v236_v13 = vadd.f32 %v235_v11, %v169_v5  ;;  %v307_v14 = vpop.f32.mrb[3].mxu1 }
 0x306   :  { %v270_v15 = vpack.c.bf16 %v243_v12, %v243_v12  ;;  %v244_v16 = vadd.f32 %v279_v10, %v236_v13 }
 0x308   :  { %254 = vst.msk [vmem:[%s426_s8] sm:$0xf] %vm253_vm3, %v270_v15  ;;  %v271_v17 = vpack.c.bf16 %v244_v16, %v244_v16 }
 0x30a   :  { %255 = vst.msk [vmem:[%s426_s8 + $0x4] sm:$0xf] %vm253_vm3, %v271_v17 }

// kernel: _lambda_.125
= control target key start
LH: loop header
LB: loop body
LE: loop exit
PB: predicated region body
PF: predicated region fallthrough
CT: control target
= control target key end

     0   :  { %10 = vsyncpa [#allocation4], 0  ;;  %s483_s0 = inlined_call_operand.vmem [shape: bf16[32,32], index: 0, kind: input, shape index: {}]   ;;  %s484_s1 = inlined_call_operand.hbm [shape: bf16[1,32], index: 1, kind: input, shape index: {}]   ;;  %s485_s2 = inlined_call_operand.hbm [shape: bf16[1,32], index: 2, kind: input, shape index: {}]   ;;  %s486_s3 = inlined_call_operand.vmem [shape: bf16[1,32,128], index: 3, kind: input, shape index: {}]   ;;  %s487_s4 = inlined_call_operand.hbm [shape: bf16[1,1,128], index: 4, kind: input, shape index: {}]   ;;  %s488_s5 = inlined_call_operand.vmem [shape: bf16[1,32,128], index: 5, kind: output, shape index: {}]  }
   0x1   :  { %11 = vsyncpa [#allocation6], 0  ;;  %s384_s18 = smov [#allocation5]   ;;  %s385_s20 = smov [#allocation3]  }
   0x2   :  { %s30_s19 = sshll.u32 %s384_s18, 4  ;;  %s20_s21 = sshll.u32 %s385_s20, 4  ;;  %s31_s19 = int_to_ptr.vmem [resolvable:$true] %s30_s19  ;;  %s21_s21 = int_to_ptr.vmem [resolvable:$true] %s20_s21 }
   0x3   :  { %s314_s24 = scalar_lea.hbm %s485_s2, 16 }
   0x4   :  { %p315_p0 = scmp.ne.s32.totalorder %s485_s2, %s314_s24  ;;  %p318_p1 = scmp.lt.u32.totalorder %s314_s24, %s485_s2 }
   0x6   :  { %p320_p2 = pnand %p318_p1, %p315_p0 }
   0x8   :  { %323 = shalt.err (!%p320_p2)
}
   0x9   :  { %s324_s29 = scalar_lea.vmem %s31_s19, 16  ;;  %s328_s30 = scalar_lea.vmem %s31_s19, 32 }
   0xa   :  { %p325_p3 = scmp.ne.s32.totalorder %s31_s19, %s324_s29  ;;  %p329_p4 = scmp.lt.s32.totalorder %s31_s19, %s31_s19 }
   0xb   :  { %p330_p5 = scmp.lt.s32.totalorder %s328_s30, %s324_s29 }
   0xd   :  { %p331_p6 = por %p330_p5, %p329_p4 }
   0xf   :  { %p332_p7 = pnand %p331_p6, %p325_p3 }
  0x11   :  { %335 = shalt.err (!%p332_p7)
}
  0x12   :  { %33 = dma.hbm_to_vmem [thread:$0]  %s485_s2, 16, %s31_s19, [#allocation6]  }
  0x13   :  { %s336_s10 = scalar_lea.hbm %s484_s1, 16 }
  0x14   :  { %p337_p8 = scmp.ne.s32.totalorder %s484_s1, %s336_s10  ;;  %p340_p9 = scmp.lt.u32.totalorder %s336_s10, %s484_s1 }
  0x16   :  { %p342_p10 = pnand %p340_p9, %p337_p8 }
  0x18   :  { %345 = shalt.err (!%p342_p10)
}
  0x19   :  { %s346_s15 = scalar_lea.vmem %s21_s21, 16  ;;  %s350_s16 = scalar_lea.vmem %s21_s21, 32 }
  0x1a   :  { %p347_p11 = scmp.ne.s32.totalorder %s21_s21, %s346_s15  ;;  %p351_p12 = scmp.lt.s32.totalorder %s21_s21, %s21_s21 }
  0x1b   :  { %p352_p13 = scmp.lt.s32.totalorder %s350_s16, %s346_s15 }
  0x1d   :  { %p353_p0 = por %p352_p13, %p351_p12 }
  0x1f   :  { %p354_p1 = pnand %p353_p0, %p347_p11 }
  0x21   :  { %357 = shalt.err (!%p354_p1)
}
  0x22   :  { %23 = dma.hbm_to_vmem [thread:$0]  %s484_s1, 16, %s21_s21, [#allocation4]  }
  0x23   :  { %s386_s18 = smov [#allocation7]   ;;  %s358_s23 = scalar_lea.hbm %s487_s4, 16 }
  0x24   :  { %s42_s19 = sshll.u32 %s386_s18, 4  ;;  %p359_p2 = scmp.ne.s32.totalorder %s487_s4, %s358_s23  ;;  %s43_s19 = int_to_ptr.vmem [resolvable:$true] %s42_s19 }
  0x25   :  { %p362_p3 = scmp.lt.u32.totalorder %s358_s23, %s487_s4 }
  0x27   :  { %p364_p4 = pnand %p362_p3, %p359_p2 }
  0x29   :  { %367 = shalt.err (!%p364_p4)
}
  0x2a   :  { %s368_s28 = scalar_lea.vmem %s43_s19, 16  ;;  %s372_s1 = scalar_lea.vmem %s43_s19, 32 }
  0x2b   :  { %p369_p5 = scmp.ne.s32.totalorder %s43_s19, %s368_s28  ;;  %p373_p6 = scmp.lt.s32.totalorder %s43_s19, %s43_s19 }
  0x2c   :  { %p374_p7 = scmp.lt.s32.totalorder %s372_s1, %s368_s28 }
  0x2e   :  { %p375_p8 = por %p374_p7, %p373_p6 }
  0x30   :  { %p376_p9 = pnand %p375_p8, %p369_p5 }
  0x32   :  { %379 = shalt.err (!%p376_p9)
}
  0x33   :  { %45 = dma.hbm_to_vmem [thread:$0]  %s487_s4, 16, %s43_s19, [#allocation6]  }
  0x34   :  { %380 = dma.done.wait [#allocation4], 16  }
  0x35   :  { %381 = vsyncadd [#allocation4], 4294967280 }
  0x36   :  { %382 = dma.done.wait [#allocation6], 32  }
  0x37   :  { %383 = vsyncadd [#allocation6], 4294967264  ;;  %v270_v0 = vld [vmem:[%s483_s0] sm:$0xff]   ;;  %vm73_vm0 = vcmask 261120   ;;  %v287_v1 = vld [vmem:[%s483_s0 + $0x8] sm:$0xff]   ;;  %v129_v35 = vlaneseq }
  0x38   :  { %v271_v2 = vunpack.c.l.bf16 %v270_v0  ;;  %v275_v3 = vunpack.c.l.bf16 %v287_v1  ;;  %v272_v4 = vunpack.c.h.bf16 %v270_v0  ;;  %v276_v5 = vunpack.c.h.bf16 %v287_v1  ;;  %v304_v30 = vld [vmem:[%s486_s3] sm:$0xff]   ;;  %v305_v31 = vld [vmem:[%s486_s3 + $0x8] sm:$0xff]   ;;  %v127_v44 = vld [vmem:[#allocation3] sm:$0x1] }
  0x39   :  { %293 = vmatprep.subr.bf16.mxu0 %v304_v30  ;;  %v130_v42 = vshrl.u32 %v129_v35, 7  ;;  %v128_v47 = vunpack.c.l.bf16 %v127_v44  ;;  %v137_v49 = vld [vmem:[#allocation5] sm:$0x1] }
  0x3a   :  { %v74_v6 = vsel %vm73_vm0, %v271_v2, 0.0  ;;  %v80_v7 = vsel %vm73_vm0, %v275_v3, 0.0  ;;  %v77_v8 = vsel %vm73_vm0, %v272_v4, 0.0  ;;  %v83_v9 = vsel %vm73_vm0, %v276_v5, 0.0  ;;  %294 = vmatpush3.bf16.msra.mxu0 %v304_v30 }
  0x3b   :  { %75 = vadd.xlane.f32.xlu0 %v74_v6  ;;  %81 = vadd.xlane.f32.xlu1 %v80_v7  ;;  %v131_v48 = vsub.s32 0, %v130_v42  ;;  %v138_v52 = vunpack.c.l.bf16 %v137_v49 }
  0x3c   :  { %295 = vmatprep.subr.bf16.mxu0 %v305_v31 }
  0x3d   :  { %v132_v51 = vrot.slane %v128_v47, %v131_v48  ;;  %v142_v56 = vrot.slane %v138_v52, %v131_v48 }
  0x3e   :  { %296 = vmatpush3.bf16.msra.mxu0 %v305_v31 }
  0x3f   :  { %78 = vadd.xlane.f32.xlu0 %v77_v8  ;;  %84 = vadd.xlane.f32.xlu1 %v83_v9  ;;  %v157_v9 = vld [vmem:[#allocation7] sm:$0x1] }
  0xc8   :  { %v76_v10 = vpop.xlane.xlu0 %75  ;;  %v82_v11 = vpop.xlane.xlu1 %81 }
  0xc9   :  { %v87_v12 = vmul.f32 0.03125, %v76_v10  ;;  %v89_v13 = vmul.f32 0.03125, %v82_v11  ;;  %v158_v10 = vunpack.c.l.bf16 %v157_v9 }
  0xcb   :  { %v91_v14 = vsub.f32 %v271_v2, %v87_v12  ;;  %v93_v15 = vsub.f32 %v275_v3, %v89_v13  ;;  %v162_v11 = vrot.slane %v158_v10, %v131_v48 }
  0xcc   :  { %v79_v16 = vpop.xlane.xlu0 %78  ;;  %v85_v17 = vpop.xlane.xlu1 %84 }
  0xcd   :  { %v88_v18 = vmul.f32 0.03125, %v79_v16  ;;  %v90_v19 = vmul.f32 0.03125, %v85_v17  ;;  %v95_v20 = vmul.f32 %v91_v14, %v91_v14  ;;  %v97_v21 = vmul.f32 %v93_v15, %v93_v15 }
  0xcf   :  { %v92_v22 = vsub.f32 %v272_v4, %v88_v18  ;;  %v94_v23 = vsub.f32 %v276_v5, %v90_v19  ;;  %v99_v24 = vsel %vm73_vm0, %v95_v20, 0.0  ;;  %v105_v25 = vsel %vm73_vm0, %v97_v21, 0.0 }
  0xd0   :  { %100 = vadd.xlane.f32.xlu0 %v99_v24 }
  0xd1   :  { %v96_v26 = vmul.f32 %v92_v22, %v92_v22  ;;  %v98_v27 = vmul.f32 %v94_v23, %v94_v23 }
  0xd3   :  { %v102_v28 = vsel %vm73_vm0, %v96_v26, 0.0  ;;  %v108_v29 = vsel %vm73_vm0, %v98_v27, 0.0 }
  0xd4   :  { %106 = vadd.xlane.f32.xlu0 %v105_v25  ;;  %103 = vadd.xlane.f32.xlu1 %v102_v28 }
  0xd8   :  { %109 = vadd.xlane.f32.xlu1 %v108_v29 }
 0x15d   :  { %v101_v32 = vpop.xlane.xlu0 %100 }
 0x15e   :  { %v111_v33 = vmul.f32 0.03125, %v101_v32 }
 0x160   :  { %v115_v34 = vadd.f32 1e-05, %v111_v33 }
 0x161   :  { %v104_v36 = vpop.xlane.xlu1 %103  ;;  %v107_v37 = vpop.xlane.xlu0 %106 }
 0x162   :  { %306 = vrsqrt.f32 %v115_v34  ;;  %v112_v38 = vmul.f32 0.03125, %v104_v36  ;;  %v113_v39 = vmul.f32 0.03125, %v107_v37 }
 0x164   :  { %v116_v40 = vadd.f32 1e-05, %v112_v38  ;;  %v117_v41 = vadd.f32 1e-05, %v113_v39 }
 0x165   :  { %v110_v43 = vpop.xlane.xlu1 %109 }
 0x166   :  { %308 = vrsqrt.f32 %v116_v40  ;;  %v114_v45 = vmul.f32 0.03125, %v110_v43 }
 0x167   :  { %310 = vrsqrt.f32 %v117_v41 }
 0x168   :  { %v118_v46 = vadd.f32 1e-05, %v114_v45 }
 0x16a   :  { %312 = vrsqrt.f32 %v118_v46 }
 0x16c   :  { %v307_v50 = vpop.eup %306 }
 0x16d   :  { %v123_v53 = vmul.f32 %v307_v50, %v91_v14 }
 0x16f   :  { %v133_v57 = vmul.f32 %v132_v51, %v123_v53 }
 0x170   :  { %v309_v54 = vpop.eup %308 }
 0x171   :  { %v311_v55 = vpop.eup %310  ;;  %v124_v58 = vmul.f32 %v309_v54, %v92_v22  ;;  %v143_v62 = vadd.f32 %v142_v56, %v133_v57 }
 0x172   :  { %v125_v59 = vmul.f32 %v311_v55, %v93_v15 }
 0x173   :  { %v134_v60 = vmul.f32 %v132_v51, %v124_v58 }
 0x174   :  { %v313_v61 = vpop.eup %312  ;;  %v135_v0 = vmul.f32 %v132_v51, %v125_v59 }
 0x175   :  { %v144_v63 = vadd.f32 %v142_v56, %v134_v60  ;;  %v126_v1 = vmul.f32 %v313_v61, %v94_v23 }
 0x176   :  { %v145_v4 = vadd.f32 %v142_v56, %v135_v0 }
 0x177   :  { %v147_v2 = vpack.c.bf16 %v144_v63, %v143_v62  ;;  %v136_v3 = vmul.f32 %v132_v51, %v126_v1 }
 0x179   :  { %149 = vst.msk [vmem:[#allocation2] sm:$0xff] %vm73_vm0, %v147_v2  ;;  %v146_v5 = vadd.f32 %v142_v56, %v136_v3 }
 0x17b   :  { %v148_v6 = vpack.c.bf16 %v146_v5, %v145_v4 }
 0x17d   :  { %150 = vst.msk [vmem:[#allocation2 + $0x8] sm:$0xff] %vm73_vm0, %v148_v6 }
 0x180   :  { %v151_v7 = vld [vmem:[#allocation2] sm:$0xff] }
 0x181   :  { %297 = vmatprep.mubr.msk.bf16.mxu0 %vm73_vm0, %v151_v7 }
 0x184   :  { %v152_v8 = vld [vmem:[#allocation2 + $0x8] sm:$0xff] }
 0x185   :  { %298 = vmatmul.mubr.msk.bf16.vlgmr.msra.gmra.mrb[0].mxu0 %vm73_vm0, %v152_v8 }
 0x258   :  { %v299_v12 = vpop.f32.mrb[0].mxu0 }
 0x259   :  { %v216_v13 = vpop.f32.mrb[1].mxu0  ;;  %v225_v15 = vadd.f32 %v299_v12, %v162_v11 }
 0x25a   :  { %v300_v14 = vpop.f32.mrb[2].mxu0  ;;  %v217_v18 = vadd.f32 %v216_v13, %v162_v11 }
 0x25b   :  { %v228_v16 = vadd.f32 %v300_v14, %v162_v11  ;;  %v219_v17 = vpop.f32.mrb[3].mxu0 }
 0x25c   :  { %v220_v19 = vadd.f32 %v219_v17, %v162_v11 }
 0x25d   :  { %v285_v20 = vpack.c.bf16 %v228_v16, %v225_v15 }
 0x25e   :  { %v280_v21 = vpack.c.bf16 %v220_v19, %v217_v18 }
 0x25f   :  { %288 = vst [vmem:[%s488_s5 + $0x8] sm:$0xff] %v285_v20  }
 0x260   :  { %281 = vst [vmem:[%s488_s5] sm:$0xff] %v280_v21  }
 0x261   :  { %255 = vsyncpa [#allocation4], 1 }
 0x262   :  { %256 = vsyncpa [#allocation6], 1 }

</bundles_post_ra>
